<compile_context>
chip_gen: v6e
topology: v6e:2x2x1
jax: 0.10.0
libtpu: 0.0.40
codegen_flags: <defaults>
</compile_context>

<pallas_src>
import functools
import math

import jax
import jax.numpy as jnp
from jax.experimental import pallas as pl
from jax.experimental.pallas import tpu as pltpu


def _round_up(v, m):
    return (v + m - 1) // m * m


# -----------------------------------------------------------------------------
# Fused Pallas kernel (one grid step == one batch element, all stages in VMEM)
# -----------------------------------------------------------------------------
def _inception_m_fused_kernel(x_ref, w1b_ref, b1b_ref, w2_ref, b2_ref,
                              w3_ref, b3_ref, o_ref, h1b_ref, acc_ref,
                              *, planes, wp, q0, lq, last_relu):
    """Fused InceptionM forward for one (spatially padded, flattened) image.

    x_ref   : (Lp, Cin)        bf16, zero-padded image, row-major flat,
                               padded width wp is a multiple of 8.
    w1b_ref : (Cin, 2*planes)  bf16, [branch3x3.conv1 | branch1x1.conv], BN folded.
    b1b_ref : (1, 2*planes)    f32 folded biases.
    w2_ref  : (9, planes, planes) bf16 3x3 weights (BN folded), tap t = 3*i + j.
    b2_ref  : (1, planes)      f32.
    w3_ref  : (planes, 4*planes) bf16 (BN folded).
    b3_ref  : (1, 4*planes)    f32.
    o_ref   : (lq, 5*planes)   f32, row-cropped concat output (junk columns are
                               sliced away by the wrapper).
    h1b_ref : (Lp, 2*planes)   f32 VMEM scratch (merged 1x1 activations).
    acc_ref : (lq, planes)     f32 VMEM scratch (3x3 conv accumulator).
    """
    # ---- stage 1: merged 1x1 convs (branch3x3.conv1 | branch1x1.conv) -------
    y = jnp.dot(x_ref[...], w1b_ref[...], preferred_element_type=jnp.float32)
    y = y + b1b_ref[...]
    if last_relu:
        y = jnp.maximum(y, 0.0)
    else:
        # ReLU always on the branch3x3.conv1 half; branch1x1 half stays linear.
        lane = jax.lax.broadcasted_iota(jnp.int32, y.shape, 1)
        y = jnp.where(lane < planes, jnp.maximum(y, 0.0), y)
    h1b_ref[...] = y

    # ---- stage 2: 3x3 conv (stride 1, pad 1) as 9 shifted flat matmuls ------
    # Only the row-cropped range [q0, q0+lq) is accumulated; the cropped output
    # positions never touch padded-border activations, so no masking is needed.
    for t in range(9):
        dr, dc = t // 3 - 1, t % 3 - 1
        off = q0 + dr * wp + dc                      # static tap offset
        patch = h1b_ref[off:off + lq, 0:planes].astype(jnp.bfloat16)
        contrib = jnp.dot(patch, w2_ref[t], preferred_element_type=jnp.float32)
        if t == 0:
            acc_ref[...] = contrib
        else:
            acc_ref[...] += contrib

    # ---- stage 3: BN+ReLU, tail 1x1 (conv3), concat with branch1x1, store ---
    h2 = jnp.maximum(acc_ref[...] + b2_ref[...], 0.0).astype(jnp.bfloat16)
    y3 = jnp.dot(h2, w3_ref[...], preferred_element_type=jnp.float32)
    y3 = y3 + b3_ref[...]
    if last_relu:
        y3 = jnp.maximum(y3, 0.0)
    yb = h1b_ref[q0:q0 + lq, planes:2 * planes]      # branch1x1, row-cropped
    o_ref[:, 0:4 * planes] = y3.astype(o_ref.dtype)
    o_ref[:, 4 * planes:5 * planes] = yb.astype(o_ref.dtype)


# -----------------------------------------------------------------------------
# BN folding (inference mode)
# -----------------------------------------------------------------------------
def _bn_fold(w, gamma, beta, mean, var, *, eps):
    """Fold inference BN into conv weight (last dim = Cout) and a bias row."""
    scale = gamma * jax.lax.rsqrt(var + eps)
    w_f = w * scale                                  # broadcasts over Cout
    bias = (beta - mean * scale).reshape(1, -1)
    return w_f, bias


# -----------------------------------------------------------------------------
# InceptionM forward (single fused pallas_call)
# -----------------------------------------------------------------------------
def inception_m_forward(x_nchw, params, *, last_relu=True):
    N, Cin, H, W = x_nchw.shape
    planes = params["branch3x3"]["w1"].shape[1]
    exp = params["branch3x3"]["w3"].shape[1] // planes
    assert exp * planes == params["branch3x3"]["w3"].shape[1]

    Hp = H + 2
    Wp_a = _round_up(W + 2, 8)          # padded width, multiple of 8 (alignment)
    Lp = Hp * Wp_a                      # flat length of the padded image
    Hc, Wc = H - 2, W - 2               # center-cropped spatial size
    q0 = 2 * Wp_a                       # first row-cropped flat position
    Lq = Hc * Wp_a                      # row-cropped compute range
    Ctot = planes * exp + planes

    # ---- fold BN into weights / biases (trace-time, tiny) -------------------
    p3, p1 = params["branch3x3"], params["branch1x1"]
    w1, b1 = _bn_fold(p3["w1"], *p3["bn1"], eps=1e-5)
    wb, bb = _bn_fold(p1["w"], *p1["bn"], eps=1e-3)
    w1b = jnp.concatenate([w1, wb], axis=1).astype(jnp.bfloat16)   # (Cin, 2P)
    b1b = jnp.concatenate([b1, bb], axis=1).astype(jnp.float32)    # (1, 2P)
    w2, b2 = _bn_fold(p3["w2"], *p3["bn2"], eps=1e-5)
    w2 = w2.reshape(9, planes, planes).astype(jnp.bfloat16)        # tap = 3i+j
    b2 = b2.astype(jnp.float32)
    w3, b3 = _bn_fold(p3["w3"], *p3["bn3"], eps=1e-5)
    w3 = w3.astype(jnp.bfloat16)
    b3 = b3.astype(jnp.float32)

    # ---- one pad pass: NCHW -> NHWC, bf16, pad to (Hp, Wp_a), flatten -------
    xh = jnp.transpose(x_nchw, (0, 2, 3, 1)).astype(jnp.bfloat16)
    xp = jnp.pad(xh, ((0, 0), (1, 1), (1, Wp_a - W - 1), (0, 0)))
    xf = xp.reshape(N, Lp, Cin)

    out = pl.pallas_call(
        functools.partial(_inception_m_fused_kernel, planes=planes, wp=Wp_a,
                          q0=q0, lq=Lq, last_relu=last_relu),
        out_shape=jax.ShapeDtypeStruct((N, Lq, Ctot), jnp.float32),
        grid_spec=pltpu.PrefetchScalarGridSpec(
            num_scalar_prefetch=0,
            grid=(N,),
            in_specs=[
                pl.BlockSpec((None, Lp, Cin), lambda b: (b, 0, 0)),
                pl.BlockSpec((Cin, 2 * planes), lambda b: (0, 0)),
                pl.BlockSpec((1, 2 * planes), lambda b: (0, 0)),
                pl.BlockSpec((9, planes, planes), lambda b: (0, 0, 0)),
                pl.BlockSpec((1, planes), lambda b: (0, 0)),
                pl.BlockSpec((planes, exp * planes), lambda b: (0, 0)),
                pl.BlockSpec((1, exp * planes), lambda b: (0, 0)),
            ],
            out_specs=pl.BlockSpec((None, Lq, Ctot), lambda b: (b, 0, 0)),
            scratch_shapes=[
                pltpu.VMEM((Lp, 2 * planes), jnp.float32),   # merged 1x1 acts
                pltpu.VMEM((Lq, planes), jnp.float32),       # 3x3 accumulator
            ],
        ),
        compiler_params=pltpu.CompilerParams(
            dimension_semantics=("parallel",)),
    )(xf, w1b, b1b, w2, b2, w3, b3)

    # Row crop was done in-kernel; column crop is one cheap slice, then NCHW.
    out = out.reshape(N, Hc, Wp_a, Ctot)[:, :, 2:2 + Wc, :]
    return jnp.transpose(out, (0, 3, 1, 2))


# -----------------------------------------------------------------------------
# Pure-JAX reference (XLA convs) for a tolerance check
# -----------------------------------------------------------------------------
def _reference_forward(x_nchw, params, *, last_relu=True):
    dn = ("NCHW", "HWIO", "NCHW")

    def conv(x, w, pad):
        return jax.lax.conv_general_dilated(x, w, window_strides=(1, 1),
                                            padding=pad, dimension_numbers=dn)

    def bn(y, bn_p, eps):
        gamma, beta, mean, var = bn_p
        inv = gamma * jax.lax.rsqrt(var + eps)
        return y * inv[None, :, None, None] + (beta - mean * inv)[None, :, None, None]

    p3, p1 = params["branch3x3"], params["branch1x1"]
    h = jax.nn.relu(bn(conv(x_nchw, p3["w1"][None, None], [(0, 0), (0, 0)]),
                       p3["bn1"], 1e-5))
    h = jax.nn.relu(bn(conv(h, p3["w2"], [(1, 1), (1, 1)]), p3["bn2"], 1e-5))
    h = bn(conv(h, p3["w3"][None, None], [(0, 0), (0, 0)]), p3["bn3"], 1e-5)
    g = bn(conv(x_nchw, p1["w"][None, None], [(0, 0), (0, 0)]), p1["bn"], 1e-3)
    if last_relu:
        h, g = jax.nn.relu(h), jax.nn.relu(g)
    out = jnp.concatenate([h, g], axis=1)
    return out[:, :, 1:-1, 1:-1]


# -----------------------------------------------------------------------------
# Deterministic parameter init (conv weights random, BN at PyTorch init stats)
# -----------------------------------------------------------------------------
def _conv_w(key, kh, kw, cin, cout):
    n = kh * kw * cout
    return jax.random.normal(key, (kh, kw, cin, cout),
                             jnp.float32) * math.sqrt(2.0 / n)


def _bn(c):
    # gamma=1, beta=0, running_mean=0, running_var=1 (eval-mode BN)
    return (jnp.ones((c,), jnp.float32), jnp.zeros((c,), jnp.float32),
            jnp.zeros((c,), jnp.float32), jnp.ones((c,), jnp.float32))


def init_params(key, in_channels, planes, expansion=4):
    ks = jax.random.split(key, 4)
    return {
        "branch3x3": {
            "w1": _conv_w(ks[0], 1, 1, in_channels, planes)[0, 0],   # (Cin,P)
            "bn1": _bn(planes),
            "w2": _conv_w(ks[1], 3, 3, planes, planes),              # HWIO
            "bn2": _bn(planes),
            "w3": _conv_w(ks[2], 1, 1, planes, planes * expansion)[0, 0],
            "bn3": _bn(planes * expansion),
        },
        "branch1x1": {
            "w": _conv_w(ks[3], 1, 1, in_channels, planes)[0, 0],
            "bn": _bn(planes),
        },
    }


if __name__ == "__main__":
    root = jax.random.PRNGKey(0)
    k_in, k_par = jax.random.split(root)

    N, Cin, H, W = 2, 64, 16, 16
    planes = 32

    x = jax.random.normal(k_in, (N, Cin, H, W), jnp.float32)   # NCHW like PyTorch
    params = init_params(k_par, Cin, planes)

    fwd = jax.jit(functools.partial(inception_m_forward, last_relu=True))
    out = fwd(x, params)
    jax.block_until_ready(out)

    assert out.shape == (N, planes * 4 + planes, H - 2, W - 2), out.shape
    assert bool(jnp.all(jnp.isfinite(out)))

    # Tolerance check against a pure-JAX (XLA conv) reference (bf16 MXU path).
    ref = jax.block_until_ready(_reference_forward(x, params, last_relu=True))
    err = float(jnp.max(jnp.abs(out - ref)))
    scale = float(jnp.max(jnp.abs(ref)))
    assert err <= 3e-2 * scale + 2e-2, (err, scale)

    print("KERNEL_OK")
</pallas_src>

<mosaic_0001>
module attributes {stable_mosaic.version = 11 : i64} {
  func.func @_inception_m_fused_kernel(%arg0: i32, %arg1: memref<1x432x64xbf16, #tpu.memory_space<vmem>>, %arg2: memref<64x64xbf16, #tpu.memory_space<vmem>>, %arg3: memref<1x64xf32, #tpu.memory_space<vmem>>, %arg4: memref<9x32x32xbf16, #tpu.memory_space<vmem>>, %arg5: memref<1x32xf32, #tpu.memory_space<vmem>>, %arg6: memref<32x128xbf16, #tpu.memory_space<vmem>>, %arg7: memref<1x128xf32, #tpu.memory_space<vmem>>, %arg8: memref<1x336x160xf32, #tpu.memory_space<vmem>>, %arg9: memref<432x64xf32, #tpu.memory_space<vmem>>, %arg10: memref<336x32xf32, #tpu.memory_space<vmem>>) attributes {dimension_semantics = [#tpu.dimension_semantics<parallel>], iteration_bounds = array<i64: 2>, scalar_prefetch = 0 : i64, scratch_operands = 2 : i64, tpu.core_type = #tpu.core_type<tc>, window_params = [{transform_indices = @transform_0, window_bounds = array<i64: 1, 432, 64>}, {pipeline_mode = #tpu.pipeline_mode<synchronous>, transform_indices = @transform_1, window_bounds = array<i64: 64, 64>}, {pipeline_mode = #tpu.pipeline_mode<synchronous>, transform_indices = @transform_2, window_bounds = array<i64: 1, 64>}, {pipeline_mode = #tpu.pipeline_mode<synchronous>, transform_indices = @transform_3, window_bounds = array<i64: 9, 32, 32>}, {pipeline_mode = #tpu.pipeline_mode<synchronous>, transform_indices = @transform_4, window_bounds = array<i64: 1, 32>}, {pipeline_mode = #tpu.pipeline_mode<synchronous>, transform_indices = @transform_5, window_bounds = array<i64: 32, 128>}, {pipeline_mode = #tpu.pipeline_mode<synchronous>, transform_indices = @transform_6, window_bounds = array<i64: 1, 128>}, {transform_indices = @transform_7, window_bounds = array<i64: 1, 336, 160>}]} {
    %c0 = arith.constant 0 : index
    %c0_0 = arith.constant 0 : index
    %c0_1 = arith.constant 0 : index
    %0 = vector.load %arg1[%c0, %c0_0, %c0_1] : memref<1x432x64xbf16, #tpu.memory_space<vmem>>, vector<1x432x64xbf16>
    %1 = vector.shape_cast %0 : vector<1x432x64xbf16> to vector<432x64xbf16>
    %c0_2 = arith.constant 0 : index
    %c0_3 = arith.constant 0 : index
    %2 = vector.load %arg2[%c0_2, %c0_3] : memref<64x64xbf16, #tpu.memory_space<vmem>>, vector<64x64xbf16>
    %cst = arith.constant dense<0.000000e+00> : vector<432x64xf32>
    %3 = tpu.matmul %1, %2, %cst {dimension_numbers = #tpu.dot_dimension_numbers<[1], [0], [0], [1], [0, 0, 1, 1], [], []>} : vector<432x64xbf16>, vector<64x64xbf16>, vector<432x64xf32> -> vector<432x64xf32>
    %c0_4 = arith.constant 0 : index
    %c0_5 = arith.constant 0 : index
    %4 = vector.load %arg3[%c0_4, %c0_5] : memref<1x64xf32, #tpu.memory_space<vmem>>, vector<1x64xf32>
    %5 = vector.broadcast %4 : vector<1x64xf32> to vector<432x64xf32>
    %6 = arith.addf %3, %5 : vector<432x64xf32>
    %cst_6 = arith.constant 0.000000e+00 : f32
    %7 = vector.broadcast %cst_6 : f32 to vector<432x64xf32>
    %8 = arith.maximumf %6, %7 : vector<432x64xf32>
    %c0_7 = arith.constant 0 : index
    %c0_8 = arith.constant 0 : index
    %9 = vector.load %arg9[%c0_7, %c0_8] : memref<432x64xf32, #tpu.memory_space<vmem>>, vector<432x64xf32>
    tpu.vector_store %arg9[%c0_7, %c0_8], %8 {strides = array<i32>} : memref<432x64xf32, #tpu.memory_space<vmem>>, vector<432x64xf32>,
    %c23 = arith.constant 23 : index
    %c0_9 = arith.constant 0 : index
    %10 = vector.load %arg9[%c23, %c0_9] : memref<432x64xf32, #tpu.memory_space<vmem>>, vector<336x32xf32>
    %11 = arith.truncf %10 : vector<336x32xf32> to vector<336x32xbf16>
    %c0_10 = arith.constant 0 : index
    %c0_11 = arith.constant 0 : index
    %c0_12 = arith.constant 0 : index
    %12 = vector.load %arg4[%c0_10, %c0_11, %c0_12] : memref<9x32x32xbf16, #tpu.memory_space<vmem>>, vector<1x32x32xbf16>
    %13 = vector.shape_cast %12 : vector<1x32x32xbf16> to vector<32x32xbf16>
    %cst_13 = arith.constant dense<0.000000e+00> : vector<336x32xf32>
    %14 = tpu.matmul %11, %13, %cst_13 {dimension_numbers = #tpu.dot_dimension_numbers<[1], [0], [0], [1], [0, 0, 1, 1], [], []>} : vector<336x32xbf16>, vector<32x32xbf16>, vector<336x32xf32> -> vector<336x32xf32>
    %c0_14 = arith.constant 0 : index
    %c0_15 = arith.constant 0 : index
    %15 = vector.load %arg10[%c0_14, %c0_15] : memref<336x32xf32, #tpu.memory_space<vmem>>, vector<336x32xf32>
    tpu.vector_store %arg10[%c0_14, %c0_15], %14 {strides = array<i32>} : memref<336x32xf32, #tpu.memory_space<vmem>>, vector<336x32xf32>,
    %c24 = arith.constant 24 : index
    %c0_16 = arith.constant 0 : index
    %16 = vector.load %arg9[%c24, %c0_16] : memref<432x64xf32, #tpu.memory_space<vmem>>, vector<336x32xf32>
    %17 = arith.truncf %16 : vector<336x32xf32> to vector<336x32xbf16>
    %c1 = arith.constant 1 : index
    %c0_17 = arith.constant 0 : index
    %c0_18 = arith.constant 0 : index
    %18 = vector.load %arg4[%c1, %c0_17, %c0_18] : memref<9x32x32xbf16, #tpu.memory_space<vmem>>, vector<1x32x32xbf16>
    %19 = vector.shape_cast %18 : vector<1x32x32xbf16> to vector<32x32xbf16>
    %cst_19 = arith.constant dense<0.000000e+00> : vector<336x32xf32>
    %20 = tpu.matmul %17, %19, %cst_19 {dimension_numbers = #tpu.dot_dimension_numbers<[1], [0], [0], [1], [0, 0, 1, 1], [], []>} : vector<336x32xbf16>, vector<32x32xbf16>, vector<336x32xf32> -> vector<336x32xf32>
    %c0_20 = arith.constant 0 : index
    %c0_21 = arith.constant 0 : index
    %21 = vector.load %arg10[%c0_20, %c0_21] : memref<336x32xf32, #tpu.memory_space<vmem>>, vector<336x32xf32>
    %22 = arith.addf %21, %20 : vector<336x32xf32>
    %c0_22 = arith.constant 0 : index
    %c0_23 = arith.constant 0 : index
    %23 = vector.load %arg10[%c0_22, %c0_23] : memref<336x32xf32, #tpu.memory_space<vmem>>, vector<336x32xf32>
    tpu.vector_store %arg10[%c0_22, %c0_23], %22 {strides = array<i32>} : memref<336x32xf32, #tpu.memory_space<vmem>>, vector<336x32xf32>,
    %c25 = arith.constant 25 : index
    %c0_24 = arith.constant 0 : index
    %24 = vector.load %arg9[%c25, %c0_24] : memref<432x64xf32, #tpu.memory_space<vmem>>, vector<336x32xf32>
    %25 = arith.truncf %24 : vector<336x32xf32> to vector<336x32xbf16>
    %c2 = arith.constant 2 : index
    %c0_25 = arith.constant 0 : index
    %c0_26 = arith.constant 0 : index
    %26 = vector.load %arg4[%c2, %c0_25, %c0_26] : memref<9x32x32xbf16, #tpu.memory_space<vmem>>, vector<1x32x32xbf16>
    %27 = vector.shape_cast %26 : vector<1x32x32xbf16> to vector<32x32xbf16>
    %cst_27 = arith.constant dense<0.000000e+00> : vector<336x32xf32>
    %28 = tpu.matmul %25, %27, %cst_27 {dimension_numbers = #tpu.dot_dimension_numbers<[1], [0], [0], [1], [0, 0, 1, 1], [], []>} : vector<336x32xbf16>, vector<32x32xbf16>, vector<336x32xf32> -> vector<336x32xf32>
    %c0_28 = arith.constant 0 : index
    %c0_29 = arith.constant 0 : index
    %29 = vector.load %arg10[%c0_28, %c0_29] : memref<336x32xf32, #tpu.memory_space<vmem>>, vector<336x32xf32>
    %30 = arith.addf %29, %28 : vector<336x32xf32>
    %c0_30 = arith.constant 0 : index
    %c0_31 = arith.constant 0 : index
    %31 = vector.load %arg10[%c0_30, %c0_31] : memref<336x32xf32, #tpu.memory_space<vmem>>, vector<336x32xf32>
    tpu.vector_store %arg10[%c0_30, %c0_31], %30 {strides = array<i32>} : memref<336x32xf32, #tpu.memory_space<vmem>>, vector<336x32xf32>,
    %c47 = arith.constant 47 : index
    %c0_32 = arith.constant 0 : index
    %32 = vector.load %arg9[%c47, %c0_32] : memref<432x64xf32, #tpu.memory_space<vmem>>, vector<336x32xf32>
    %33 = arith.truncf %32 : vector<336x32xf32> to vector<336x32xbf16>
    %c3 = arith.constant 3 : index
    %c0_33 = arith.constant 0 : index
    %c0_34 = arith.constant 0 : index
    %34 = vector.load %arg4[%c3, %c0_33, %c0_34] : memref<9x32x32xbf16, #tpu.memory_space<vmem>>, vector<1x32x32xbf16>
    %35 = vector.shape_cast %34 : vector<1x32x32xbf16> to vector<32x32xbf16>
    %cst_35 = arith.constant dense<0.000000e+00> : vector<336x32xf32>
    %36 = tpu.matmul %33, %35, %cst_35 {dimension_numbers = #tpu.dot_dimension_numbers<[1], [0], [0], [1], [0, 0, 1, 1], [], []>} : vector<336x32xbf16>, vector<32x32xbf16>, vector<336x32xf32> -> vector<336x32xf32>
    %c0_36 = arith.constant 0 : index
    %c0_37 = arith.constant 0 : index
    %37 = vector.load %arg10[%c0_36, %c0_37] : memref<336x32xf32, #tpu.memory_space<vmem>>, vector<336x32xf32>
    %38 = arith.addf %37, %36 : vector<336x32xf32>
    %c0_38 = arith.constant 0 : index
    %c0_39 = arith.constant 0 : index
    %39 = vector.load %arg10[%c0_38, %c0_39] : memref<336x32xf32, #tpu.memory_space<vmem>>, vector<336x32xf32>
    tpu.vector_store %arg10[%c0_38, %c0_39], %38 {strides = array<i32>} : memref<336x32xf32, #tpu.memory_space<vmem>>, vector<336x32xf32>,
    %c48 = arith.constant 48 : index
    %c0_40 = arith.constant 0 : index
    %40 = vector.load %arg9[%c48, %c0_40] : memref<432x64xf32, #tpu.memory_space<vmem>>, vector<336x32xf32>
    %41 = arith.truncf %40 : vector<336x32xf32> to vector<336x32xbf16>
    %c4 = arith.constant 4 : index
    %c0_41 = arith.constant 0 : index
    %c0_42 = arith.constant 0 : index
    %42 = vector.load %arg4[%c4, %c0_41, %c0_42] : memref<9x32x32xbf16, #tpu.memory_space<vmem>>, vector<1x32x32xbf16>
    %43 = vector.shape_cast %42 : vector<1x32x32xbf16> to vector<32x32xbf16>
    %cst_43 = arith.constant dense<0.000000e+00> : vector<336x32xf32>
    %44 = tpu.matmul %41, %43, %cst_43 {dimension_numbers = #tpu.dot_dimension_numbers<[1], [0], [0], [1], [0, 0, 1, 1], [], []>} : vector<336x32xbf16>, vector<32x32xbf16>, vector<336x32xf32> -> vector<336x32xf32>
    %c0_44 = arith.constant 0 : index
    %c0_45 = arith.constant 0 : index
    %45 = vector.load %arg10[%c0_44, %c0_45] : memref<336x32xf32, #tpu.memory_space<vmem>>, vector<336x32xf32>
    %46 = arith.addf %45, %44 : vector<336x32xf32>
    %c0_46 = arith.constant 0 : index
    %c0_47 = arith.constant 0 : index
    %47 = vector.load %arg10[%c0_46, %c0_47] : memref<336x32xf32, #tpu.memory_space<vmem>>, vector<336x32xf32>
    tpu.vector_store %arg10[%c0_46, %c0_47], %46 {strides = array<i32>} : memref<336x32xf32, #tpu.memory_space<vmem>>, vector<336x32xf32>,
    %c49 = arith.constant 49 : index
    %c0_48 = arith.constant 0 : index
    %48 = vector.load %arg9[%c49, %c0_48] : memref<432x64xf32, #tpu.memory_space<vmem>>, vector<336x32xf32>
    %49 = arith.truncf %48 : vector<336x32xf32> to vector<336x32xbf16>
    %c5 = arith.constant 5 : index
    %c0_49 = arith.constant 0 : index
    %c0_50 = arith.constant 0 : index
    %50 = vector.load %arg4[%c5, %c0_49, %c0_50] : memref<9x32x32xbf16, #tpu.memory_space<vmem>>, vector<1x32x32xbf16>
    %51 = vector.shape_cast %50 : vector<1x32x32xbf16> to vector<32x32xbf16>
    %cst_51 = arith.constant dense<0.000000e+00> : vector<336x32xf32>
    %52 = tpu.matmul %49, %51, %cst_51 {dimension_numbers = #tpu.dot_dimension_numbers<[1], [0], [0], [1], [0, 0, 1, 1], [], []>} : vector<336x32xbf16>, vector<32x32xbf16>, vector<336x32xf32> -> vector<336x32xf32>
    %c0_52 = arith.constant 0 : index
    %c0_53 = arith.constant 0 : index
    %53 = vector.load %arg10[%c0_52, %c0_53] : memref<336x32xf32, #tpu.memory_space<vmem>>, vector<336x32xf32>
    %54 = arith.addf %53, %52 : vector<336x32xf32>
    %c0_54 = arith.constant 0 : index
    %c0_55 = arith.constant 0 : index
    %55 = vector.load %arg10[%c0_54, %c0_55] : memref<336x32xf32, #tpu.memory_space<vmem>>, vector<336x32xf32>
    tpu.vector_store %arg10[%c0_54, %c0_55], %54 {strides = array<i32>} : memref<336x32xf32, #tpu.memory_space<vmem>>, vector<336x32xf32>,
    %c71 = arith.constant 71 : index
    %c0_56 = arith.constant 0 : index
    %56 = vector.load %arg9[%c71, %c0_56] : memref<432x64xf32, #tpu.memory_space<vmem>>, vector<336x32xf32>
    %57 = arith.truncf %56 : vector<336x32xf32> to vector<336x32xbf16>
    %c6 = arith.constant 6 : index
    %c0_57 = arith.constant 0 : index
    %c0_58 = arith.constant 0 : index
    %58 = vector.load %arg4[%c6, %c0_57, %c0_58] : memref<9x32x32xbf16, #tpu.memory_space<vmem>>, vector<1x32x32xbf16>
    %59 = vector.shape_cast %58 : vector<1x32x32xbf16> to vector<32x32xbf16>
    %cst_59 = arith.constant dense<0.000000e+00> : vector<336x32xf32>
    %60 = tpu.matmul %57, %59, %cst_59 {dimension_numbers = #tpu.dot_dimension_numbers<[1], [0], [0], [1], [0, 0, 1, 1], [], []>} : vector<336x32xbf16>, vector<32x32xbf16>, vector<336x32xf32> -> vector<336x32xf32>
    %c0_60 = arith.constant 0 : index
    %c0_61 = arith.constant 0 : index
    %61 = vector.load %arg10[%c0_60, %c0_61] : memref<336x32xf32, #tpu.memory_space<vmem>>, vector<336x32xf32>
    %62 = arith.addf %61, %60 : vector<336x32xf32>
    %c0_62 = arith.constant 0 : index
    %c0_63 = arith.constant 0 : index
    %63 = vector.load %arg10[%c0_62, %c0_63] : memref<336x32xf32, #tpu.memory_space<vmem>>, vector<336x32xf32>
    tpu.vector_store %arg10[%c0_62, %c0_63], %62 {strides = array<i32>} : memref<336x32xf32, #tpu.memory_space<vmem>>, vector<336x32xf32>,
    %c72 = arith.constant 72 : index
    %c0_64 = arith.constant 0 : index
    %64 = vector.load %arg9[%c72, %c0_64] : memref<432x64xf32, #tpu.memory_space<vmem>>, vector<336x32xf32>
    %65 = arith.truncf %64 : vector<336x32xf32> to vector<336x32xbf16>
    %c7 = arith.constant 7 : index
    %c0_65 = arith.constant 0 : index
    %c0_66 = arith.constant 0 : index
    %66 = vector.load %arg4[%c7, %c0_65, %c0_66] : memref<9x32x32xbf16, #tpu.memory_space<vmem>>, vector<1x32x32xbf16>
    %67 = vector.shape_cast %66 : vector<1x32x32xbf16> to vector<32x32xbf16>
    %cst_67 = arith.constant dense<0.000000e+00> : vector<336x32xf32>
    %68 = tpu.matmul %65, %67, %cst_67 {dimension_numbers = #tpu.dot_dimension_numbers<[1], [0], [0], [1], [0, 0, 1, 1], [], []>} : vector<336x32xbf16>, vector<32x32xbf16>, vector<336x32xf32> -> vector<336x32xf32>
    %c0_68 = arith.constant 0 : index
    %c0_69 = arith.constant 0 : index
    %69 = vector.load %arg10[%c0_68, %c0_69] : memref<336x32xf32, #tpu.memory_space<vmem>>, vector<336x32xf32>
    %70 = arith.addf %69, %68 : vector<336x32xf32>
    %c0_70 = arith.constant 0 : index
    %c0_71 = arith.constant 0 : index
    %71 = vector.load %arg10[%c0_70, %c0_71] : memref<336x32xf32, #tpu.memory_space<vmem>>, vector<336x32xf32>
    tpu.vector_store %arg10[%c0_70, %c0_71], %70 {strides = array<i32>} : memref<336x32xf32, #tpu.memory_space<vmem>>, vector<336x32xf32>,
    %c73 = arith.constant 73 : index
    %c0_72 = arith.constant 0 : index
    %72 = vector.load %arg9[%c73, %c0_72] : memref<432x64xf32, #tpu.memory_space<vmem>>, vector<336x32xf32>
    %73 = arith.truncf %72 : vector<336x32xf32> to vector<336x32xbf16>
    %c8 = arith.constant 8 : index
    %c0_73 = arith.constant 0 : index
    %c0_74 = arith.constant 0 : index
    %74 = vector.load %arg4[%c8, %c0_73, %c0_74] : memref<9x32x32xbf16, #tpu.memory_space<vmem>>, vector<1x32x32xbf16>
    %75 = vector.shape_cast %74 : vector<1x32x32xbf16> to vector<32x32xbf16>
    %cst_75 = arith.constant dense<0.000000e+00> : vector<336x32xf32>
    %76 = tpu.matmul %73, %75, %cst_75 {dimension_numbers = #tpu.dot_dimension_numbers<[1], [0], [0], [1], [0, 0, 1, 1], [], []>} : vector<336x32xbf16>, vector<32x32xbf16>, vector<336x32xf32> -> vector<336x32xf32>
    %c0_76 = arith.constant 0 : index
    %c0_77 = arith.constant 0 : index
    %77 = vector.load %arg10[%c0_76, %c0_77] : memref<336x32xf32, #tpu.memory_space<vmem>>, vector<336x32xf32>
    %78 = arith.addf %77, %76 : vector<336x32xf32>
    %c0_78 = arith.constant 0 : index
    %c0_79 = arith.constant 0 : index
    %79 = vector.load %arg10[%c0_78, %c0_79] : memref<336x32xf32, #tpu.memory_space<vmem>>, vector<336x32xf32>
    tpu.vector_store %arg10[%c0_78, %c0_79], %78 {strides = array<i32>} : memref<336x32xf32, #tpu.memory_space<vmem>>, vector<336x32xf32>,
    %c0_80 = arith.constant 0 : index
    %c0_81 = arith.constant 0 : index
    %80 = vector.load %arg10[%c0_80, %c0_81] : memref<336x32xf32, #tpu.memory_space<vmem>>, vector<336x32xf32>
    %c0_82 = arith.constant 0 : index
    %c0_83 = arith.constant 0 : index
    %81 = vector.load %arg5[%c0_82, %c0_83] : memref<1x32xf32, #tpu.memory_space<vmem>>, vector<1x32xf32>
    %82 = vector.broadcast %81 : vector<1x32xf32> to vector<336x32xf32>
    %83 = arith.addf %80, %82 : vector<336x32xf32>
    %cst_84 = arith.constant 0.000000e+00 : f32
    %84 = vector.broadcast %cst_84 : f32 to vector<336x32xf32>
    %85 = arith.maximumf %83, %84 : vector<336x32xf32>
    %86 = arith.truncf %85 : vector<336x32xf32> to vector<336x32xbf16>
    %c0_85 = arith.constant 0 : index
    %c0_86 = arith.constant 0 : index
    %87 = vector.load %arg6[%c0_85, %c0_86] : memref<32x128xbf16, #tpu.memory_space<vmem>>, vector<32x128xbf16>
    %cst_87 = arith.constant dense<0.000000e+00> : vector<336x128xf32>
    %88 = tpu.matmul %86, %87, %cst_87 {dimension_numbers = #tpu.dot_dimension_numbers<[1], [0], [0], [1], [0, 0, 1, 1], [], []>} : vector<336x32xbf16>, vector<32x128xbf16>, vector<336x128xf32> -> vector<336x128xf32>
    %c0_88 = arith.constant 0 : index
    %c0_89 = arith.constant 0 : index
    %89 = vector.load %arg7[%c0_88, %c0_89] : memref<1x128xf32, #tpu.memory_space<vmem>>, vector<1x128xf32>
    %90 = vector.broadcast %89 : vector<1x128xf32> to vector<336x128xf32>
    %91 = arith.addf %88, %90 : vector<336x128xf32>
    %cst_90 = arith.constant 0.000000e+00 : f32
    %92 = vector.broadcast %cst_90 : f32 to vector<336x128xf32>
    %93 = arith.maximumf %91, %92 : vector<336x128xf32>
    %c48_91 = arith.constant 48 : index
    %c32 = arith.constant 32 : index
    %94 = vector.load %arg9[%c48_91, %c32] : memref<432x64xf32, #tpu.memory_space<vmem>>, vector<336x32xf32>
    %c0_92 = arith.constant 0 : index
    %c0_93 = arith.constant 0 : index
    %c0_94 = arith.constant 0 : index
    %95 = vector.load %arg8[%c0_92, %c0_93, %c0_94] : memref<1x336x160xf32, #tpu.memory_space<vmem>>, vector<1x336x128xf32>
    %96 = vector.shape_cast %95 : vector<1x336x128xf32> to vector<336x128xf32>
    %97 = vector.shape_cast %93 : vector<336x128xf32> to vector<1x336x128xf32>
    tpu.vector_store %arg8[%c0_92, %c0_93, %c0_94], %97 {strides = array<i32>} : memref<1x336x160xf32, #tpu.memory_space<vmem>>, vector<1x336x128xf32>,
    %c0_95 = arith.constant 0 : index
    %c0_96 = arith.constant 0 : index
    %c128 = arith.constant 128 : index
    %98 = vector.load %arg8[%c0_95, %c0_96, %c128] : memref<1x336x160xf32, #tpu.memory_space<vmem>>, vector<1x336x32xf32>
    %99 = vector.shape_cast %98 : vector<1x336x32xf32> to vector<336x32xf32>
    %100 = vector.shape_cast %94 : vector<336x32xf32> to vector<1x336x32xf32>
    tpu.vector_store %arg8[%c0_95, %c0_96, %c128], %100 {strides = array<i32>} : memref<1x336x160xf32, #tpu.memory_space<vmem>>, vector<1x336x32xf32>,
    return
  }
  func.func @transform_0(%arg0: i32) -> (i32, i32, i32) {
    %c0_i32 = arith.constant 0 : i32
    %c0_i32_0 = arith.constant 0 : i32
    %c0_i32_1 = arith.constant 0 : i32
    return %arg0, %c0_i32, %c0_i32_0 : i32, i32, i32
  }
  func.func @transform_1(%arg0: i32) -> (i32, i32) {
    %c0_i32 = arith.constant 0 : i32
    %c0_i32_0 = arith.constant 0 : i32
    %c0_i32_1 = arith.constant 0 : i32
    return %c0_i32, %c0_i32_0 : i32, i32
  }
  func.func @transform_2(%arg0: i32) -> (i32, i32) {
    %c0_i32 = arith.constant 0 : i32
    %c0_i32_0 = arith.constant 0 : i32
    %c0_i32_1 = arith.constant 0 : i32
    return %c0_i32, %c0_i32_0 : i32, i32
  }
  func.func @transform_3(%arg0: i32) -> (i32, i32, i32) {
    %c0_i32 = arith.constant 0 : i32
    %c0_i32_0 = arith.constant 0 : i32
    %c0_i32_1 = arith.constant 0 : i32
    %c0_i32_2 = arith.constant 0 : i32
    return %c0_i32, %c0_i32_0, %c0_i32_1 : i32, i32, i32
  }
  func.func @transform_4(%arg0: i32) -> (i32, i32) {
    %c0_i32 = arith.constant 0 : i32
    %c0_i32_0 = arith.constant 0 : i32
    %c0_i32_1 = arith.constant 0 : i32
    return %c0_i32, %c0_i32_0 : i32, i32
  }
  func.func @transform_5(%arg0: i32) -> (i32, i32) {
    %c0_i32 = arith.constant 0 : i32
    %c0_i32_0 = arith.constant 0 : i32
    %c0_i32_1 = arith.constant 0 : i32
    return %c0_i32, %c0_i32_0 : i32, i32
  }
  func.func @transform_6(%arg0: i32) -> (i32, i32) {
    %c0_i32 = arith.constant 0 : i32
    %c0_i32_0 = arith.constant 0 : i32
    %c0_i32_1 = arith.constant 0 : i32
    return %c0_i32, %c0_i32_0 : i32, i32
  }
  func.func @transform_7(%arg0: i32) -> (i32, i32, i32) {
    %c0_i32 = arith.constant 0 : i32
    %c0_i32_0 = arith.constant 0 : i32
    %c0_i32_1 = arith.constant 0 : i32
    return %arg0, %c0_i32, %c0_i32_0 : i32, i32, i32
  }
}

</mosaic_0001>

<bundles_post_ra>
// kernel: inception_m_forward.1
= control target key start
LH: loop header
LB: loop body
LE: loop exit
PB: predicated region body
PF: predicated region fallthrough
CT: control target
= control target key end

     0   :  { %s7634_s24 = smov 0   ;;  %s10240_s0 = inlined_call_operand.vmem [shape: bf16[2,432,64], index: 0, kind: input, shape index: {}]   ;;  %s10241_s1 = inlined_call_operand.vmem [shape: bf16[64,64], index: 1, kind: input, shape index: {}]   ;;  %s10242_s2 = inlined_call_operand.vmem [shape: f32[1,64], index: 2, kind: input, shape index: {}]   ;;  %s10243_s3 = inlined_call_operand.vmem [shape: bf16[9,32,32], index: 3, kind: input, shape index: {}]   ;;  %s10244_s4 = inlined_call_operand.vmem [shape: f32[1,32], index: 4, kind: input, shape index: {}]   ;;  %s10245_s5 = inlined_call_operand.vmem [shape: bf16[32,128], index: 5, kind: input, shape index: {}]   ;;  %s10246_s6 = inlined_call_operand.vmem [shape: f32[1,128], index: 6, kind: input, shape index: {}]   ;;  %s10247_s7 = inlined_call_operand.vmem [shape: f32[2,336,160], index: 7, kind: output, shape index: {}]  }
   0x1 LB: > { %s5925_s25 = sadd.s32 4294967295, %s7589_s24   ;;  %p5929_p0 = scmp.ge.s32.totalorder %s7589_s24, 1  ;;  %s7589_s24 = sphi %s7634_s24, %s17_s24  }
   0x2   : > { %p237_p1 = scmp.lt.s32.totalorder %s7589_s24, 3 }
   0x4   : > { %p238_p2 = pnand %p5929_p0, %p237_p1 }
   0x5   : > { %p269_p3 = scmp.lt.s32.totalorder (!%p238_p2), %s5925_s25, 1  ;;  %s7593_s27 = smov (!%p238_p2), 96  }
   0x6   : > { %241 = sbr.rel (%p238_p2) target bundleno = 1509 (0x5e5), region = 48 }
   0xb   : > { %v7531_v0 = vld [vmem:[%s10241_s1 + $0x18] sm:$0xff]   ;;  %v7591_v1 = vmov 0.0   ;;  %v7532_v2 = vld [vmem:[%s10241_s1 + $0x10] sm:$0xff]   ;;  %vm7592_vm0 = vmmov 0   ;;  %s10249_s25 = smov (!%p269_p3, %s5925_s25), 1  ;;  %v7533_v3 = vld [vmem:[%s10241_s1 + $0x8] sm:$0xff]  }
   0xc   : > { %6518 = vmatprep.subr.bf16.mxu0 %v7591_v1  ;;  %7514 = vmatprep.subr.bf16.mxu1 %v7591_v1  ;;  %s7518_s9 = smul.u32 216, %s10249_s25  ;;  %v7534_v4 = vld [vmem:[%s10241_s1] sm:$0xff]   ;;  %vm508_vm1 = vcmask 523264   ;;  %v7552_v7 = vld [vmem:[%s10243_s3 + $0x8] sm:$0xff]   ;;  %vm1026_vm2 = vcmask 261120  }
   0xd   : > { %6519 = vmatpush3.bf16.msra.mxu0 %v7531_v0  ;;  %6526 = vmatprep.mubr.msk.bf16.mxu0 %vm7592_vm0, %v7591_v1  ;;  %v7563_v18 = vld [vmem:[%s10243_s3] sm:$0xff]   ;;  %v7564_v62 = vld [vmem:[%s10243_s3 + $0x28] sm:$0xff]   ;;  %s7519_s13 = smul.u32 672, %s10249_s25 }
   0xe   : > { %6520 = vmatprep.subr.bf16.mxu0 %v7591_v1  ;;  %6666 = vmatprep.mubr.msk.bf16.mxu1 %vm7592_vm0, %v7591_v1  ;;  %s7665_s12 = scalar_lea.vmem %s10240_s0, %s7518_s9  ;;  %v7782_v32 = vld [vmem:[%s10242_s2] ss:$0 sm:$0xff] }
   0xf   : > { %v7535_v5 = vld [vmem:[%s7665_s12] sm:$0xff]   ;;  %v7536_v6 = vld [vmem:[%s7665_s12 + $0x8] sm:$0xff]   ;;  %v7537_v8 = vld [vmem:[%s7665_s12 + $0x10] sm:$0xff]   ;;  %7516 = vmatpush3.bf16.msra.mxu1 %v7552_v7  ;;  %s7992_s16 = scalar_lea.vmem %s10247_s7, %s7519_s13 }
  0x10   : > { %7515 = vmatprep.subr.bf16.mxu1 %v7591_v1  ;;  %v7538_v9 = vld [vmem:[%s7665_s12 + $0x18] sm:$0xff]   ;;  %v7539_v10 = vld [vmem:[%s7665_s12 + $0x20] sm:$0xff]   ;;  %v7540_v11 = vld [vmem:[%s7665_s12 + $0x28] sm:$0xff]  }
  0x11   : > { %6521 = vmatpush3.bf16.msra.mxu0 %v7532_v2  ;;  %v7541_v12 = vld [vmem:[%s7665_s12 + $0x30] sm:$0xff]   ;;  %v7542_v13 = vld [vmem:[%s7665_s12 + $0x38] sm:$0xff]   ;;  %v7543_v14 = vld [vmem:[%s7665_s12 + $0x40] sm:$0xff]  }
  0x12   : > { %6522 = vmatprep.subr.bf16.mxu0 %v7591_v1  ;;  %v7544_v15 = vld [vmem:[%s7665_s12 + $0x48] sm:$0xff]   ;;  %v7545_v16 = vld [vmem:[%s7665_s12 + $0x50] sm:$0xff]   ;;  %v7546_v17 = vld [vmem:[%s7665_s12 + $0x58] sm:$0xff]  }
  0x13   : > { %v7547_v19 = vld [vmem:[%s7665_s12 + $0x60] sm:$0xff]   ;;  %7517 = vmatpush3.bf16.msra.mxu1 %v7563_v18  ;;  %v7548_v20 = vld [vmem:[%s7665_s12 + $0x68] sm:$0xff]   ;;  %v7549_v21 = vld [vmem:[%s7665_s12 + $0x70] sm:$0xff]  }
  0x14   : > { %6722 = vmatprep.subr.bf16.mxu1 %v7591_v1  ;;  %v7550_v22 = vld [vmem:[%s7665_s12 + $0x78] sm:$0xff]   ;;  %v7551_v23 = vld [vmem:[%s7665_s12 + $0x80] sm:$0xff]   ;;  %v7553_v24 = vld [vmem:[%s7665_s12 + $0x88] sm:$0xff]  }
  0x15   : > { %6523 = vmatpush3.bf16.msra.mxu0 %v7533_v3  ;;  %v7554_v25 = vld [vmem:[%s7665_s12 + $0x90] sm:$0xff]   ;;  %v7555_v26 = vld [vmem:[%s7665_s12 + $0x98] sm:$0xff]   ;;  %v7556_v27 = vld [vmem:[%s7665_s12 + $0xa0] sm:$0xff]  }
  0x16   : > { %6524 = vmatprep.subr.bf16.mxu0 %v7591_v1  ;;  %v7557_v28 = vld [vmem:[%s7665_s12 + $0xa8] sm:$0xff]   ;;  %v7558_v29 = vld [vmem:[%s7665_s12 + $0xb0] sm:$0xff]   ;;  %v7559_v30 = vld [vmem:[%s7665_s12 + $0xb8] sm:$0xff]  }
  0x17   : > { %v7560_v31 = vld [vmem:[%s7665_s12 + $0xc0] sm:$0xff]   ;;  %v7561_v36 = vld [vmem:[%s7665_s12 + $0xc8] sm:$0xff]   ;;  %v7562_v43 = vld [vmem:[%s7665_s12 + $0xd0] sm:$0xff]  }
  0x19   : > { %6525 = vmatpush3.bf16.msra.mxu0 %v7534_v4 }
  0x1a   : > { %6634 = vmatprep.subr.bf16.mxu0 %v7591_v1 }
  0x1c   : > { %6527 = vmatmul.mubr.msk.bf16.vlgmr.msra.gmra.mxu0 %vm508_vm1, %v7535_v5  ;;  %v7565_v5 = vld [vmem:[%s10243_s3 + $0x20] sm:$0xff]  }
  0x1d   : > { %6530 = vmatprep.mubr.msk.bf16.mxu0 %vm7592_vm0, %v7591_v1  ;;  %6635 = vmatpush3.bf16.msra.mxu0 %v7552_v7 }
  0x1e   : > { %6636 = vmatprep.subr.bf16.mxu0 %v7591_v1 }
  0x21   : > { %6637 = vmatpush3.bf16.msra.mxu0 %v7563_v18 }
  0x22   : > { %6810 = vmatprep.subr.bf16.mxu0 %v7591_v1 }
  0x24   : > { %6531 = vmatmul.mubr.msk.bf16.gmra.mxu0 %vm508_vm1, %v7536_v6 }
  0x25   : > { %6534 = vmatprep.mubr.msk.bf16.mxu0 %vm7592_vm0, %v7591_v1 }
  0x2c   : > { %6535 = vmatmul.mubr.msk.bf16.gmra.mxu0 %vm508_vm1, %v7537_v8 }
  0x2d   : > { %6538 = vmatprep.mubr.msk.bf16.mxu0 %vm7592_vm0, %v7591_v1 }
  0x34   : > { %6539 = vmatmul.mubr.msk.bf16.gmra.mxu0 %vm508_vm1, %v7538_v9 }
  0x35   : > { %6542 = vmatprep.mubr.msk.bf16.mxu0 %vm7592_vm0, %v7591_v1 }
  0x3c   : > { %6543 = vmatmul.mubr.msk.bf16.gmra.mxu0 %vm508_vm1, %v7539_v10 }
  0x3d   : > { %6546 = vmatprep.mubr.msk.bf16.mxu0 %vm7592_vm0, %v7591_v1 }
  0x44   : > { %6547 = vmatmul.mubr.msk.bf16.gmra.mxu0 %vm508_vm1, %v7540_v11 }
  0x45   : > { %6550 = vmatprep.mubr.msk.bf16.mxu0 %vm7592_vm0, %v7591_v1 }
  0x4c   : > { %6551 = vmatmul.mubr.msk.bf16.gmra.mxu0 %vm508_vm1, %v7541_v12 }
  0x4d   : > { %6554 = vmatprep.mubr.msk.bf16.mxu0 %vm7592_vm0, %v7591_v1 }
  0x54   : > { %6555 = vmatmul.mubr.msk.bf16.gmra.mxu0 %vm508_vm1, %v7542_v13 }
  0x55   : > { %6558 = vmatprep.mubr.msk.bf16.mxu0 %vm7592_vm0, %v7591_v1 }
  0x5c   : > { %6559 = vmatmul.mubr.msk.bf16.gmra.mxu0 %vm508_vm1, %v7543_v14 }
  0x5d   : > { %6562 = vmatprep.mubr.msk.bf16.mxu0 %vm7592_vm0, %v7591_v1 }
  0x64   : > { %6563 = vmatmul.mubr.msk.bf16.gmra.mxu0 %vm508_vm1, %v7544_v15 }
  0x65   : > { %6566 = vmatprep.mubr.msk.bf16.mxu0 %vm7592_vm0, %v7591_v1 }
  0x6c   : > { %6567 = vmatmul.mubr.msk.bf16.gmra.mxu0 %vm508_vm1, %v7545_v16 }
  0x6d   : > { %6570 = vmatprep.mubr.msk.bf16.mxu0 %vm7592_vm0, %v7591_v1 }
  0x74   : > { %6571 = vmatmul.mubr.msk.bf16.gmra.mxu0 %vm508_vm1, %v7546_v17 }
  0x75   : > { %6574 = vmatprep.mubr.msk.bf16.mxu0 %vm7592_vm0, %v7591_v1 }
  0x7c   : > { %6575 = vmatmul.mubr.msk.bf16.gmra.mxu0 %vm508_vm1, %v7547_v19 }
  0x7d   : > { %6578 = vmatprep.mubr.msk.bf16.mxu0 %vm7592_vm0, %v7591_v1 }
  0x84   : > { %6579 = vmatmul.mubr.msk.bf16.gmra.mxu0 %vm508_vm1, %v7548_v20 }
  0x85   : > { %6582 = vmatprep.mubr.msk.bf16.mxu0 %vm7592_vm0, %v7591_v1 }
  0x8c   : > { %6583 = vmatmul.mubr.msk.bf16.gmra.mxu0 %vm508_vm1, %v7549_v21 }
  0x8d   : > { %6586 = vmatprep.mubr.msk.bf16.mxu0 %vm7592_vm0, %v7591_v1 }
  0x94   : > { %6587 = vmatmul.mubr.msk.bf16.gmra.mxu0 %vm508_vm1, %v7550_v22 }
  0x95   : > { %6590 = vmatprep.mubr.msk.bf16.mxu0 %vm7592_vm0, %v7591_v1 }
  0x9c   : > { %6591 = vmatmul.mubr.msk.bf16.gmra.mxu0 %vm508_vm1, %v7551_v23 }
  0x9d   : > { %6594 = vmatprep.mubr.msk.bf16.mxu0 %vm7592_vm0, %v7591_v1 }
  0xa4   : > { %6595 = vmatmul.mubr.msk.bf16.gmra.mxu0 %vm508_vm1, %v7553_v24 }
  0xa5   : > { %6598 = vmatprep.mubr.msk.bf16.mxu0 %vm7592_vm0, %v7591_v1 }
  0xac   : > { %6599 = vmatmul.mubr.msk.bf16.gmra.mxu0 %vm508_vm1, %v7554_v25 }
  0xad   : > { %6602 = vmatprep.mubr.msk.bf16.mxu0 %vm7592_vm0, %v7591_v1 }
  0xb4   : > { %6603 = vmatmul.mubr.msk.bf16.gmra.mxu0 %vm508_vm1, %v7555_v26 }
  0xb5   : > { %6606 = vmatprep.mubr.msk.bf16.mxu0 %vm7592_vm0, %v7591_v1 }
  0xbc   : > { %6607 = vmatmul.mubr.msk.bf16.gmra.mxu0 %vm508_vm1, %v7556_v27 }
  0xbd   : > { %6610 = vmatprep.mubr.msk.bf16.mxu0 %vm7592_vm0, %v7591_v1 }
  0xc4   : > { %6611 = vmatmul.mubr.msk.bf16.gmra.mxu0 %vm508_vm1, %v7557_v28 }
  0xc5   : > { %6614 = vmatprep.mubr.msk.bf16.mxu0 %vm7592_vm0, %v7591_v1 }
  0xcc   : > { %6615 = vmatmul.mubr.msk.bf16.gmra.mxu0 %vm508_vm1, %v7558_v29 }
  0xcd   : > { %6618 = vmatprep.mubr.msk.bf16.mxu0 %vm7592_vm0, %v7591_v1 }
  0xd4   : > { %6619 = vmatmul.mubr.msk.bf16.gmra.mxu0 %vm508_vm1, %v7559_v30 }
  0xd5   : > { %6622 = vmatprep.mubr.msk.bf16.mxu0 %vm7592_vm0, %v7591_v1 }
  0xdc   : > { %v624_v33 = vpop.f32.mrf.mxu0  ;;  %6623 = vmatmul.mubr.msk.bf16.gmra.mxu0 %vm508_vm1, %v7560_v31 }
  0xdd   : > { %6626 = vmatprep.mubr.msk.bf16.mxu0 %vm7592_vm0, %v7591_v1 }
  0xde   : > { %v6528_v34 = vpop.f32.mrf.mxu0 }
  0xe0   : > { %v627_v35 = vpop.f32.mrf.mxu0 }
  0xe2   : > { %v6529_v37 = vpop.f32.mrf.mxu0 }
  0xe4   : > { %v632_v38 = vpop.f32.mrf.mxu0  ;;  %6627 = vmatmul.mubr.msk.bf16.gmra.mxu0 %vm508_vm1, %v7561_v36 }
  0xe5   : > { %v633_v39 = vadd.f32 %v7782_v32, %v632_v38  ;;  %6630 = vmatprep.mubr.msk.bf16.mxu0 %vm7592_vm0, %v7591_v1 }
  0xe6   : > { %v6532_v40 = vpop.f32.mrf.mxu0 }
  0xe7   : > { %v841_v41 = vmax.f32 %v633_v39, 0.0 }
  0xe8   : > { %v635_v42 = vpop.f32.mrf.mxu0 }
  0xe9   : > { %895 = vst.msk [vmem:[#allocation2 + $0x10] sm:$0xff] %vm508_vm1, %v841_v41  ;;  %v636_v44 = vadd.f32 %v7782_v32, %v635_v42 }
  0xea   : > { %v6533_v45 = vpop.f32.mrf.mxu0 }
  0xeb   : > { %v842_v46 = vmax.f32 %v636_v44, 0.0 }
  0xec   : > { %v640_v47 = vpop.f32.mrf.mxu0  ;;  %6631 = vmatmul.mubr.msk.bf16.gmra.mxu0 %vm508_vm1, %v7562_v43 }
  0xed   : > { %896 = vst.msk [vmem:[#allocation2 + $0x18] sm:$0xff] %vm508_vm1, %v842_v46  ;;  %v641_v48 = vadd.f32 %v7782_v32, %v640_v47  ;;  %6638 = vmatprep.mubr.msk.bf16.mxu0 %vm7592_vm0, %v7591_v1 }
  0xee   : > { %v6536_v49 = vpop.f32.mrf.mxu0 }
  0xef   : > { %v843_v50 = vmax.f32 %v641_v48, 0.0 }
  0xf0   : > { %v643_v51 = vpop.f32.mrf.mxu0 }
  0xf1   : > { %897 = vst.msk [vmem:[#allocation2 + $0x20] sm:$0xff] %vm508_vm1, %v843_v50  ;;  %v644_v52 = vadd.f32 %v7782_v32, %v643_v51 }
  0xf2   : > { %v6537_v53 = vpop.f32.mrf.mxu0 }
  0xf3   : > { %v844_v54 = vmax.f32 %v644_v52, 0.0 }
  0xf4   : > { %v648_v55 = vpop.f32.mrf.mxu0  ;;  %v947_v60 = vld [vmem:[#allocation2 + $0x17] sm:$0xff] }
  0xf5   : > { %898 = vst.msk [vmem:[#allocation2 + $0x28] sm:$0xff] %vm508_vm1, %v844_v54  ;;  %v649_v56 = vadd.f32 %v7782_v32, %v648_v55 }
  0xf6   : > { %v6540_v57 = vpop.f32.mrf.mxu0 }
  0xf7   : > { %v845_v58 = vmax.f32 %v649_v56, 0.0 }
  0xf8   : > { %v651_v59 = vpop.f32.mrf.mxu0  ;;  %v948_v61 = vld [vmem:[#allocation2 + $0x1f] sm:$0xff] }
  0xf9   : > { %899 = vst.msk [vmem:[#allocation2 + $0x30] sm:$0xff] %vm508_vm1, %v845_v58  ;;  %v652_v63 = vadd.f32 %v7782_v32, %v651_v59  ;;  %v989_v0 = vpack.c.bf16 %v948_v61, %v947_v60 }
  0xfa   : > { %v6541_v2 = vpop.f32.mrf.mxu0 }
  0xfb   : > { %v846_v3 = vmax.f32 %v652_v63, 0.0  ;;  %6639 = vmatmul.mubr.msk.bf16.vlgmr.msra.gmra.mxu0 %vm1026_vm2, %v989_v0 }
  0xfc   : > { %v656_v4 = vpop.f32.mrf.mxu0  ;;  %6642 = vmatprep.mubr.msk.bf16.mxu0 %vm7592_vm0, %v7591_v1  ;;  %6811 = vmatpush3.bf16.msra.mxu0 %v7564_v62  ;;  %v949_v11 = vld [vmem:[#allocation2 + $0x27] sm:$0xff] }
  0xfd   : > { %900 = vst.msk [vmem:[#allocation2 + $0x38] sm:$0xff] %vm508_vm1, %v846_v3  ;;  %v657_v6 = vadd.f32 %v7782_v32, %v656_v4  ;;  %6812 = vmatprep.subr.bf16.mxu0 %v7591_v1 }
  0xfe   : > { %v6544_v7 = vpop.f32.mrf.mxu0 }
  0xff   : > { %v847_v8 = vmax.f32 %v657_v6, 0.0 }
 0x100   : > { %v659_v9 = vpop.f32.mrf.mxu0  ;;  %v5576_v10 = vld [vmem:[#allocation2 + $0x30] sm:$0xff]  ;;  %6813 = vmatpush3.bf16.msra.mxu0 %v7565_v5 }
 0x101   : > { %v950_v12 = vld [vmem:[#allocation2 + $0x2f] sm:$0xff]  ;;  %901 = vst.msk [vmem:[#allocation2 + $0x40] sm:$0xff] %vm508_vm1, %v847_v8  ;;  %v660_v13 = vadd.f32 %v7782_v32, %v659_v9  ;;  %5702 = vrot.lane.b32.xlu0 %v5576_v10, %s7593_s27  ;;  %6986 = vmatprep.subr.bf16.mxu0 %v7591_v1 }
 0x102   : > { %v990_v14 = vpack.c.bf16 %v950_v12, %v949_v11  ;;  %v6545_v15 = vpop.f32.mrf.mxu0 }
 0x103   : > { %v848_v16 = vmax.f32 %v660_v13, 0.0 }
 0x104   : > { %6643 = vmatmul.mubr.msk.bf16.gmra.mxu0 %vm1026_vm2, %v990_v14  ;;  %v664_v17 = vpop.f32.mrf.mxu0  ;;  %v5577_v18 = vld [vmem:[#allocation2 + $0x38] sm:$0xff] }
 0x105   : > { %6646 = vmatprep.mubr.msk.bf16.mxu0 %vm7592_vm0, %v7591_v1  ;;  %902 = vst.msk [vmem:[#allocation2 + $0x48] sm:$0xff] %vm508_vm1, %v848_v16  ;;  %v665_v19 = vadd.f32 %v7782_v32, %v664_v17  ;;  %5704 = vrot.lane.b32.xlu0 %v5577_v18, %s7593_s27  ;;  %v951_v24 = vld [vmem:[#allocation2 + $0x37] sm:$0xff] }
 0x106   : > { %v6548_v20 = vpop.f32.mrf.mxu0 }
 0x107   : > { %v849_v21 = vmax.f32 %v665_v19, 0.0 }
 0x108   : > { %v667_v22 = vpop.f32.mrf.mxu0  ;;  %v5578_v23 = vld [vmem:[#allocation2 + $0x40] sm:$0xff] }
 0x109   : > { %v952_v25 = vld [vmem:[#allocation2 + $0x3f] sm:$0xff]  ;;  %903 = vst.msk [vmem:[#allocation2 + $0x50] sm:$0xff] %vm508_vm1, %v849_v21  ;;  %v668_v26 = vadd.f32 %v7782_v32, %v667_v22  ;;  %5706 = vrot.lane.b32.xlu1 %v5578_v23, %s7593_s27 }
 0x10a   : > { %v991_v27 = vpack.c.bf16 %v952_v25, %v951_v24  ;;  %v6549_v28 = vpop.f32.mrf.mxu0  ;;  %v1804_v24 = vld [vmem:[#allocation2 + $0x21] sm:$0xff] }
 0x10b   : > { %v850_v29 = vmax.f32 %v668_v26, 0.0  ;;  %v7566_v26 = vld [vmem:[%s10243_s3 + $0x18] sm:$0xff]  }
 0x10c   : > { %6647 = vmatmul.mubr.msk.bf16.gmra.mxu0 %vm1026_vm2, %v991_v27  ;;  %v672_v30 = vpop.f32.mrf.mxu0  ;;  %v5579_v31 = vld [vmem:[#allocation2 + $0x48] sm:$0xff]  ;;  %v1803_v27 = vld [vmem:[#allocation2 + $0x19] sm:$0xff] }
 0x10d   : > { %6650 = vmatprep.mubr.msk.bf16.mxu0 %vm7592_vm0, %v7591_v1  ;;  %904 = vst.msk [vmem:[#allocation2 + $0x58] sm:$0xff] %vm508_vm1, %v850_v29  ;;  %v673_v33 = vadd.f32 %v7782_v32, %v672_v30  ;;  %5708 = vrot.lane.b32.xlu1 %v5579_v31, %s7593_s27  ;;  %v953_v38 = vld [vmem:[#allocation2 + $0x47] sm:$0xff] }
 0x10e   : > { %v6552_v34 = vpop.f32.mrf.mxu0 }
 0x10f   : > { %v851_v35 = vmax.f32 %v673_v33, 0.0 }
 0x110   : > { %v675_v36 = vpop.f32.mrf.mxu0  ;;  %v5580_v37 = vld [vmem:[#allocation2 + $0x50] sm:$0xff] }
 0x111   : > { %v954_v39 = vld [vmem:[#allocation2 + $0x4f] sm:$0xff]  ;;  %905 = vst.msk [vmem:[#allocation2 + $0x60] sm:$0xff] %vm508_vm1, %v851_v35  ;;  %v676_v40 = vadd.f32 %v7782_v32, %v675_v36  ;;  %5710 = vrot.lane.b32.xlu0 %v5580_v37, %s7593_s27  ;;  %v1845_v35 = vpack.c.bf16 %v1804_v24, %v1803_v27 }
 0x112   : > { %v992_v41 = vpack.c.bf16 %v954_v39, %v953_v38  ;;  %v6553_v42 = vpop.f32.mrf.mxu0  ;;  %v7569_v37 = vld [vmem:[%s10243_s3 + $0x48] sm:$0xff]  }
 0x113   : > { %v852_v43 = vmax.f32 %v676_v40, 0.0 }
 0x114   : > { %6651 = vmatmul.mubr.msk.bf16.gmra.mxu0 %vm1026_vm2, %v992_v41  ;;  %v680_v44 = vpop.f32.mrf.mxu0  ;;  %v5581_v45 = vld [vmem:[#allocation2 + $0x58] sm:$0xff]  ;;  %v7567_v41 = vld [vmem:[%s10243_s3 + $0x10] sm:$0xff]  }
 0x115   : > { %6654 = vmatprep.mubr.msk.bf16.mxu0 %vm7592_vm0, %v7591_v1  ;;  %906 = vst.msk [vmem:[#allocation2 + $0x68] sm:$0xff] %vm508_vm1, %v852_v43  ;;  %v681_v46 = vadd.f32 %v7782_v32, %v680_v44  ;;  %5712 = vrot.lane.b32.xlu1 %v5581_v45, %s7593_s27  ;;  %v955_v51 = vld [vmem:[#allocation2 + $0x57] sm:$0xff] }
 0x116   : > { %v6556_v47 = vpop.f32.mrf.mxu0  ;;  %v1806_v44 = vld [vmem:[#allocation2 + $0x31] sm:$0xff] }
 0x117   : > { %v853_v48 = vmax.f32 %v681_v46, 0.0  ;;  %v1805_v46 = vld [vmem:[#allocation2 + $0x29] sm:$0xff] }
 0x118   : > { %v683_v49 = vpop.f32.mrf.mxu0  ;;  %v5582_v50 = vld [vmem:[#allocation2 + $0x60] sm:$0xff] }
 0x119   : > { %v956_v52 = vld [vmem:[#allocation2 + $0x5f] sm:$0xff]  ;;  %907 = vst.msk [vmem:[#allocation2 + $0x70] sm:$0xff] %vm508_vm1, %v853_v48  ;;  %v684_v53 = vadd.f32 %v7782_v32, %v683_v49  ;;  %5714 = vrot.lane.b32.xlu0 %v5582_v50, %s7593_s27 }
 0x11a   : > { %v993_v54 = vpack.c.bf16 %v956_v52, %v955_v51  ;;  %v6557_v55 = vpop.f32.mrf.mxu0 }
 0x11b   : > { %v854_v56 = vmax.f32 %v684_v53, 0.0  ;;  %v1846_v53 = vpack.c.bf16 %v1806_v44, %v1805_v46 }
 0x11c   : > { %6655 = vmatmul.mubr.msk.bf16.gmra.mxu0 %vm1026_vm2, %v993_v54  ;;  %v688_v57 = vpop.f32.mrf.mxu0  ;;  %v5583_v58 = vld [vmem:[#allocation2 + $0x68] sm:$0xff] }
 0x11d   : > { %6658 = vmatprep.mubr.msk.bf16.mxu0 %vm7592_vm0, %v7591_v1  ;;  %908 = vst.msk [vmem:[#allocation2 + $0x78] sm:$0xff] %vm508_vm1, %v854_v56  ;;  %v689_v59 = vadd.f32 %v7782_v32, %v688_v57  ;;  %5716 = vrot.lane.b32.xlu1 %v5583_v58, %s7593_s27  ;;  %v957_v0 = vld [vmem:[#allocation2 + $0x67] sm:$0xff] }
 0x11e   : > { %v6560_v60 = vpop.f32.mrf.mxu0 }
 0x11f   : > { %v855_v61 = vmax.f32 %v689_v59, 0.0  ;;  %v1808_v60 = vld [vmem:[#allocation2 + $0x41] sm:$0xff] }
 0x120   : > { %v691_v62 = vpop.f32.mrf.mxu0  ;;  %v5584_v63 = vld [vmem:[#allocation2 + $0x70] sm:$0xff] }
 0x121   : > { %v958_v2 = vld [vmem:[#allocation2 + $0x6f] sm:$0xff]  ;;  %909 = vst.msk [vmem:[#allocation2 + $0x80] sm:$0xff] %vm508_vm1, %v855_v61  ;;  %v692_v3 = vadd.f32 %v7782_v32, %v691_v62  ;;  %5718 = vrot.lane.b32.xlu0 %v5584_v63, %s7593_s27  ;;  %v1807_v62 = vld [vmem:[#allocation2 + $0x39] sm:$0xff] }
 0x122   : > { %v994_v4 = vpack.c.bf16 %v958_v2, %v957_v0  ;;  %v6561_v5 = vpop.f32.mrf.mxu0 }
 0x123   : > { %v856_v6 = vmax.f32 %v692_v3, 0.0 }
 0x124   : > { %6659 = vmatmul.mubr.msk.bf16.gmra.mxu0 %vm1026_vm2, %v994_v4  ;;  %v696_v7 = vpop.f32.mrf.mxu0  ;;  %v5585_v8 = vld [vmem:[#allocation2 + $0x78] sm:$0xff] }
 0x125   : > { %6662 = vmatprep.mubr.msk.bf16.mxu0 %vm7592_vm0, %v7591_v1  ;;  %910 = vst.msk [vmem:[#allocation2 + $0x88] sm:$0xff] %vm508_vm1, %v856_v6  ;;  %v697_v9 = vadd.f32 %v7782_v32, %v696_v7  ;;  %5720 = vrot.lane.b32.xlu1 %v5585_v8, %s7593_s27  ;;  %v959_v14 = vld [vmem:[#allocation2 + $0x77] sm:$0xff]  ;;  %v1847_v6 = vpack.c.bf16 %v1808_v60, %v1807_v62 }
 0x126   : > { %v6564_v10 = vpop.f32.mrf.mxu0  ;;  %v1814_v46 = vld [vmem:[#allocation2 + $0x71] sm:$0xff] }
 0x127   : > { %v857_v11 = vmax.f32 %v697_v9, 0.0 }
 0x128   : > { %v699_v12 = vpop.f32.mrf.mxu0  ;;  %v5586_v13 = vld [vmem:[#allocation2 + $0x80] sm:$0xff] }
 0x129   : > { %v960_v15 = vld [vmem:[#allocation2 + $0x7f] sm:$0xff]  ;;  %911 = vst.msk [vmem:[#allocation2 + $0x90] sm:$0xff] %vm508_vm1, %v857_v11  ;;  %v700_v16 = vadd.f32 %v7782_v32, %v699_v12  ;;  %5722 = vrot.lane.b32.xlu0 %v5586_v13, %s7593_s27  ;;  %v1810_v13 = vld [vmem:[#allocation2 + $0x51] sm:$0xff] }
 0x12a   : > { %v995_v17 = vpack.c.bf16 %v960_v15, %v959_v14  ;;  %v6565_v18 = vpop.f32.mrf.mxu0  ;;  %v1809_v15 = vld [vmem:[#allocation2 + $0x49] sm:$0xff] }
 0x12b   : > { %v858_v19 = vmax.f32 %v700_v16, 0.0 }
 0x12c   : > { %6663 = vmatmul.mubr.msk.bf16.gmra.mxu0 %vm1026_vm2, %v995_v17  ;;  %v704_v20 = vpop.f32.mrf.mxu0  ;;  %v5587_v21 = vld [vmem:[#allocation2 + $0x88] sm:$0xff] }
 0x12d   : > { %6814 = vmatprep.mubr.msk.bf16.mxu0 %vm7592_vm0, %v7591_v1  ;;  %912 = vst.msk [vmem:[#allocation2 + $0x98] sm:$0xff] %vm508_vm1, %v858_v19  ;;  %v705_v22 = vadd.f32 %v7782_v32, %v704_v20  ;;  %5724 = vrot.lane.b32.xlu1 %v5587_v21, %s7593_s27  ;;  %v961_v30 = vld [vmem:[#allocation2 + $0x87] sm:$0xff] }
 0x12e   : > { %v6568_v23 = vpop.f32.mrf.mxu0 }
 0x12f   : > { %v859_v25 = vmax.f32 %v705_v22, 0.0  ;;  %v1848_v22 = vpack.c.bf16 %v1810_v13, %v1809_v15 }
 0x130   : > { %v707_v28 = vpop.f32.mrf.mxu0  ;;  %v5588_v29 = vld [vmem:[#allocation2 + $0x90] sm:$0xff] }
 0x131   : > { %v962_v31 = vld [vmem:[#allocation2 + $0x8f] sm:$0xff]  ;;  %913 = vst.msk [vmem:[#allocation2 + $0xa0] sm:$0xff] %vm508_vm1, %v859_v25  ;;  %v708_v33 = vadd.f32 %v7782_v32, %v707_v28  ;;  %5726 = vrot.lane.b32.xlu0 %v5588_v29, %s7593_s27  ;;  %v1812_v29 = vld [vmem:[#allocation2 + $0x61] sm:$0xff] }
 0x132   : > { %v996_v34 = vpack.c.bf16 %v962_v31, %v961_v30  ;;  %v6569_v36 = vpop.f32.mrf.mxu0  ;;  %v1811_v31 = vld [vmem:[#allocation2 + $0x59] sm:$0xff] }
 0x133   : > { %v860_v38 = vmax.f32 %v708_v33, 0.0 }
 0x134   : > { %6667 = vmatmul.mubr.msk.bf16.vlgmr.msra.gmra.mxu1 %vm1026_vm2, %v996_v34  ;;  %6815 = vmatmul.mubr.msk.bf16.vlgmr.msra.gmra.mxu0 %vm1026_vm2, %v1845_v35  ;;  %v712_v39 = vpop.f32.mrf.mxu0  ;;  %v5589_v40 = vld [vmem:[#allocation2 + $0x98] sm:$0xff] }
 0x135   : > { %6723 = vmatpush3.bf16.msra.mxu1 %v7566_v26  ;;  %6670 = vmatprep.mubr.msk.bf16.mxu1 %vm7592_vm0, %v7591_v1  ;;  %914 = vst.msk [vmem:[#allocation2 + $0xa8] sm:$0xff] %vm508_vm1, %v860_v38  ;;  %v713_v42 = vadd.f32 %v7782_v32, %v712_v39  ;;  %v963_v49 = vld [vmem:[#allocation2 + $0x97] sm:$0xff]  ;;  %v1849_v39 = vpack.c.bf16 %v1812_v29, %v1811_v31 }
 0x136   : > { %5728 = vrot.lane.b32.xlu1 %v5589_v40, %s7593_s27  ;;  %6818 = vmatprep.mubr.msk.bf16.mxu0 %vm7592_vm0, %v7591_v1  ;;  %v6572_v43 = vpop.f32.mrf.mxu0 }
 0x137   : > { %6724 = vmatprep.subr.bf16.mxu1 %v7591_v1  ;;  %6987 = vmatpush3.bf16.msra.mxu0 %v7569_v37  ;;  %v861_v45 = vmax.f32 %v713_v42, 0.0 }
 0x138   : > { %6988 = vmatprep.subr.bf16.mxu0 %v7591_v1  ;;  %v715_v47 = vpop.f32.mrf.mxu0  ;;  %v5590_v48 = vld [vmem:[#allocation2 + $0xa0] sm:$0xff] }
 0x139   : > { %v964_v50 = vld [vmem:[#allocation2 + $0x9f] sm:$0xff]  ;;  %6725 = vmatpush3.bf16.msra.mxu1 %v7567_v41  ;;  %915 = vst.msk [vmem:[#allocation2 + $0xb0] sm:$0xff] %vm508_vm1, %v861_v45  ;;  %v716_v51 = vadd.f32 %v7782_v32, %v715_v47  ;;  %5730 = vrot.lane.b32.xlu0 %v5590_v48, %s7593_s27  ;;  %v1813_v48 = vld [vmem:[#allocation2 + $0x69] sm:$0xff] }
 0x13a   : > { %v997_v52 = vpack.c.bf16 %v964_v50, %v963_v49  ;;  %6898 = vmatprep.subr.bf16.mxu1 %v7591_v1  ;;  %v6573_v54 = vpop.f32.mrf.mxu0  ;;  %v7570_v49 = vld [vmem:[%s10243_s3 + $0x40] sm:$0xff]  }
 0x13b   : > { %v862_v55 = vmax.f32 %v716_v51, 0.0  ;;  %6989 = vmatpush3.bf16.msra.mxu0 %v7570_v49 }
 0x13c   : > { %6671 = vmatmul.mubr.msk.bf16.gmra.mxu1 %vm1026_vm2, %v997_v52  ;;  %6819 = vmatmul.mubr.msk.bf16.gmra.mxu0 %vm1026_vm2, %v1846_v53  ;;  %v720_v56 = vpop.f32.mrf.mxu0  ;;  %v5591_v57 = vld [vmem:[#allocation2 + $0xa8] sm:$0xff] }
 0x13d   : > { %6674 = vmatprep.mubr.msk.bf16.mxu1 %vm7592_vm0, %v7591_v1  ;;  %6822 = vmatprep.mubr.msk.bf16.mxu0 %vm7592_vm0, %v7591_v1  ;;  %916 = vst.msk [vmem:[#allocation2 + $0xb8] sm:$0xff] %vm508_vm1, %v862_v55  ;;  %v721_v58 = vadd.f32 %v7782_v32, %v720_v56  ;;  %v965_v2 = vld [vmem:[#allocation2 + $0xa7] sm:$0xff]  ;;  %v1850_v56 = vpack.c.bf16 %v1814_v46, %v1813_v48 }
 0x13e   : > { %5732 = vrot.lane.b32.xlu1 %v5591_v57, %s7593_s27  ;;  %v6576_v59 = vpop.f32.mrf.mxu0  ;;  %7162 = vmatprep.subr.bf16.mxu0 %v7591_v1 }
 0x13f   : > { %v863_v61 = vmax.f32 %v721_v58, 0.0 }
 0x140   : > { %v723_v63 = vpop.f32.mrf.mxu0  ;;  %v5592_v0 = vld [vmem:[#allocation2 + $0xb0] sm:$0xff] }
 0x141   : > { %v966_v3 = vld [vmem:[#allocation2 + $0xaf] sm:$0xff]  ;;  %917 = vst.msk [vmem:[#allocation2 + $0xc0] sm:$0xff] %vm508_vm1, %v863_v61  ;;  %v724_v4 = vadd.f32 %v7782_v32, %v723_v63  ;;  %5734 = vrot.lane.b32.xlu0 %v5592_v0, %s7593_s27  ;;  %v1816_v63 = vld [vmem:[#allocation2 + $0x81] sm:$0xff] }
 0x142   : > { %v998_v5 = vpack.c.bf16 %v966_v3, %v965_v2  ;;  %v6577_v7 = vpop.f32.mrf.mxu0  ;;  %v1815_v2 = vld [vmem:[#allocation2 + $0x79] sm:$0xff] }
 0x143   : > { %v864_v8 = vmax.f32 %v724_v4, 0.0 }
 0x144   : > { %6675 = vmatmul.mubr.msk.bf16.gmra.mxu1 %vm1026_vm2, %v998_v5  ;;  %6823 = vmatmul.mubr.msk.bf16.gmra.mxu0 %vm1026_vm2, %v1847_v6  ;;  %v728_v9 = vpop.f32.mrf.mxu0  ;;  %v5593_v10 = vld [vmem:[#allocation2 + $0xb8] sm:$0xff] }
 0x145   : > { %6678 = vmatprep.mubr.msk.bf16.mxu1 %vm7592_vm0, %v7591_v1  ;;  %6826 = vmatprep.mubr.msk.bf16.mxu0 %vm7592_vm0, %v7591_v1  ;;  %918 = vst.msk [vmem:[#allocation2 + $0xc8] sm:$0xff] %vm508_vm1, %v864_v8  ;;  %v729_v11 = vadd.f32 %v7782_v32, %v728_v9  ;;  %v967_v18 = vld [vmem:[#allocation2 + $0xb7] sm:$0xff]  ;;  %v1851_v9 = vpack.c.bf16 %v1816_v63, %v1815_v2 }
 0x146   : > { %5736 = vrot.lane.b32.xlu1 %v5593_v10, %s7593_s27  ;;  %v6580_v12 = vpop.f32.mrf.mxu0 }
 0x147   : > { %v865_v14 = vmax.f32 %v729_v11, 0.0 }
 0x148   : > { %v731_v16 = vpop.f32.mrf.mxu0  ;;  %v5594_v17 = vld [vmem:[#allocation2 + $0xc0] sm:$0xff] }
 0x149   : > { %v968_v19 = vld [vmem:[#allocation2 + $0xbf] sm:$0xff]  ;;  %919 = vst.msk [vmem:[#allocation2 + $0xd0] sm:$0xff] %vm508_vm1, %v865_v14  ;;  %v732_v20 = vadd.f32 %v7782_v32, %v731_v16  ;;  %5738 = vrot.lane.b32.xlu0 %v5594_v17, %s7593_s27  ;;  %v1818_v16 = vld [vmem:[#allocation2 + $0x91] sm:$0xff] }
 0x14a   : > { %v999_v21 = vpack.c.bf16 %v968_v19, %v967_v18  ;;  %v6581_v23 = vpop.f32.mrf.mxu0  ;;  %v1817_v18 = vld [vmem:[#allocation2 + $0x89] sm:$0xff] }
 0x14b   : > { %v866_v24 = vmax.f32 %v732_v20, 0.0 }
 0x14c   : > { %6679 = vmatmul.mubr.msk.bf16.gmra.mxu1 %vm1026_vm2, %v999_v21  ;;  %6827 = vmatmul.mubr.msk.bf16.gmra.mxu0 %vm1026_vm2, %v1848_v22  ;;  %v736_v25 = vpop.f32.mrf.mxu0  ;;  %v5595_v26 = vld [vmem:[#allocation2 + $0xc8] sm:$0xff] }
 0x14d   : > { %6682 = vmatprep.mubr.msk.bf16.mxu1 %vm7592_vm0, %v7591_v1  ;;  %6830 = vmatprep.mubr.msk.bf16.mxu0 %vm7592_vm0, %v7591_v1  ;;  %920 = vst.msk [vmem:[#allocation2 + $0xd8] sm:$0xff] %vm508_vm1, %v866_v24  ;;  %v737_v27 = vadd.f32 %v7782_v32, %v736_v25  ;;  %v969_v35 = vld [vmem:[#allocation2 + $0xc7] sm:$0xff]  ;;  %v1852_v25 = vpack.c.bf16 %v1818_v16, %v1817_v18 }
 0x14e   : > { %5740 = vrot.lane.b32.xlu1 %v5595_v26, %s7593_s27  ;;  %v6584_v28 = vpop.f32.mrf.mxu0 }
 0x14f   : > { %v867_v30 = vmax.f32 %v737_v27, 0.0 }
 0x150   : > { %v739_v33 = vpop.f32.mrf.mxu0  ;;  %v5596_v34 = vld [vmem:[#allocation2 + $0xd0] sm:$0xff] }
 0x151   : > { %v970_v36 = vld [vmem:[#allocation2 + $0xcf] sm:$0xff]  ;;  %921 = vst.msk [vmem:[#allocation2 + $0xe0] sm:$0xff] %vm508_vm1, %v867_v30  ;;  %v740_v37 = vadd.f32 %v7782_v32, %v739_v33  ;;  %5742 = vrot.lane.b32.xlu0 %v5596_v34, %s7593_s27  ;;  %v1820_v33 = vld [vmem:[#allocation2 + $0xa1] sm:$0xff] }
 0x152   : > { %v1000_v38 = vpack.c.bf16 %v970_v36, %v969_v35  ;;  %v6585_v40 = vpop.f32.mrf.mxu0  ;;  %v1819_v35 = vld [vmem:[#allocation2 + $0x99] sm:$0xff] }
 0x153   : > { %v868_v41 = vmax.f32 %v740_v37, 0.0 }
 0x154   : > { %6683 = vmatmul.mubr.msk.bf16.gmra.mxu1 %vm1026_vm2, %v1000_v38  ;;  %6831 = vmatmul.mubr.msk.bf16.gmra.mxu0 %vm1026_vm2, %v1849_v39  ;;  %v744_v42 = vpop.f32.mrf.mxu0  ;;  %v5597_v43 = vld [vmem:[#allocation2 + $0xd8] sm:$0xff] }
 0x155   : > { %6686 = vmatprep.mubr.msk.bf16.mxu1 %vm7592_vm0, %v7591_v1  ;;  %6834 = vmatprep.mubr.msk.bf16.mxu0 %vm7592_vm0, %v7591_v1  ;;  %922 = vst.msk [vmem:[#allocation2 + $0xe8] sm:$0xff] %vm508_vm1, %v868_v41  ;;  %v745_v44 = vadd.f32 %v7782_v32, %v744_v42  ;;  %v971_v52 = vld [vmem:[#allocation2 + $0xd7] sm:$0xff]  ;;  %v1853_v42 = vpack.c.bf16 %v1820_v33, %v1819_v35 }
 0x156   : > { %5744 = vrot.lane.b32.xlu1 %v5597_v43, %s7593_s27  ;;  %v6588_v45 = vpop.f32.mrf.mxu0 }
 0x157   : > { %v869_v47 = vmax.f32 %v745_v44, 0.0 }
 0x158   : > { %v747_v50 = vpop.f32.mrf.mxu0  ;;  %v5598_v51 = vld [vmem:[#allocation2 + $0xe0] sm:$0xff] }
 0x159   : > { %v972_v53 = vld [vmem:[#allocation2 + $0xdf] sm:$0xff]  ;;  %923 = vst.msk [vmem:[#allocation2 + $0xf0] sm:$0xff] %vm508_vm1, %v869_v47  ;;  %v748_v54 = vadd.f32 %v7782_v32, %v747_v50  ;;  %5746 = vrot.lane.b32.xlu0 %v5598_v51, %s7593_s27  ;;  %v1822_v50 = vld [vmem:[#allocation2 + $0xb1] sm:$0xff] }
 0x15a   : > { %v1001_v55 = vpack.c.bf16 %v972_v53, %v971_v52  ;;  %v6589_v57 = vpop.f32.mrf.mxu0  ;;  %v1821_v53 = vld [vmem:[#allocation2 + $0xa9] sm:$0xff] }
 0x15b   : > { %v870_v58 = vmax.f32 %v748_v54, 0.0 }
 0x15c   : > { %6687 = vmatmul.mubr.msk.bf16.gmra.mxu1 %vm1026_vm2, %v1001_v55  ;;  %6835 = vmatmul.mubr.msk.bf16.gmra.mxu0 %vm1026_vm2, %v1850_v56  ;;  %v752_v59 = vpop.f32.mrf.mxu0  ;;  %v5599_v60 = vld [vmem:[#allocation2 + $0xe8] sm:$0xff] }
 0x15d   : > { %6690 = vmatprep.mubr.msk.bf16.mxu1 %vm7592_vm0, %v7591_v1  ;;  %6838 = vmatprep.mubr.msk.bf16.mxu0 %vm7592_vm0, %v7591_v1  ;;  %924 = vst.msk [vmem:[#allocation2 + $0xf8] sm:$0xff] %vm508_vm1, %v870_v58  ;;  %v753_v61 = vadd.f32 %v7782_v32, %v752_v59  ;;  %v973_v5 = vld [vmem:[#allocation2 + $0xe7] sm:$0xff] }
 0x15e   : > { %5748 = vrot.lane.b32.xlu1 %v5599_v60, %s7593_s27  ;;  %v6592_v62 = vpop.f32.mrf.mxu0  ;;  %v1854_v60 = vpack.c.bf16 %v1822_v50, %v1821_v53 }
 0x15f   : > { %v871_v0 = vmax.f32 %v753_v61, 0.0 }
 0x160   : > { %v755_v3 = vpop.f32.mrf.mxu0  ;;  %v5600_v4 = vld [vmem:[#allocation2 + $0xf0] sm:$0xff] }
 0x161   : > { %v974_v6 = vld [vmem:[#allocation2 + $0xef] sm:$0xff]  ;;  %925 = vst.msk [vmem:[#allocation2 + $0x100] sm:$0xff] %vm508_vm1, %v871_v0  ;;  %v756_v7 = vadd.f32 %v7782_v32, %v755_v3  ;;  %5750 = vrot.lane.b32.xlu0 %v5600_v4, %s7593_s27 }
 0x162   : > { %v1002_v8 = vpack.c.bf16 %v974_v6, %v973_v5  ;;  %v6593_v10 = vpop.f32.mrf.mxu0  ;;  %v1824_v5 = vld [vmem:[#allocation2 + $0xc1] sm:$0xff] }
 0x163   : > { %v872_v11 = vmax.f32 %v756_v7, 0.0 }
 0x164   : > { %6691 = vmatmul.mubr.msk.bf16.gmra.mxu1 %vm1026_vm2, %v1002_v8  ;;  %6839 = vmatmul.mubr.msk.bf16.gmra.mxu0 %vm1026_vm2, %v1851_v9  ;;  %v760_v12 = vpop.f32.mrf.mxu0  ;;  %v5601_v13 = vld [vmem:[#allocation2 + $0xf8] sm:$0xff] }
 0x165   : > { %6694 = vmatprep.mubr.msk.bf16.mxu1 %vm7592_vm0, %v7591_v1  ;;  %6842 = vmatprep.mubr.msk.bf16.mxu0 %vm7592_vm0, %v7591_v1  ;;  %926 = vst.msk [vmem:[#allocation2 + $0x108] sm:$0xff] %vm508_vm1, %v872_v11  ;;  %v761_v14 = vadd.f32 %v7782_v32, %v760_v12  ;;  %v975_v21 = vld [vmem:[#allocation2 + $0xf7] sm:$0xff] }
 0x166   : > { %5752 = vrot.lane.b32.xlu1 %v5601_v13, %s7593_s27  ;;  %v6596_v15 = vpop.f32.mrf.mxu0  ;;  %v1823_v8 = vld [vmem:[#allocation2 + $0xb9] sm:$0xff] }
 0x167   : > { %v873_v17 = vmax.f32 %v761_v14, 0.0  ;;  %v1855_v15 = vpack.c.bf16 %v1824_v5, %v1823_v8  ;;  %v1829_v5 = vld [vmem:[#allocation2 + $0xe9] sm:$0xff] }
 0x168   : > { %v763_v19 = vpop.f32.mrf.mxu0  ;;  %v5602_v20 = vld [vmem:[#allocation2 + $0x100] sm:$0xff] }
 0x169   : > { %v976_v22 = vld [vmem:[#allocation2 + $0xff] sm:$0xff]  ;;  %927 = vst.msk [vmem:[#allocation2 + $0x110] sm:$0xff] %vm508_vm1, %v873_v17  ;;  %v764_v23 = vadd.f32 %v7782_v32, %v763_v19  ;;  %5754 = vrot.lane.b32.xlu0 %v5602_v20, %s7593_s27 }
 0x16a   : > { %v1003_v24 = vpack.c.bf16 %v976_v22, %v975_v21  ;;  %v6597_v26 = vpop.f32.mrf.mxu0 }
 0x16b   : > { %v874_v27 = vmax.f32 %v764_v23, 0.0 }
 0x16c   : > { %6695 = vmatmul.mubr.msk.bf16.gmra.mxu1 %vm1026_vm2, %v1003_v24  ;;  %6843 = vmatmul.mubr.msk.bf16.gmra.mxu0 %vm1026_vm2, %v1852_v25  ;;  %v768_v28 = vpop.f32.mrf.mxu0  ;;  %v5603_v29 = vld [vmem:[#allocation2 + $0x108] sm:$0xff]  ;;  %v1826_v24 = vld [vmem:[#allocation2 + $0xd1] sm:$0xff] }
 0x16d   : > { %6698 = vmatprep.mubr.msk.bf16.mxu1 %vm7592_vm0, %v7591_v1  ;;  %6846 = vmatprep.mubr.msk.bf16.mxu0 %vm7592_vm0, %v7591_v1  ;;  %928 = vst.msk [vmem:[#allocation2 + $0x118] sm:$0xff] %vm508_vm1, %v874_v27  ;;  %v769_v30 = vadd.f32 %v7782_v32, %v768_v28  ;;  %v977_v38 = vld [vmem:[#allocation2 + $0x107] sm:$0xff] }
 0x16e   : > { %5756 = vrot.lane.b32.xlu1 %v5603_v29, %s7593_s27  ;;  %v6600_v31 = vpop.f32.mrf.mxu0  ;;  %v1825_v27 = vld [vmem:[#allocation2 + $0xc9] sm:$0xff] }
 0x16f   : > { %v875_v34 = vmax.f32 %v769_v30, 0.0  ;;  %v1856_v35 = vpack.c.bf16 %v1826_v24, %v1825_v27  ;;  %v1832_v24 = vld [vmem:[#allocation2 + $0x101] sm:$0xff] }
 0x170   : > { %v771_v36 = vpop.f32.mrf.mxu0  ;;  %v5604_v37 = vld [vmem:[#allocation2 + $0x110] sm:$0xff] }
 0x171   : > { %v978_v39 = vld [vmem:[#allocation2 + $0x10f] sm:$0xff]  ;;  %929 = vst.msk [vmem:[#allocation2 + $0x120] sm:$0xff] %vm508_vm1, %v875_v34  ;;  %v772_v40 = vadd.f32 %v7782_v32, %v771_v36  ;;  %5758 = vrot.lane.b32.xlu0 %v5604_v37, %s7593_s27 }
 0x172   : > { %v1004_v41 = vpack.c.bf16 %v978_v39, %v977_v38  ;;  %v6601_v43 = vpop.f32.mrf.mxu0 }
 0x173   : > { %v876_v44 = vmax.f32 %v772_v40, 0.0  ;;  %v5703_v45 = vpop.permute.xlu0 %5702 }
 0x174   : > { %6699 = vmatmul.mubr.msk.bf16.gmra.mxu1 %vm1026_vm2, %v1004_v41  ;;  %6847 = vmatmul.mubr.msk.bf16.gmra.mxu0 %vm1026_vm2, %v1853_v42  ;;  %5828 = vst.msk [vmem:[%s7992_s16 + $0x8] sm:$0xff] %vm1026_vm2, %v5703_v45  ;;  %v776_v46 = vpop.f32.mrf.mxu0  ;;  %v5605_v47 = vld [vmem:[#allocation2 + $0x118] sm:$0xff] }
 0x175   : > { %6702 = vmatprep.mubr.msk.bf16.mxu1 %vm7592_vm0, %v7591_v1  ;;  %6850 = vmatprep.mubr.msk.bf16.mxu0 %vm7592_vm0, %v7591_v1  ;;  %930 = vst.msk [vmem:[#allocation2 + $0x128] sm:$0xff] %vm508_vm1, %v876_v44  ;;  %v777_v48 = vadd.f32 %v7782_v32, %v776_v46  ;;  %v979_v56 = vld [vmem:[#allocation2 + $0x117] sm:$0xff]  ;;  %v1828_v44 = vld [vmem:[#allocation2 + $0xe1] sm:$0xff] }
 0x176   : > { %5760 = vrot.lane.b32.xlu1 %v5605_v47, %s7593_s27  ;;  %v6604_v49 = vpop.f32.mrf.mxu0  ;;  %v1827_v47 = vld [vmem:[#allocation2 + $0xd9] sm:$0xff] }
 0x177   : > { %v877_v51 = vmax.f32 %v777_v48, 0.0  ;;  %v5705_v52 = vpop.permute.xlu0 %5704 }
 0x178   : > { %5829 = vst.msk [vmem:[%s7992_s16 + $0x18] sm:$0xff] %vm1026_vm2, %v5705_v52  ;;  %v779_v54 = vpop.f32.mrf.mxu0  ;;  %v8007_v55 = vld [vmem:[#allocation2 + $0x120] sm:$0xff] }
 0x179   : > { %v980_v57 = vld [vmem:[#allocation2 + $0x11f] sm:$0xff]  ;;  %931 = vst.msk [vmem:[#allocation2 + $0x130] sm:$0xff] %vm508_vm1, %v877_v51  ;;  %v780_v58 = vadd.f32 %v7782_v32, %v779_v54  ;;  %5762 = vrot.lane.b32.xlu0 %v8007_v55, %s7593_s27  ;;  %v1857_v54 = vpack.c.bf16 %v1828_v44, %v1827_v47  ;;  %v7571_v44 = vld [vmem:[%s10243_s3 + $0x30] sm:$0xff]  }
 0x17a   : > { %v1005_v59 = vpack.c.bf16 %v980_v57, %v979_v56  ;;  %v6605_v61 = vpop.f32.mrf.mxu0 }
 0x17b   : > { %v878_v62 = vmax.f32 %v780_v58, 0.0  ;;  %v5707_v63 = vpop.permute.xlu1 %5706  ;;  %v8099_v61 = vld [vmem:[%s10242_s2] ss:$0 sm:$0xff] }
 0x17c   : > { %6703 = vmatmul.mubr.msk.bf16.gmra.mxu1 %vm1026_vm2, %v1005_v59  ;;  %6851 = vmatmul.mubr.msk.bf16.gmra.mxu0 %vm1026_vm2, %v1854_v60  ;;  %5830 = vst.msk [vmem:[%s7992_s16 + $0x28] sm:$0xff] %vm1026_vm2, %v5707_v63  ;;  %v784_v0 = vpop.f32.mrf.mxu0  ;;  %v8017_v2 = vld [vmem:[#allocation2 + $0x128] sm:$0xff] }
 0x17d   : > { %6706 = vmatprep.mubr.msk.bf16.mxu1 %vm7592_vm0, %v7591_v1  ;;  %6854 = vmatprep.mubr.msk.bf16.mxu0 %vm7592_vm0, %v7591_v1  ;;  %932 = vst.msk [vmem:[#allocation2 + $0x138] sm:$0xff] %vm508_vm1, %v878_v62  ;;  %v785_v3 = vadd.f32 %v7782_v32, %v784_v0  ;;  %v981_v11 = vld [vmem:[#allocation2 + $0x127] sm:$0xff]  ;;  %v1830_v0 = vld [vmem:[#allocation2 + $0xf1] sm:$0xff] }
 0x17e   : > { %5764 = vrot.lane.b32.xlu1 %v8017_v2, %s7593_s27  ;;  %v6608_v4 = vpop.f32.mrf.mxu0 }
 0x17f   : > { %v879_v6 = vmax.f32 %v785_v3, 0.0  ;;  %v5709_v7 = vpop.permute.xlu1 %5708 }
 0x180   : > { %5831 = vst.msk [vmem:[%s7992_s16 + $0x38] sm:$0xff] %vm1026_vm2, %v5709_v7  ;;  %v787_v9 = vpop.f32.mrf.mxu0  ;;  %v8029_v10 = vld [vmem:[#allocation2 + $0x130] sm:$0xff] }
 0x181   : > { %v982_v12 = vld [vmem:[#allocation2 + $0x12f] sm:$0xff]  ;;  %933 = vst.msk [vmem:[#allocation2 + $0x140] sm:$0xff] %vm508_vm1, %v879_v6  ;;  %v788_v13 = vadd.f32 %v7782_v32, %v787_v9  ;;  %5766 = vrot.lane.b32.xlu0 %v8029_v10, %s7593_s27  ;;  %v1392_v16 = vpack.c.bf16 %v8029_v10, %v8017_v2 }
 0x182   : > { %v1006_v14 = vpack.c.bf16 %v982_v12, %v981_v11  ;;  %v6609_v17 = vpop.f32.mrf.mxu0 }
 0x183   : > { %v880_v18 = vmax.f32 %v788_v13, 0.0  ;;  %v5711_v19 = vpop.permute.xlu0 %5710  ;;  %v1858_v13 = vpack.c.bf16 %v1830_v0, %v1829_v5  ;;  %v1836_v5 = vld [vmem:[#allocation2 + $0x121] sm:$0xff] }
 0x184   : > { %6707 = vmatmul.mubr.msk.bf16.gmra.mxu1 %vm1026_vm2, %v1006_v14  ;;  %6855 = vmatmul.mubr.msk.bf16.gmra.mxu0 %vm1026_vm2, %v1855_v15  ;;  %5832 = vst.msk [vmem:[%s7992_s16 + $0x48] sm:$0xff] %vm1026_vm2, %v5711_v19  ;;  %v792_v20 = vpop.f32.mrf.mxu0  ;;  %v8041_v21 = vld [vmem:[#allocation2 + $0x138] sm:$0xff] }
 0x185   : > { %6710 = vmatprep.mubr.msk.bf16.mxu1 %vm7592_vm0, %v7591_v1  ;;  %6858 = vmatprep.mubr.msk.bf16.mxu0 %vm7592_vm0, %v7591_v1  ;;  %934 = vst.msk [vmem:[#allocation2 + $0x148] sm:$0xff] %vm508_vm1, %v880_v18  ;;  %v793_v22 = vadd.f32 %v7782_v32, %v792_v20  ;;  %v983_v30 = vld [vmem:[#allocation2 + $0x137] sm:$0xff] }
 0x186   : > { %5768 = vrot.lane.b32.xlu1 %v8041_v21, %s7593_s27  ;;  %v6612_v23 = vpop.f32.mrf.mxu0 }
 0x187   : > { %v881_v25 = vmax.f32 %v793_v22, 0.0  ;;  %v5713_v26 = vpop.permute.xlu1 %5712  ;;  %v1334_v23 = vld [vmem:[#allocation2 + $0x20] sm:$0xff] }
 0x188   : > { %5833 = vst.msk [vmem:[%s7992_s16 + $0x58] sm:$0xff] %vm1026_vm2, %v5713_v26  ;;  %v795_v28 = vpop.f32.mrf.mxu0  ;;  %v8053_v29 = vld [vmem:[#allocation2 + $0x140] sm:$0xff] }
 0x189   : > { %v984_v31 = vld [vmem:[#allocation2 + $0x13f] sm:$0xff]  ;;  %935 = vst.msk [vmem:[#allocation2 + $0x150] sm:$0xff] %vm508_vm1, %v881_v25  ;;  %v796_v33 = vadd.f32 %v7782_v32, %v795_v28  ;;  %5770 = vrot.lane.b32.xlu0 %v8053_v29, %s7593_s27  ;;  %v1393_v36 = vpack.c.bf16 %v8053_v29, %v8041_v21 }
 0x18a   : > { %v1007_v34 = vpack.c.bf16 %v984_v31, %v983_v30  ;;  %v6613_v37 = vpop.f32.mrf.mxu0  ;;  %v1333_v28 = vld [vmem:[#allocation2 + $0x18] sm:$0xff] }
 0x18b   : > { %v882_v38 = vmax.f32 %v796_v33, 0.0  ;;  %v5715_v39 = vpop.permute.xlu0 %5714  ;;  %v1831_v30 = vld [vmem:[#allocation2 + $0xf9] sm:$0xff] }
 0x18c   : > { %6711 = vmatmul.mubr.msk.bf16.gmra.mxu1 %vm1026_vm2, %v1007_v34  ;;  %6859 = vmatmul.mubr.msk.bf16.gmra.mxu0 %vm1026_vm2, %v1856_v35  ;;  %5834 = vst.msk [vmem:[%s7992_s16 + $0x68] sm:$0xff] %vm1026_vm2, %v5715_v39  ;;  %v800_v40 = vpop.f32.mrf.mxu0  ;;  %v8065_v41 = vld [vmem:[#allocation2 + $0x148] sm:$0xff]  ;;  %v7568_v31 = vld [vmem:[%s10243_s3 + $0x38] sm:$0xff]   ;;  %v1375_v34 = vpack.c.bf16 %v1334_v23, %v1333_v28  ;;  %v1859_v35 = vpack.c.bf16 %v1832_v24, %v1831_v30 }
 0x18d   : > { %6714 = vmatprep.mubr.msk.bf16.mxu1 %vm7592_vm0, %v7591_v1  ;;  %6862 = vmatprep.mubr.msk.bf16.mxu0 %vm7592_vm0, %v7591_v1  ;;  %936 = vst.msk [vmem:[#allocation2 + $0x158] sm:$0xff] %vm508_vm1, %v882_v38  ;;  %v801_v42 = vadd.f32 %v7782_v32, %v800_v40  ;;  %v985_v50 = vld [vmem:[#allocation2 + $0x147] sm:$0xff] }
 0x18e   : > { %5772 = vrot.lane.b32.xlu1 %v8065_v41, %s7593_s27  ;;  %v6616_v43 = vpop.f32.mrf.mxu0  ;;  %v8193_v23 = vld [vmem:[#allocation2 + $0x48] sm:$0xff] }
 0x18f   : > { %v883_v45 = vmax.f32 %v801_v42, 0.0  ;;  %v5717_v46 = vpop.permute.xlu1 %5716  ;;  %v1837_v24 = vld [vmem:[#allocation2 + $0x129] sm:$0xff] }
 0x190   : > { %5835 = vst.msk [vmem:[%s7992_s16 + $0x78] sm:$0xff] %vm1026_vm2, %v5717_v46  ;;  %v803_v48 = vpop.f32.mrf.mxu0  ;;  %v8077_v49 = vld [vmem:[#allocation2 + $0x150] sm:$0xff] }
 0x191   : > { %v986_v51 = vld [vmem:[#allocation2 + $0x14f] sm:$0xff]  ;;  %937 = vst.msk [vmem:[#allocation2 + $0x160] sm:$0xff] %vm508_vm1, %v883_v45  ;;  %v804_v52 = vadd.f32 %v7782_v32, %v803_v48  ;;  %5774 = vrot.lane.b32.xlu0 %v8077_v49, %s7593_s27  ;;  %v1394_v56 = vpack.c.bf16 %v8077_v49, %v8065_v41 }
 0x192   : > { %v1008_v53 = vpack.c.bf16 %v986_v51, %v985_v50  ;;  %v6617_v57 = vpop.f32.mrf.mxu0  ;;  %v8152_v48 = vld [vmem:[#allocation2 + $0x30] sm:$0xff] }
 0x193   : > { %v884_v58 = vmax.f32 %v804_v52, 0.0  ;;  %v5719_v59 = vpop.permute.xlu0 %5718  ;;  %v1834_v50 = vld [vmem:[#allocation2 + $0x111] sm:$0xff]  ;;  %v1833_v57 = vld [vmem:[#allocation2 + $0x109] sm:$0xff] }
 0x194   : > { %6715 = vmatmul.mubr.msk.bf16.gmra.mxu1 %vm1026_vm2, %v1008_v53  ;;  %6863 = vmatmul.mubr.msk.bf16.gmra.mxu0 %vm1026_vm2, %v1857_v54  ;;  %5836 = vst.msk [vmem:[%s7992_s16 + $0x88] sm:$0xff] %vm1026_vm2, %v5719_v59  ;;  %v808_v60 = vpop.f32.mrf.mxu0  ;;  %v8089_v32 = vld [vmem:[#allocation2 + $0x158] sm:$0xff]  ;;  %v1335_v54 = vld [vmem:[#allocation2 + $0x28] sm:$0xff] }
 0x195   : > { %6718 = vmatprep.mubr.msk.bf16.mxu1 %vm7592_vm0, %v7591_v1  ;;  %6866 = vmatprep.mubr.msk.bf16.mxu0 %vm7592_vm0, %v7591_v1  ;;  %938 = vst.msk [vmem:[#allocation2 + $0x168] sm:$0xff] %vm508_vm1, %v884_v58  ;;  %v809_v62 = vadd.f32 %v8099_v61, %v808_v60  ;;  %v987_v8 = vld [vmem:[#allocation2 + $0x157] sm:$0xff]  ;;  %v1376_v59 = vpack.c.bf16 %v8152_v48, %v1335_v54 }
 0x196   : > { %5776 = vrot.lane.b32.xlu1 %v8089_v32, %s7593_s27  ;;  %v6620_v63 = vpop.f32.mrf.mxu0  ;;  %v1860_v60 = vpack.c.bf16 %v1834_v50, %v1833_v57  ;;  %v8229_v57 = vld [vmem:[#allocation2 + $0x68] sm:$0xff] }
 0x197   : > { %v885_v3 = vmax.f32 %v809_v62, 0.0  ;;  %v5721_v4 = vpop.permute.xlu1 %5720 }
 0x198   : > { %5837 = vst.msk [vmem:[%s7992_s16 + $0x98] sm:$0xff] %vm1026_vm2, %v5721_v4  ;;  %v811_v6 = vpop.f32.mrf.mxu0  ;;  %v8106_v7 = vld [vmem:[#allocation2 + $0x160] sm:$0xff] }
 0x199   : > { %v988_v9 = vld [vmem:[#allocation2 + $0x15f] sm:$0xff]  ;;  %939 = vst.msk [vmem:[#allocation2 + $0x170] sm:$0xff] %vm508_vm1, %v885_v3  ;;  %v812_v11 = vadd.f32 %v8099_v61, %v811_v6  ;;  %5778 = vrot.lane.b32.xlu0 %v8106_v7, %s7593_s27  ;;  %v1395_v14 = vpack.c.bf16 %v8106_v7, %v8089_v32  ;;  %v2273_v7 = vld [vmem:[#allocation2 + $0x2f] sm:$0xff] }
 0x19a   : > { %v1009_v12 = vpack.c.bf16 %v988_v9, %v987_v8  ;;  %v6621_v15 = vpop.f32.mrf.mxu0  ;;  %v8177_v9 = vld [vmem:[#allocation2 + $0x38] sm:$0xff] }
 0x19b   : > { %v886_v17 = vmax.f32 %v812_v11, 0.0  ;;  %v5723_v18 = vpop.permute.xlu0 %5722  ;;  %v1835_v11 = vld [vmem:[#allocation2 + $0x119] sm:$0xff] }
 0x19c   : > { %6719 = vmatmul.mubr.msk.bf16.gmra.mxu1 %vm1026_vm2, %v1009_v12  ;;  %6867 = vmatmul.mubr.msk.bf16.gmra.mxu0 %vm1026_vm2, %v1858_v13  ;;  %5838 = vst.msk [vmem:[%s7992_s16 + $0xa8] sm:$0xff] %vm1026_vm2, %v5723_v18  ;;  %v5615_v19 = vld [vmem:[#allocation2 + $0x168] sm:$0xff]  ;;  %v816_v20 = vpop.f32.mrf.mxu0  ;;  %v1861_v15 = vpack.c.bf16 %v1836_v5, %v1835_v11  ;;  %v8247_v11 = vld [vmem:[#allocation2 + $0x78] sm:$0xff] }
 0x19d   : > { %6726 = vmatprep.mubr.msk.bf16.mxu1 %vm7592_vm0, %v7591_v1  ;;  %6870 = vmatprep.mubr.msk.bf16.mxu0 %vm7592_vm0, %v7591_v1  ;;  %940 = vst.msk [vmem:[#allocation2 + $0x178] sm:$0xff] %vm508_vm1, %v886_v17  ;;  %v817_v22 = vadd.f32 %v8099_v61, %v816_v20  ;;  %v1838_v20 = vld [vmem:[#allocation2 + $0x131] sm:$0xff]  ;;  %v1844_v5 = vld [vmem:[#allocation2 + $0x161] sm:$0xff] }
 0x19e   : > { %5780 = vrot.lane.b32.xlu1 %v5615_v19, %s7593_s27  ;;  %v6624_v25 = vpop.f32.mrf.mxu0  ;;  %v8189_v19 = vld [vmem:[#allocation2 + $0x50] sm:$0xff] }
 0x19f   : > { %v5725_v26 = vpop.permute.xlu1 %5724  ;;  %v887_v27 = vmax.f32 %v817_v22, 0.0  ;;  %v1378_v25 = vpack.c.bf16 %v8189_v19, %v8193_v23 }
 0x1a0   : > { %5839 = vst.msk [vmem:[%s7992_s16 + $0xb8] sm:$0xff] %vm1026_vm2, %v5725_v26  ;;  %v819_v33 = vpop.f32.mrf.mxu0  ;;  %v8132_v39 = vld [vmem:[#allocation2 + $0x170] sm:$0xff]  ;;  %v1862_v26 = vpack.c.bf16 %v1838_v20, %v1837_v24 }
 0x1a1   : > { %941 = vst.msk [vmem:[#allocation2 + $0x180] sm:$0xff] %vm508_vm1, %v887_v27  ;;  %v820_v37 = vadd.f32 %v8099_v61, %v819_v33  ;;  %5782 = vrot.lane.b32.xlu0 %v8132_v39, %s7593_s27  ;;  %v1840_v33 = vld [vmem:[#allocation2 + $0x141] sm:$0xff]  ;;  %v8260_v24 = vld [vmem:[#allocation2 + $0x90] sm:$0xff] }
 0x1a2   : > { %v6625_v38 = vpop.f32.mrf.mxu0 }
 0x1a3   : > { %v5727_v40 = vpop.permute.xlu0 %5726  ;;  %v888_v42 = vmax.f32 %v820_v37, 0.0  ;;  %v8211_v37 = vld [vmem:[#allocation2 + $0x58] sm:$0xff] }
 0x1a4   : > { %6727 = vmatmul.mubr.msk.bf16.vlgmr.msra.gmra.mxu1 %vm1026_vm2, %v1375_v34  ;;  %6871 = vmatmul.mubr.msk.bf16.gmra.mxu0 %vm1026_vm2, %v1859_v35  ;;  %5840 = vst.msk [vmem:[%s7992_s16 + $0xc8] sm:$0xff] %vm1026_vm2, %v5727_v40  ;;  %v824_v43 = vpop.f32.mrf.mxu0  ;;  %v8143_v45 = vld [vmem:[#allocation2 + $0x178] sm:$0xff] }
 0x1a5   : > { %6899 = vmatpush3.bf16.msra.mxu1 %v7568_v31  ;;  %6730 = vmatprep.mubr.msk.bf16.mxu1 %vm7592_vm0, %v7591_v1  ;;  %942 = vst.msk [vmem:[#allocation2 + $0x188] sm:$0xff] %vm508_vm1, %v888_v42  ;;  %v825_v46 = vadd.f32 %v8099_v61, %v824_v43  ;;  %v2805_v47 = vpack.c.bf16 %v8143_v45, %v8132_v39  ;;  %v8206_v31 = vld [vmem:[#allocation2 + $0x60] sm:$0xff] }
 0x1a6   : > { %6874 = vmatprep.mubr.msk.bf16.mxu0 %vm7592_vm0, %v7591_v1  ;;  %6900 = vmatprep.subr.bf16.mxu1 %v7591_v1  ;;  %v6628_v51 = vpop.f32.mrf.mxu0  ;;  %v1839_v38 = vld [vmem:[#allocation2 + $0x139] sm:$0xff]  ;;  %v1379_v42 = vpack.c.bf16 %v8206_v31, %v8211_v37 }
 0x1a7   : > { %5784 = vrot.lane.b32.xlu1 %v8143_v45, %s7593_s27  ;;  %v889_v53 = vmax.f32 %v825_v46, 0.0  ;;  %v1863_v43 = vpack.c.bf16 %v1840_v33, %v1839_v38  ;;  %v8224_v51 = vld [vmem:[#allocation2 + $0x70] sm:$0xff]  ;;  %v2785_v33 = vpack.c.bf16 %v8177_v9, %v8152_v48 }
 0x1a8   : > { %v5729_v52 = vpop.permute.xlu1 %5728  ;;  %v827_v58 = vpop.f32.mrf.mxu0 }
 0x1a9   : > { %5841 = vst.msk [vmem:[%s7992_s16 + $0xd8] sm:$0xff] %vm1026_vm2, %v5729_v52  ;;  %6901 = vmatpush3.bf16.msra.mxu1 %v7571_v44  ;;  %v828_v62 = vadd.f32 %v8099_v61, %v827_v58  ;;  %v8173_v61 = vld [vmem:[#allocation2 + $0x40] sm:$0xff]  ;;  %v1842_v52 = vld [vmem:[#allocation2 + $0x151] sm:$0xff]  ;;  %v1841_v58 = vld [vmem:[#allocation2 + $0x149] sm:$0xff] }
 0x1aa   : > { %943 = vst.msk [vmem:[#allocation2 + $0x190] sm:$0xff] %vm508_vm1, %v889_v53  ;;  %7074 = vmatprep.subr.bf16.mxu1 %v7591_v1  ;;  %v6629_v63 = vpop.f32.mrf.mxu0  ;;  %v1377_v13 = vpack.c.bf16 %v8173_v61, %v8177_v9  ;;  %v8283_v9 = vld [vmem:[#allocation2 + $0xa0] sm:$0xff] }
 0x1ab   : > { %v5731_v0 = vpop.permute.xlu0 %5730  ;;  %v890_v3 = vmax.f32 %v828_v62, 0.0  ;;  %v1864_v62 = vpack.c.bf16 %v1842_v52, %v1841_v58  ;;  %v8304_v58 = vld [vmem:[#allocation2 + $0xb0] sm:$0xff] }
 0x1ac   : > { %6731 = vmatmul.mubr.msk.bf16.gmra.mxu1 %vm1026_vm2, %v1376_v59  ;;  %6875 = vmatmul.mubr.msk.bf16.gmra.mxu0 %vm1026_vm2, %v1860_v60  ;;  %5842 = vst.msk [vmem:[%s7992_s16 + $0xe8] sm:$0xff] %vm1026_vm2, %v5731_v0  ;;  %v832_v4 = vpop.f32.mrf.mxu0  ;;  %v1380_v60 = vpack.c.bf16 %v8224_v51, %v8229_v57 }
 0x1ad   : > { %6734 = vmatprep.mubr.msk.bf16.mxu1 %vm7592_vm0, %v7591_v1  ;;  %6878 = vmatprep.mubr.msk.bf16.mxu0 %vm7592_vm0, %v7591_v1  ;;  %944 = vst.msk [vmem:[#allocation2 + $0x198] sm:$0xff] %vm508_vm1, %v890_v3  ;;  %v8242_v4 = vld [vmem:[#allocation2 + $0x80] sm:$0xff] }
 0x1ae   : > { %v6632_v6 = vpop.f32.mrf.mxu0 }
 0x1b0   : > { %v5733_v8 = vpop.permute.xlu1 %5732  ;;  %v835_v12 = vpop.f32.mrf.mxu0 }
 0x1b1   : > { %5843 = vst.msk [vmem:[%s7992_s16 + $0xf8] sm:$0xff] %vm1026_vm2, %v5733_v8  ;;  %v1843_v12 = vld [vmem:[#allocation2 + $0x159] sm:$0xff] }
 0x1b2   : > { %v6633_v17 = vpop.f32.mrf.mxu0 }
 0x1b3   : > { %v5735_v18 = vpop.permute.xlu0 %5734  ;;  %v1865_v17 = vpack.c.bf16 %v1844_v5, %v1843_v12 }
 0x1b4   : > { %6735 = vmatmul.mubr.msk.bf16.gmra.mxu1 %vm1026_vm2, %v1377_v13  ;;  %6879 = vmatmul.mubr.msk.bf16.gmra.mxu0 %vm1026_vm2, %v1861_v15  ;;  %5844 = vst.msk [vmem:[%s7992_s16 + $0x108] sm:$0xff] %vm1026_vm2, %v5735_v18  ;;  %v1381_v15 = vpack.c.bf16 %v8242_v4, %v8247_v11 }
 0x1b5   : > { %6738 = vmatprep.mubr.msk.bf16.mxu1 %vm7592_vm0, %v7591_v1  ;;  %6882 = vmatprep.mubr.msk.bf16.mxu0 %vm7592_vm0, %v7591_v1 }
 0x1b8   : > { %v5737_v22 = vpop.permute.xlu1 %5736 }
 0x1b9   : > { %5845 = vst.msk [vmem:[%s7992_s16 + $0x118] sm:$0xff] %vm1026_vm2, %v5737_v22 }
 0x1bb   : > { %v5739_v27 = vpop.permute.xlu0 %5738  ;;  %v1124_v28 = vpop.f32.mrf.mxu0 }
 0x1bc   : > { %6739 = vmatmul.mubr.msk.bf16.gmra.mxu1 %vm1026_vm2, %v1378_v25  ;;  %6883 = vmatmul.mubr.msk.bf16.gmra.mxu0 %vm1026_vm2, %v1862_v26  ;;  %5846 = vst.msk [vmem:[%s7992_s16 + $0x128] sm:$0xff] %vm1026_vm2, %v5739_v27  ;;  %1291 = vst.msk [vmem:[#allocation3] sm:$0xff] %vm1026_vm2, %v1124_v28  ;;  %v8265_v27 = vld [vmem:[#allocation2 + $0x88] sm:$0xff] }
 0x1bd   : > { %6742 = vmatprep.mubr.msk.bf16.mxu1 %vm7592_vm0, %v7591_v1  ;;  %6886 = vmatprep.mubr.msk.bf16.mxu0 %vm7592_vm0, %v7591_v1  ;;  %v6640_v30 = vpop.f32.mrf.mxu0 }
 0x1be   : > { %v1382_v30 = vpack.c.bf16 %v8260_v24, %v8265_v27 }
 0x1bf   : > { %v1127_v35 = vpop.f32.mrf.mxu0 }
 0x1c0   : > { %v5741_v34 = vpop.permute.xlu1 %5740  ;;  %1292 = vst.msk [vmem:[#allocation3 + $0x8] sm:$0xff] %vm1026_vm2, %v1127_v35 }
 0x1c1   : > { %5847 = vst.msk [vmem:[%s7992_s16 + $0x138] sm:$0xff] %vm1026_vm2, %v5741_v34  ;;  %v6641_v40 = vpop.f32.mrf.mxu0  ;;  %v7573_v34 = vld [vmem:[%s10243_s3 + $0x68] sm:$0xff]  }
 0x1c3   : > { %v5743_v44 = vpop.permute.xlu0 %5742 }
 0x1c4   : > { %v1132_v46 = vpop.f32.mrf.mxu0  ;;  %6743 = vmatmul.mubr.msk.bf16.gmra.mxu1 %vm1026_vm2, %v1379_v42  ;;  %6887 = vmatmul.mubr.msk.bf16.gmra.mxu0 %vm1026_vm2, %v1863_v43  ;;  %5848 = vst.msk [vmem:[%s7992_s16 + $0x148] sm:$0xff] %vm1026_vm2, %v5743_v44  ;;  %v8289_v43 = vld [vmem:[#allocation2 + $0x98] sm:$0xff] }
 0x1c5   : > { %1293 = vst.msk [vmem:[#allocation3 + $0x10] sm:$0xff] %vm1026_vm2, %v1132_v46  ;;  %6746 = vmatprep.mubr.msk.bf16.mxu1 %vm7592_vm0, %v7591_v1  ;;  %6890 = vmatprep.mubr.msk.bf16.mxu0 %vm7592_vm0, %v7591_v1  ;;  %v1383_v46 = vpack.c.bf16 %v8283_v9, %v8289_v43 }
 0x1c6   : > { %v6644_v50 = vpop.f32.mrf.mxu0 }
 0x1c7   : > { %v2786_v50 = vpack.c.bf16 %v8193_v23, %v8173_v61 }
 0x1c8   : > { %v5745_v53 = vpop.permute.xlu1 %5744  ;;  %v1135_v54 = vpop.f32.mrf.mxu0 }
 0x1c9   : > { %5849 = vst.msk [vmem:[%s7992_s16 + $0x158] sm:$0xff] %vm1026_vm2, %v5745_v53  ;;  %1294 = vst.msk [vmem:[#allocation3 + $0x18] sm:$0xff] %vm1026_vm2, %v1135_v54 }
 0x1ca   : > { %v6645_v59 = vpop.f32.mrf.mxu0 }
 0x1cb   : > { %v5747_v63 = vpop.permute.xlu0 %5746  ;;  %v8309_v59 = vld [vmem:[#allocation2 + $0xa8] sm:$0xff] }
 0x1cc   : > { %v1140_v0 = vpop.f32.mrf.mxu0  ;;  %6747 = vmatmul.mubr.msk.bf16.gmra.mxu1 %vm1026_vm2, %v1380_v60  ;;  %6891 = vmatmul.mubr.msk.bf16.gmra.mxu0 %vm1026_vm2, %v1864_v62  ;;  %5850 = vst.msk [vmem:[%s7992_s16 + $0x168] sm:$0xff] %vm1026_vm2, %v5747_v63  ;;  %v1384_v62 = vpack.c.bf16 %v8304_v58, %v8309_v59  ;;  %v2787_v63 = vpack.c.bf16 %v8211_v37, %v8189_v19 }
 0x1cd   : > { %1295 = vst.msk [vmem:[#allocation3 + $0x20] sm:$0xff] %vm1026_vm2, %v1140_v0  ;;  %6750 = vmatprep.mubr.msk.bf16.mxu1 %vm7592_vm0, %v7591_v1  ;;  %6894 = vmatprep.mubr.msk.bf16.mxu0 %vm7592_vm0, %v7591_v1 }
 0x1ce   : > { %v6648_v3 = vpop.f32.mrf.mxu0 }
 0x1d0   : > { %v5749_v6 = vpop.permute.xlu1 %5748  ;;  %v1143_v8 = vpop.f32.mrf.mxu0 }
 0x1d1   : > { %5851 = vst.msk [vmem:[%s7992_s16 + $0x178] sm:$0xff] %vm1026_vm2, %v5749_v6  ;;  %1296 = vst.msk [vmem:[#allocation3 + $0x28] sm:$0xff] %vm1026_vm2, %v1143_v8  ;;  %v8324_v6 = vld [vmem:[#allocation2 + $0xc0] sm:$0xff]  ;;  %v8329_v8 = vld [vmem:[#allocation2 + $0xb8] sm:$0xff] }
 0x1d2   : > { %v6649_v13 = vpop.f32.mrf.mxu0 }
 0x1d3   : > { %v5751_v18 = vpop.permute.xlu0 %5750  ;;  %v1385_v13 = vpack.c.bf16 %v8324_v6, %v8329_v8 }
 0x1d4   : > { %v1148_v20 = vpop.f32.mrf.mxu0  ;;  %6751 = vmatmul.mubr.msk.bf16.gmra.mxu1 %vm1026_vm2, %v1381_v15  ;;  %6895 = vmatmul.mubr.msk.bf16.gmra.mxu0 %vm1026_vm2, %v1865_v17  ;;  %5852 = vst.msk [vmem:[%s7992_s16 + $0x188] sm:$0xff] %vm1026_vm2, %v5751_v18  ;;  %v2788_v15 = vpack.c.bf16 %v8229_v57, %v8206_v31 }
 0x1d5   : > { %1297 = vst.msk [vmem:[#allocation3 + $0x30] sm:$0xff] %vm1026_vm2, %v1148_v20  ;;  %6754 = vmatprep.mubr.msk.bf16.mxu1 %vm7592_vm0, %v7591_v1  ;;  %6990 = vmatprep.mubr.msk.bf16.mxu0 %vm7592_vm0, %v7591_v1 }
 0x1d6   : > { %v6652_v22 = vpop.f32.mrf.mxu0 }
 0x1d7   : > { %v8346_v22 = vld [vmem:[#allocation2 + $0xd0] sm:$0xff] }
 0x1d8   : > { %v5753_v25 = vpop.permute.xlu1 %5752  ;;  %v1151_v26 = vpop.f32.mrf.mxu0 }
 0x1d9   : > { %5853 = vst.msk [vmem:[%s7992_s16 + $0x198] sm:$0xff] %vm1026_vm2, %v5753_v25  ;;  %1298 = vst.msk [vmem:[#allocation3 + $0x38] sm:$0xff] %vm1026_vm2, %v1151_v26 }
 0x1da   : > { %v6653_v28 = vpop.f32.mrf.mxu0 }
 0x1db   : > { %v5755_v35 = vpop.permute.xlu0 %5754 }
 0x1dc   : > { %v1156_v38 = vpop.f32.mrf.mxu0  ;;  %6755 = vmatmul.mubr.msk.bf16.gmra.mxu1 %vm1026_vm2, %v1382_v30  ;;  %6991 = vmatmul.mubr.msk.bf16.vlgmr.msra.gmra.mxu0 %vm1026_vm2, %v2785_v33  ;;  %5854 = vst.msk [vmem:[%s7992_s16 + $0x1a8] sm:$0xff] %vm1026_vm2, %v5755_v35  ;;  %v8353_v30 = vld [vmem:[#allocation2 + $0xc8] sm:$0xff]  ;;  %v2789_v35 = vpack.c.bf16 %v8247_v11, %v8224_v51 }
 0x1dd   : > { %1299 = vst.msk [vmem:[#allocation3 + $0x40] sm:$0xff] %vm1026_vm2, %v1156_v38  ;;  %6758 = vmatprep.mubr.msk.bf16.mxu1 %vm7592_vm0, %v7591_v1  ;;  %6994 = vmatprep.mubr.msk.bf16.mxu0 %vm7592_vm0, %v7591_v1 }
 0x1de   : > { %v6656_v48 = vpop.f32.mrf.mxu0  ;;  %7163 = vmatpush3.bf16.msra.mxu0 %v7573_v34  ;;  %v1386_v34 = vpack.c.bf16 %v8346_v22, %v8353_v30 }
 0x1df   : > { %7164 = vmatprep.subr.bf16.mxu0 %v7591_v1 }
 0x1e0   : > { %v5757_v40 = vpop.permute.xlu1 %5756  ;;  %v1159_v42 = vpop.f32.mrf.mxu0 }
 0x1e1   : > { %5855 = vst.msk [vmem:[%s7992_s16 + $0x1b8] sm:$0xff] %vm1026_vm2, %v5757_v40  ;;  %1300 = vst.msk [vmem:[#allocation3 + $0x48] sm:$0xff] %vm1026_vm2, %v1159_v42 }
 0x1e2   : > { %v6657_v44 = vpop.f32.mrf.mxu0 }
 0x1e3   : > { %v5759_v52 = vpop.permute.xlu0 %5758  ;;  %v8370_v44 = vld [vmem:[#allocation2 + $0xe0] sm:$0xff] }
 0x1e4   : > { %v1164_v53 = vpop.f32.mrf.mxu0  ;;  %6759 = vmatmul.mubr.msk.bf16.gmra.mxu1 %vm1026_vm2, %v1383_v46  ;;  %6995 = vmatmul.mubr.msk.bf16.gmra.mxu0 %vm1026_vm2, %v2786_v50  ;;  %5856 = vst.msk [vmem:[%s7992_s16 + $0x1c8] sm:$0xff] %vm1026_vm2, %v5759_v52  ;;  %v7574_v52 = vld [vmem:[%s10243_s3 + $0x60] sm:$0xff]  }
 0x1e5   : > { %1301 = vst.msk [vmem:[#allocation3 + $0x50] sm:$0xff] %vm1026_vm2, %v1164_v53  ;;  %6762 = vmatprep.mubr.msk.bf16.mxu1 %vm7592_vm0, %v7591_v1  ;;  %6998 = vmatprep.mubr.msk.bf16.mxu0 %vm7592_vm0, %v7591_v1 }
 0x1e6   : > { %v6660_v54 = vpop.f32.mrf.mxu0  ;;  %7165 = vmatpush3.bf16.msra.mxu0 %v7574_v52 }
 0x1e7   : > { %v8380_v54 = vld [vmem:[#allocation2 + $0xd8] sm:$0xff]  ;;  %7338 = vmatprep.subr.bf16.mxu0 %v7591_v1 }
 0x1e8   : > { %v5761_v61 = vpop.permute.xlu1 %5760  ;;  %v1167_v23 = vpop.f32.mrf.mxu0 }
 0x1e9   : > { %5857 = vst.msk [vmem:[%s7992_s16 + $0x1d8] sm:$0xff] %vm1026_vm2, %v5761_v61  ;;  %1302 = vst.msk [vmem:[#allocation3 + $0x58] sm:$0xff] %vm1026_vm2, %v1167_v23  ;;  %v1387_v23 = vpack.c.bf16 %v8370_v44, %v8380_v54 }
 0x1ea   : > { %v6661_v60 = vpop.f32.mrf.mxu0 }
 0x1eb   : > { %v5763_v0 = vpop.permute.xlu0 %5762  ;;  %v2790_v60 = vpack.c.bf16 %v8265_v27, %v8242_v4 }
 0x1ec   : > { %v1172_v3 = vpop.f32.mrf.mxu0  ;;  %6763 = vmatmul.mubr.msk.bf16.gmra.mxu1 %vm1026_vm2, %v1384_v62  ;;  %6999 = vmatmul.mubr.msk.bf16.gmra.mxu0 %vm1026_vm2, %v2787_v63  ;;  %5858 = vst.msk [vmem:[%s7992_s16 + $0x1e8] sm:$0xff] %vm1026_vm2, %v5763_v0 }
 0x1ed   : > { %1303 = vst.msk [vmem:[#allocation3 + $0x60] sm:$0xff] %vm1026_vm2, %v1172_v3  ;;  %6766 = vmatprep.mubr.msk.bf16.mxu1 %vm7592_vm0, %v7591_v1  ;;  %7002 = vmatprep.mubr.msk.bf16.mxu0 %vm7592_vm0, %v7591_v1 }
 0x1ee   : > { %v6664_v5 = vpop.f32.mrf.mxu0 }
 0x1ef   : > { %v8398_v5 = vld [vmem:[#allocation2 + $0xf0] sm:$0xff] }
 0x1f0   : > { %v5765_v19 = vpop.permute.xlu1 %5764  ;;  %v1175_v37 = vpop.f32.mrf.mxu0 }
 0x1f1   : > { %5859 = vst.msk [vmem:[%s7992_s16 + $0x1f8] sm:$0xff] %vm1026_vm2, %v5765_v19  ;;  %1304 = vst.msk [vmem:[#allocation3 + $0x68] sm:$0xff] %vm1026_vm2, %v1175_v37 }
 0x1f2   : > { %v6665_v12 = vpop.f32.mrf.mxu0 }
 0x1f3   : > { %v5767_v18 = vpop.permute.xlu0 %5766 }
 0x1f4   : > { %v1180_v17 = vpop.f32.mrf.mxu1  ;;  %6767 = vmatmul.mubr.msk.bf16.gmra.mxu1 %vm1026_vm2, %v1385_v13  ;;  %7003 = vmatmul.mubr.msk.bf16.gmra.mxu0 %vm1026_vm2, %v2788_v15  ;;  %5860 = vst.msk [vmem:[%s7992_s16 + $0x208] sm:$0xff] %vm1026_vm2, %v5767_v18  ;;  %v8340_v20 = vpop.f32.mrf.mxu0  ;;  %v8405_v13 = vld [vmem:[#allocation2 + $0xe8] sm:$0xff]  ;;  %v2791_v18 = vpack.c.bf16 %v8289_v43, %v8260_v24 }
 0x1f5   : > { %1305 = vst.msk [vmem:[#allocation3 + $0x70] sm:$0xff] %vm1026_vm2, %v1180_v17  ;;  %6770 = vmatprep.mubr.msk.bf16.mxu1 %vm7592_vm0, %v7591_v1  ;;  %7006 = vmatprep.mubr.msk.bf16.mxu0 %vm7592_vm0, %v7591_v1  ;;  %v1388_v17 = vpack.c.bf16 %v8398_v5, %v8405_v13 }
 0x1f6   : > { %v6668_v31 = vpop.f32.mrf.mxu1  ;;  %v6816_v57 = vpop.f32.mrf.mxu0 }
 0x1f8   : > { %v1183_v25 = vpop.f32.mrf.mxu1  ;;  %v5769_v26 = vpop.permute.xlu1 %5768 }
 0x1f9   : > { %1306 = vst.msk [vmem:[#allocation3 + $0x78] sm:$0xff] %vm1026_vm2, %v1183_v25  ;;  %5861 = vst.msk [vmem:[%s7992_s16 + $0x218] sm:$0xff] %vm1026_vm2, %v5769_v26  ;;  %v8351_v28 = vpop.f32.mrf.mxu0 }
 0x1fa   : > { %v6669_v33 = vpop.f32.mrf.mxu1 }
 0x1fb   : > { %v6817_v38 = vpop.f32.mrf.mxu0  ;;  %v5771_v40 = vpop.permute.xlu0 %5770  ;;  %v8422_v33 = vld [vmem:[#allocation2 + $0x100] sm:$0xff] }
 0x1fc   : > { %v1188_v48 = vpop.f32.mrf.mxu1  ;;  %6771 = vmatmul.mubr.msk.bf16.gmra.mxu1 %vm1026_vm2, %v1386_v34  ;;  %7007 = vmatmul.mubr.msk.bf16.gmra.mxu0 %vm1026_vm2, %v2789_v35  ;;  %5862 = vst.msk [vmem:[%s7992_s16 + $0x228] sm:$0xff] %vm1026_vm2, %v5771_v40 }
 0x1fd   : > { %1307 = vst.msk [vmem:[#allocation3 + $0x80] sm:$0xff] %vm1026_vm2, %v1188_v48  ;;  %v8364_v42 = vpop.f32.mrf.mxu0  ;;  %6774 = vmatprep.mubr.msk.bf16.mxu1 %vm7592_vm0, %v7591_v1  ;;  %7010 = vmatprep.mubr.msk.bf16.mxu0 %vm7592_vm0, %v7591_v1  ;;  %v8429_v48 = vld [vmem:[#allocation2 + $0xf8] sm:$0xff] }
 0x1fe   : > { %v6672_v51 = vpop.f32.mrf.mxu1 }
 0x1ff   : > { %v6820_v11 = vpop.f32.mrf.mxu0  ;;  %v1389_v51 = vpack.c.bf16 %v8422_v33, %v8429_v48 }
 0x200   : > { %v1191_v46 = vpop.f32.mrf.mxu1  ;;  %v5773_v50 = vpop.permute.xlu1 %5772  ;;  %v2792_v11 = vpack.c.bf16 %v8309_v59, %v8283_v9  ;;  %v8444_v59 = vld [vmem:[#allocation2 + $0x110] sm:$0xff] }
 0x201   : > { %1308 = vst.msk [vmem:[#allocation3 + $0x88] sm:$0xff] %vm1026_vm2, %v1191_v46  ;;  %5863 = vst.msk [vmem:[%s7992_s16 + $0x238] sm:$0xff] %vm1026_vm2, %v5773_v50  ;;  %v8378_v53 = vpop.f32.mrf.mxu0 }
 0x202   : > { %v6673_v61 = vpop.f32.mrf.mxu1 }
 0x203   : > { %v6821_v62 = vpop.f32.mrf.mxu0  ;;  %v5775_v0 = vpop.permute.xlu0 %5774 }
 0x204   : > { %v1196_v63 = vpop.f32.mrf.mxu1  ;;  %6775 = vmatmul.mubr.msk.bf16.gmra.mxu1 %vm1026_vm2, %v1387_v23  ;;  %7011 = vmatmul.mubr.msk.bf16.gmra.mxu0 %vm1026_vm2, %v2790_v60  ;;  %5864 = vst.msk [vmem:[%s7992_s16 + $0x248] sm:$0xff] %vm1026_vm2, %v5775_v0  ;;  %v8449_v62 = vld [vmem:[#allocation2 + $0x108] sm:$0xff] }
 0x205   : > { %1309 = vst.msk [vmem:[#allocation3 + $0x90] sm:$0xff] %vm1026_vm2, %v1196_v63  ;;  %v8392_v3 = vpop.f32.mrf.mxu0  ;;  %6778 = vmatprep.mubr.msk.bf16.mxu1 %vm7592_vm0, %v7591_v1  ;;  %7014 = vmatprep.mubr.msk.bf16.mxu0 %vm7592_vm0, %v7591_v1 }
 0x206   : > { %v6676_v4 = vpop.f32.mrf.mxu1 }
 0x207   : > { %v6824_v27 = vpop.f32.mrf.mxu0  ;;  %v1390_v4 = vpack.c.bf16 %v8444_v59, %v8449_v62 }
 0x208   : > { %v1199_v19 = vpop.f32.mrf.mxu1  ;;  %v5777_v37 = vpop.permute.xlu1 %5776  ;;  %v2793_v27 = vpack.c.bf16 %v8329_v8, %v8304_v58 }
 0x209   : > { %1310 = vst.msk [vmem:[#allocation3 + $0x98] sm:$0xff] %vm1026_vm2, %v1199_v19  ;;  %5865 = vst.msk [vmem:[%s7992_s16 + $0x258] sm:$0xff] %vm1026_vm2, %v5777_v37  ;;  %v8403_v12 = vpop.f32.mrf.mxu0 }
 0x20a   : > { %v6677_v15 = vpop.f32.mrf.mxu1 }
 0x20b   : > { %v6825_v31 = vpop.f32.mrf.mxu0  ;;  %v5779_v25 = vpop.permute.xlu0 %5778 }
 0x20c   : > { %v1204_v57 = vpop.f32.mrf.mxu1  ;;  %6779 = vmatmul.mubr.msk.bf16.gmra.mxu1 %vm1026_vm2, %v1388_v17  ;;  %7015 = vmatmul.mubr.msk.bf16.gmra.mxu0 %vm1026_vm2, %v2791_v18  ;;  %5866 = vst.msk [vmem:[%s7992_s16 + $0x268] sm:$0xff] %vm1026_vm2, %v5779_v25 }
 0x20d   : > { %1311 = vst.msk [vmem:[#allocation3 + $0xa0] sm:$0xff] %vm1026_vm2, %v1204_v57  ;;  %v8416_v26 = vpop.f32.mrf.mxu0  ;;  %6782 = vmatprep.mubr.msk.bf16.mxu1 %vm7592_vm0, %v7591_v1  ;;  %7018 = vmatprep.mubr.msk.bf16.mxu0 %vm7592_vm0, %v7591_v1  ;;  %v8471_v57 = vld [vmem:[#allocation2 + $0x118] sm:$0xff] }
 0x20e   : > { %v6680_v24 = vpop.f32.mrf.mxu1 }
 0x20f   : > { %v6828_v43 = vpop.f32.mrf.mxu0  ;;  %v1391_v24 = vpack.c.bf16 %v8007_v55, %v8471_v57 }
 0x210   : > { %v1207_v34 = vpop.f32.mrf.mxu1  ;;  %v5781_v35 = vpop.permute.xlu1 %5780  ;;  %v2794_v43 = vpack.c.bf16 %v8353_v30, %v8324_v6 }
 0x211   : > { %1312 = vst.msk [vmem:[#allocation3 + $0xa8] sm:$0xff] %vm1026_vm2, %v1207_v34  ;;  %5867 = vst.msk [vmem:[%s7992_s16 + $0x278] sm:$0xff] %vm1026_vm2, %v5781_v35  ;;  %v8427_v38 = vpop.f32.mrf.mxu0 }
 0x212   : > { %v6681_v40 = vpop.f32.mrf.mxu1 }
 0x213   : > { %v6829_v46 = vpop.f32.mrf.mxu0  ;;  %v5783_v63 = vpop.permute.xlu0 %5782 }
 0x214   : > { %v1212_v50 = vpop.f32.mrf.mxu1  ;;  %6783 = vmatmul.mubr.msk.bf16.gmra.mxu1 %vm1026_vm2, %v1389_v51  ;;  %7019 = vmatmul.mubr.msk.bf16.gmra.mxu0 %vm1026_vm2, %v2792_v11  ;;  %5868 = vst.msk [vmem:[%s7992_s16 + $0x288] sm:$0xff] %vm1026_vm2, %v5783_v63  ;;  %v2795_v46 = vpack.c.bf16 %v8380_v54, %v8346_v22 }
 0x215   : > { %1313 = vst.msk [vmem:[#allocation3 + $0xb0] sm:$0xff] %vm1026_vm2, %v1212_v50  ;;  %v8438_v52 = vpop.f32.mrf.mxu0  ;;  %6786 = vmatprep.mubr.msk.bf16.mxu1 %vm7592_vm0, %v7591_v1  ;;  %7022 = vmatprep.mubr.msk.bf16.mxu0 %vm7592_vm0, %v7591_v1 }
 0x216   : > { %v6684_v61 = vpop.f32.mrf.mxu1 }
 0x217   : > { %v6832_v9 = vpop.f32.mrf.mxu0 }
 0x218   : > { %v1215_v23 = vpop.f32.mrf.mxu1 }
 0x219   : > { %1314 = vst.msk [vmem:[#allocation3 + $0xb8] sm:$0xff] %vm1026_vm2, %v1215_v23  ;;  %v8447_v60 = vpop.f32.mrf.mxu0  ;;  %v5785_v19 = vpop.permute.xlu1 %5784 }
 0x21a   : > { %v6685_v0 = vpop.f32.mrf.mxu1  ;;  %5869 = vst.msk [vmem:[%s7992_s16 + $0x298] sm:$0xff] %vm1026_vm2, %v5785_v19 }
 0x21b   : > { %v6833_v37 = vpop.f32.mrf.mxu0 }
 0x21c   : > { %v1220_v15 = vpop.f32.mrf.mxu1  ;;  %6787 = vmatmul.mubr.msk.bf16.gmra.mxu1 %vm1026_vm2, %v1390_v4  ;;  %7023 = vmatmul.mubr.msk.bf16.gmra.mxu0 %vm1026_vm2, %v2793_v27 }
 0x21d   : > { %1315 = vst.msk [vmem:[#allocation3 + $0xc0] sm:$0xff] %vm1026_vm2, %v1220_v15  ;;  %v8462_v17 = vpop.f32.mrf.mxu0  ;;  %6790 = vmatprep.mubr.msk.bf16.mxu1 %vm7592_vm0, %v7591_v1  ;;  %7026 = vmatprep.mubr.msk.bf16.mxu0 %vm7592_vm0, %v7591_v1 }
 0x21e   : > { %v6688_v58 = vpop.f32.mrf.mxu1 }
 0x21f   : > { %v6836_v8 = vpop.f32.mrf.mxu0 }
 0x220   : > { %v1223_v18 = vpop.f32.mrf.mxu1 }
 0x221   : > { %1316 = vst.msk [vmem:[#allocation3 + $0xc8] sm:$0xff] %vm1026_vm2, %v1223_v18  ;;  %v8469_v31 = vpop.f32.mrf.mxu0 }
 0x222   : > { %v6689_v25 = vpop.f32.mrf.mxu1 }
 0x223   : > { %v6837_v34 = vpop.f32.mrf.mxu0 }
 0x224   : > { %v1228_v35 = vpop.f32.mrf.mxu1  ;;  %6791 = vmatmul.mubr.msk.bf16.gmra.mxu1 %vm1026_vm2, %v1391_v24  ;;  %7027 = vmatmul.mubr.msk.bf16.gmra.mxu0 %vm1026_vm2, %v2794_v43  ;;  %v2274_v24 = vld [vmem:[#allocation2 + $0x37] sm:$0xff] }
 0x225   : > { %1317 = vst.msk [vmem:[#allocation3 + $0xd0] sm:$0xff] %vm1026_vm2, %v1228_v35  ;;  %v8480_v40 = vpop.f32.mrf.mxu0  ;;  %6794 = vmatprep.mubr.msk.bf16.mxu1 %vm7592_vm0, %v7591_v1  ;;  %7030 = vmatprep.mubr.msk.bf16.mxu0 %vm7592_vm0, %v7591_v1  ;;  %v2315_v35 = vpack.c.bf16 %v2274_v24, %v2273_v7 }
 0x226   : > { %v6692_v55 = vpop.f32.mrf.mxu1 }
 0x227   : > { %v6840_v51 = vpop.f32.mrf.mxu0  ;;  %v2799_v55 = vpack.c.bf16 %v8471_v57, %v8444_v59  ;;  %v8575_v57 = vld [vmem:[#allocation2 + $0x47] sm:$0xff] }
 0x228   : > { %v1231_v11 = vpop.f32.mrf.mxu1 }
 0x229   : > { %1318 = vst.msk [vmem:[#allocation3 + $0xd8] sm:$0xff] %vm1026_vm2, %v1231_v11  ;;  %v8487_v6 = vpop.f32.mrf.mxu0 }
 0x22a   : > { %v6693_v30 = vpop.f32.mrf.mxu1 }
 0x22b   : > { %v6841_v50 = vpop.f32.mrf.mxu0 }
 0x22c   : > { %v1236_v61 = vpop.f32.mrf.mxu1  ;;  %6795 = vmatmul.mubr.msk.bf16.gmra.mxu1 %vm1026_vm2, %v1392_v16  ;;  %7031 = vmatmul.mubr.msk.bf16.gmra.mxu0 %vm1026_vm2, %v2795_v46  ;;  %v2796_v16 = vpack.c.bf16 %v8405_v13, %v8370_v44  ;;  %v7575_v46 = vld [vmem:[%s10243_s3 + $0x50] sm:$0xff]  }
 0x22d   : > { %1319 = vst.msk [vmem:[#allocation3 + $0xe0] sm:$0xff] %vm1026_vm2, %v1236_v61  ;;  %v8497_v9 = vpop.f32.mrf.mxu0  ;;  %6798 = vmatprep.mubr.msk.bf16.mxu1 %vm7592_vm0, %v7591_v1  ;;  %7034 = vmatprep.mubr.msk.bf16.mxu0 %vm7592_vm0, %v7591_v1  ;;  %v2774_v61 = vld [vmem:[#allocation2 + $0x128] sm:$0xff] }
 0x22e   : > { %v6696_v22 = vpop.f32.mrf.mxu1 }
 0x22f   : > { %v6844_v54 = vpop.f32.mrf.mxu0 }
 0x230   : > { %v1239_v23 = vpop.f32.mrf.mxu1 }
 0x231   : > { %1320 = vst.msk [vmem:[#allocation3 + $0xe8] sm:$0xff] %vm1026_vm2, %v1239_v23  ;;  %v8504_v2 = vpop.f32.mrf.mxu0  ;;  %v2275_v23 = vld [vmem:[#allocation2 + $0x3f] sm:$0xff] }
 0x232   : > { %v6697_v10 = vpop.f32.mrf.mxu1 }
 0x233   : > { %v6845_v63 = vpop.f32.mrf.mxu0  ;;  %v2773_v10 = vld [vmem:[#allocation2 + $0x120] sm:$0xff] }
 0x234   : > { %v1244_v0 = vpop.f32.mrf.mxu1  ;;  %6799 = vmatmul.mubr.msk.bf16.gmra.mxu1 %vm1026_vm2, %v1393_v36  ;;  %7035 = vmatmul.mubr.msk.bf16.gmra.mxu0 %vm1026_vm2, %v2796_v16  ;;  %v2797_v36 = vpack.c.bf16 %v8429_v48, %v8398_v5  ;;  %v2316_v63 = vpack.c.bf16 %v8575_v57, %v2275_v23  ;;  %v1677_v23 = vld [vmem:[#allocation3] sm:$0xff] }
 0x235   : > { %1321 = vst.msk [vmem:[#allocation3 + $0xf0] sm:$0xff] %vm1026_vm2, %v1244_v0  ;;  %v8514_v4 = vpop.f32.mrf.mxu0  ;;  %6802 = vmatprep.mubr.msk.bf16.mxu1 %vm7592_vm0, %v7591_v1  ;;  %7038 = vmatprep.mubr.msk.bf16.mxu0 %vm7592_vm0, %v7591_v1  ;;  %v2800_v0 = vpack.c.bf16 %v2774_v61, %v2773_v10 }
 0x236   : > { %v6700_v44 = vpop.f32.mrf.mxu1 }
 0x237   : > { %v6848_v13 = vpop.f32.mrf.mxu0 }
 0x238   : > { %v1247_v27 = vpop.f32.mrf.mxu1 }
 0x239   : > { %1322 = vst.msk [vmem:[#allocation3 + $0xf8] sm:$0xff] %vm1026_vm2, %v1247_v27  ;;  %v8521_v21 = vpop.f32.mrf.mxu0 }
 0x23a   : > { %v6701_v29 = vpop.f32.mrf.mxu1 }
 0x23b   : > { %v6849_v19 = vpop.f32.mrf.mxu0 }
 0x23c   : > { %v1252_v37 = vpop.f32.mrf.mxu1  ;;  %6803 = vmatmul.mubr.msk.bf16.gmra.mxu1 %vm1026_vm2, %v1394_v56  ;;  %7039 = vmatmul.mubr.msk.bf16.gmra.mxu0 %vm1026_vm2, %v2797_v36  ;;  %v2798_v56 = vpack.c.bf16 %v8449_v62, %v8422_v33  ;;  %v8591_v19 = vld [vmem:[#allocation2 + $0x57] sm:$0xff] }
 0x23d   : > { %1323 = vst.msk [vmem:[#allocation3 + $0x100] sm:$0xff] %vm1026_vm2, %v1252_v37  ;;  %v8531_v15 = vpop.f32.mrf.mxu0  ;;  %6806 = vmatprep.mubr.msk.bf16.mxu1 %vm7592_vm0, %v7591_v1  ;;  %7042 = vmatprep.mubr.msk.bf16.mxu0 %vm7592_vm0, %v7591_v1  ;;  %v2776_v37 = vld [vmem:[#allocation2 + $0x138] sm:$0xff] }
 0x23e   : > { %v6704_v5 = vpop.f32.mrf.mxu1 }
 0x23f   : > { %v6852_v48 = vpop.f32.mrf.mxu0 }
 0x240   : > { %v1255_v58 = vpop.f32.mrf.mxu1 }
 0x241   : > { %1324 = vst.msk [vmem:[#allocation3 + $0x108] sm:$0xff] %vm1026_vm2, %v1255_v58  ;;  %v8538_v41 = vpop.f32.mrf.mxu0  ;;  %v8596_v58 = vld [vmem:[#allocation2 + $0x4f] sm:$0xff] }
 0x242   : > { %v6705_v49 = vpop.f32.mrf.mxu1 }
 0x243   : > { %v6853_v8 = vpop.f32.mrf.mxu0  ;;  %v2775_v49 = vld [vmem:[#allocation2 + $0x130] sm:$0xff] }
 0x244   : > { %v1260_v18 = vpop.f32.mrf.mxu1  ;;  %6807 = vmatmul.mubr.msk.bf16.gmra.mxu1 %vm1026_vm2, %v1395_v14  ;;  %7043 = vmatmul.mubr.msk.bf16.gmra.mxu0 %vm1026_vm2, %v2798_v56  ;;  %v7572_v14 = vld [vmem:[%s10243_s3 + $0x58] sm:$0xff]   ;;  %v2317_v8 = vpack.c.bf16 %v8591_v19, %v8596_v58 }
 0x245   : > { %1325 = vst.msk [vmem:[#allocation3 + $0x110] sm:$0xff] %vm1026_vm2, %v1260_v18  ;;  %v8548_v25 = vpop.f32.mrf.mxu0  ;;  %6902 = vmatprep.mubr.msk.bf16.mxu1 %vm7592_vm0, %v7591_v1  ;;  %7046 = vmatprep.mubr.msk.bf16.mxu0 %vm7592_vm0, %v7591_v1  ;;  %v2801_v18 = vpack.c.bf16 %v2776_v37, %v2775_v49  ;;  %v8631_v49 = vld [vmem:[#allocation2 + $0x6f] sm:$0xff] }
 0x246   : > { %v6708_v33 = vpop.f32.mrf.mxu1 }
 0x247   : > { %v6856_v62 = vpop.f32.mrf.mxu0 }
 0x248   : > { %v1263_v43 = vpop.f32.mrf.mxu1 }
 0x249   : > { %1326 = vst.msk [vmem:[#allocation3 + $0x118] sm:$0xff] %vm1026_vm2, %v1263_v43  ;;  %v8555_v32 = vpop.f32.mrf.mxu0 }
 0x24a   : > { %v6709_v34 = vpop.f32.mrf.mxu1 }
 0x24b   : > { %v6857_v51 = vpop.f32.mrf.mxu0  ;;  %v2778_v34 = vld [vmem:[#allocation2 + $0x148] sm:$0xff] }
 0x24c   : > { %v1268_v11 = vpop.f32.mrf.mxu1  ;;  %6903 = vmatmul.mubr.msk.bf16.vlgmr.msra.gmra.mxu1 %vm1026_vm2, %v2315_v35  ;;  %7047 = vmatmul.mubr.msk.bf16.gmra.mxu0 %vm1026_vm2, %v2799_v55  ;;  %v8614_v51 = vld [vmem:[#allocation2 + $0x5f] sm:$0xff] }
 0x24d   : > { %1327 = vst.msk [vmem:[#allocation3 + $0x120] sm:$0xff] %vm1026_vm2, %v1268_v11  ;;  %v8565_v30 = vpop.f32.mrf.mxu0  ;;  %7075 = vmatpush3.bf16.msra.mxu1 %v7572_v14  ;;  %6906 = vmatprep.mubr.msk.bf16.mxu1 %vm7592_vm0, %v7591_v1  ;;  %v8609_v14 = vld [vmem:[#allocation2 + $0x67] sm:$0xff] }
 0x24e   : > { %v6712_v50 = vpop.f32.mrf.mxu1  ;;  %7050 = vmatprep.mubr.msk.bf16.mxu0 %vm7592_vm0, %v7591_v1  ;;  %7076 = vmatprep.subr.bf16.mxu1 %v7591_v1  ;;  %v2777_v11 = vld [vmem:[#allocation2 + $0x140] sm:$0xff] }
 0x24f   : > { %v6860_v59 = vpop.f32.mrf.mxu0  ;;  %v2318_v50 = vpack.c.bf16 %v8609_v14, %v8614_v51 }
 0x250   : > { %v1271_v22 = vpop.f32.mrf.mxu1  ;;  %v2802_v59 = vpack.c.bf16 %v2778_v34, %v2777_v11 }
 0x251   : > { %1328 = vst.msk [vmem:[#allocation3 + $0x128] sm:$0xff] %vm1026_vm2, %v1271_v22  ;;  %v8578_v54 = vpop.f32.mrf.mxu0  ;;  %7077 = vmatpush3.bf16.msra.mxu1 %v7575_v46 }
 0x252   : > { %v6713_v16 = vpop.f32.mrf.mxu1  ;;  %7250 = vmatprep.subr.bf16.mxu1 %v7591_v1 }
 0x253   : > { %v6861_v44 = vpop.f32.mrf.mxu0 }
 0x254   : > { %v1276_v13 = vpop.f32.mrf.mxu1  ;;  %6907 = vmatmul.mubr.msk.bf16.gmra.mxu1 %vm1026_vm2, %v2316_v63  ;;  %7051 = vmatmul.mubr.msk.bf16.gmra.mxu0 %vm1026_vm2, %v2800_v0  ;;  %v8627_v44 = vld [vmem:[#allocation2 + $0x77] sm:$0xff] }
 0x255   : > { %1329 = vst.msk [vmem:[#allocation3 + $0x130] sm:$0xff] %vm1026_vm2, %v1276_v13  ;;  %v8585_v27 = vpop.f32.mrf.mxu0  ;;  %6910 = vmatprep.mubr.msk.bf16.mxu1 %vm7592_vm0, %v7591_v1  ;;  %7054 = vmatprep.mubr.msk.bf16.mxu0 %vm7592_vm0, %v7591_v1  ;;  %v2780_v13 = vld [vmem:[#allocation2 + $0x158] sm:$0xff] }
 0x256   : > { %v6716_v29 = vpop.f32.mrf.mxu1 }
 0x257   : > { %v6864_v36 = vpop.f32.mrf.mxu0 }
 0x258   : > { %v1279_v5 = vpop.f32.mrf.mxu1  ;;  %v1678_v36 = vld [vmem:[#allocation3 + $0x8] sm:$0xff] }
 0x259   : > { %1330 = vst.msk [vmem:[#allocation3 + $0x138] sm:$0xff] %vm1026_vm2, %v1279_v5  ;;  %v8594_v48 = vpop.f32.mrf.mxu0 }
 0x25a   : > { %v6717_v56 = vpop.f32.mrf.mxu1 }
 0x25b   : > { %v6865_v33 = vpop.f32.mrf.mxu0  ;;  %v2779_v56 = vld [vmem:[#allocation2 + $0x150] sm:$0xff] }
 0x25c   : > { %v1284_v62 = vpop.f32.mrf.mxu1  ;;  %6911 = vmatmul.mubr.msk.bf16.gmra.mxu1 %vm1026_vm2, %v2317_v8  ;;  %7055 = vmatmul.mubr.msk.bf16.gmra.mxu0 %vm1026_vm2, %v2801_v18  ;;  %v2319_v18 = vpack.c.bf16 %v8627_v44, %v8631_v49  ;;  %v2803_v33 = vpack.c.bf16 %v2780_v13, %v2779_v56  ;;  %v8650_v13 = vld [vmem:[#allocation2 + $0x7f] sm:$0xff] }
 0x25d   : > { %1331 = vst.msk [vmem:[#allocation3 + $0x140] sm:$0xff] %vm1026_vm2, %v1284_v62  ;;  %v8603_v24 = vpop.f32.mrf.mxu0  ;;  %6914 = vmatprep.mubr.msk.bf16.mxu1 %vm7592_vm0, %v7591_v1  ;;  %7058 = vmatprep.mubr.msk.bf16.mxu0 %vm7592_vm0, %v7591_v1 }
 0x25e   : > { %v6720_v43 = vpop.f32.mrf.mxu1 }
 0x25f   : > { %v6868_v7 = vpop.f32.mrf.mxu0 }
 0x260   : > { %v1287_v35 = vpop.f32.mrf.mxu1  ;;  %v1679_v7 = vld [vmem:[#allocation3 + $0x10] sm:$0xff] }
 0x261   : > { %1332 = vst.msk [vmem:[#allocation3 + $0x148] sm:$0xff] %vm1026_vm2, %v1287_v35  ;;  %v8612_v55 = vpop.f32.mrf.mxu0 }
 0x262   : > { %v6721_v46 = vpop.f32.mrf.mxu1 }
 0x263   : > { %v6869_v61 = vpop.f32.mrf.mxu0 }
 0x264   : > { %v1510_v22 = vpop.f32.mrf.mxu1  ;;  %6915 = vmatmul.mubr.msk.bf16.gmra.mxu1 %vm1026_vm2, %v2318_v50  ;;  %7059 = vmatmul.mubr.msk.bf16.gmra.mxu0 %vm1026_vm2, %v2802_v59  ;;  %v8645_v59 = vld [vmem:[#allocation2 + $0x87] sm:$0xff] }
 0x265   : > { %v1719_v10 = vadd.f32 %v1677_v23, %v1510_v22  ;;  %v8620_v16 = vpop.f32.mrf.mxu0  ;;  %6918 = vmatprep.mubr.msk.bf16.mxu1 %vm7592_vm0, %v7591_v1  ;;  %7062 = vmatprep.mubr.msk.bf16.mxu0 %vm7592_vm0, %v7591_v1  ;;  %v2782_v61 = vld [vmem:[#allocation2 + $0x168] sm:$0xff] }
 0x266   : > { %v6728_v63 = vpop.f32.mrf.mxu1 }
 0x267   : > { %1761 = vst.msk [vmem:[#allocation3] sm:$0xff] %vm1026_vm2, %v1719_v10  ;;  %v6872_v0 = vpop.f32.mrf.mxu0  ;;  %v1680_v10 = vld [vmem:[#allocation3 + $0x18] sm:$0xff] }
 0x268   : > { %v1513_v29 = vpop.f32.mrf.mxu1 }
 0x269   : > { %v1720_v37 = vadd.f32 %v1678_v36, %v1513_v29  ;;  %v8629_v5 = vpop.f32.mrf.mxu0  ;;  %v2781_v29 = vld [vmem:[#allocation2 + $0x160] sm:$0xff] }
 0x26a   : > { %v6729_v8 = vpop.f32.mrf.mxu1  ;;  %v2804_v56 = vpack.c.bf16 %v2782_v61, %v2781_v29 }
 0x26b   : > { %1762 = vst.msk [vmem:[#allocation3 + $0x8] sm:$0xff] %vm1026_vm2, %v1720_v37  ;;  %v6873_v62 = vpop.f32.mrf.mxu0  ;;  %v2320_v37 = vpack.c.bf16 %v8645_v59, %v8650_v13 }
 0x26c   : > { %v1518_v43 = vpop.f32.mrf.mxu1  ;;  %6919 = vmatmul.mubr.msk.bf16.gmra.mxu1 %vm1026_vm2, %v2319_v18  ;;  %7063 = vmatmul.mubr.msk.bf16.gmra.mxu0 %vm1026_vm2, %v2803_v33  ;;  %v1681_v62 = vld [vmem:[#allocation3 + $0x20] sm:$0xff] }
 0x26d   : > { %v1721_v34 = vadd.f32 %v1679_v7, %v1518_v43  ;;  %v8638_v35 = vpop.f32.mrf.mxu0  ;;  %6922 = vmatprep.mubr.msk.bf16.mxu1 %vm7592_vm0, %v7591_v1  ;;  %7066 = vmatprep.mubr.msk.bf16.mxu0 %vm7592_vm0, %v7591_v1 }
 0x26e   : > { %v6732_v11 = vpop.f32.mrf.mxu1  ;;  %v2147_v46 = vld [vmem:[#allocation3] sm:$0xff] }
 0x26f   : > { %1763 = vst.msk [vmem:[#allocation3 + $0x10] sm:$0xff] %vm1026_vm2, %v1721_v34  ;;  %v6876_v50 = vpop.f32.mrf.mxu0  ;;  %v2189_v22 = vadd.f32 %v2147_v46, %v8340_v20  ;;  %v8667_v46 = vld [vmem:[#allocation2 + $0x97] sm:$0xff] }
 0x270   : > { %v1521_v23 = vpop.f32.mrf.mxu1 }
 0x271   : > { %v1722_v63 = vadd.f32 %v1680_v10, %v1521_v23  ;;  %v8648_v0 = vpop.f32.mrf.mxu0  ;;  %2231 = vst.msk [vmem:[#allocation3] sm:$0xff] %vm1026_vm2, %v2189_v22  ;;  %v1682_v22 = vld [vmem:[#allocation3 + $0x28] sm:$0xff] }
 0x272   : > { %v6733_v36 = vpop.f32.mrf.mxu1  ;;  %v2148_v8 = vld [vmem:[#allocation3 + $0x8] sm:$0xff] }
 0x273   : > { %1764 = vst.msk [vmem:[#allocation3 + $0x18] sm:$0xff] %vm1026_vm2, %v1722_v63  ;;  %v6877_v18 = vpop.f32.mrf.mxu0  ;;  %v2190_v20 = vadd.f32 %v2148_v8, %v8351_v28  ;;  %v8672_v63 = vld [vmem:[#allocation2 + $0x8f] sm:$0xff] }
 0x274   : > { %v1526_v33 = vpop.f32.mrf.mxu1  ;;  %6923 = vmatmul.mubr.msk.bf16.gmra.mxu1 %vm1026_vm2, %v2320_v37  ;;  %7067 = vmatmul.mubr.msk.bf16.gmra.mxu0 %vm1026_vm2, %v2804_v56  ;;  %v2321_v36 = vpack.c.bf16 %v8667_v46, %v8672_v63  ;;  %v1683_v18 = vld [vmem:[#allocation3 + $0x30] sm:$0xff] }
 0x275   : > { %v1723_v43 = vadd.f32 %v1681_v62, %v1526_v33  ;;  %v8659_v7 = vpop.f32.mrf.mxu0  ;;  %6926 = vmatprep.mubr.msk.bf16.mxu1 %vm7592_vm0, %v7591_v1  ;;  %7070 = vmatprep.mubr.msk.bf16.mxu0 %vm7592_vm0, %v7591_v1  ;;  %2232 = vst.msk [vmem:[#allocation3 + $0x8] sm:$0xff] %vm1026_vm2, %v2190_v20 }
 0x276   : > { %v6736_v34 = vpop.f32.mrf.mxu1  ;;  %v2149_v11 = vld [vmem:[#allocation3 + $0x10] sm:$0xff] }
 0x277   : > { %1765 = vst.msk [vmem:[#allocation3 + $0x20] sm:$0xff] %vm1026_vm2, %v1723_v43  ;;  %v6880_v28 = vpop.f32.mrf.mxu0  ;;  %v2191_v50 = vadd.f32 %v2149_v11, %v8364_v42  ;;  %v8692_v34 = vld [vmem:[#allocation2 + $0xa7] sm:$0xff] }
 0x278   : > { %v1529_v61 = vpop.f32.mrf.mxu1 }
 0x279   : > { %v1724_v23 = vadd.f32 %v1682_v22, %v1529_v61  ;;  %v8670_v10 = vpop.f32.mrf.mxu0  ;;  %2233 = vst.msk [vmem:[#allocation3 + $0x10] sm:$0xff] %vm1026_vm2, %v2191_v50  ;;  %v8697_v50 = vld [vmem:[#allocation2 + $0x9f] sm:$0xff] }
 0x27a   : > { %v6737_v29 = vpop.f32.mrf.mxu1  ;;  %v2150_v37 = vld [vmem:[#allocation3 + $0x18] sm:$0xff]  ;;  %v2322_v22 = vpack.c.bf16 %v8692_v34, %v8697_v50 }
 0x27b   : > { %1766 = vst.msk [vmem:[#allocation3 + $0x28] sm:$0xff] %vm1026_vm2, %v1724_v23  ;;  %v6881_v56 = vpop.f32.mrf.mxu0  ;;  %v2192_v8 = vadd.f32 %v2150_v37, %v8378_v53  ;;  %v3725_v23 = vpack.c.bf16 %v8596_v58, %v8575_v57 }
 0x27c   : > { %v1534_v42 = vpop.f32.mrf.mxu1  ;;  %6927 = vmatmul.mubr.msk.bf16.gmra.mxu1 %vm1026_vm2, %v2321_v36  ;;  %7071 = vmatmul.mubr.msk.bf16.gmra.mxu0 %vm1026_vm2, %v2805_v47  ;;  %v1684_v47 = vld [vmem:[#allocation3 + $0x38] sm:$0xff] }
 0x27d   : > { %v1725_v20 = vadd.f32 %v1683_v18, %v1534_v42  ;;  %v8684_v33 = vpop.f32.mrf.mxu0  ;;  %6930 = vmatprep.mubr.msk.bf16.mxu1 %vm7592_vm0, %v7591_v1  ;;  %7166 = vmatprep.mubr.msk.bf16.mxu0 %vm7592_vm0, %v7591_v1  ;;  %2234 = vst.msk [vmem:[#allocation3 + $0x18] sm:$0xff] %vm1026_vm2, %v2192_v8  ;;  %v1685_v8 = vld [vmem:[#allocation3 + $0x40] sm:$0xff] }
 0x27e   : > { %v6740_v53 = vpop.f32.mrf.mxu1  ;;  %v2151_v62 = vld [vmem:[#allocation3 + $0x20] sm:$0xff] }
 0x27f   : > { %1767 = vst.msk [vmem:[#allocation3 + $0x30] sm:$0xff] %vm1026_vm2, %v1725_v20  ;;  %v6884_v43 = vpop.f32.mrf.mxu0  ;;  %v2193_v39 = vadd.f32 %v2151_v62, %v8392_v3  ;;  %v7577_v3 = vld [vmem:[%s10243_s3 + $0x88] sm:$0xff]   ;;  %v8719_v20 = vld [vmem:[#allocation2 + $0xb7] sm:$0xff] }
 0x280   : > { %v1537_v45 = vpop.f32.mrf.mxu1  ;;  %v1686_v43 = vld [vmem:[#allocation3 + $0x48] sm:$0xff] }
 0x281   : > { %v1726_v11 = vadd.f32 %v1684_v47, %v1537_v45  ;;  %v8695_v28 = vpop.f32.mrf.mxu0  ;;  %2235 = vst.msk [vmem:[#allocation3 + $0x20] sm:$0xff] %vm1026_vm2, %v2193_v39  ;;  %v8725_v47 = vld [vmem:[#allocation2 + $0xaf] sm:$0xff] }
 0x282   : > { %v6741_v61 = vpop.f32.mrf.mxu1  ;;  %v2152_v29 = vld [vmem:[#allocation3 + $0x28] sm:$0xff] }
 0x283   : > { %1768 = vst.msk [vmem:[#allocation3 + $0x38] sm:$0xff] %vm1026_vm2, %v1726_v11  ;;  %v6885_v36 = vpop.f32.mrf.mxu0  ;;  %v2194_v37 = vadd.f32 %v2152_v29, %v8403_v12  ;;  %v2323_v61 = vpack.c.bf16 %v8719_v20, %v8725_v47 }
 0x284   : > { %v1542_v56 = vpop.f32.mrf.mxu1  ;;  %6931 = vmatmul.mubr.msk.bf16.gmra.mxu1 %vm1026_vm2, %v2322_v22  ;;  %7167 = vmatmul.mubr.msk.bf16.vlgmr.msra.gmra.mxu0 %vm1026_vm2, %v3725_v23  ;;  %v3726_v22 = vpack.c.bf16 %v8614_v51, %v8591_v19  ;;  %v1687_v36 = vld [vmem:[#allocation3 + $0x50] sm:$0xff] }
 0x285   : > { %v1727_v42 = vadd.f32 %v1685_v8, %v1542_v56  ;;  %v8711_v18 = vpop.f32.mrf.mxu0  ;;  %6934 = vmatprep.mubr.msk.bf16.mxu1 %vm7592_vm0, %v7591_v1  ;;  %7170 = vmatprep.mubr.msk.bf16.mxu0 %vm7592_vm0, %v7591_v1  ;;  %2236 = vst.msk [vmem:[#allocation3 + $0x28] sm:$0xff] %vm1026_vm2, %v2194_v37  ;;  %v8744_v8 = vld [vmem:[#allocation2 + $0xc7] sm:$0xff] }
 0x286   : > { %v6744_v57 = vpop.f32.mrf.mxu1  ;;  %7339 = vmatpush3.bf16.msra.mxu0 %v7577_v3  ;;  %v2153_v12 = vld [vmem:[#allocation3 + $0x30] sm:$0xff] }
 0x287   : > { %1769 = vst.msk [vmem:[#allocation3 + $0x40] sm:$0xff] %vm1026_vm2, %v1727_v42  ;;  %v6888_v58 = vpop.f32.mrf.mxu0  ;;  %v2195_v53 = vadd.f32 %v2153_v12, %v8416_v26  ;;  %7340 = vmatprep.subr.bf16.mxu0 %v7591_v1  ;;  %v1688_v12 = vld [vmem:[#allocation3 + $0x58] sm:$0xff] }
 0x288   : > { %v1545_v62 = vpop.f32.mrf.mxu1 }
 0x289   : > { %v1728_v39 = vadd.f32 %v1686_v43, %v1545_v62  ;;  %v8723_v45 = vpop.f32.mrf.mxu0  ;;  %2237 = vst.msk [vmem:[#allocation3 + $0x30] sm:$0xff] %vm1026_vm2, %v2195_v53  ;;  %v8749_v62 = vld [vmem:[#allocation2 + $0xbf] sm:$0xff] }
 0x28a   : > { %v6745_v11 = vpop.f32.mrf.mxu1  ;;  %v2154_v23 = vld [vmem:[#allocation3 + $0x38] sm:$0xff] }
 0x28b   : > { %1770 = vst.msk [vmem:[#allocation3 + $0x48] sm:$0xff] %vm1026_vm2, %v1728_v39  ;;  %v6889_v26 = vpop.f32.mrf.mxu0  ;;  %v2196_v3 = vadd.f32 %v2154_v23, %v8427_v38  ;;  %v2324_v39 = vpack.c.bf16 %v8744_v8, %v8749_v62  ;;  %v3727_v11 = vpack.c.bf16 %v8631_v49, %v8609_v14 }
 0x28c   : > { %v1550_v29 = vpop.f32.mrf.mxu1  ;;  %6935 = vmatmul.mubr.msk.bf16.gmra.mxu1 %vm1026_vm2, %v2323_v61  ;;  %7171 = vmatmul.mubr.msk.bf16.gmra.mxu0 %vm1026_vm2, %v3726_v22  ;;  %v1689_v26 = vld [vmem:[#allocation3 + $0x60] sm:$0xff] }
 0x28d   : > { %v1729_v37 = vadd.f32 %v1687_v36, %v1550_v29  ;;  %v8736_v56 = vpop.f32.mrf.mxu0  ;;  %6938 = vmatprep.mubr.msk.bf16.mxu1 %vm7592_vm0, %v7591_v1  ;;  %7174 = vmatprep.mubr.msk.bf16.mxu0 %vm7592_vm0, %v7591_v1  ;;  %2238 = vst.msk [vmem:[#allocation3 + $0x38] sm:$0xff] %vm1026_vm2, %v2196_v3  ;;  %v8768_v36 = vld [vmem:[#allocation2 + $0xd7] sm:$0xff] }
 0x28e   : > { %v6748_v19 = vpop.f32.mrf.mxu1  ;;  %v2155_v51 = vld [vmem:[#allocation3 + $0x40] sm:$0xff] }
 0x28f   : > { %1771 = vst.msk [vmem:[#allocation3 + $0x50] sm:$0xff] %vm1026_vm2, %v1729_v37  ;;  %v6892_v38 = vpop.f32.mrf.mxu0  ;;  %v2197_v42 = vadd.f32 %v2155_v51, %v8438_v52  ;;  %v1690_v51 = vld [vmem:[#allocation3 + $0x68] sm:$0xff] }
 0x290   : > { %v1553_v57 = vpop.f32.mrf.mxu1 }
 0x291   : > { %v1730_v58 = vadd.f32 %v1688_v12, %v1553_v57  ;;  %v8747_v53 = vpop.f32.mrf.mxu0  ;;  %2239 = vst.msk [vmem:[#allocation3 + $0x40] sm:$0xff] %vm1026_vm2, %v2197_v42  ;;  %v8773_v57 = vld [vmem:[#allocation2 + $0xcf] sm:$0xff] }
 0x292   : > { %v6749_v43 = vpop.f32.mrf.mxu1  ;;  %v2156_v61 = vld [vmem:[#allocation3 + $0x48] sm:$0xff] }
 0x293   : > { %1772 = vst.msk [vmem:[#allocation3 + $0x58] sm:$0xff] %vm1026_vm2, %v1730_v58  ;;  %v6893_v52 = vpop.f32.mrf.mxu0  ;;  %v2198_v22 = vadd.f32 %v2156_v61, %v8447_v60  ;;  %v2325_v58 = vpack.c.bf16 %v8768_v36, %v8773_v57  ;;  %v3728_v43 = vpack.c.bf16 %v8650_v13, %v8627_v44 }
 0x294   : > { %v1558_v23 = vpop.f32.mrf.mxu1  ;;  %6939 = vmatmul.mubr.msk.bf16.gmra.mxu1 %vm1026_vm2, %v2324_v39  ;;  %7175 = vmatmul.mubr.msk.bf16.gmra.mxu0 %vm1026_vm2, %v3727_v11  ;;  %v1691_v52 = vld [vmem:[#allocation3 + $0x70] sm:$0xff] }
 0x295   : > { %v1731_v3 = vadd.f32 %v1689_v26, %v1558_v23  ;;  %v8760_v29 = vpop.f32.mrf.mxu0  ;;  %6942 = vmatprep.mubr.msk.bf16.mxu1 %vm7592_vm0, %v7591_v1  ;;  %7178 = vmatprep.mubr.msk.bf16.mxu0 %vm7592_vm0, %v7591_v1  ;;  %2240 = vst.msk [vmem:[#allocation3 + $0x48] sm:$0xff] %vm1026_vm2, %v2198_v22  ;;  %v8792_v26 = vld [vmem:[#allocation2 + $0xe7] sm:$0xff] }
 0x296   : > { %v6752_v14 = vpop.f32.mrf.mxu1  ;;  %v2157_v49 = vld [vmem:[#allocation3 + $0x50] sm:$0xff] }
 0x297   : > { %1773 = vst.msk [vmem:[#allocation3 + $0x60] sm:$0xff] %vm1026_vm2, %v1731_v3  ;;  %v6896_v60 = vpop.f32.mrf.mxu0  ;;  %v2199_v37 = vadd.f32 %v2157_v49, %v8462_v17  ;;  %v1692_v49 = vld [vmem:[#allocation3 + $0x78] sm:$0xff] }
 0x298   : > { %v1561_v19 = vpop.f32.mrf.mxu1 }
 0x299   : > { %v1732_v38 = vadd.f32 %v1690_v51, %v1561_v19  ;;  %v8771_v42 = vpop.f32.mrf.mxu0  ;;  %2241 = vst.msk [vmem:[#allocation3 + $0x50] sm:$0xff] %vm1026_vm2, %v2199_v37  ;;  %v8797_v19 = vld [vmem:[#allocation2 + $0xdf] sm:$0xff] }
 0x29a   : > { %v6753_v12 = vpop.f32.mrf.mxu1  ;;  %v2158_v39 = vld [vmem:[#allocation3 + $0x58] sm:$0xff] }
 0x29b   : > { %1774 = vst.msk [vmem:[#allocation3 + $0x68] sm:$0xff] %vm1026_vm2, %v1732_v38  ;;  %v6897_v17 = vpop.f32.mrf.mxu0  ;;  %v2200_v11 = vadd.f32 %v2158_v39, %v8469_v31  ;;  %v2326_v38 = vpack.c.bf16 %v8792_v26, %v8797_v19  ;;  %v3729_v12 = vpack.c.bf16 %v8672_v63, %v8645_v59 }
 0x29c   : > { %v1566_v61 = vpop.f32.mrf.mxu1  ;;  %6943 = vmatmul.mubr.msk.bf16.gmra.mxu1 %vm1026_vm2, %v2325_v58  ;;  %7179 = vmatmul.mubr.msk.bf16.gmra.mxu0 %vm1026_vm2, %v3728_v43  ;;  %v1693_v17 = vld [vmem:[#allocation3 + $0x80] sm:$0xff] }
 0x29d   : > { %v1733_v22 = vadd.f32 %v1691_v52, %v1566_v61  ;;  %v8784_v23 = vpop.f32.mrf.mxu0  ;;  %6946 = vmatprep.mubr.msk.bf16.mxu1 %vm7592_vm0, %v7591_v1  ;;  %7182 = vmatprep.mubr.msk.bf16.mxu0 %vm7592_vm0, %v7591_v1  ;;  %2242 = vst.msk [vmem:[#allocation3 + $0x58] sm:$0xff] %vm1026_vm2, %v2200_v11  ;;  %v8816_v52 = vld [vmem:[#allocation2 + $0xf7] sm:$0xff] }
 0x29e   : > { %v6756_v44 = vpop.f32.mrf.mxu1  ;;  %v2159_v13 = vld [vmem:[#allocation3 + $0x60] sm:$0xff] }
 0x29f   : > { %1775 = vst.msk [vmem:[#allocation3 + $0x70] sm:$0xff] %vm1026_vm2, %v1733_v22  ;;  %v6992_v31 = vpop.f32.mrf.mxu0  ;;  %v2201_v3 = vadd.f32 %v2159_v13, %v8480_v40  ;;  %v1694_v13 = vld [vmem:[#allocation3 + $0x88] sm:$0xff] }
 0x2a0   : > { %v1569_v14 = vpop.f32.mrf.mxu1 }
 0x2a1   : > { %v1734_v60 = vadd.f32 %v1692_v49, %v1569_v14  ;;  %v8795_v37 = vpop.f32.mrf.mxu0  ;;  %2243 = vst.msk [vmem:[#allocation3 + $0x60] sm:$0xff] %vm1026_vm2, %v2201_v3  ;;  %v8821_v14 = vld [vmem:[#allocation2 + $0xef] sm:$0xff]  ;;  %v7578_v49 = vld [vmem:[%s10243_s3 + $0x80] sm:$0xff]  }
 0x2a2   : > { %v6757_v51 = vpop.f32.mrf.mxu1  ;;  %v2160_v58 = vld [vmem:[#allocation3 + $0x68] sm:$0xff]  ;;  %7341 = vmatpush3.bf16.msra.mxu0 %v7578_v49 }
 0x2a3   : > { %1776 = vst.msk [vmem:[#allocation3 + $0x78] sm:$0xff] %vm1026_vm2, %v1734_v60  ;;  %v6993_v40 = vpop.f32.mrf.mxu0  ;;  %v2202_v43 = vadd.f32 %v2160_v58, %v8487_v6  ;;  %v2327_v51 = vpack.c.bf16 %v8816_v52, %v8821_v14 }
 0x2a4   : > { %v1574_v39 = vpop.f32.mrf.mxu1  ;;  %6947 = vmatmul.mubr.msk.bf16.gmra.mxu1 %vm1026_vm2, %v2326_v38  ;;  %7183 = vmatmul.mubr.msk.bf16.gmra.mxu0 %vm1026_vm2, %v3729_v12 }
 0x2a5   : > { %v1735_v11 = vadd.f32 %v1693_v17, %v1574_v39  ;;  %v8808_v61 = vpop.f32.mrf.mxu0  ;;  %6950 = vmatprep.mubr.msk.bf16.mxu1 %vm7592_vm0, %v7591_v1  ;;  %7186 = vmatprep.mubr.msk.bf16.mxu0 %vm7592_vm0, %v7591_v1  ;;  %2244 = vst.msk [vmem:[#allocation3 + $0x68] sm:$0xff] %vm1026_vm2, %v2202_v43  ;;  %v1695_v43 = vld [vmem:[#allocation3 + $0x90] sm:$0xff] }
 0x2a6   : > { %v6760_v59 = vpop.f32.mrf.mxu1  ;;  %v2161_v63 = vld [vmem:[#allocation3 + $0x70] sm:$0xff] }
 0x2a7   : > { %1777 = vst.msk [vmem:[#allocation3 + $0x80] sm:$0xff] %vm1026_vm2, %v1735_v11  ;;  %v6996_v6 = vpop.f32.mrf.mxu0  ;;  %v2203_v22 = vadd.f32 %v2161_v63, %v8497_v9  ;;  %v3730_v9 = vpack.c.bf16 %v8697_v50, %v8667_v46  ;;  %v8843_v11 = vld [vmem:[#allocation2 + $0x107] sm:$0xff] }
 0x2a8   : > { %v1577_v44 = vpop.f32.mrf.mxu1  ;;  %v1696_v6 = vld [vmem:[#allocation3 + $0x98] sm:$0xff] }
 0x2a9   : > { %v1736_v31 = vadd.f32 %v1694_v13, %v1577_v44  ;;  %v8819_v3 = vpop.f32.mrf.mxu0  ;;  %2245 = vst.msk [vmem:[#allocation3 + $0x70] sm:$0xff] %vm1026_vm2, %v2203_v22  ;;  %v8848_v13 = vld [vmem:[#allocation2 + $0xff] sm:$0xff] }
 0x2aa   : > { %v6761_v60 = vpop.f32.mrf.mxu1  ;;  %v2162_v38 = vld [vmem:[#allocation3 + $0x78] sm:$0xff]  ;;  %v2328_v49 = vpack.c.bf16 %v8843_v11, %v8848_v13 }
 0x2ab   : > { %1778 = vst.msk [vmem:[#allocation3 + $0x88] sm:$0xff] %vm1026_vm2, %v1736_v31  ;;  %v6997_v12 = vpop.f32.mrf.mxu0  ;;  %v2204_v58 = vadd.f32 %v2162_v38, %v8504_v2  ;;  %v3731_v60 = vpack.c.bf16 %v8725_v47, %v8692_v34 }
 0x2ac   : > { %v1582_v40 = vpop.f32.mrf.mxu1  ;;  %6951 = vmatmul.mubr.msk.bf16.gmra.mxu1 %vm1026_vm2, %v2327_v51  ;;  %7187 = vmatmul.mubr.msk.bf16.gmra.mxu0 %vm1026_vm2, %v3730_v9  ;;  %v1697_v12 = vld [vmem:[#allocation3 + $0xa0] sm:$0xff] }
 0x2ad   : > { %v1737_v39 = vadd.f32 %v1695_v43, %v1582_v40  ;;  %v8835_v17 = vpop.f32.mrf.mxu0  ;;  %6954 = vmatprep.mubr.msk.bf16.mxu1 %vm7592_vm0, %v7591_v1  ;;  %7190 = vmatprep.mubr.msk.bf16.mxu0 %vm7592_vm0, %v7591_v1  ;;  %2246 = vst.msk [vmem:[#allocation3 + $0x78] sm:$0xff] %vm1026_vm2, %v2204_v58  ;;  %v8867_v43 = vld [vmem:[#allocation2 + $0x117] sm:$0xff] }
 0x2ae   : > { %v6764_v46 = vpop.f32.mrf.mxu1  ;;  %v2163_v50 = vld [vmem:[#allocation3 + $0x80] sm:$0xff] }
 0x2af   : > { %1779 = vst.msk [vmem:[#allocation3 + $0x90] sm:$0xff] %vm1026_vm2, %v1737_v39  ;;  %v7000_v2 = vpop.f32.mrf.mxu0  ;;  %v2205_v59 = vadd.f32 %v2163_v50, %v8514_v4  ;;  %v1698_v50 = vld [vmem:[#allocation3 + $0xa8] sm:$0xff] }
 0x2b0   : > { %v1585_v63 = vpop.f32.mrf.mxu1 }
 0x2b1   : > { %v1738_v22 = vadd.f32 %v1696_v6, %v1585_v63  ;;  %v8846_v44 = vpop.f32.mrf.mxu0  ;;  %2247 = vst.msk [vmem:[#allocation3 + $0x80] sm:$0xff] %vm1026_vm2, %v2205_v59  ;;  %v8872_v63 = vld [vmem:[#allocation2 + $0x10f] sm:$0xff] }
 0x2b2   : > { %v6765_v31 = vpop.f32.mrf.mxu1  ;;  %v2164_v51 = vld [vmem:[#allocation3 + $0x88] sm:$0xff] }
 0x2b3   : > { %1780 = vst.msk [vmem:[#allocation3 + $0x98] sm:$0xff] %vm1026_vm2, %v1738_v22  ;;  %v7001_v4 = vpop.f32.mrf.mxu0  ;;  %v2206_v9 = vadd.f32 %v2164_v51, %v8521_v21  ;;  %v2329_v22 = vpack.c.bf16 %v8867_v43, %v8872_v63  ;;  %v3732_v31 = vpack.c.bf16 %v8749_v62, %v8719_v20 }
 0x2b4   : > { %v1590_v38 = vpop.f32.mrf.mxu1  ;;  %6955 = vmatmul.mubr.msk.bf16.gmra.mxu1 %vm1026_vm2, %v2328_v49  ;;  %7191 = vmatmul.mubr.msk.bf16.gmra.mxu0 %vm1026_vm2, %v3731_v60  ;;  %v1699_v4 = vld [vmem:[#allocation3 + $0xb0] sm:$0xff] }
 0x2b5   : > { %v1739_v58 = vadd.f32 %v1697_v12, %v1590_v38  ;;  %v8859_v40 = vpop.f32.mrf.mxu0  ;;  %6958 = vmatprep.mubr.msk.bf16.mxu1 %vm7592_vm0, %v7591_v1  ;;  %7194 = vmatprep.mubr.msk.bf16.mxu0 %vm7592_vm0, %v7591_v1  ;;  %2248 = vst.msk [vmem:[#allocation3 + $0x88] sm:$0xff] %vm1026_vm2, %v2206_v9  ;;  %v8891_v12 = vld [vmem:[#allocation2 + $0x127] sm:$0xff] }
 0x2b6   : > { %v6768_v34 = vpop.f32.mrf.mxu1  ;;  %v2165_v47 = vld [vmem:[#allocation3 + $0x90] sm:$0xff] }
 0x2b7   : > { %1781 = vst.msk [vmem:[#allocation3 + $0xa0] sm:$0xff] %vm1026_vm2, %v1739_v58  ;;  %v7004_v21 = vpop.f32.mrf.mxu0  ;;  %v2207_v39 = vadd.f32 %v2165_v47, %v8531_v15  ;;  %v1700_v47 = vld [vmem:[#allocation3 + $0xb8] sm:$0xff] }
 0x2b8   : > { %v1593_v46 = vpop.f32.mrf.mxu1 }
 0x2b9   : > { %v1740_v2 = vadd.f32 %v1698_v50, %v1593_v46  ;;  %v8870_v59 = vpop.f32.mrf.mxu0  ;;  %2249 = vst.msk [vmem:[#allocation3 + $0x90] sm:$0xff] %vm1026_vm2, %v2207_v39  ;;  %v8896_v46 = vld [vmem:[#allocation2 + $0x11f] sm:$0xff] }
 0x2ba   : > { %v6769_v6 = vpop.f32.mrf.mxu1  ;;  %v2166_v49 = vld [vmem:[#allocation3 + $0x98] sm:$0xff] }
 0x2bb   : > { %1782 = vst.msk [vmem:[#allocation3 + $0xa8] sm:$0xff] %vm1026_vm2, %v1740_v2  ;;  %v7005_v15 = vpop.f32.mrf.mxu0  ;;  %v2208_v60 = vadd.f32 %v2166_v49, %v8538_v41  ;;  %v2330_v2 = vpack.c.bf16 %v8891_v12, %v8896_v46  ;;  %v3733_v6 = vpack.c.bf16 %v8773_v57, %v8744_v8 }
 0x2bc   : > { %v1598_v51 = vpop.f32.mrf.mxu1  ;;  %6959 = vmatmul.mubr.msk.bf16.gmra.mxu1 %vm1026_vm2, %v2329_v22  ;;  %7195 = vmatmul.mubr.msk.bf16.gmra.mxu0 %vm1026_vm2, %v3732_v31  ;;  %v1701_v15 = vld [vmem:[#allocation3 + $0xc0] sm:$0xff] }
 0x2bd   : > { %v1741_v9 = vadd.f32 %v1699_v4, %v1598_v51  ;;  %v8883_v38 = vpop.f32.mrf.mxu0  ;;  %6962 = vmatprep.mubr.msk.bf16.mxu1 %vm7592_vm0, %v7591_v1  ;;  %7198 = vmatprep.mubr.msk.bf16.mxu0 %vm7592_vm0, %v7591_v1  ;;  %2250 = vst.msk [vmem:[#allocation3 + $0x98] sm:$0xff] %vm1026_vm2, %v2208_v60  ;;  %v8915_v4 = vld [vmem:[#allocation2 + $0x137] sm:$0xff] }
 0x2be   : > { %v6772_v20 = vpop.f32.mrf.mxu1  ;;  %v2167_v62 = vld [vmem:[#allocation3 + $0xa0] sm:$0xff] }
 0x2bf   : > { %1783 = vst.msk [vmem:[#allocation3 + $0xb0] sm:$0xff] %vm1026_vm2, %v1741_v9  ;;  %v7008_v41 = vpop.f32.mrf.mxu0  ;;  %v2209_v58 = vadd.f32 %v2167_v62, %v8548_v25  ;;  %v1702_v62 = vld [vmem:[#allocation3 + $0xc8] sm:$0xff] }
 0x2c0   : > { %v1601_v34 = vpop.f32.mrf.mxu1 }
 0x2c1   : > { %v1742_v21 = vadd.f32 %v1700_v47, %v1601_v34  ;;  %v8894_v39 = vpop.f32.mrf.mxu0  ;;  %2251 = vst.msk [vmem:[#allocation3 + $0xa0] sm:$0xff] %vm1026_vm2, %v2209_v58  ;;  %v8920_v34 = vld [vmem:[#allocation2 + $0x12f] sm:$0xff] }
 0x2c2   : > { %v6773_v50 = vpop.f32.mrf.mxu1  ;;  %v2168_v22 = vld [vmem:[#allocation3 + $0xa8] sm:$0xff] }
 0x2c3   : > { %1784 = vst.msk [vmem:[#allocation3 + $0xb8] sm:$0xff] %vm1026_vm2, %v1742_v21  ;;  %v7009_v25 = vpop.f32.mrf.mxu0  ;;  %v2210_v31 = vadd.f32 %v2168_v22, %v8555_v32  ;;  %v2331_v21 = vpack.c.bf16 %v8915_v4, %v8920_v34  ;;  %v3734_v50 = vpack.c.bf16 %v8797_v19, %v8768_v36 }
 0x2c4   : > { %v1606_v49 = vpop.f32.mrf.mxu1  ;;  %6963 = vmatmul.mubr.msk.bf16.gmra.mxu1 %vm1026_vm2, %v2330_v2  ;;  %7199 = vmatmul.mubr.msk.bf16.gmra.mxu0 %vm1026_vm2, %v3733_v6  ;;  %v1703_v25 = vld [vmem:[#allocation3 + $0xd0] sm:$0xff] }
 0x2c5   : > { %v1743_v60 = vadd.f32 %v1701_v15, %v1606_v49  ;;  %v8907_v51 = vpop.f32.mrf.mxu0  ;;  %6966 = vmatprep.mubr.msk.bf16.mxu1 %vm7592_vm0, %v7591_v1  ;;  %7202 = vmatprep.mubr.msk.bf16.mxu0 %vm7592_vm0, %v7591_v1  ;;  %2252 = vst.msk [vmem:[#allocation3 + $0xa8] sm:$0xff] %vm1026_vm2, %v2210_v31  ;;  %v8939_v15 = vld [vmem:[#allocation2 + $0x147] sm:$0xff] }
 0x2c6   : > { %v6776_v8 = vpop.f32.mrf.mxu1  ;;  %v2169_v57 = vld [vmem:[#allocation3 + $0xb0] sm:$0xff] }
 0x2c7   : > { %1785 = vst.msk [vmem:[#allocation3 + $0xc0] sm:$0xff] %vm1026_vm2, %v1743_v60  ;;  %v7012_v32 = vpop.f32.mrf.mxu0  ;;  %v2211_v9 = vadd.f32 %v2169_v57, %v8565_v30  ;;  %v1704_v57 = vld [vmem:[#allocation3 + $0xd8] sm:$0xff] }
 0x2c8   : > { %v1609_v20 = vpop.f32.mrf.mxu1 }
 0x2c9   : > { %v1744_v41 = vadd.f32 %v1702_v62, %v1609_v20  ;;  %v8918_v58 = vpop.f32.mrf.mxu0  ;;  %2253 = vst.msk [vmem:[#allocation3 + $0xb0] sm:$0xff] %vm1026_vm2, %v2211_v9  ;;  %v8944_v20 = vld [vmem:[#allocation2 + $0x13f] sm:$0xff] }
 0x2ca   : > { %v6777_v47 = vpop.f32.mrf.mxu1  ;;  %v2170_v2 = vld [vmem:[#allocation3 + $0xb8] sm:$0xff] }
 0x2cb   : > { %1786 = vst.msk [vmem:[#allocation3 + $0xc8] sm:$0xff] %vm1026_vm2, %v1744_v41  ;;  %v7013_v30 = vpop.f32.mrf.mxu0  ;;  %v2212_v6 = vadd.f32 %v2170_v2, %v8578_v54  ;;  %v2332_v41 = vpack.c.bf16 %v8939_v15, %v8944_v20  ;;  %v3735_v47 = vpack.c.bf16 %v8821_v14, %v8792_v26 }
 0x2cc   : > { %v1614_v22 = vpop.f32.mrf.mxu1  ;;  %6967 = vmatmul.mubr.msk.bf16.gmra.mxu1 %vm1026_vm2, %v2331_v21  ;;  %7203 = vmatmul.mubr.msk.bf16.gmra.mxu0 %vm1026_vm2, %v3734_v50  ;;  %v1705_v30 = vld [vmem:[#allocation3 + $0xe0] sm:$0xff] }
 0x2cd   : > { %v1745_v31 = vadd.f32 %v1703_v25, %v1614_v22  ;;  %v8931_v49 = vpop.f32.mrf.mxu0  ;;  %6970 = vmatprep.mubr.msk.bf16.mxu1 %vm7592_vm0, %v7591_v1  ;;  %7206 = vmatprep.mubr.msk.bf16.mxu0 %vm7592_vm0, %v7591_v1  ;;  %2254 = vst.msk [vmem:[#allocation3 + $0xb8] sm:$0xff] %vm1026_vm2, %v2212_v6  ;;  %v8963_v25 = vld [vmem:[#allocation2 + $0x157] sm:$0xff] }
 0x2ce   : > { %v6780_v36 = vpop.f32.mrf.mxu1  ;;  %v2171_v19 = vld [vmem:[#allocation3 + $0xc0] sm:$0xff] }
 0x2cf   : > { %1787 = vst.msk [vmem:[#allocation3 + $0xd0] sm:$0xff] %vm1026_vm2, %v1745_v31  ;;  %v7016_v54 = vpop.f32.mrf.mxu0  ;;  %v2213_v60 = vadd.f32 %v2171_v19, %v8585_v27  ;;  %v1706_v19 = vld [vmem:[#allocation3 + $0xe8] sm:$0xff] }
 0x2d0   : > { %v1617_v8 = vpop.f32.mrf.mxu1 }
 0x2d1   : > { %v1746_v32 = vadd.f32 %v1704_v57, %v1617_v8  ;;  %v8942_v9 = vpop.f32.mrf.mxu0  ;;  %2255 = vst.msk [vmem:[#allocation3 + $0xc0] sm:$0xff] %vm1026_vm2, %v2213_v60  ;;  %v8968_v8 = vld [vmem:[#allocation2 + $0x14f] sm:$0xff] }
 0x2d2   : > { %v6781_v62 = vpop.f32.mrf.mxu1  ;;  %v2172_v21 = vld [vmem:[#allocation3 + $0xc8] sm:$0xff] }
 0x2d3   : > { %1788 = vst.msk [vmem:[#allocation3 + $0xd8] sm:$0xff] %vm1026_vm2, %v1746_v32  ;;  %v7017_v27 = vpop.f32.mrf.mxu0  ;;  %v2214_v50 = vadd.f32 %v2172_v21, %v8594_v48  ;;  %v2333_v32 = vpack.c.bf16 %v8963_v25, %v8968_v8  ;;  %v3736_v62 = vpack.c.bf16 %v8848_v13, %v8816_v52 }
 0x2d4   : > { %v1622_v2 = vpop.f32.mrf.mxu1  ;;  %6971 = vmatmul.mubr.msk.bf16.gmra.mxu1 %vm1026_vm2, %v2332_v41  ;;  %7207 = vmatmul.mubr.msk.bf16.gmra.mxu0 %vm1026_vm2, %v3735_v47  ;;  %v1707_v27 = vld [vmem:[#allocation3 + $0xf0] sm:$0xff] }
 0x2d5   : > { %v1747_v6 = vadd.f32 %v1705_v30, %v1622_v2  ;;  %v8955_v22 = vpop.f32.mrf.mxu0  ;;  %6974 = vmatprep.mubr.msk.bf16.mxu1 %vm7592_vm0, %v7591_v1  ;;  %7210 = vmatprep.mubr.msk.bf16.mxu0 %vm7592_vm0, %v7591_v1  ;;  %2256 = vst.msk [vmem:[#allocation3 + $0xc8] sm:$0xff] %vm1026_vm2, %v2214_v50  ;;  %v8987_v30 = vld [vmem:[#allocation2 + $0x167] sm:$0xff] }
 0x2d6   : > { %v6784_v26 = vpop.f32.mrf.mxu1  ;;  %v2173_v14 = vld [vmem:[#allocation3 + $0xd0] sm:$0xff] }
 0x2d7   : > { %1789 = vst.msk [vmem:[#allocation3 + $0xe0] sm:$0xff] %vm1026_vm2, %v1747_v6  ;;  %v7020_v48 = vpop.f32.mrf.mxu0  ;;  %v2215_v31 = vadd.f32 %v2173_v14, %v8603_v24  ;;  %v1708_v14 = vld [vmem:[#allocation3 + $0xf8] sm:$0xff] }
 0x2d8   : > { %v1625_v36 = vpop.f32.mrf.mxu1 }
 0x2d9   : > { %v1748_v54 = vadd.f32 %v1706_v19, %v1625_v36  ;;  %v8966_v60 = vpop.f32.mrf.mxu0  ;;  %2257 = vst.msk [vmem:[#allocation3 + $0xd0] sm:$0xff] %vm1026_vm2, %v2215_v31  ;;  %v8992_v36 = vld [vmem:[#allocation2 + $0x15f] sm:$0xff] }
 0x2da   : > { %v6785_v57 = vpop.f32.mrf.mxu1  ;;  %v2174_v41 = vld [vmem:[#allocation3 + $0xd8] sm:$0xff] }
 0x2db   : > { %1790 = vst.msk [vmem:[#allocation3 + $0xe8] sm:$0xff] %vm1026_vm2, %v1748_v54  ;;  %v7021_v24 = vpop.f32.mrf.mxu0  ;;  %v2216_v47 = vadd.f32 %v2174_v41, %v8612_v55  ;;  %v2334_v54 = vpack.c.bf16 %v8987_v30, %v8992_v36  ;;  %v3737_v57 = vpack.c.bf16 %v8872_v63, %v8843_v11 }
 0x2dc   : > { %v1630_v21 = vpop.f32.mrf.mxu1  ;;  %6975 = vmatmul.mubr.msk.bf16.gmra.mxu1 %vm1026_vm2, %v2333_v32  ;;  %7211 = vmatmul.mubr.msk.bf16.gmra.mxu0 %vm1026_vm2, %v3736_v62  ;;  %v1709_v24 = vld [vmem:[#allocation3 + $0x100] sm:$0xff] }
 0x2dd   : > { %v1749_v50 = vadd.f32 %v1707_v27, %v1630_v21  ;;  %v8979_v2 = vpop.f32.mrf.mxu0  ;;  %6978 = vmatprep.mubr.msk.bf16.mxu1 %vm7592_vm0, %v7591_v1  ;;  %7214 = vmatprep.mubr.msk.bf16.mxu0 %vm7592_vm0, %v7591_v1  ;;  %2258 = vst.msk [vmem:[#allocation3 + $0xd8] sm:$0xff] %vm1026_vm2, %v2216_v47  ;;  %v9011_v27 = vld [vmem:[#allocation2 + $0x177] sm:$0xff] }
 0x2de   : > { %v6788_v52 = vpop.f32.mrf.mxu1  ;;  %v2175_v13 = vld [vmem:[#allocation3 + $0xe0] sm:$0xff] }
 0x2df   : > { %1791 = vst.msk [vmem:[#allocation3 + $0xf0] sm:$0xff] %vm1026_vm2, %v1749_v50  ;;  %v7024_v55 = vpop.f32.mrf.mxu0  ;;  %v2217_v6 = vadd.f32 %v2175_v13, %v8620_v16  ;;  %v1710_v13 = vld [vmem:[#allocation3 + $0x108] sm:$0xff] }
 0x2e0   : > { %v1633_v26 = vpop.f32.mrf.mxu1 }
 0x2e1   : > { %v1750_v48 = vadd.f32 %v1708_v14, %v1633_v26  ;;  %v8990_v31 = vpop.f32.mrf.mxu0  ;;  %2259 = vst.msk [vmem:[#allocation3 + $0xe0] sm:$0xff] %vm1026_vm2, %v2217_v6  ;;  %v9016_v26 = vld [vmem:[#allocation2 + $0x16f] sm:$0xff] }
 0x2e2   : > { %v6789_v19 = vpop.f32.mrf.mxu1  ;;  %v2176_v32 = vld [vmem:[#allocation3 + $0xe8] sm:$0xff] }
 0x2e3   : > { %1792 = vst.msk [vmem:[#allocation3 + $0xf8] sm:$0xff] %vm1026_vm2, %v1750_v48  ;;  %v7025_v16 = vpop.f32.mrf.mxu0  ;;  %v2218_v62 = vadd.f32 %v2176_v32, %v8629_v5  ;;  %v2335_v48 = vpack.c.bf16 %v9011_v27, %v9016_v26  ;;  %v3738_v19 = vpack.c.bf16 %v8896_v46, %v8867_v43 }
 0x2e4   : > { %v1638_v41 = vpop.f32.mrf.mxu1  ;;  %6979 = vmatmul.mubr.msk.bf16.gmra.mxu1 %vm1026_vm2, %v2334_v54  ;;  %7215 = vmatmul.mubr.msk.bf16.gmra.mxu0 %vm1026_vm2, %v3737_v57  ;;  %v1711_v16 = vld [vmem:[#allocation3 + $0x110] sm:$0xff] }
 0x2e5   : > { %v1751_v47 = vadd.f32 %v1709_v24, %v1638_v41  ;;  %v9003_v21 = vpop.f32.mrf.mxu0  ;;  %6982 = vmatprep.mubr.msk.bf16.mxu1 %vm7592_vm0, %v7591_v1  ;;  %7218 = vmatprep.mubr.msk.bf16.mxu0 %vm7592_vm0, %v7591_v1  ;;  %2260 = vst.msk [vmem:[#allocation3 + $0xe8] sm:$0xff] %vm1026_vm2, %v2218_v62  ;;  %v3214_v24 = vld [vmem:[#allocation2 + $0x39] sm:$0xff] }
 0x2e6   : > { %v6792_v11 = vpop.f32.mrf.mxu1  ;;  %v2177_v63 = vld [vmem:[#allocation3 + $0xf0] sm:$0xff] }
 0x2e7   : > { %1793 = vst.msk [vmem:[#allocation3 + $0x100] sm:$0xff] %vm1026_vm2, %v1751_v47  ;;  %v7028_v5 = vpop.f32.mrf.mxu0  ;;  %v2219_v50 = vadd.f32 %v2177_v63, %v8638_v35  ;;  %v1712_v63 = vld [vmem:[#allocation3 + $0x118] sm:$0xff] }
 0x2e8   : > { %v1641_v52 = vpop.f32.mrf.mxu1 }
 0x2e9   : > { %v1752_v55 = vadd.f32 %v1710_v13, %v1641_v52  ;;  %v9014_v6 = vpop.f32.mrf.mxu0  ;;  %2261 = vst.msk [vmem:[#allocation3 + $0xf0] sm:$0xff] %vm1026_vm2, %v2219_v50  ;;  %v3213_v52 = vld [vmem:[#allocation2 + $0x31] sm:$0xff] }
 0x2ea   : > { %v6793_v14 = vpop.f32.mrf.mxu1  ;;  %v2178_v54 = vld [vmem:[#allocation3 + $0xf8] sm:$0xff]  ;;  %v7576_v13 = vld [vmem:[%s10243_s3 + $0x78] sm:$0xff]  }
 0x2eb   : > { %1794 = vst.msk [vmem:[#allocation3 + $0x108] sm:$0xff] %vm1026_vm2, %v1752_v55  ;;  %v7029_v35 = vpop.f32.mrf.mxu0  ;;  %v2220_v57 = vadd.f32 %v2178_v54, %v8648_v0  ;;  %v3255_v14 = vpack.c.bf16 %v3214_v24, %v3213_v52  ;;  %v1714_v24 = vld [vmem:[#allocation3 + $0x128] sm:$0xff] }
 0x2ec   : > { %v1646_v32 = vpop.f32.mrf.mxu1  ;;  %6983 = vmatmul.mubr.msk.bf16.gmra.mxu1 %vm1026_vm2, %v2335_v48  ;;  %7219 = vmatmul.mubr.msk.bf16.gmra.mxu0 %vm1026_vm2, %v3738_v19  ;;  %v3739_v48 = vpack.c.bf16 %v8920_v34, %v8891_v12  ;;  %v7579_v12 = vld [vmem:[%s10243_s3 + $0x70] sm:$0xff]  }
 0x2ed   : > { %v1753_v62 = vadd.f32 %v1711_v16, %v1646_v32  ;;  %v9027_v41 = vpop.f32.mrf.mxu0  ;;  %7078 = vmatprep.mubr.msk.bf16.mxu1 %vm7592_vm0, %v7591_v1  ;;  %7222 = vmatprep.mubr.msk.bf16.mxu0 %vm7592_vm0, %v7591_v1  ;;  %2262 = vst.msk [vmem:[#allocation3 + $0xf8] sm:$0xff] %vm1026_vm2, %v2220_v57  ;;  %v1713_v57 = vld [vmem:[#allocation3 + $0x120] sm:$0xff] }
 0x2ee   : > { %v6796_v43 = vpop.f32.mrf.mxu1  ;;  %v2179_v46 = vld [vmem:[#allocation3 + $0x100] sm:$0xff] }
 0x2ef   : > { %1795 = vst.msk [vmem:[#allocation3 + $0x110] sm:$0xff] %vm1026_vm2, %v1753_v62  ;;  %v7032_v0 = vpop.f32.mrf.mxu0  ;;  %v2221_v47 = vadd.f32 %v2179_v46, %v8659_v7  ;;  %v9060_v43 = vld [vmem:[#allocation2 + $0x49] sm:$0xff] }
 0x2f0   : > { %v1649_v11 = vpop.f32.mrf.mxu1 }
 0x2f1   : > { %v1754_v5 = vadd.f32 %v1712_v63, %v1649_v11  ;;  %v9036_v50 = vpop.f32.mrf.mxu0  ;;  %2263 = vst.msk [vmem:[#allocation3 + $0x100] sm:$0xff] %vm1026_vm2, %v2221_v47  ;;  %v3215_v63 = vld [vmem:[#allocation2 + $0x41] sm:$0xff] }
 0x2f2   : > { %v6797_v55 = vpop.f32.mrf.mxu1  ;;  %v2180_v19 = vld [vmem:[#allocation3 + $0x108] sm:$0xff]  ;;  %v3256_v52 = vpack.c.bf16 %v9060_v43, %v3215_v63 }
 0x2f3   : > { %1796 = vst.msk [vmem:[#allocation3 + $0x118] sm:$0xff] %vm1026_vm2, %v1754_v5  ;;  %v7033_v7 = vpop.f32.mrf.mxu0  ;;  %v2222_v54 = vadd.f32 %v2180_v19, %v8670_v10  ;;  %v1715_v19 = vld [vmem:[#allocation3 + $0x130] sm:$0xff] }
 0x2f4   : > { %v1654_v35 = vpop.f32.mrf.mxu1  ;;  %7079 = vmatmul.mubr.msk.bf16.vlgmr.msra.gmra.mxu1 %vm1026_vm2, %v3255_v14  ;;  %7223 = vmatmul.mubr.msk.bf16.gmra.mxu0 %vm1026_vm2, %v3739_v48 }
 0x2f5   : > { %v1755_v32 = vadd.f32 %v1713_v57, %v1654_v35  ;;  %v9048_v16 = vpop.f32.mrf.mxu0  ;;  %7251 = vmatpush3.bf16.msra.mxu1 %v7576_v13  ;;  %7082 = vmatprep.mubr.msk.bf16.mxu1 %vm7592_vm0, %v7591_v1  ;;  %2264 = vst.msk [vmem:[#allocation3 + $0x108] sm:$0xff] %vm1026_vm2, %v2222_v54  ;;  %v3740_v13 = vpack.c.bf16 %v8944_v20, %v8915_v4  ;;  %v9082_v35 = vld [vmem:[#allocation2 + $0x59] sm:$0xff] }
 0x2f6   : > { %v6800_v10 = vpop.f32.mrf.mxu1  ;;  %7226 = vmatprep.mubr.msk.bf16.mxu0 %vm7592_vm0, %v7591_v1  ;;  %7252 = vmatprep.subr.bf16.mxu1 %v7591_v1  ;;  %v2181_v34 = vld [vmem:[#allocation3 + $0x110] sm:$0xff] }
 0x2f7   : > { %1797 = vst.msk [vmem:[#allocation3 + $0x120] sm:$0xff] %vm1026_vm2, %v1755_v32  ;;  %v7036_v62 = vpop.f32.mrf.mxu0  ;;  %v2223_v46 = vadd.f32 %v2181_v34, %v8684_v33 }
 0x2f8   : > { %v1657_v0 = vpop.f32.mrf.mxu1  ;;  %v9087_v62 = vld [vmem:[#allocation2 + $0x51] sm:$0xff] }
 0x2f9   : > { %v1756_v47 = vadd.f32 %v1714_v24, %v1657_v0  ;;  %v9063_v11 = vpop.f32.mrf.mxu0  ;;  %7253 = vmatpush3.bf16.msra.mxu1 %v7579_v12  ;;  %2265 = vst.msk [vmem:[#allocation3 + $0x110] sm:$0xff] %vm1026_vm2, %v2223_v46  ;;  %v1716_v12 = vld [vmem:[#allocation3 + $0x138] sm:$0xff]  ;;  %v3257_v0 = vpack.c.bf16 %v9082_v35, %v9087_v62  ;;  %v3741_v24 = vpack.c.bf16 %v8968_v8, %v8939_v15 }
 0x2fa   : > { %v6801_v5 = vpop.f32.mrf.mxu1  ;;  %v2182_v55 = vld [vmem:[#allocation3 + $0x118] sm:$0xff]  ;;  %7426 = vmatprep.subr.bf16.mxu1 %v7591_v1 }
 0x2fb   : > { %1798 = vst.msk [vmem:[#allocation3 + $0x128] sm:$0xff] %vm1026_vm2, %v1756_v47  ;;  %v7037_v33 = vpop.f32.mrf.mxu0  ;;  %v2224_v14 = vadd.f32 %v2182_v55, %v8695_v28 }
 0x2fc   : > { %v1662_v48 = vpop.f32.mrf.mxu1  ;;  %7083 = vmatmul.mubr.msk.bf16.gmra.mxu1 %vm1026_vm2, %v3256_v52  ;;  %7227 = vmatmul.mubr.msk.bf16.gmra.mxu0 %vm1026_vm2, %v3740_v13  ;;  %v1717_v52 = vld [vmem:[#allocation3 + $0x140] sm:$0xff] }
 0x2fd   : > { %v1757_v7 = vadd.f32 %v1715_v19, %v1662_v48  ;;  %v9074_v54 = vpop.f32.mrf.mxu0  ;;  %7086 = vmatprep.mubr.msk.bf16.mxu1 %vm7592_vm0, %v7591_v1  ;;  %7230 = vmatprep.mubr.msk.bf16.mxu0 %vm7592_vm0, %v7591_v1  ;;  %2266 = vst.msk [vmem:[#allocation3 + $0x118] sm:$0xff] %vm1026_vm2, %v2224_v14  ;;  %v9106_v33 = vld [vmem:[#allocation2 + $0x69] sm:$0xff]  ;;  %v1718_v19 = vld [vmem:[#allocation3 + $0x148] sm:$0xff] }
 0x2fe   : > { %v6804_v4 = vpop.f32.mrf.mxu1  ;;  %v2183_v20 = vld [vmem:[#allocation3 + $0x120] sm:$0xff] }
 0x2ff   : > { %1799 = vst.msk [vmem:[#allocation3 + $0x130] sm:$0xff] %vm1026_vm2, %v1757_v7  ;;  %v7040_v28 = vpop.f32.mrf.mxu0  ;;  %v2225_v57 = vadd.f32 %v2183_v20, %v8711_v18  ;;  %v9111_v20 = vld [vmem:[#allocation2 + $0x61] sm:$0xff] }
 0x300   : > { %v1665_v32 = vpop.f32.mrf.mxu1 }
 0x301   : > { %v1758_v10 = vadd.f32 %v1716_v12, %v1665_v32  ;;  %v9085_v34 = vpop.f32.mrf.mxu0  ;;  %2267 = vst.msk [vmem:[#allocation3 + $0x120] sm:$0xff] %vm1026_vm2, %v2225_v57  ;;  %v3258_v57 = vpack.c.bf16 %v9106_v33, %v9111_v20  ;;  %v3742_v32 = vpack.c.bf16 %v8992_v36, %v8963_v25 }
 0x302   : > { %v6805_v46 = vpop.f32.mrf.mxu1  ;;  %v2184_v47 = vld [vmem:[#allocation3 + $0x128] sm:$0xff] }
 0x303   : > { %1800 = vst.msk [vmem:[#allocation3 + $0x138] sm:$0xff] %vm1026_vm2, %v1758_v10  ;;  %v7041_v18 = vpop.f32.mrf.mxu0  ;;  %v2226_v63 = vadd.f32 %v2184_v47, %v8723_v45 }
 0x304   : > { %v1670_v5 = vpop.f32.mrf.mxu1  ;;  %7087 = vmatmul.mubr.msk.bf16.gmra.mxu1 %vm1026_vm2, %v3257_v0  ;;  %7231 = vmatmul.mubr.msk.bf16.gmra.mxu0 %vm1026_vm2, %v3741_v24  ;;  %v2617_v0 = vld [vmem:[#allocation3] sm:$0xff]  ;;  %v9130_v18 = vld [vmem:[#allocation2 + $0x79] sm:$0xff] }
 0x305   : > { %v1759_v13 = vadd.f32 %v1717_v52, %v1670_v5  ;;  %v9098_v55 = vpop.f32.mrf.mxu0  ;;  %7090 = vmatprep.mubr.msk.bf16.mxu1 %vm7592_vm0, %v7591_v1  ;;  %7234 = vmatprep.mubr.msk.bf16.mxu0 %vm7592_vm0, %v7591_v1  ;;  %2268 = vst.msk [vmem:[#allocation3 + $0x128] sm:$0xff] %vm1026_vm2, %v2226_v63  ;;  %v2618_v52 = vld [vmem:[#allocation3 + $0x8] sm:$0xff] }
 0x306   : > { %v6808_v15 = vpop.f32.mrf.mxu1  ;;  %v2185_v8 = vld [vmem:[#allocation3 + $0x130] sm:$0xff] }
 0x307   : > { %1801 = vst.msk [vmem:[#allocation3 + $0x140] sm:$0xff] %vm1026_vm2, %v1759_v13  ;;  %v7044_v45 = vpop.f32.mrf.mxu0  ;;  %v2227_v14 = vadd.f32 %v2185_v8, %v8736_v56  ;;  %v9135_v8 = vld [vmem:[#allocation2 + $0x71] sm:$0xff] }
 0x308   : > { %v1673_v48 = vpop.f32.mrf.mxu1 }
 0x309   : > { %v1760_v7 = vadd.f32 %v1718_v19, %v1673_v48  ;;  %v9109_v4 = vpop.f32.mrf.mxu0  ;;  %2269 = vst.msk [vmem:[#allocation3 + $0x130] sm:$0xff] %vm1026_vm2, %v2227_v14  ;;  %v3259_v14 = vpack.c.bf16 %v9130_v18, %v9135_v8  ;;  %v3743_v48 = vpack.c.bf16 %v9016_v26, %v8987_v30 }
 0x30a   : > { %v6809_v28 = vpop.f32.mrf.mxu1  ;;  %v2186_v12 = vld [vmem:[#allocation3 + $0x138] sm:$0xff] }
 0x30b   : > { %1802 = vst.msk [vmem:[#allocation3 + $0x148] sm:$0xff] %vm1026_vm2, %v1760_v7  ;;  %v7045_v56 = vpop.f32.mrf.mxu0  ;;  %v2228_v10 = vadd.f32 %v2186_v12, %v8747_v53 }
 0x30c   : > { %v2450_v46 = vpop.f32.mrf.mxu1  ;;  %7091 = vmatmul.mubr.msk.bf16.gmra.mxu1 %vm1026_vm2, %v3258_v57  ;;  %7235 = vmatmul.mubr.msk.bf16.gmra.mxu0 %vm1026_vm2, %v3742_v32  ;;  %v2619_v57 = vld [vmem:[#allocation3 + $0x10] sm:$0xff]  ;;  %v9154_v56 = vld [vmem:[#allocation2 + $0x89] sm:$0xff] }
 0x30d   : > { %v2659_v24 = vadd.f32 %v2617_v0, %v2450_v46  ;;  %v9122_v47 = vpop.f32.mrf.mxu0  ;;  %7094 = vmatprep.mubr.msk.bf16.mxu1 %vm7592_vm0, %v7591_v1  ;;  %7238 = vmatprep.mubr.msk.bf16.mxu0 %vm7592_vm0, %v7591_v1  ;;  %2270 = vst.msk [vmem:[#allocation3 + $0x138] sm:$0xff] %vm1026_vm2, %v2228_v10  ;;  %v3722_v10 = vld [vmem:[#allocation2 + $0x17f] sm:$0xff] }
 0x30e   : > { %v6904_v25 = vpop.f32.mrf.mxu1  ;;  %v2187_v36 = vld [vmem:[#allocation3 + $0x140] sm:$0xff] }
 0x30f   : > { %2701 = vst.msk [vmem:[#allocation3] sm:$0xff] %vm1026_vm2, %v2659_v24  ;;  %v7048_v53 = vpop.f32.mrf.mxu0  ;;  %v2229_v63 = vadd.f32 %v2187_v36, %v8760_v29  ;;  %v2620_v24 = vld [vmem:[#allocation3 + $0x18] sm:$0xff] }
 0x310   : > { %v2453_v5 = vpop.f32.mrf.mxu1  ;;  %v9159_v53 = vld [vmem:[#allocation2 + $0x81] sm:$0xff] }
 0x311   : > { %v2660_v13 = vadd.f32 %v2618_v52, %v2453_v5  ;;  %v9133_v15 = vpop.f32.mrf.mxu0  ;;  %2271 = vst.msk [vmem:[#allocation3 + $0x140] sm:$0xff] %vm1026_vm2, %v2229_v63  ;;  %v3260_v5 = vpack.c.bf16 %v9154_v56, %v9159_v53  ;;  %v3744_v52 = vpack.c.bf16 %v3722_v10, %v9011_v27 }
 0x312   : > { %v6905_v45 = vpop.f32.mrf.mxu1  ;;  %v2188_v19 = vld [vmem:[#allocation3 + $0x148] sm:$0xff] }
 0x313   : > { %2702 = vst.msk [vmem:[#allocation3 + $0x8] sm:$0xff] %vm1026_vm2, %v2660_v13  ;;  %v7049_v29 = vpop.f32.mrf.mxu0  ;;  %v2230_v7 = vadd.f32 %v2188_v19, %v8771_v42 }
 0x314   : > { %v2458_v28 = vpop.f32.mrf.mxu1  ;;  %7095 = vmatmul.mubr.msk.bf16.gmra.mxu1 %vm1026_vm2, %v3259_v14  ;;  %7239 = vmatmul.mubr.msk.bf16.gmra.mxu0 %vm1026_vm2, %v3743_v48  ;;  %v2621_v48 = vld [vmem:[#allocation3 + $0x20] sm:$0xff] }
 0x315   : > { %v2661_v32 = vadd.f32 %v2619_v57, %v2458_v28  ;;  %v9146_v12 = vpop.f32.mrf.mxu0  ;;  %7098 = vmatprep.mubr.msk.bf16.mxu1 %vm7592_vm0, %v7591_v1  ;;  %7242 = vmatprep.mubr.msk.bf16.mxu0 %vm7592_vm0, %v7591_v1  ;;  %2272 = vst.msk [vmem:[#allocation3 + $0x148] sm:$0xff] %vm1026_vm2, %v2230_v7  ;;  %v9177_v28 = vld [vmem:[#allocation2 + $0x99] sm:$0xff]  ;;  %v3723_v57 = vld [vmem:[#allocation2 + $0x187] sm:$0xff] }
 0x316   : > { %v6908_v30 = vpop.f32.mrf.mxu1  ;;  %v3087_v26 = vld [vmem:[#allocation3] sm:$0xff] }
 0x317   : > { %2703 = vst.msk [vmem:[#allocation3 + $0x10] sm:$0xff] %vm1026_vm2, %v2661_v32  ;;  %v7052_v42 = vpop.f32.mrf.mxu0  ;;  %v3129_v46 = vadd.f32 %v3087_v26, %v8784_v23  ;;  %v3724_v32 = vld [vmem:[#allocation2 + $0x18f] sm:$0xff] }
 0x318   : > { %v2461_v0 = vpop.f32.mrf.mxu1  ;;  %v2622_v42 = vld [vmem:[#allocation3 + $0x28] sm:$0xff] }
 0x319   : > { %v2662_v25 = vadd.f32 %v2620_v24, %v2461_v0  ;;  %v9157_v36 = vpop.f32.mrf.mxu0  ;;  %3171 = vst.msk [vmem:[#allocation3] sm:$0xff] %vm1026_vm2, %v3129_v46  ;;  %v9182_v0 = vld [vmem:[#allocation2 + $0x91] sm:$0xff] }
 0x31a   : > { %v6909_v63 = vpop.f32.mrf.mxu1  ;;  %v3088_v13 = vld [vmem:[#allocation3 + $0x8] sm:$0xff] }
 0x31b   : > { %2704 = vst.msk [vmem:[#allocation3 + $0x18] sm:$0xff] %vm1026_vm2, %v2662_v25  ;;  %v7053_v45 = vpop.f32.mrf.mxu0  ;;  %v3130_v23 = vadd.f32 %v3088_v13, %v8795_v37  ;;  %v3261_v25 = vpack.c.bf16 %v9177_v28, %v9182_v0  ;;  %v3745_v63 = vpack.c.bf16 %v3724_v32, %v3723_v57  ;;  %v2624_v57 = vld [vmem:[#allocation3 + $0x38] sm:$0xff] }
 0x31c   : > { %v2466_v14 = vpop.f32.mrf.mxu1  ;;  %7099 = vmatmul.mubr.msk.bf16.gmra.mxu1 %vm1026_vm2, %v3260_v5  ;;  %7243 = vmatmul.mubr.msk.bf16.gmra.mxu0 %vm1026_vm2, %v3744_v52  ;;  %v2623_v45 = vld [vmem:[#allocation3 + $0x30] sm:$0xff] }
 0x31d   : > { %v2663_v19 = vadd.f32 %v2621_v48, %v2466_v14  ;;  %v9169_v29 = vpop.f32.mrf.mxu0  ;;  %7102 = vmatprep.mubr.msk.bf16.mxu1 %vm7592_vm0, %v7591_v1  ;;  %7246 = vmatprep.mubr.msk.bf16.mxu0 %vm7592_vm0, %v7591_v1  ;;  %3172 = vst.msk [vmem:[#allocation3 + $0x8] sm:$0xff] %vm1026_vm2, %v3130_v23 }
 0x31e   : > { %v6912_v27 = vpop.f32.mrf.mxu1  ;;  %v3089_v7 = vld [vmem:[#allocation3 + $0x10] sm:$0xff] }
 0x31f   : > { %2705 = vst.msk [vmem:[#allocation3 + $0x20] sm:$0xff] %vm1026_vm2, %v2663_v19  ;;  %v7056_v37 = vpop.f32.mrf.mxu0  ;;  %v3131_v30 = vadd.f32 %v3089_v7, %v8808_v61  ;;  %v9199_v27 = vld [vmem:[#allocation2 + $0xa9] sm:$0xff] }
 0x320   : > { %v2469_v26 = vpop.f32.mrf.mxu1 }
 0x321   : > { %v2664_v10 = vadd.f32 %v2622_v42, %v2469_v26  ;;  %v9180_v46 = vpop.f32.mrf.mxu0  ;;  %3173 = vst.msk [vmem:[#allocation3 + $0x10] sm:$0xff] %vm1026_vm2, %v3131_v30  ;;  %v9204_v26 = vld [vmem:[#allocation2 + $0xa1] sm:$0xff] }
 0x322   : > { %v6913_v24 = vpop.f32.mrf.mxu1  ;;  %v3090_v5 = vld [vmem:[#allocation3 + $0x18] sm:$0xff] }
 0x323   : > { %2706 = vst.msk [vmem:[#allocation3 + $0x28] sm:$0xff] %vm1026_vm2, %v2664_v10  ;;  %v7057_v52 = vpop.f32.mrf.mxu0  ;;  %v3132_v61 = vadd.f32 %v3090_v5, %v8819_v3  ;;  %v3262_v10 = vpack.c.bf16 %v9199_v27, %v9204_v26  ;;  %v4665_v24 = vpack.c.bf16 %v9087_v62, %v9060_v43 }
 0x324   : > { %v2474_v13 = vpop.f32.mrf.mxu1  ;;  %7103 = vmatmul.mubr.msk.bf16.gmra.mxu1 %vm1026_vm2, %v3261_v25  ;;  %7247 = vmatmul.mubr.msk.bf16.gmra.mxu0 %vm1026_vm2, %v3745_v63  ;;  %v2625_v52 = vld [vmem:[#allocation3 + $0x40] sm:$0xff] }
 0x325   : > { %v2665_v23 = vadd.f32 %v2623_v45, %v2474_v13  ;;  %v9191_v14 = vpop.f32.mrf.mxu0  ;;  %7106 = vmatprep.mubr.msk.bf16.mxu1 %vm7592_vm0, %v7591_v1  ;;  %7342 = vmatprep.mubr.msk.bf16.mxu0 %vm7592_vm0, %v7591_v1  ;;  %3174 = vst.msk [vmem:[#allocation3 + $0x18] sm:$0xff] %vm1026_vm2, %v3132_v61  ;;  %v9223_v45 = vld [vmem:[#allocation2 + $0xb9] sm:$0xff] }
 0x326   : > { %v6916_v48 = vpop.f32.mrf.mxu1  ;;  %v3091_v19 = vld [vmem:[#allocation3 + $0x20] sm:$0xff] }
 0x327   : > { %2707 = vst.msk [vmem:[#allocation3 + $0x30] sm:$0xff] %vm1026_vm2, %v2665_v23  ;;  %v7060_v3 = vpop.f32.mrf.mxu0  ;;  %v3133_v7 = vadd.f32 %v3091_v19, %v8835_v17  ;;  %v2626_v19 = vld [vmem:[#allocation3 + $0x48] sm:$0xff] }
 0x328   : > { %v2477_v37 = vpop.f32.mrf.mxu1 }
 0x329   : > { %v2666_v32 = vadd.f32 %v2624_v57, %v2477_v37  ;;  %v9202_v30 = vpop.f32.mrf.mxu0  ;;  %3175 = vst.msk [vmem:[#allocation3 + $0x20] sm:$0xff] %vm1026_vm2, %v3133_v7  ;;  %v9228_v37 = vld [vmem:[#allocation2 + $0xb1] sm:$0xff] }
 0x32a   : > { %v6917_v42 = vpop.f32.mrf.mxu1  ;;  %v3092_v25 = vld [vmem:[#allocation3 + $0x28] sm:$0xff] }
 0x32b   : > { %2708 = vst.msk [vmem:[#allocation3 + $0x38] sm:$0xff] %vm1026_vm2, %v2666_v32  ;;  %v7061_v17 = vpop.f32.mrf.mxu0  ;;  %v3134_v63 = vadd.f32 %v3092_v25, %v8846_v44  ;;  %v3263_v32 = vpack.c.bf16 %v9223_v45, %v9228_v37  ;;  %v4666_v42 = vpack.c.bf16 %v9111_v20, %v9082_v35 }
 0x32c   : > { %v2482_v5 = vpop.f32.mrf.mxu1  ;;  %7107 = vmatmul.mubr.msk.bf16.gmra.mxu1 %vm1026_vm2, %v3262_v10  ;;  %7343 = vmatmul.mubr.msk.bf16.vlgmr.msra.gmra.mxu0 %vm1026_vm2, %v4665_v24  ;;  %v2627_v17 = vld [vmem:[#allocation3 + $0x50] sm:$0xff] }
 0x32d   : > { %v2667_v61 = vadd.f32 %v2625_v52, %v2482_v5  ;;  %v9215_v13 = vpop.f32.mrf.mxu0  ;;  %7110 = vmatprep.mubr.msk.bf16.mxu1 %vm7592_vm0, %v7591_v1  ;;  %7346 = vmatprep.mubr.msk.bf16.mxu0 %vm7592_vm0, %v7591_v1  ;;  %3176 = vst.msk [vmem:[#allocation3 + $0x28] sm:$0xff] %vm1026_vm2, %v3134_v63  ;;  %v9247_v52 = vld [vmem:[#allocation2 + $0xc9] sm:$0xff] }
 0x32e   : > { %v6920_v43 = vpop.f32.mrf.mxu1  ;;  %v3093_v62 = vld [vmem:[#allocation3 + $0x30] sm:$0xff] }
 0x32f   : > { %2709 = vst.msk [vmem:[#allocation3 + $0x40] sm:$0xff] %vm1026_vm2, %v2667_v61  ;;  %v7064_v44 = vpop.f32.mrf.mxu0  ;;  %v3135_v23 = vadd.f32 %v3093_v62, %v8859_v40  ;;  %v2628_v62 = vld [vmem:[#allocation3 + $0x58] sm:$0xff] }
 0x330   : > { %v2485_v48 = vpop.f32.mrf.mxu1 }
 0x331   : > { %v2668_v3 = vadd.f32 %v2626_v19, %v2485_v48  ;;  %v9226_v7 = vpop.f32.mrf.mxu0  ;;  %3177 = vst.msk [vmem:[#allocation3 + $0x30] sm:$0xff] %vm1026_vm2, %v3135_v23  ;;  %v9252_v48 = vld [vmem:[#allocation2 + $0xc1] sm:$0xff] }
 0x332   : > { %v6921_v57 = vpop.f32.mrf.mxu1  ;;  %v3094_v10 = vld [vmem:[#allocation3 + $0x38] sm:$0xff] }
 0x333   : > { %2710 = vst.msk [vmem:[#allocation3 + $0x48] sm:$0xff] %vm1026_vm2, %v2668_v3  ;;  %v7065_v40 = vpop.f32.mrf.mxu0  ;;  %v3136_v24 = vadd.f32 %v3094_v10, %v8870_v59  ;;  %v3264_v3 = vpack.c.bf16 %v9247_v52, %v9252_v48  ;;  %v4667_v57 = vpack.c.bf16 %v9135_v8, %v9106_v33 }
 0x334   : > { %v2490_v25 = vpop.f32.mrf.mxu1  ;;  %7111 = vmatmul.mubr.msk.bf16.gmra.mxu1 %vm1026_vm2, %v3263_v32  ;;  %7347 = vmatmul.mubr.msk.bf16.gmra.mxu0 %vm1026_vm2, %v4666_v42  ;;  %v2629_v40 = vld [vmem:[#allocation3 + $0x60] sm:$0xff] }
 0x335   : > { %v2669_v63 = vadd.f32 %v2627_v17, %v2490_v25  ;;  %v9239_v5 = vpop.f32.mrf.mxu0  ;;  %7114 = vmatprep.mubr.msk.bf16.mxu1 %vm7592_vm0, %v7591_v1  ;;  %7350 = vmatprep.mubr.msk.bf16.mxu0 %vm7592_vm0, %v7591_v1  ;;  %3178 = vst.msk [vmem:[#allocation3 + $0x38] sm:$0xff] %vm1026_vm2, %v3136_v24  ;;  %v9271_v17 = vld [vmem:[#allocation2 + $0xd9] sm:$0xff] }
 0x336   : > { %v6924_v35 = vpop.f32.mrf.mxu1  ;;  %v3095_v20 = vld [vmem:[#allocation3 + $0x40] sm:$0xff] }
 0x337   : > { %2711 = vst.msk [vmem:[#allocation3 + $0x50] sm:$0xff] %vm1026_vm2, %v2669_v63  ;;  %v7068_v59 = vpop.f32.mrf.mxu0  ;;  %v3137_v61 = vadd.f32 %v3095_v20, %v8883_v38  ;;  %v2630_v20 = vld [vmem:[#allocation3 + $0x68] sm:$0xff] }
 0x338   : > { %v2493_v43 = vpop.f32.mrf.mxu1 }
 0x339   : > { %v2670_v44 = vadd.f32 %v2628_v62, %v2493_v43  ;;  %v9250_v23 = vpop.f32.mrf.mxu0  ;;  %3179 = vst.msk [vmem:[#allocation3 + $0x40] sm:$0xff] %vm1026_vm2, %v3137_v61  ;;  %v9276_v43 = vld [vmem:[#allocation2 + $0xd1] sm:$0xff] }
 0x33a   : > { %v6925_v19 = vpop.f32.mrf.mxu1  ;;  %v3096_v32 = vld [vmem:[#allocation3 + $0x48] sm:$0xff] }
 0x33b   : > { %2712 = vst.msk [vmem:[#allocation3 + $0x58] sm:$0xff] %vm1026_vm2, %v2670_v44  ;;  %v7069_v38 = vpop.f32.mrf.mxu0  ;;  %v3138_v42 = vadd.f32 %v3096_v32, %v8894_v39  ;;  %v3265_v44 = vpack.c.bf16 %v9271_v17, %v9276_v43  ;;  %v4668_v19 = vpack.c.bf16 %v9159_v53, %v9130_v18 }
 0x33c   : > { %v2498_v10 = vpop.f32.mrf.mxu1  ;;  %7115 = vmatmul.mubr.msk.bf16.gmra.mxu1 %vm1026_vm2, %v3264_v3  ;;  %7351 = vmatmul.mubr.msk.bf16.gmra.mxu0 %vm1026_vm2, %v4667_v57  ;;  %v2631_v38 = vld [vmem:[#allocation3 + $0x70] sm:$0xff] }
 0x33d   : > { %v2671_v24 = vadd.f32 %v2629_v40, %v2498_v10  ;;  %v9263_v25 = vpop.f32.mrf.mxu0  ;;  %7118 = vmatprep.mubr.msk.bf16.mxu1 %vm7592_vm0, %v7591_v1  ;;  %7354 = vmatprep.mubr.msk.bf16.mxu0 %vm7592_vm0, %v7591_v1  ;;  %3180 = vst.msk [vmem:[#allocation3 + $0x48] sm:$0xff] %vm1026_vm2, %v3138_v42  ;;  %v9295_v40 = vld [vmem:[#allocation2 + $0xe9] sm:$0xff] }
 0x33e   : > { %v6928_v33 = vpop.f32.mrf.mxu1  ;;  %v3097_v8 = vld [vmem:[#allocation3 + $0x50] sm:$0xff] }
 0x33f   : > { %2713 = vst.msk [vmem:[#allocation3 + $0x60] sm:$0xff] %vm1026_vm2, %v2671_v24  ;;  %v7072_v39 = vpop.f32.mrf.mxu0  ;;  %v3139_v63 = vadd.f32 %v3097_v8, %v8907_v51  ;;  %v2632_v8 = vld [vmem:[#allocation3 + $0x78] sm:$0xff] }
 0x340   : > { %v2501_v35 = vpop.f32.mrf.mxu1 }
 0x341   : > { %v2672_v59 = vadd.f32 %v2630_v20, %v2501_v35  ;;  %v9274_v61 = vpop.f32.mrf.mxu0  ;;  %3181 = vst.msk [vmem:[#allocation3 + $0x50] sm:$0xff] %vm1026_vm2, %v3139_v63  ;;  %v9300_v35 = vld [vmem:[#allocation2 + $0xe1] sm:$0xff] }
 0x342   : > { %v6929_v62 = vpop.f32.mrf.mxu1  ;;  %v3098_v3 = vld [vmem:[#allocation3 + $0x58] sm:$0xff] }
 0x343   : > { %2714 = vst.msk [vmem:[#allocation3 + $0x68] sm:$0xff] %vm1026_vm2, %v2672_v59  ;;  %v7073_v51 = vpop.f32.mrf.mxu0  ;;  %v3140_v57 = vadd.f32 %v3098_v3, %v8918_v58  ;;  %v3266_v59 = vpack.c.bf16 %v9295_v40, %v9300_v35  ;;  %v4669_v62 = vpack.c.bf16 %v9182_v0, %v9154_v56 }
 0x344   : > { %v2506_v32 = vpop.f32.mrf.mxu1  ;;  %7119 = vmatmul.mubr.msk.bf16.gmra.mxu1 %vm1026_vm2, %v3265_v44  ;;  %7355 = vmatmul.mubr.msk.bf16.gmra.mxu0 %vm1026_vm2, %v4668_v19  ;;  %v2633_v51 = vld [vmem:[#allocation3 + $0x80] sm:$0xff] }
 0x345   : > { %v2673_v42 = vadd.f32 %v2631_v38, %v2506_v32  ;;  %v9287_v10 = vpop.f32.mrf.mxu0  ;;  %7122 = vmatprep.mubr.msk.bf16.mxu1 %vm7592_vm0, %v7591_v1  ;;  %7358 = vmatprep.mubr.msk.bf16.mxu0 %vm7592_vm0, %v7591_v1  ;;  %3182 = vst.msk [vmem:[#allocation3 + $0x58] sm:$0xff] %vm1026_vm2, %v3140_v57  ;;  %v9319_v38 = vld [vmem:[#allocation2 + $0xf9] sm:$0xff] }
 0x346   : > { %v6932_v18 = vpop.f32.mrf.mxu1  ;;  %v3099_v53 = vld [vmem:[#allocation3 + $0x60] sm:$0xff] }
 0x347   : > { %2715 = vst.msk [vmem:[#allocation3 + $0x70] sm:$0xff] %vm1026_vm2, %v2673_v42  ;;  %v7168_v58 = vpop.f32.mrf.mxu0  ;;  %v3141_v24 = vadd.f32 %v3099_v53, %v8931_v49  ;;  %v2634_v53 = vld [vmem:[#allocation3 + $0x88] sm:$0xff] }
 0x348   : > { %v2509_v33 = vpop.f32.mrf.mxu1 }
 0x349   : > { %v2674_v39 = vadd.f32 %v2632_v8, %v2509_v33  ;;  %v9298_v63 = vpop.f32.mrf.mxu0  ;;  %3183 = vst.msk [vmem:[#allocation3 + $0x60] sm:$0xff] %vm1026_vm2, %v3141_v24  ;;  %v9324_v33 = vld [vmem:[#allocation2 + $0xf1] sm:$0xff] }
 0x34a   : > { %v6933_v20 = vpop.f32.mrf.mxu1  ;;  %v3100_v44 = vld [vmem:[#allocation3 + $0x68] sm:$0xff] }
 0x34b   : > { %2716 = vst.msk [vmem:[#allocation3 + $0x78] sm:$0xff] %vm1026_vm2, %v2674_v39  ;;  %v7169_v49 = vpop.f32.mrf.mxu0  ;;  %v3142_v19 = vadd.f32 %v3100_v44, %v8942_v9  ;;  %v3267_v39 = vpack.c.bf16 %v9319_v38, %v9324_v33  ;;  %v4670_v20 = vpack.c.bf16 %v9204_v26, %v9177_v28 }
 0x34c   : > { %v2514_v3 = vpop.f32.mrf.mxu1  ;;  %7123 = vmatmul.mubr.msk.bf16.gmra.mxu1 %vm1026_vm2, %v3266_v59  ;;  %7359 = vmatmul.mubr.msk.bf16.gmra.mxu0 %vm1026_vm2, %v4669_v62  ;;  %v2635_v49 = vld [vmem:[#allocation3 + $0x90] sm:$0xff] }
 0x34d   : > { %v2675_v57 = vadd.f32 %v2633_v51, %v2514_v3  ;;  %v9311_v32 = vpop.f32.mrf.mxu0  ;;  %7126 = vmatprep.mubr.msk.bf16.mxu1 %vm7592_vm0, %v7591_v1  ;;  %7362 = vmatprep.mubr.msk.bf16.mxu0 %vm7592_vm0, %v7591_v1  ;;  %3184 = vst.msk [vmem:[#allocation3 + $0x68] sm:$0xff] %vm1026_vm2, %v3142_v19  ;;  %v9343_v51 = vld [vmem:[#allocation2 + $0x109] sm:$0xff] }
 0x34e   : > { %v6936_v56 = vpop.f32.mrf.mxu1  ;;  %v3101_v0 = vld [vmem:[#allocation3 + $0x70] sm:$0xff] }
 0x34f   : > { %2717 = vst.msk [vmem:[#allocation3 + $0x80] sm:$0xff] %vm1026_vm2, %v2675_v57  ;;  %v7172_v9 = vpop.f32.mrf.mxu0  ;;  %v3143_v42 = vadd.f32 %v3101_v0, %v8955_v22  ;;  %v2636_v0 = vld [vmem:[#allocation3 + $0x98] sm:$0xff] }
 0x350   : > { %v2517_v18 = vpop.f32.mrf.mxu1 }
 0x351   : > { %v2676_v58 = vadd.f32 %v2634_v53, %v2517_v18  ;;  %v9322_v24 = vpop.f32.mrf.mxu0  ;;  %3185 = vst.msk [vmem:[#allocation3 + $0x70] sm:$0xff] %vm1026_vm2, %v3143_v42  ;;  %v9348_v18 = vld [vmem:[#allocation2 + $0x101] sm:$0xff] }
 0x352   : > { %v6937_v8 = vpop.f32.mrf.mxu1  ;;  %v3102_v59 = vld [vmem:[#allocation3 + $0x78] sm:$0xff] }
 0x353   : > { %2718 = vst.msk [vmem:[#allocation3 + $0x88] sm:$0xff] %vm1026_vm2, %v2676_v58  ;;  %v7173_v22 = vpop.f32.mrf.mxu0  ;;  %v3144_v62 = vadd.f32 %v3102_v59, %v8966_v60  ;;  %v3268_v58 = vpack.c.bf16 %v9343_v51, %v9348_v18  ;;  %v4671_v8 = vpack.c.bf16 %v9228_v37, %v9199_v27 }
 0x354   : > { %v2522_v44 = vpop.f32.mrf.mxu1  ;;  %7127 = vmatmul.mubr.msk.bf16.gmra.mxu1 %vm1026_vm2, %v3267_v39  ;;  %7363 = vmatmul.mubr.msk.bf16.gmra.mxu0 %vm1026_vm2, %v4670_v20  ;;  %v2637_v22 = vld [vmem:[#allocation3 + $0xa0] sm:$0xff] }
 0x355   : > { %v2677_v19 = vadd.f32 %v2635_v49, %v2522_v44  ;;  %v9335_v3 = vpop.f32.mrf.mxu0  ;;  %7130 = vmatprep.mubr.msk.bf16.mxu1 %vm7592_vm0, %v7591_v1  ;;  %7366 = vmatprep.mubr.msk.bf16.mxu0 %vm7592_vm0, %v7591_v1  ;;  %3186 = vst.msk [vmem:[#allocation3 + $0x78] sm:$0xff] %vm1026_vm2, %v3144_v62  ;;  %v9367_v49 = vld [vmem:[#allocation2 + $0x119] sm:$0xff] }
 0x356   : > { %v6940_v28 = vpop.f32.mrf.mxu1  ;;  %v3103_v26 = vld [vmem:[#allocation3 + $0x80] sm:$0xff] }
 0x357   : > { %2719 = vst.msk [vmem:[#allocation3 + $0x90] sm:$0xff] %vm1026_vm2, %v2677_v19  ;;  %v7176_v60 = vpop.f32.mrf.mxu0  ;;  %v3145_v57 = vadd.f32 %v3103_v26, %v8979_v2  ;;  %v2638_v26 = vld [vmem:[#allocation3 + $0xa8] sm:$0xff] }
 0x358   : > { %v2525_v56 = vpop.f32.mrf.mxu1 }
 0x359   : > { %v2678_v9 = vadd.f32 %v2636_v0, %v2525_v56  ;;  %v9346_v42 = vpop.f32.mrf.mxu0  ;;  %3187 = vst.msk [vmem:[#allocation3 + $0x80] sm:$0xff] %vm1026_vm2, %v3145_v57  ;;  %v9372_v56 = vld [vmem:[#allocation2 + $0x111] sm:$0xff] }
 0x35a   : > { %v6941_v53 = vpop.f32.mrf.mxu1  ;;  %v3104_v39 = vld [vmem:[#allocation3 + $0x88] sm:$0xff] }
 0x35b   : > { %2720 = vst.msk [vmem:[#allocation3 + $0x98] sm:$0xff] %vm1026_vm2, %v2678_v9  ;;  %v7177_v2 = vpop.f32.mrf.mxu0  ;;  %v3146_v20 = vadd.f32 %v3104_v39, %v8990_v31  ;;  %v3269_v9 = vpack.c.bf16 %v9367_v49, %v9372_v56  ;;  %v4672_v53 = vpack.c.bf16 %v9252_v48, %v9223_v45 }
 0x35c   : > { %v2530_v59 = vpop.f32.mrf.mxu1  ;;  %7131 = vmatmul.mubr.msk.bf16.gmra.mxu1 %vm1026_vm2, %v3268_v58  ;;  %7367 = vmatmul.mubr.msk.bf16.gmra.mxu0 %vm1026_vm2, %v4671_v8  ;;  %v2639_v2 = vld [vmem:[#allocation3 + $0xb0] sm:$0xff] }
 0x35d   : > { %v2679_v62 = vadd.f32 %v2637_v22, %v2530_v59  ;;  %v9359_v44 = vpop.f32.mrf.mxu0  ;;  %7134 = vmatprep.mubr.msk.bf16.mxu1 %vm7592_vm0, %v7591_v1  ;;  %7370 = vmatprep.mubr.msk.bf16.mxu0 %vm7592_vm0, %v7591_v1  ;;  %3188 = vst.msk [vmem:[#allocation3 + $0x88] sm:$0xff] %vm1026_vm2, %v3146_v20  ;;  %v9391_v22 = vld [vmem:[#allocation2 + $0x129] sm:$0xff] }
 0x35e   : > { %v6944_v27 = vpop.f32.mrf.mxu1  ;;  %v3105_v37 = vld [vmem:[#allocation3 + $0x90] sm:$0xff] }
 0x35f   : > { %2721 = vst.msk [vmem:[#allocation3 + $0xa0] sm:$0xff] %vm1026_vm2, %v2679_v62  ;;  %v7180_v31 = vpop.f32.mrf.mxu0  ;;  %v3147_v19 = vadd.f32 %v3105_v37, %v9003_v21  ;;  %v2640_v37 = vld [vmem:[#allocation3 + $0xb8] sm:$0xff] }
 0x360   : > { %v2533_v28 = vpop.f32.mrf.mxu1 }
 0x361   : > { %v2680_v60 = vadd.f32 %v2638_v26, %v2533_v28  ;;  %v9370_v57 = vpop.f32.mrf.mxu0  ;;  %3189 = vst.msk [vmem:[#allocation3 + $0x90] sm:$0xff] %vm1026_vm2, %v3147_v19  ;;  %v9396_v28 = vld [vmem:[#allocation2 + $0x121] sm:$0xff] }
 0x362   : > { %v6945_v0 = vpop.f32.mrf.mxu1  ;;  %v3106_v58 = vld [vmem:[#allocation3 + $0x98] sm:$0xff] }
 0x363   : > { %2722 = vst.msk [vmem:[#allocation3 + $0xa8] sm:$0xff] %vm1026_vm2, %v2680_v60  ;;  %v7181_v21 = vpop.f32.mrf.mxu0  ;;  %v3148_v8 = vadd.f32 %v3106_v58, %v9014_v6  ;;  %v3270_v60 = vpack.c.bf16 %v9391_v22, %v9396_v28  ;;  %v4673_v0 = vpack.c.bf16 %v9276_v43, %v9247_v52 }
 0x364   : > { %v2538_v39 = vpop.f32.mrf.mxu1  ;;  %7135 = vmatmul.mubr.msk.bf16.gmra.mxu1 %vm1026_vm2, %v3269_v9  ;;  %7371 = vmatmul.mubr.msk.bf16.gmra.mxu0 %vm1026_vm2, %v4672_v53  ;;  %v2641_v21 = vld [vmem:[#allocation3 + $0xc0] sm:$0xff] }
 0x365   : > { %v2681_v20 = vadd.f32 %v2639_v2, %v2538_v39  ;;  %v9383_v59 = vpop.f32.mrf.mxu0  ;;  %7138 = vmatprep.mubr.msk.bf16.mxu1 %vm7592_vm0, %v7591_v1  ;;  %7374 = vmatprep.mubr.msk.bf16.mxu0 %vm7592_vm0, %v7591_v1  ;;  %3190 = vst.msk [vmem:[#allocation3 + $0x98] sm:$0xff] %vm1026_vm2, %v3148_v8  ;;  %v9415_v2 = vld [vmem:[#allocation2 + $0x139] sm:$0xff] }
 0x366   : > { %v6948_v45 = vpop.f32.mrf.mxu1  ;;  %v3107_v48 = vld [vmem:[#allocation3 + $0xa0] sm:$0xff] }
 0x367   : > { %2723 = vst.msk [vmem:[#allocation3 + $0xb0] sm:$0xff] %vm1026_vm2, %v2681_v20  ;;  %v7184_v6 = vpop.f32.mrf.mxu0  ;;  %v3149_v62 = vadd.f32 %v3107_v48, %v9027_v41  ;;  %v2642_v48 = vld [vmem:[#allocation3 + $0xc8] sm:$0xff] }
 0x368   : > { %v2541_v27 = vpop.f32.mrf.mxu1 }
 0x369   : > { %v2682_v31 = vadd.f32 %v2640_v37, %v2541_v27  ;;  %v9394_v19 = vpop.f32.mrf.mxu0  ;;  %3191 = vst.msk [vmem:[#allocation3 + $0xa0] sm:$0xff] %vm1026_vm2, %v3149_v62  ;;  %v9420_v27 = vld [vmem:[#allocation2 + $0x131] sm:$0xff] }
 0x36a   : > { %v6949_v26 = vpop.f32.mrf.mxu1  ;;  %v3108_v9 = vld [vmem:[#allocation3 + $0xa8] sm:$0xff] }
 0x36b   : > { %2724 = vst.msk [vmem:[#allocation3 + $0xb8] sm:$0xff] %vm1026_vm2, %v2682_v31  ;;  %v7185_v41 = vpop.f32.mrf.mxu0  ;;  %v3150_v53 = vadd.f32 %v3108_v9, %v9036_v50  ;;  %v3271_v31 = vpack.c.bf16 %v9415_v2, %v9420_v27  ;;  %v4674_v26 = vpack.c.bf16 %v9300_v35, %v9271_v17 }
 0x36c   : > { %v2546_v58 = vpop.f32.mrf.mxu1  ;;  %7139 = vmatmul.mubr.msk.bf16.gmra.mxu1 %vm1026_vm2, %v3270_v60  ;;  %7375 = vmatmul.mubr.msk.bf16.gmra.mxu0 %vm1026_vm2, %v4673_v0  ;;  %v2643_v41 = vld [vmem:[#allocation3 + $0xd0] sm:$0xff] }
 0x36d   : > { %v2683_v8 = vadd.f32 %v2641_v21, %v2546_v58  ;;  %v9407_v39 = vpop.f32.mrf.mxu0  ;;  %7142 = vmatprep.mubr.msk.bf16.mxu1 %vm7592_vm0, %v7591_v1  ;;  %7378 = vmatprep.mubr.msk.bf16.mxu0 %vm7592_vm0, %v7591_v1  ;;  %3192 = vst.msk [vmem:[#allocation3 + $0xa8] sm:$0xff] %vm1026_vm2, %v3150_v53  ;;  %v9439_v21 = vld [vmem:[#allocation2 + $0x149] sm:$0xff] }
 0x36e   : > { %v6952_v52 = vpop.f32.mrf.mxu1  ;;  %v3109_v43 = vld [vmem:[#allocation3 + $0xb0] sm:$0xff] }
 0x36f   : > { %2725 = vst.msk [vmem:[#allocation3 + $0xc0] sm:$0xff] %vm1026_vm2, %v2683_v8  ;;  %v7188_v50 = vpop.f32.mrf.mxu0  ;;  %v3151_v20 = vadd.f32 %v3109_v43, %v9048_v16  ;;  %v2644_v43 = vld [vmem:[#allocation3 + $0xd8] sm:$0xff] }
 0x370   : > { %v2549_v45 = vpop.f32.mrf.mxu1 }
 0x371   : > { %v2684_v6 = vadd.f32 %v2642_v48, %v2549_v45  ;;  %v9418_v62 = vpop.f32.mrf.mxu0  ;;  %3193 = vst.msk [vmem:[#allocation3 + $0xb0] sm:$0xff] %vm1026_vm2, %v3151_v20  ;;  %v9444_v45 = vld [vmem:[#allocation2 + $0x141] sm:$0xff] }
 0x372   : > { %v6953_v37 = vpop.f32.mrf.mxu1  ;;  %v3110_v60 = vld [vmem:[#allocation3 + $0xb8] sm:$0xff] }
 0x373   : > { %2726 = vst.msk [vmem:[#allocation3 + $0xc8] sm:$0xff] %vm1026_vm2, %v2684_v6  ;;  %v7189_v16 = vpop.f32.mrf.mxu0  ;;  %v3152_v0 = vadd.f32 %v3110_v60, %v9063_v11  ;;  %v3272_v6 = vpack.c.bf16 %v9439_v21, %v9444_v45  ;;  %v4675_v37 = vpack.c.bf16 %v9324_v33, %v9295_v40 }
 0x374   : > { %v2554_v9 = vpop.f32.mrf.mxu1  ;;  %7143 = vmatmul.mubr.msk.bf16.gmra.mxu1 %vm1026_vm2, %v3271_v31  ;;  %7379 = vmatmul.mubr.msk.bf16.gmra.mxu0 %vm1026_vm2, %v4674_v26  ;;  %v2645_v16 = vld [vmem:[#allocation3 + $0xe0] sm:$0xff] }
 0x375   : > { %v2685_v53 = vadd.f32 %v2643_v41, %v2554_v9  ;;  %v9431_v58 = vpop.f32.mrf.mxu0  ;;  %7146 = vmatprep.mubr.msk.bf16.mxu1 %vm7592_vm0, %v7591_v1  ;;  %7382 = vmatprep.mubr.msk.bf16.mxu0 %vm7592_vm0, %v7591_v1  ;;  %3194 = vst.msk [vmem:[#allocation3 + $0xb8] sm:$0xff] %vm1026_vm2, %v3152_v0  ;;  %v9463_v41 = vld [vmem:[#allocation2 + $0x159] sm:$0xff] }
 0x376   : > { %v6956_v17 = vpop.f32.mrf.mxu1  ;;  %v3111_v35 = vld [vmem:[#allocation3 + $0xc0] sm:$0xff] }
 0x377   : > { %2727 = vst.msk [vmem:[#allocation3 + $0xd0] sm:$0xff] %vm1026_vm2, %v2685_v53  ;;  %v7192_v11 = vpop.f32.mrf.mxu0  ;;  %v3153_v8 = vadd.f32 %v3111_v35, %v9074_v54  ;;  %v2646_v35 = vld [vmem:[#allocation3 + $0xe8] sm:$0xff] }
 0x378   : > { %v2557_v52 = vpop.f32.mrf.mxu1 }
 0x379   : > { %v2686_v50 = vadd.f32 %v2644_v43, %v2557_v52  ;;  %v9442_v20 = vpop.f32.mrf.mxu0  ;;  %3195 = vst.msk [vmem:[#allocation3 + $0xc0] sm:$0xff] %vm1026_vm2, %v3153_v8  ;;  %v9468_v52 = vld [vmem:[#allocation2 + $0x151] sm:$0xff] }
 0x37a   : > { %v6957_v48 = vpop.f32.mrf.mxu1  ;;  %v3112_v31 = vld [vmem:[#allocation3 + $0xc8] sm:$0xff] }
 0x37b   : > { %2728 = vst.msk [vmem:[#allocation3 + $0xd8] sm:$0xff] %vm1026_vm2, %v2686_v50  ;;  %v7193_v54 = vpop.f32.mrf.mxu0  ;;  %v3154_v26 = vadd.f32 %v3112_v31, %v9085_v34  ;;  %v3273_v50 = vpack.c.bf16 %v9463_v41, %v9468_v52  ;;  %v4676_v48 = vpack.c.bf16 %v9348_v18, %v9319_v38 }
 0x37c   : > { %v2562_v60 = vpop.f32.mrf.mxu1  ;;  %7147 = vmatmul.mubr.msk.bf16.gmra.mxu1 %vm1026_vm2, %v3272_v6  ;;  %7383 = vmatmul.mubr.msk.bf16.gmra.mxu0 %vm1026_vm2, %v4675_v37  ;;  %v2647_v54 = vld [vmem:[#allocation3 + $0xf0] sm:$0xff] }
 0x37d   : > { %v2687_v0 = vadd.f32 %v2645_v16, %v2562_v60  ;;  %v9455_v9 = vpop.f32.mrf.mxu0  ;;  %7150 = vmatprep.mubr.msk.bf16.mxu1 %vm7592_vm0, %v7591_v1  ;;  %7386 = vmatprep.mubr.msk.bf16.mxu0 %vm7592_vm0, %v7591_v1  ;;  %3196 = vst.msk [vmem:[#allocation3 + $0xc8] sm:$0xff] %vm1026_vm2, %v3154_v26  ;;  %v9487_v16 = vld [vmem:[#allocation2 + $0x169] sm:$0xff] }
 0x37e   : > { %v6960_v40 = vpop.f32.mrf.mxu1  ;;  %v3113_v33 = vld [vmem:[#allocation3 + $0xd0] sm:$0xff] }
 0x37f   : > { %2729 = vst.msk [vmem:[#allocation3 + $0xe0] sm:$0xff] %vm1026_vm2, %v2687_v0  ;;  %v7196_v34 = vpop.f32.mrf.mxu0  ;;  %v3155_v53 = vadd.f32 %v3113_v33, %v9098_v55  ;;  %v2648_v33 = vld [vmem:[#allocation3 + $0xf8] sm:$0xff] }
 0x380   : > { %v2565_v17 = vpop.f32.mrf.mxu1 }
 0x381   : > { %v2688_v11 = vadd.f32 %v2646_v35, %v2565_v17  ;;  %v9466_v8 = vpop.f32.mrf.mxu0  ;;  %3197 = vst.msk [vmem:[#allocation3 + $0xd0] sm:$0xff] %vm1026_vm2, %v3155_v53  ;;  %v9492_v17 = vld [vmem:[#allocation2 + $0x161] sm:$0xff] }
 0x382   : > { %v6961_v43 = vpop.f32.mrf.mxu1  ;;  %v3114_v6 = vld [vmem:[#allocation3 + $0xd8] sm:$0xff] }
 0x383   : > { %2730 = vst.msk [vmem:[#allocation3 + $0xe8] sm:$0xff] %vm1026_vm2, %v2688_v11  ;;  %v7197_v55 = vpop.f32.mrf.mxu0  ;;  %v3156_v37 = vadd.f32 %v3114_v6, %v9109_v4  ;;  %v3274_v11 = vpack.c.bf16 %v9487_v16, %v9492_v17  ;;  %v4677_v43 = vpack.c.bf16 %v9372_v56, %v9343_v51 }
 0x384   : > { %v2570_v31 = vpop.f32.mrf.mxu1  ;;  %7151 = vmatmul.mubr.msk.bf16.gmra.mxu1 %vm1026_vm2, %v3273_v50  ;;  %7387 = vmatmul.mubr.msk.bf16.gmra.mxu0 %vm1026_vm2, %v4676_v48  ;;  %v2649_v55 = vld [vmem:[#allocation3 + $0x100] sm:$0xff] }
 0x385   : > { %v2689_v26 = vadd.f32 %v2647_v54, %v2570_v31  ;;  %v9479_v60 = vpop.f32.mrf.mxu0  ;;  %7154 = vmatprep.mubr.msk.bf16.mxu1 %vm7592_vm0, %v7591_v1  ;;  %7390 = vmatprep.mubr.msk.bf16.mxu0 %vm7592_vm0, %v7591_v1  ;;  %3198 = vst.msk [vmem:[#allocation3 + $0xd8] sm:$0xff] %vm1026_vm2, %v3156_v37  ;;  %v9511_v54 = vld [vmem:[#allocation2 + $0x179] sm:$0xff] }
 0x386   : > { %v6964_v38 = vpop.f32.mrf.mxu1  ;;  %v3115_v18 = vld [vmem:[#allocation3 + $0xe0] sm:$0xff] }
 0x387   : > { %2731 = vst.msk [vmem:[#allocation3 + $0xf0] sm:$0xff] %vm1026_vm2, %v2689_v26  ;;  %v7200_v4 = vpop.f32.mrf.mxu0  ;;  %v3157_v0 = vadd.f32 %v3115_v18, %v9122_v47  ;;  %v2650_v18 = vld [vmem:[#allocation3 + $0x108] sm:$0xff] }
 0x388   : > { %v2573_v40 = vpop.f32.mrf.mxu1 }
 0x389   : > { %v2690_v34 = vadd.f32 %v2648_v33, %v2573_v40  ;;  %v9490_v53 = vpop.f32.mrf.mxu0  ;;  %3199 = vst.msk [vmem:[#allocation3 + $0xe0] sm:$0xff] %vm1026_vm2, %v3157_v0  ;;  %v9516_v40 = vld [vmem:[#allocation2 + $0x171] sm:$0xff] }
 0x38a   : > { %v6965_v35 = vpop.f32.mrf.mxu1  ;;  %v3116_v50 = vld [vmem:[#allocation3 + $0xe8] sm:$0xff] }
 0x38b   : > { %2732 = vst.msk [vmem:[#allocation3 + $0xf8] sm:$0xff] %vm1026_vm2, %v2690_v34  ;;  %v7201_v47 = vpop.f32.mrf.mxu0  ;;  %v3158_v48 = vadd.f32 %v3116_v50, %v9133_v15  ;;  %v3275_v34 = vpack.c.bf16 %v9511_v54, %v9516_v40  ;;  %v4678_v35 = vpack.c.bf16 %v9396_v28, %v9367_v49 }
 0x38c   : > { %v2578_v6 = vpop.f32.mrf.mxu1  ;;  %7155 = vmatmul.mubr.msk.bf16.gmra.mxu1 %vm1026_vm2, %v3274_v11  ;;  %7391 = vmatmul.mubr.msk.bf16.gmra.mxu0 %vm1026_vm2, %v4677_v43  ;;  %v2651_v47 = vld [vmem:[#allocation3 + $0x110] sm:$0xff] }
 0x38d   : > { %v2691_v37 = vadd.f32 %v2649_v55, %v2578_v6  ;;  %v9503_v31 = vpop.f32.mrf.mxu0  ;;  %7158 = vmatprep.mubr.msk.bf16.mxu1 %vm7592_vm0, %v7591_v1  ;;  %7394 = vmatprep.mubr.msk.bf16.mxu0 %vm7592_vm0, %v7591_v1  ;;  %3200 = vst.msk [vmem:[#allocation3 + $0xe8] sm:$0xff] %vm1026_vm2, %v3158_v48  ;;  %v4154_v55 = vld [vmem:[#allocation2 + $0x50] sm:$0xff] }
 0x38e   : > { %v6968_v51 = vpop.f32.mrf.mxu1  ;;  %v3117_v56 = vld [vmem:[#allocation3 + $0xf0] sm:$0xff] }
 0x38f   : > { %2733 = vst.msk [vmem:[#allocation3 + $0x100] sm:$0xff] %vm1026_vm2, %v2691_v37  ;;  %v7204_v15 = vpop.f32.mrf.mxu0  ;;  %v3159_v26 = vadd.f32 %v3117_v56, %v9146_v12  ;;  %v2652_v56 = vld [vmem:[#allocation3 + $0x118] sm:$0xff] }
 0x390   : > { %v2581_v38 = vpop.f32.mrf.mxu1 }
 0x391   : > { %v2692_v4 = vadd.f32 %v2650_v18, %v2581_v38  ;;  %v9514_v0 = vpop.f32.mrf.mxu0  ;;  %3201 = vst.msk [vmem:[#allocation3 + $0xf0] sm:$0xff] %vm1026_vm2, %v3159_v26  ;;  %v4153_v38 = vld [vmem:[#allocation2 + $0x48] sm:$0xff] }
 0x392   : > { %v6969_v33 = vpop.f32.mrf.mxu1  ;;  %v3118_v11 = vld [vmem:[#allocation3 + $0xf8] sm:$0xff] }
 0x393   : > { %2734 = vst.msk [vmem:[#allocation3 + $0x108] sm:$0xff] %vm1026_vm2, %v2692_v4  ;;  %v7205_v12 = vpop.f32.mrf.mxu0  ;;  %v3160_v43 = vadd.f32 %v3118_v11, %v9157_v36  ;;  %v4195_v4 = vpack.c.bf16 %v4154_v55, %v4153_v38  ;;  %v4679_v33 = vpack.c.bf16 %v9420_v27, %v9391_v22  ;;  %v4680_v38 = vpack.c.bf16 %v9444_v45, %v9415_v2 }
 0x394   : > { %v2586_v50 = vpop.f32.mrf.mxu1  ;;  %7159 = vmatmul.mubr.msk.bf16.gmra.mxu1 %vm1026_vm2, %v3275_v34  ;;  %7395 = vmatmul.mubr.msk.bf16.gmra.mxu0 %vm1026_vm2, %v4678_v35  ;;  %v7580_v34 = vld [vmem:[%s10245_s5 + $0x8] sm:$0xff]  }
 0x395   : > { %v2693_v48 = vadd.f32 %v2651_v47, %v2586_v50  ;;  %v9527_v6 = vpop.f32.mrf.mxu0  ;;  %7254 = vmatprep.mubr.msk.bf16.mxu1 %vm7592_vm0, %v7591_v1  ;;  %7398 = vmatprep.mubr.msk.bf16.mxu0 %vm7592_vm0, %v7591_v1  ;;  %3202 = vst.msk [vmem:[#allocation3 + $0xf8] sm:$0xff] %vm1026_vm2, %v3160_v43  ;;  %v2653_v43 = vld [vmem:[#allocation3 + $0x120] sm:$0xff] }
 0x396   : > { %v6972_v49 = vpop.f32.mrf.mxu1  ;;  %v3119_v28 = vld [vmem:[#allocation3 + $0x100] sm:$0xff] }
 0x397   : > { %2735 = vst.msk [vmem:[#allocation3 + $0x110] sm:$0xff] %vm1026_vm2, %v2693_v48  ;;  %v7208_v36 = vpop.f32.mrf.mxu0  ;;  %v3161_v37 = vadd.f32 %v3119_v28, %v9169_v29  ;;  %v4156_v48 = vld [vmem:[#allocation2 + $0x60] sm:$0xff] }
 0x398   : > { %v2589_v51 = vpop.f32.mrf.mxu1  ;;  %v2654_v36 = vld [vmem:[#allocation3 + $0x128] sm:$0xff] }
 0x399   : > { %v2694_v15 = vadd.f32 %v2652_v56, %v2589_v51  ;;  %v9536_v26 = vpop.f32.mrf.mxu0  ;;  %3203 = vst.msk [vmem:[#allocation3 + $0x100] sm:$0xff] %vm1026_vm2, %v3161_v37  ;;  %v4155_v51 = vld [vmem:[#allocation2 + $0x58] sm:$0xff] }
 0x39a   : > { %v6973_v18 = vpop.f32.mrf.mxu1  ;;  %v3120_v35 = vld [vmem:[#allocation3 + $0x108] sm:$0xff] }
 0x39b   : > { %2736 = vst.msk [vmem:[#allocation3 + $0x118] sm:$0xff] %vm1026_vm2, %v2694_v15  ;;  %v7209_v29 = vpop.f32.mrf.mxu0  ;;  %v3162_v11 = vadd.f32 %v3120_v35, %v9180_v46  ;;  %v4196_v15 = vpack.c.bf16 %v4156_v48, %v4155_v51  ;;  %v4157_v48 = vld [vmem:[#allocation2 + $0x68] sm:$0xff] }
 0x39c   : > { %v2594_v12 = vpop.f32.mrf.mxu1  ;;  %7255 = vmatmul.mubr.msk.bf16.vlgmr.msra.gmra.mxu1 %vm1026_vm2, %v4195_v4  ;;  %7399 = vmatmul.mubr.msk.bf16.gmra.mxu0 %vm1026_vm2, %v4679_v33 }
 0x39d   : > { %v2695_v50 = vadd.f32 %v2653_v43, %v2594_v12  ;;  %v9548_v47 = vpop.f32.mrf.mxu0  ;;  %7258 = vmatprep.mubr.msk.bf16.mxu1 %vm7592_vm0, %v7591_v1  ;;  %7402 = vmatprep.mubr.msk.bf16.mxu0 %vm7592_vm0, %v7591_v1  ;;  %3204 = vst.msk [vmem:[#allocation3 + $0x108] sm:$0xff] %vm1026_vm2, %v3162_v11  ;;  %v4158_v11 = vld [vmem:[#allocation2 + $0x70] sm:$0xff]  ;;  %v7581_v12 = vld [vmem:[%s10245_s5] sm:$0xff]  }
 0x39e   : > { %v6976_v22 = vpop.f32.mrf.mxu1  ;;  %7427 = vmatpush3.bf16.msra.mxu1 %v7580_v34  ;;  %v3121_v46 = vld [vmem:[#allocation3 + $0x110] sm:$0xff] }
 0x39f   : > { %2737 = vst.msk [vmem:[#allocation3 + $0x120] sm:$0xff] %vm1026_vm2, %v2695_v50  ;;  %v7212_v27 = vpop.f32.mrf.mxu0  ;;  %7428 = vmatprep.subr.bf16.mxu1 %v7591_v1  ;;  %v3163_v49 = vadd.f32 %v3121_v46, %v9191_v14  ;;  %v2655_v34 = vld [vmem:[#allocation3 + $0x130] sm:$0xff]  ;;  %v2656_v22 = vld [vmem:[#allocation3 + $0x138] sm:$0xff] }
 0x3a0   : > { %v2597_v28 = vpop.f32.mrf.mxu1 }
 0x3a1   : > { %v2696_v55 = vadd.f32 %v2654_v36, %v2597_v28  ;;  %v9558_v37 = vpop.f32.mrf.mxu0  ;;  %3205 = vst.msk [vmem:[#allocation3 + $0x110] sm:$0xff] %vm1026_vm2, %v3163_v49  ;;  %v4197_v28 = vpack.c.bf16 %v4158_v11, %v4157_v48  ;;  %v4681_v36 = vpack.c.bf16 %v9468_v52, %v9439_v21 }
 0x3a2   : > { %v6977_v56 = vpop.f32.mrf.mxu1  ;;  %v3122_v18 = vld [vmem:[#allocation3 + $0x118] sm:$0xff]  ;;  %7429 = vmatpush3.bf16.msra.mxu1 %v7581_v12  ;;  %v4682_v12 = vpack.c.bf16 %v9492_v17, %v9463_v41 }
 0x3a3   : > { %2738 = vst.msk [vmem:[#allocation3 + $0x128] sm:$0xff] %vm1026_vm2, %v2696_v55  ;;  %v7213_v4 = vpop.f32.mrf.mxu0  ;;  %v3164_v33 = vadd.f32 %v3122_v18, %v9202_v30 }
 0x3a4   : > { %v2602_v14 = vpop.f32.mrf.mxu1  ;;  %7259 = vmatmul.mubr.msk.bf16.gmra.mxu1 %vm1026_vm2, %v4196_v15  ;;  %7403 = vmatmul.mubr.msk.bf16.gmra.mxu0 %vm1026_vm2, %v4680_v38  ;;  %v2657_v15 = vld [vmem:[#allocation3 + $0x140] sm:$0xff]  ;;  %v4160_v4 = vld [vmem:[#allocation2 + $0x80] sm:$0xff] }
 0x3a5   : > { %v2697_v35 = vadd.f32 %v2655_v34, %v2602_v14  ;;  %v9567_v29 = vpop.f32.mrf.mxu0  ;;  %7262 = vmatprep.mubr.msk.bf16.mxu1 %vm7592_vm0, %v7591_v1  ;;  %7406 = vmatprep.mubr.msk.bf16.mxu0 %vm7592_vm0, %v7591_v1  ;;  %3206 = vst.msk [vmem:[#allocation3 + $0x118] sm:$0xff] %vm1026_vm2, %v3164_v33  ;;  %v2658_v34 = vld [vmem:[#allocation3 + $0x148] sm:$0xff] }
 0x3a6   : > { %v6980_v2 = vpop.f32.mrf.mxu1  ;;  %v3123_v45 = vld [vmem:[#allocation3 + $0x120] sm:$0xff] }
 0x3a7   : > { %2739 = vst.msk [vmem:[#allocation3 + $0x130] sm:$0xff] %vm1026_vm2, %v2697_v35  ;;  %v7216_v30 = vpop.f32.mrf.mxu0  ;;  %v3165_v43 = vadd.f32 %v3123_v45, %v9215_v13  ;;  %v4159_v45 = vld [vmem:[#allocation2 + $0x78] sm:$0xff] }
 0x3a8   : > { %v2605_v50 = vpop.f32.mrf.mxu1  ;;  %v4198_v11 = vpack.c.bf16 %v4160_v4, %v4159_v45  ;;  %v4164_v45 = vld [vmem:[#allocation2 + $0xa0] sm:$0xff] }
 0x3a9   : > { %v2698_v46 = vadd.f32 %v2656_v22, %v2605_v50  ;;  %v9579_v27 = vpop.f32.mrf.mxu0  ;;  %3207 = vst.msk [vmem:[#allocation3 + $0x120] sm:$0xff] %vm1026_vm2, %v3165_v43 }
 0x3aa   : > { %v6981_v49 = vpop.f32.mrf.mxu1  ;;  %v3124_v55 = vld [vmem:[#allocation3 + $0x128] sm:$0xff] }
 0x3ab   : > { %2740 = vst.msk [vmem:[#allocation3 + $0x138] sm:$0xff] %vm1026_vm2, %v2698_v46  ;;  %v7217_v51 = vpop.f32.mrf.mxu0  ;;  %v3166_v13 = vadd.f32 %v3124_v55, %v9226_v7  ;;  %v3557_v46 = vld [vmem:[#allocation3] sm:$0xff] }
 0x3ac   : > { %v2610_v56 = vpop.f32.mrf.mxu1  ;;  %7263 = vmatmul.mubr.msk.bf16.gmra.mxu1 %vm1026_vm2, %v4197_v28  ;;  %7407 = vmatmul.mubr.msk.bf16.gmra.mxu0 %vm1026_vm2, %v4681_v36  ;;  %v4162_v28 = vld [vmem:[#allocation2 + $0x90] sm:$0xff]  ;;  %v3558_v51 = vld [vmem:[#allocation3 + $0x8] sm:$0xff] }
 0x3ad   : > { %v2699_v38 = vadd.f32 %v2657_v15, %v2610_v56  ;;  %v9588_v18 = vpop.f32.mrf.mxu0  ;;  %7266 = vmatprep.mubr.msk.bf16.mxu1 %vm7592_vm0, %v7591_v1  ;;  %7410 = vmatprep.mubr.msk.bf16.mxu0 %vm7592_vm0, %v7591_v1  ;;  %3208 = vst.msk [vmem:[#allocation3 + $0x128] sm:$0xff] %vm1026_vm2, %v3166_v13  ;;  %v4161_v15 = vld [vmem:[#allocation2 + $0x88] sm:$0xff] }
 0x3ae   : > { %v6984_v21 = vpop.f32.mrf.mxu1  ;;  %v3125_v52 = vld [vmem:[#allocation3 + $0x130] sm:$0xff] }
 0x3af   : > { %2741 = vst.msk [vmem:[#allocation3 + $0x140] sm:$0xff] %vm1026_vm2, %v2699_v38  ;;  %v7220_v7 = vpop.f32.mrf.mxu0  ;;  %v3167_v33 = vadd.f32 %v3125_v52, %v9239_v5  ;;  %v4199_v21 = vpack.c.bf16 %v4162_v28, %v4161_v15  ;;  %v4683_v52 = vpack.c.bf16 %v9516_v40, %v9487_v16  ;;  %v4166_v15 = vld [vmem:[#allocation2 + $0xb0] sm:$0xff] }
 0x3b0   : > { %v2613_v14 = vpop.f32.mrf.mxu1 }
 0x3b1   : > { %v2700_v35 = vadd.f32 %v2658_v34, %v2613_v14  ;;  %v9597_v2 = vpop.f32.mrf.mxu0  ;;  %3209 = vst.msk [vmem:[#allocation3 + $0x130] sm:$0xff] %vm1026_vm2, %v3167_v33  ;;  %v3559_v14 = vld [vmem:[#allocation3 + $0x10] sm:$0xff] }
 0x3b2   : > { %v6985_v30 = vpop.f32.mrf.mxu1  ;;  %v3126_v43 = vld [vmem:[#allocation3 + $0x138] sm:$0xff] }
 0x3b3   : > { %2742 = vst.msk [vmem:[#allocation3 + $0x148] sm:$0xff] %vm1026_vm2, %v2700_v35  ;;  %v7221_v50 = vpop.f32.mrf.mxu0  ;;  %v3168_v22 = vadd.f32 %v3126_v43, %v9250_v23  ;;  %v4662_v30 = vld [vmem:[#allocation2 + $0x181] sm:$0xff] }
 0x3b4   : > { %v3390_v5 = vpop.f32.mrf.mxu1  ;;  %7267 = vmatmul.mubr.msk.bf16.gmra.mxu1 %vm1026_vm2, %v4198_v11  ;;  %7411 = vmatmul.mubr.msk.bf16.gmra.mxu0 %vm1026_vm2, %v4682_v12  ;;  %v3560_v43 = vld [vmem:[#allocation3 + $0x18] sm:$0xff] }
 0x3b5   : > { %v3599_v48 = vadd.f32 %v3557_v46, %v3390_v5  ;;  %v9606_v49 = vpop.f32.mrf.mxu0  ;;  %7270 = vmatprep.mubr.msk.bf16.mxu1 %vm7592_vm0, %v7591_v1  ;;  %7414 = vmatprep.mubr.msk.bf16.mxu0 %vm7592_vm0, %v7591_v1  ;;  %3210 = vst.msk [vmem:[#allocation3 + $0x138] sm:$0xff] %vm1026_vm2, %v3168_v22  ;;  %v4163_v5 = vld [vmem:[#allocation2 + $0x98] sm:$0xff] }
 0x3b6   : > { %v7080_v41 = vpop.f32.mrf.mxu1  ;;  %v3127_v17 = vld [vmem:[#allocation3 + $0x140] sm:$0xff] }
 0x3b7   : > { %3641 = vst.msk [vmem:[#allocation3] sm:$0xff] %vm1026_vm2, %v3599_v48  ;;  %v7224_v23 = vpop.f32.mrf.mxu0  ;;  %v3169_v36 = vadd.f32 %v3127_v17, %v9263_v25  ;;  %v4200_v48 = vpack.c.bf16 %v4164_v45, %v4163_v5  ;;  %v4684_v41 = vpack.c.bf16 %v4662_v30, %v9511_v54 }
 0x3b8   : > { %v3393_v55 = vpop.f32.mrf.mxu1 }
 0x3b9   : > { %v3600_v13 = vadd.f32 %v3558_v51, %v3393_v55  ;;  %v9615_v56 = vpop.f32.mrf.mxu0  ;;  %3211 = vst.msk [vmem:[#allocation3 + $0x140] sm:$0xff] %vm1026_vm2, %v3169_v36 }
 0x3ba   : > { %v7081_v38 = vpop.f32.mrf.mxu1  ;;  %v3128_v7 = vld [vmem:[#allocation3 + $0x148] sm:$0xff] }
 0x3bb   : > { %3642 = vst.msk [vmem:[#allocation3 + $0x8] sm:$0xff] %vm1026_vm2, %v3600_v13  ;;  %v7225_v4 = vpop.f32.mrf.mxu0  ;;  %v3170_v33 = vadd.f32 %v3128_v7, %v9274_v61  ;;  %v4663_v38 = vld [vmem:[#allocation2 + $0x189] sm:$0xff] }
 0x3bc   : > { %v3398_v25 = vpop.f32.mrf.mxu1  ;;  %7271 = vmatmul.mubr.msk.bf16.gmra.mxu1 %vm1026_vm2, %v4199_v21  ;;  %7415 = vmatmul.mubr.msk.bf16.gmra.mxu0 %vm1026_vm2, %v4683_v52  ;;  %v4664_v21 = vld [vmem:[#allocation2 + $0x191] sm:$0xff] }
 0x3bd   : > { %v3601_v34 = vadd.f32 %v3559_v14, %v3398_v25  ;;  %v9624_v35 = vpop.f32.mrf.mxu0  ;;  %7274 = vmatprep.mubr.msk.bf16.mxu1 %vm7592_vm0, %v7591_v1  ;;  %7418 = vmatprep.mubr.msk.bf16.mxu0 %vm7592_vm0, %v7591_v1  ;;  %3212 = vst.msk [vmem:[#allocation3 + $0x148] sm:$0xff] %vm1026_vm2, %v3170_v33  ;;  %v3562_v4 = vld [vmem:[#allocation3 + $0x28] sm:$0xff]  ;;  %v4165_v14 = vld [vmem:[#allocation2 + $0xa8] sm:$0xff] }
 0x3be   : > { %v7084_v16 = vpop.f32.mrf.mxu1  ;;  %v4027_v40 = vld [vmem:[#allocation3] sm:$0xff] }
 0x3bf   : > { %3643 = vst.msk [vmem:[#allocation3 + $0x10] sm:$0xff] %vm1026_vm2, %v3601_v34  ;;  %v7228_v61 = vpop.f32.mrf.mxu0  ;;  %v4069_v11 = vadd.f32 %v4027_v40, %v9287_v10  ;;  %v3561_v10 = vld [vmem:[#allocation3 + $0x20] sm:$0xff]  ;;  %v4201_v16 = vpack.c.bf16 %v4166_v15, %v4165_v14  ;;  %v4685_v40 = vpack.c.bf16 %v4664_v21, %v4663_v38 }
 0x3c0   : > { %v3401_v12 = vpop.f32.mrf.mxu1  ;;  %v3565_v38 = vld [vmem:[#allocation3 + $0x40] sm:$0xff] }
 0x3c1   : > { %v3602_v50 = vadd.f32 %v3560_v43, %v3401_v12  ;;  %v9633_v22 = vpop.f32.mrf.mxu0  ;;  %4111 = vst.msk [vmem:[#allocation3] sm:$0xff] %vm1026_vm2, %v4069_v11  ;;  %v3563_v12 = vld [vmem:[#allocation3 + $0x30] sm:$0xff] }
 0x3c2   : > { %v7085_v46 = vpop.f32.mrf.mxu1  ;;  %v4028_v17 = vld [vmem:[#allocation3 + $0x8] sm:$0xff] }
 0x3c3   : > { %3644 = vst.msk [vmem:[#allocation3 + $0x18] sm:$0xff] %vm1026_vm2, %v3602_v50  ;;  %v7229_v23 = vpop.f32.mrf.mxu0  ;;  %v4070_v28 = vadd.f32 %v4028_v17, %v9298_v63  ;;  %v3564_v17 = vld [vmem:[#allocation3 + $0x38] sm:$0xff] }
 0x3c4   : > { %v3406_v36 = vpop.f32.mrf.mxu1  ;;  %7275 = vmatmul.mubr.msk.bf16.gmra.mxu1 %vm1026_vm2, %v4200_v48  ;;  %7419 = vmatmul.mubr.msk.bf16.gmra.mxu0 %vm1026_vm2, %v4684_v41 }
 0x3c5   : > { %v3603_v55 = vadd.f32 %v3561_v10, %v3406_v36  ;;  %v9641_v51 = vpop.f32.mrf.mxu0  ;;  %7278 = vmatprep.mubr.msk.bf16.mxu1 %vm7592_vm0, %v7591_v1  ;;  %7422 = vmatprep.mubr.msk.bf16.mxu0 %vm7592_vm0, %v7591_v1  ;;  %4112 = vst.msk [vmem:[#allocation3 + $0x8] sm:$0xff] %vm1026_vm2, %v4070_v28  ;;  %v4167_v36 = vld [vmem:[#allocation2 + $0xb8] sm:$0xff] }
 0x3c6   : > { %v7088_v54 = vpop.f32.mrf.mxu1  ;;  %v4029_v13 = vld [vmem:[#allocation3 + $0x10] sm:$0xff] }
 0x3c7   : > { %3645 = vst.msk [vmem:[#allocation3 + $0x20] sm:$0xff] %vm1026_vm2, %v3603_v55  ;;  %v7232_v63 = vpop.f32.mrf.mxu0  ;;  %v4071_v52 = vadd.f32 %v4029_v13, %v9311_v32 }
 0x3c8   : > { %v3409_v7 = vpop.f32.mrf.mxu1 }
 0x3c9   : > { %v3604_v33 = vadd.f32 %v3562_v4, %v3409_v7  ;;  %v9650_v25 = vpop.f32.mrf.mxu0  ;;  %4113 = vst.msk [vmem:[#allocation3 + $0x10] sm:$0xff] %vm1026_vm2, %v4071_v52 }
 0x3ca   : > { %v7089_v34 = vpop.f32.mrf.mxu1  ;;  %v4030_v61 = vld [vmem:[#allocation3 + $0x18] sm:$0xff] }
 0x3cb   : > { %3646 = vst.msk [vmem:[#allocation3 + $0x28] sm:$0xff] %vm1026_vm2, %v3604_v33  ;;  %v7233_v45 = vpop.f32.mrf.mxu0  ;;  %v4072_v30 = vadd.f32 %v4030_v61, %v9322_v24  ;;  %v4168_v24 = vld [vmem:[#allocation2 + $0xc0] sm:$0xff]  ;;  %v4170_v33 = vld [vmem:[#allocation2 + $0xd0] sm:$0xff]  ;;  %v3566_v34 = vld [vmem:[#allocation3 + $0x48] sm:$0xff] }
 0x3cc   : > { %v3414_v11 = vpop.f32.mrf.mxu1  ;;  %7279 = vmatmul.mubr.msk.bf16.gmra.mxu1 %vm1026_vm2, %v4201_v16  ;;  %7423 = vmatmul.mubr.msk.bf16.gmra.mxu0 %vm1026_vm2, %v4685_v40  ;;  %v4202_v55 = vpack.c.bf16 %v4168_v24, %v4167_v36  ;;  %v4169_v61 = vld [vmem:[#allocation2 + $0xc8] sm:$0xff] }
 0x3cd   : > { %v3605_v32 = vadd.f32 %v3563_v12, %v3414_v11  ;;  %v9657_v43 = vpop.f32.mrf.mxu0  ;;  %7282 = vmatprep.mubr.msk.bf16.mxu1 %vm7592_vm0, %v7591_v1  ;;  %4114 = vst.msk [vmem:[#allocation3 + $0x18] sm:$0xff] %vm1026_vm2, %v4072_v30  ;;  %v4203_v30 = vpack.c.bf16 %v4170_v33, %v4169_v61  ;;  %v3568_v36 = vld [vmem:[#allocation3 + $0x58] sm:$0xff]  ;;  %v3570_v61 = vld [vmem:[#allocation3 + $0x68] sm:$0xff] }
 0x3ce   : > { %v7092_v50 = vpop.f32.mrf.mxu1  ;;  %v4031_v5 = vld [vmem:[#allocation3 + $0x20] sm:$0xff] }
 0x3cf   : > { %3647 = vst.msk [vmem:[#allocation3 + $0x30] sm:$0xff] %vm1026_vm2, %v3605_v32  ;;  %v7236_v46 = vpop.f32.mrf.mxu0  ;;  %v4073_v48 = vadd.f32 %v4031_v5, %v9335_v3  ;;  %v3567_v5 = vld [vmem:[#allocation3 + $0x50] sm:$0xff] }
 0x3d0   : > { %v3417_v41 = vpop.f32.mrf.mxu1 }
 0x3d1   : > { %v3606_v23 = vadd.f32 %v3564_v17, %v3417_v41  ;;  %v9664_v28 = vpop.f32.mrf.mxu0  ;;  %4115 = vst.msk [vmem:[#allocation3 + $0x20] sm:$0xff] %vm1026_vm2, %v4073_v48  ;;  %v4172_v17 = vld [vmem:[#allocation2 + $0xe0] sm:$0xff] }
 0x3d2   : > { %v7093_v10 = vpop.f32.mrf.mxu1  ;;  %v4032_v54 = vld [vmem:[#allocation3 + $0x28] sm:$0xff] }
 0x3d3   : > { %3648 = vst.msk [vmem:[#allocation3 + $0x38] sm:$0xff] %vm1026_vm2, %v3606_v23  ;;  %v7237_v13 = vpop.f32.mrf.mxu0  ;;  %v4074_v63 = vadd.f32 %v4032_v54, %v9346_v42  ;;  %v4171_v54 = vld [vmem:[#allocation2 + $0xd8] sm:$0xff] }
 0x3d4   : > { %v3422_v15 = vpop.f32.mrf.mxu1  ;;  %7283 = vmatmul.mubr.msk.bf16.gmra.mxu1 %vm1026_vm2, %v4202_v55 }
 0x3d5   : > { %v3607_v3 = vadd.f32 %v3565_v38, %v3422_v15  ;;  %v9670_v21 = vpop.f32.mrf.mxu0  ;;  %7286 = vmatprep.mubr.msk.bf16.mxu1 %vm7592_vm0, %v7591_v1  ;;  %4116 = vst.msk [vmem:[#allocation3 + $0x28] sm:$0xff] %vm1026_vm2, %v4074_v63  ;;  %v4204_v63 = vpack.c.bf16 %v4172_v17, %v4171_v54  ;;  %v3572_v54 = vld [vmem:[#allocation3 + $0x78] sm:$0xff] }
 0x3d6   : > { %v7096_v52 = vpop.f32.mrf.mxu1  ;;  %v4033_v7 = vld [vmem:[#allocation3 + $0x30] sm:$0xff] }
 0x3d7   : > { %3649 = vst.msk [vmem:[#allocation3 + $0x40] sm:$0xff] %vm1026_vm2, %v3607_v3  ;;  %v7240_v4 = vpop.f32.mrf.mxu0  ;;  %v4075_v42 = vadd.f32 %v4033_v7, %v9359_v44  ;;  %v3569_v7 = vld [vmem:[#allocation3 + $0x60] sm:$0xff] }
 0x3d8   : > { %v3425_v14 = vpop.f32.mrf.mxu1 }
 0x3d9   : > { %v3608_v16 = vadd.f32 %v3566_v34, %v3425_v14  ;;  %v9677_v40 = vpop.f32.mrf.mxu0  ;;  %4117 = vst.msk [vmem:[#allocation3 + $0x30] sm:$0xff] %vm1026_vm2, %v4075_v42  ;;  %v4174_v34 = vld [vmem:[#allocation2 + $0xf0] sm:$0xff] }
 0x3da   : > { %v7097_v45 = vpop.f32.mrf.mxu1  ;;  %v4034_v11 = vld [vmem:[#allocation3 + $0x38] sm:$0xff] }
 0x3db   : > { %3650 = vst.msk [vmem:[#allocation3 + $0x48] sm:$0xff] %vm1026_vm2, %v3608_v16  ;;  %v7241_v12 = vpop.f32.mrf.mxu0  ;;  %v4076_v32 = vadd.f32 %v4034_v11, %v9370_v57  ;;  %v4173_v11 = vld [vmem:[#allocation2 + $0xe8] sm:$0xff] }
 0x3dc   : > { %v3430_v50 = vpop.f32.mrf.mxu1  ;;  %7287 = vmatmul.mubr.msk.bf16.gmra.mxu1 %vm1026_vm2, %v4203_v30 }
 0x3dd   : > { %v3609_v44 = vadd.f32 %v3567_v5, %v3430_v50  ;;  %v9683_v46 = vpop.f32.mrf.mxu0  ;;  %7290 = vmatprep.mubr.msk.bf16.mxu1 %vm7592_vm0, %v7591_v1  ;;  %4118 = vst.msk [vmem:[#allocation3 + $0x38] sm:$0xff] %vm1026_vm2, %v4076_v32  ;;  %v4205_v32 = vpack.c.bf16 %v4174_v34, %v4173_v11  ;;  %v3574_v11 = vld [vmem:[#allocation3 + $0x88] sm:$0xff] }
 0x3de   : > { %v7100_v24 = vpop.f32.mrf.mxu1  ;;  %v4035_v48 = vld [vmem:[#allocation3 + $0x40] sm:$0xff] }
 0x3df   : > { %3651 = vst.msk [vmem:[#allocation3 + $0x50] sm:$0xff] %vm1026_vm2, %v3609_v44  ;;  %v7244_v41 = vpop.f32.mrf.mxu0  ;;  %v4077_v57 = vadd.f32 %v4035_v48, %v9383_v59  ;;  %v3571_v48 = vld [vmem:[#allocation3 + $0x70] sm:$0xff] }
 0x3e0   : > { %v3433_v23 = vpop.f32.mrf.mxu1 }
 0x3e1   : > { %v3610_v10 = vadd.f32 %v3568_v36, %v3433_v23  ;;  %v9690_v55 = vpop.f32.mrf.mxu0  ;;  %4119 = vst.msk [vmem:[#allocation3 + $0x40] sm:$0xff] %vm1026_vm2, %v4077_v57  ;;  %v4176_v36 = vld [vmem:[#allocation2 + $0x100] sm:$0xff] }
 0x3e2   : > { %v7101_v13 = vpop.f32.mrf.mxu1  ;;  %v4036_v15 = vld [vmem:[#allocation3 + $0x48] sm:$0xff] }
 0x3e3   : > { %3652 = vst.msk [vmem:[#allocation3 + $0x58] sm:$0xff] %vm1026_vm2, %v3610_v10  ;;  %v7245_v38 = vpop.f32.mrf.mxu0  ;;  %v4078_v3 = vadd.f32 %v4036_v15, %v9394_v19  ;;  %v4175_v15 = vld [vmem:[#allocation2 + $0xf8] sm:$0xff] }
 0x3e4   : > { %v3438_v52 = vpop.f32.mrf.mxu1  ;;  %7291 = vmatmul.mubr.msk.bf16.gmra.mxu1 %vm1026_vm2, %v4204_v63 }
 0x3e5   : > { %v3611_v59 = vadd.f32 %v3569_v7, %v3438_v52  ;;  %v9696_v4 = vpop.f32.mrf.mxu0  ;;  %7294 = vmatprep.mubr.msk.bf16.mxu1 %vm7592_vm0, %v7591_v1  ;;  %4120 = vst.msk [vmem:[#allocation3 + $0x48] sm:$0xff] %vm1026_vm2, %v4078_v3  ;;  %v4206_v3 = vpack.c.bf16 %v4176_v36, %v4175_v15  ;;  %v3576_v15 = vld [vmem:[#allocation3 + $0x98] sm:$0xff] }
 0x3e6   : > { %v7104_v33 = vpop.f32.mrf.mxu1  ;;  %v4037_v42 = vld [vmem:[#allocation3 + $0x50] sm:$0xff] }
 0x3e7   : > { %3653 = vst.msk [vmem:[#allocation3 + $0x60] sm:$0xff] %vm1026_vm2, %v3611_v59  ;;  %v7248_v14 = vpop.f32.mrf.mxu0  ;;  %v4079_v19 = vadd.f32 %v4037_v42, %v9407_v39  ;;  %v3573_v42 = vld [vmem:[#allocation3 + $0x80] sm:$0xff] }
 0x3e8   : > { %v3441_v16 = vpop.f32.mrf.mxu1 }
 0x3e9   : > { %v3612_v45 = vadd.f32 %v3570_v61, %v3441_v16  ;;  %v9703_v30 = vpop.f32.mrf.mxu0  ;;  %4121 = vst.msk [vmem:[#allocation3 + $0x50] sm:$0xff] %vm1026_vm2, %v4079_v19  ;;  %v4178_v61 = vld [vmem:[#allocation2 + $0x110] sm:$0xff] }
 0x3ea   : > { %v7105_v12 = vpop.f32.mrf.mxu1  ;;  %v4038_v50 = vld [vmem:[#allocation3 + $0x58] sm:$0xff] }
 0x3eb   : > { %3654 = vst.msk [vmem:[#allocation3 + $0x68] sm:$0xff] %vm1026_vm2, %v3612_v45  ;;  %v7249_v5 = vpop.f32.mrf.mxu0  ;;  %v4080_v44 = vadd.f32 %v4038_v50, %v9418_v62  ;;  %v4177_v50 = vld [vmem:[#allocation2 + $0x108] sm:$0xff] }
 0x3ec   : > { %v3446_v24 = vpop.f32.mrf.mxu1  ;;  %7295 = vmatmul.mubr.msk.bf16.gmra.mxu1 %vm1026_vm2, %v4205_v32 }
 0x3ed   : > { %v3613_v39 = vadd.f32 %v3571_v48, %v3446_v24  ;;  %v9709_v41 = vpop.f32.mrf.mxu0  ;;  %7298 = vmatprep.mubr.msk.bf16.mxu1 %vm7592_vm0, %v7591_v1  ;;  %4122 = vst.msk [vmem:[#allocation3 + $0x58] sm:$0xff] %vm1026_vm2, %v4080_v44  ;;  %v4207_v44 = vpack.c.bf16 %v4178_v61, %v4177_v50  ;;  %v3578_v50 = vld [vmem:[#allocation3 + $0xa8] sm:$0xff] }
 0x3ee   : > { %v7108_v17 = vpop.f32.mrf.mxu1  ;;  %v4039_v57 = vld [vmem:[#allocation3 + $0x60] sm:$0xff] }
 0x3ef   : > { %3655 = vst.msk [vmem:[#allocation3 + $0x70] sm:$0xff] %vm1026_vm2, %v3613_v39  ;;  %v7344_v23 = vpop.f32.mrf.mxu0  ;;  %v4081_v62 = vadd.f32 %v4039_v57, %v9431_v58  ;;  %v3575_v57 = vld [vmem:[#allocation3 + $0x90] sm:$0xff] }
 0x3f0   : > { %v3449_v10 = vpop.f32.mrf.mxu1 }
 0x3f1   : > { %v3614_v13 = vadd.f32 %v3572_v54, %v3449_v10  ;;  %v9716_v63 = vpop.f32.mrf.mxu0  ;;  %4123 = vst.msk [vmem:[#allocation3 + $0x60] sm:$0xff] %vm1026_vm2, %v4081_v62  ;;  %v4180_v54 = vld [vmem:[#allocation2 + $0x120] sm:$0xff] }
 0x3f2   : > { %v7109_v38 = vpop.f32.mrf.mxu1  ;;  %v4040_v52 = vld [vmem:[#allocation3 + $0x68] sm:$0xff] }
 0x3f3   : > { %3656 = vst.msk [vmem:[#allocation3 + $0x78] sm:$0xff] %vm1026_vm2, %v3614_v13  ;;  %v7345_v7 = vpop.f32.mrf.mxu0  ;;  %v4082_v59 = vadd.f32 %v4040_v52, %v9442_v20  ;;  %v4179_v52 = vld [vmem:[#allocation2 + $0x118] sm:$0xff] }
 0x3f4   : > { %v3454_v33 = vpop.f32.mrf.mxu1  ;;  %7299 = vmatmul.mubr.msk.bf16.gmra.mxu1 %vm1026_vm2, %v4206_v3 }
 0x3f5   : > { %v3615_v58 = vadd.f32 %v3573_v42, %v3454_v33  ;;  %v9722_v14 = vpop.f32.mrf.mxu0  ;;  %7302 = vmatprep.mubr.msk.bf16.mxu1 %vm7592_vm0, %v7591_v1  ;;  %4124 = vst.msk [vmem:[#allocation3 + $0x68] sm:$0xff] %vm1026_vm2, %v4082_v59  ;;  %v4208_v59 = vpack.c.bf16 %v4180_v54, %v4179_v52  ;;  %v3580_v52 = vld [vmem:[#allocation3 + $0xb8] sm:$0xff] }
 0x3f6   : > { %v7112_v34 = vpop.f32.mrf.mxu1  ;;  %v4041_v19 = vld [vmem:[#allocation3 + $0x70] sm:$0xff] }
 0x3f7   : > { %3657 = vst.msk [vmem:[#allocation3 + $0x80] sm:$0xff] %vm1026_vm2, %v3615_v58  ;;  %v7348_v16 = vpop.f32.mrf.mxu0  ;;  %v4083_v20 = vadd.f32 %v4041_v19, %v9455_v9  ;;  %v3577_v19 = vld [vmem:[#allocation3 + $0xa0] sm:$0xff] }
 0x3f8   : > { %v3457_v45 = vpop.f32.mrf.mxu1 }
 0x3f9   : > { %v3616_v12 = vadd.f32 %v3574_v11, %v3457_v45  ;;  %v9729_v32 = vpop.f32.mrf.mxu0  ;;  %4125 = vst.msk [vmem:[#allocation3 + $0x70] sm:$0xff] %vm1026_vm2, %v4083_v20  ;;  %v4182_v11 = vld [vmem:[#allocation2 + $0x130] sm:$0xff] }
 0x3fa   : > { %v7113_v5 = vpop.f32.mrf.mxu1  ;;  %v4042_v24 = vld [vmem:[#allocation3 + $0x78] sm:$0xff] }
 0x3fb   : > { %3658 = vst.msk [vmem:[#allocation3 + $0x88] sm:$0xff] %vm1026_vm2, %v3616_v12  ;;  %v7349_v48 = vpop.f32.mrf.mxu0  ;;  %v4084_v39 = vadd.f32 %v4042_v24, %v9466_v8  ;;  %v4181_v24 = vld [vmem:[#allocation2 + $0x128] sm:$0xff] }
 0x3fc   : > { %v3462_v17 = vpop.f32.mrf.mxu1  ;;  %7303 = vmatmul.mubr.msk.bf16.gmra.mxu1 %vm1026_vm2, %v4207_v44 }
 0x3fd   : > { %v3617_v9 = vadd.f32 %v3575_v57, %v3462_v17  ;;  %v9735_v23 = vpop.f32.mrf.mxu0  ;;  %7306 = vmatprep.mubr.msk.bf16.mxu1 %vm7592_vm0, %v7591_v1  ;;  %4126 = vst.msk [vmem:[#allocation3 + $0x78] sm:$0xff] %vm1026_vm2, %v4084_v39  ;;  %v4209_v39 = vpack.c.bf16 %v4182_v11, %v4181_v24  ;;  %v3582_v24 = vld [vmem:[#allocation3 + $0xc8] sm:$0xff] }
 0x3fe   : > { %v7116_v36 = vpop.f32.mrf.mxu1  ;;  %v4043_v62 = vld [vmem:[#allocation3 + $0x80] sm:$0xff] }
 0x3ff   : > { %3659 = vst.msk [vmem:[#allocation3 + $0x90] sm:$0xff] %vm1026_vm2, %v3617_v9  ;;  %v7352_v10 = vpop.f32.mrf.mxu0  ;;  %v4085_v8 = vadd.f32 %v4043_v62, %v9479_v60  ;;  %v3579_v62 = vld [vmem:[#allocation3 + $0xb0] sm:$0xff] }
 0x400   : > { %v3465_v13 = vpop.f32.mrf.mxu1 }
 0x401   : > { %v3618_v38 = vadd.f32 %v3576_v15, %v3465_v13  ;;  %v9742_v3 = vpop.f32.mrf.mxu0  ;;  %4127 = vst.msk [vmem:[#allocation3 + $0x80] sm:$0xff] %vm1026_vm2, %v4085_v8  ;;  %v4184_v15 = vld [vmem:[#allocation2 + $0x140] sm:$0xff] }
 0x402   : > { %v7117_v7 = vpop.f32.mrf.mxu1  ;;  %v4044_v33 = vld [vmem:[#allocation3 + $0x88] sm:$0xff] }
 0x403   : > { %3660 = vst.msk [vmem:[#allocation3 + $0x98] sm:$0xff] %vm1026_vm2, %v3618_v38  ;;  %v7353_v42 = vpop.f32.mrf.mxu0  ;;  %v4086_v58 = vadd.f32 %v4044_v33, %v9490_v53  ;;  %v4183_v33 = vld [vmem:[#allocation2 + $0x138] sm:$0xff] }
 0x404   : > { %v3470_v34 = vpop.f32.mrf.mxu1  ;;  %7307 = vmatmul.mubr.msk.bf16.gmra.mxu1 %vm1026_vm2, %v4208_v59 }
 0x405   : > { %v3619_v60 = vadd.f32 %v3577_v19, %v3470_v34  ;;  %v9748_v16 = vpop.f32.mrf.mxu0  ;;  %7310 = vmatprep.mubr.msk.bf16.mxu1 %vm7592_vm0, %v7591_v1  ;;  %4128 = vst.msk [vmem:[#allocation3 + $0x88] sm:$0xff] %vm1026_vm2, %v4086_v58  ;;  %v4210_v58 = vpack.c.bf16 %v4184_v15, %v4183_v33  ;;  %v3584_v33 = vld [vmem:[#allocation3 + $0xd8] sm:$0xff] }
 0x406   : > { %v7120_v61 = vpop.f32.mrf.mxu1  ;;  %v4045_v20 = vld [vmem:[#allocation3 + $0x90] sm:$0xff] }
 0x407   : > { %3661 = vst.msk [vmem:[#allocation3 + $0xa0] sm:$0xff] %vm1026_vm2, %v3619_v60  ;;  %v7356_v45 = vpop.f32.mrf.mxu0  ;;  %v4087_v53 = vadd.f32 %v4045_v20, %v9503_v31  ;;  %v3581_v20 = vld [vmem:[#allocation3 + $0xc0] sm:$0xff] }
 0x408   : > { %v3473_v12 = vpop.f32.mrf.mxu1 }
 0x409   : > { %v3620_v5 = vadd.f32 %v3578_v50, %v3473_v12  ;;  %v9755_v44 = vpop.f32.mrf.mxu0  ;;  %4129 = vst.msk [vmem:[#allocation3 + $0x90] sm:$0xff] %vm1026_vm2, %v4087_v53  ;;  %v4186_v50 = vld [vmem:[#allocation2 + $0x150] sm:$0xff] }
 0x40a   : > { %v7121_v48 = vpop.f32.mrf.mxu1  ;;  %v4046_v17 = vld [vmem:[#allocation3 + $0x98] sm:$0xff] }
 0x40b   : > { %3662 = vst.msk [vmem:[#allocation3 + $0xa8] sm:$0xff] %vm1026_vm2, %v3620_v5  ;;  %v7357_v57 = vpop.f32.mrf.mxu0  ;;  %v4088_v9 = vadd.f32 %v4046_v17, %v9514_v0  ;;  %v4185_v17 = vld [vmem:[#allocation2 + $0x148] sm:$0xff] }
 0x40c   : > { %v3478_v36 = vpop.f32.mrf.mxu1  ;;  %7311 = vmatmul.mubr.msk.bf16.gmra.mxu1 %vm1026_vm2, %v4209_v39 }
 0x40d   : > { %v3621_v31 = vadd.f32 %v3579_v62, %v3478_v36  ;;  %v9761_v10 = vpop.f32.mrf.mxu0  ;;  %7314 = vmatprep.mubr.msk.bf16.mxu1 %vm7592_vm0, %v7591_v1  ;;  %4130 = vst.msk [vmem:[#allocation3 + $0x98] sm:$0xff] %vm1026_vm2, %v4088_v9  ;;  %v4211_v9 = vpack.c.bf16 %v4186_v50, %v4185_v17  ;;  %v3586_v17 = vld [vmem:[#allocation3 + $0xe8] sm:$0xff] }
 0x40e   : > { %v7124_v54 = vpop.f32.mrf.mxu1  ;;  %v4047_v8 = vld [vmem:[#allocation3 + $0xa0] sm:$0xff] }
 0x40f   : > { %3663 = vst.msk [vmem:[#allocation3 + $0xb0] sm:$0xff] %vm1026_vm2, %v3621_v31  ;;  %v7360_v13 = vpop.f32.mrf.mxu0  ;;  %v4089_v0 = vadd.f32 %v4047_v8, %v9527_v6  ;;  %v3583_v8 = vld [vmem:[#allocation3 + $0xd0] sm:$0xff] }
 0x410   : > { %v3481_v38 = vpop.f32.mrf.mxu1 }
 0x411   : > { %v3622_v7 = vadd.f32 %v3580_v52, %v3481_v38  ;;  %v9768_v59 = vpop.f32.mrf.mxu0  ;;  %4131 = vst.msk [vmem:[#allocation3 + $0xa0] sm:$0xff] %vm1026_vm2, %v4089_v0  ;;  %v4188_v52 = vld [vmem:[#allocation2 + $0x160] sm:$0xff] }
 0x412   : > { %v7125_v42 = vpop.f32.mrf.mxu1  ;;  %v4048_v34 = vld [vmem:[#allocation3 + $0xa8] sm:$0xff] }
 0x413   : > { %3664 = vst.msk [vmem:[#allocation3 + $0xb8] sm:$0xff] %vm1026_vm2, %v3622_v7  ;;  %v7361_v19 = vpop.f32.mrf.mxu0  ;;  %v4090_v60 = vadd.f32 %v4048_v34, %v9536_v26  ;;  %v4187_v34 = vld [vmem:[#allocation2 + $0x158] sm:$0xff] }
 0x414   : > { %v3486_v61 = vpop.f32.mrf.mxu1  ;;  %7315 = vmatmul.mubr.msk.bf16.gmra.mxu1 %vm1026_vm2, %v4210_v58 }
 0x415   : > { %v3623_v6 = vadd.f32 %v3581_v20, %v3486_v61  ;;  %v9774_v45 = vpop.f32.mrf.mxu0  ;;  %7318 = vmatprep.mubr.msk.bf16.mxu1 %vm7592_vm0, %v7591_v1  ;;  %4132 = vst.msk [vmem:[#allocation3 + $0xa8] sm:$0xff] %vm1026_vm2, %v4090_v60  ;;  %v4212_v60 = vpack.c.bf16 %v4188_v52, %v4187_v34 }
 0x416   : > { %v7128_v11 = vpop.f32.mrf.mxu1  ;;  %v4049_v53 = vld [vmem:[#allocation3 + $0xb0] sm:$0xff] }
 0x417   : > { %3665 = vst.msk [vmem:[#allocation3 + $0xc0] sm:$0xff] %vm1026_vm2, %v3623_v6  ;;  %v7364_v12 = vpop.f32.mrf.mxu0  ;;  %v4091_v26 = vadd.f32 %v4049_v53, %v9548_v47  ;;  %v3585_v53 = vld [vmem:[#allocation3 + $0xe0] sm:$0xff] }
 0x418   : > { %v3489_v5 = vpop.f32.mrf.mxu1 }
 0x419   : > { %v3624_v48 = vadd.f32 %v3582_v24, %v3489_v5  ;;  %v9781_v39 = vpop.f32.mrf.mxu0  ;;  %4133 = vst.msk [vmem:[#allocation3 + $0xb0] sm:$0xff] %vm1026_vm2, %v4091_v26  ;;  %v4190_v24 = vld [vmem:[#allocation2 + $0x170] sm:$0xff] }
 0x41a   : > { %v7129_v57 = vpop.f32.mrf.mxu1  ;;  %v4050_v36 = vld [vmem:[#allocation3 + $0xb8] sm:$0xff] }
 0x41b   : > { %3666 = vst.msk [vmem:[#allocation3 + $0xc8] sm:$0xff] %vm1026_vm2, %v3624_v48  ;;  %v7365_v62 = vpop.f32.mrf.mxu0  ;;  %v4092_v31 = vadd.f32 %v4050_v36, %v9558_v37  ;;  %v4189_v36 = vld [vmem:[#allocation2 + $0x168] sm:$0xff] }
 0x41c   : > { %v3494_v54 = vpop.f32.mrf.mxu1  ;;  %7319 = vmatmul.mubr.msk.bf16.gmra.mxu1 %vm1026_vm2, %v4211_v9 }
 0x41d   : > { %v3625_v47 = vadd.f32 %v3583_v8, %v3494_v54  ;;  %v9787_v13 = vpop.f32.mrf.mxu0  ;;  %7322 = vmatprep.mubr.msk.bf16.mxu1 %vm7592_vm0, %v7591_v1  ;;  %4134 = vst.msk [vmem:[#allocation3 + $0xb8] sm:$0xff] %vm1026_vm2, %v4092_v31  ;;  %v4213_v31 = vpack.c.bf16 %v4190_v24, %v4189_v36 }
 0x41e   : > { %v7132_v15 = vpop.f32.mrf.mxu1  ;;  %v4051_v0 = vld [vmem:[#allocation3 + $0xc0] sm:$0xff] }
 0x41f   : > { %3667 = vst.msk [vmem:[#allocation3 + $0xd0] sm:$0xff] %vm1026_vm2, %v3625_v47  ;;  %v7368_v38 = vpop.f32.mrf.mxu0  ;;  %v4093_v37 = vadd.f32 %v4051_v0, %v9567_v29  ;;  %v3587_v0 = vld [vmem:[#allocation3 + $0xf0] sm:$0xff] }
 0x420   : > { %v3497_v7 = vpop.f32.mrf.mxu1 }
 0x421   : > { %v3626_v42 = vadd.f32 %v3584_v33, %v3497_v7  ;;  %v9794_v58 = vpop.f32.mrf.mxu0  ;;  %4135 = vst.msk [vmem:[#allocation3 + $0xc0] sm:$0xff] %vm1026_vm2, %v4093_v37  ;;  %v4191_v33 = vld [vmem:[#allocation2 + $0x178] sm:$0xff] }
 0x422   : > { %v7133_v19 = vpop.f32.mrf.mxu1  ;;  %v4052_v61 = vld [vmem:[#allocation3 + $0xc8] sm:$0xff] }
 0x423   : > { %3668 = vst.msk [vmem:[#allocation3 + $0xd8] sm:$0xff] %vm1026_vm2, %v3626_v42  ;;  %v7369_v20 = vpop.f32.mrf.mxu0  ;;  %v4094_v6 = vadd.f32 %v4052_v61, %v9579_v27  ;;  %v4192_v42 = vld [vmem:[#allocation2 + $0x180] sm:$0xff]  ;;  %v3588_v19 = vld [vmem:[#allocation3 + $0xf8] sm:$0xff] }
 0x424   : > { %v3502_v11 = vpop.f32.mrf.mxu1  ;;  %7323 = vmatmul.mubr.msk.bf16.gmra.mxu1 %vm1026_vm2, %v4212_v60 }
 0x425   : > { %v3627_v29 = vadd.f32 %v3585_v53, %v3502_v11  ;;  %v9800_v12 = vpop.f32.mrf.mxu0  ;;  %7326 = vmatprep.mubr.msk.bf16.mxu1 %vm7592_vm0, %v7591_v1  ;;  %4136 = vst.msk [vmem:[#allocation3 + $0xc8] sm:$0xff] %vm1026_vm2, %v4094_v6  ;;  %v4214_v6 = vpack.c.bf16 %v4192_v42, %v4191_v33 }
 0x426   : > { %v7136_v50 = vpop.f32.mrf.mxu1  ;;  %v4053_v26 = vld [vmem:[#allocation3 + $0xd0] sm:$0xff] }
 0x427   : > { %3669 = vst.msk [vmem:[#allocation3 + $0xe0] sm:$0xff] %vm1026_vm2, %v3627_v29  ;;  %v7372_v5 = vpop.f32.mrf.mxu0  ;;  %v4095_v27 = vadd.f32 %v4053_v26, %v9588_v18  ;;  %v3589_v26 = vld [vmem:[#allocation3 + $0x100] sm:$0xff] }
 0x428   : > { %v3505_v48 = vpop.f32.mrf.mxu1 }
 0x429   : > { %v3628_v57 = vadd.f32 %v3586_v17, %v3505_v48  ;;  %v9807_v9 = vpop.f32.mrf.mxu0  ;;  %4137 = vst.msk [vmem:[#allocation3 + $0xd0] sm:$0xff] %vm1026_vm2, %v4095_v27  ;;  %v4193_v17 = vld [vmem:[#allocation2 + $0x188] sm:$0xff] }
 0x42a   : > { %v7137_v62 = vpop.f32.mrf.mxu1  ;;  %v4054_v54 = vld [vmem:[#allocation3 + $0xd8] sm:$0xff] }
 0x42b   : > { %3670 = vst.msk [vmem:[#allocation3 + $0xe8] sm:$0xff] %vm1026_vm2, %v3628_v57  ;;  %v7373_v8 = vpop.f32.mrf.mxu0  ;;  %v4096_v47 = vadd.f32 %v4054_v54, %v9597_v2  ;;  %v4194_v57 = vld [vmem:[#allocation2 + $0x190] sm:$0xff]  ;;  %v3590_v62 = vld [vmem:[#allocation3 + $0x108] sm:$0xff] }
 0x42c   : > { %v3510_v15 = vpop.f32.mrf.mxu1  ;;  %7327 = vmatmul.mubr.msk.bf16.gmra.mxu1 %vm1026_vm2, %v4213_v31 }
 0x42d   : > { %v3629_v18 = vadd.f32 %v3587_v0, %v3510_v15  ;;  %v9813_v38 = vpop.f32.mrf.mxu0  ;;  %7330 = vmatprep.mubr.msk.bf16.mxu1 %vm7592_vm0, %v7591_v1  ;;  %4138 = vst.msk [vmem:[#allocation3 + $0xd8] sm:$0xff] %vm1026_vm2, %v4096_v47  ;;  %v4215_v47 = vpack.c.bf16 %v4194_v57, %v4193_v17 }
 0x42e   : > { %v7140_v52 = vpop.f32.mrf.mxu1  ;;  %v4055_v37 = vld [vmem:[#allocation3 + $0xe0] sm:$0xff] }
 0x42f   : > { %3671 = vst.msk [vmem:[#allocation3 + $0xf0] sm:$0xff] %vm1026_vm2, %v3629_v18  ;;  %v7376_v7 = vpop.f32.mrf.mxu0  ;;  %v4097_v2 = vadd.f32 %v4055_v37, %v9606_v49  ;;  %v3591_v37 = vld [vmem:[#allocation3 + $0x110] sm:$0xff] }
 0x430   : > { %v3513_v34 = vpop.f32.mrf.mxu1 }
 0x431   : > { %v3630_v60 = vadd.f32 %v3588_v19, %v3513_v34  ;;  %v9820_v61 = vpop.f32.mrf.mxu0  ;;  %4139 = vst.msk [vmem:[#allocation3 + $0xe0] sm:$0xff] %vm1026_vm2, %v4097_v2  ;;  %v3592_v19 = vld [vmem:[#allocation3 + $0x118] sm:$0xff] }
 0x432   : > { %v7141_v20 = vpop.f32.mrf.mxu1  ;;  %v4056_v11 = vld [vmem:[#allocation3 + $0xe8] sm:$0xff] }
 0x433   : > { %3672 = vst.msk [vmem:[#allocation3 + $0xf8] sm:$0xff] %vm1026_vm2, %v3630_v60  ;;  %v7377_v53 = vpop.f32.mrf.mxu0  ;;  %v4098_v29 = vadd.f32 %v4056_v11, %v9615_v56 }
 0x434   : > { %v3518_v50 = vpop.f32.mrf.mxu1  ;;  %7331 = vmatmul.mubr.msk.bf16.gmra.mxu1 %vm1026_vm2, %v4214_v6 }
 0x435   : > { %v3631_v49 = vadd.f32 %v3589_v26, %v3518_v50  ;;  %v9826_v5 = vpop.f32.mrf.mxu0  ;;  %7334 = vmatprep.mubr.msk.bf16.mxu1 %vm7592_vm0, %v7591_v1  ;;  %4140 = vst.msk [vmem:[#allocation3 + $0xe8] sm:$0xff] %vm1026_vm2, %v4098_v29  ;;  %v3593_v26 = vld [vmem:[#allocation3 + $0x120] sm:$0xff] }
 0x436   : > { %v7144_v24 = vpop.f32.mrf.mxu1  ;;  %v4057_v27 = vld [vmem:[#allocation3 + $0xf0] sm:$0xff] }
 0x437   : > { %3673 = vst.msk [vmem:[#allocation3 + $0x100] sm:$0xff] %vm1026_vm2, %v3631_v49  ;;  %v7380_v48 = vpop.f32.mrf.mxu0  ;;  %v4099_v56 = vadd.f32 %v4057_v27, %v9624_v35 }
 0x438   : > { %v3521_v36 = vpop.f32.mrf.mxu1 }
 0x439   : > { %v3632_v31 = vadd.f32 %v3590_v62, %v3521_v36  ;;  %v9833_v54 = vpop.f32.mrf.mxu0  ;;  %4141 = vst.msk [vmem:[#allocation3 + $0xf0] sm:$0xff] %vm1026_vm2, %v4099_v56  ;;  %v3594_v56 = vld [vmem:[#allocation3 + $0x128] sm:$0xff] }
 0x43a   : > { %v7145_v8 = vpop.f32.mrf.mxu1  ;;  %v4058_v15 = vld [vmem:[#allocation3 + $0xf8] sm:$0xff] }
 0x43b   : > { %3674 = vst.msk [vmem:[#allocation3 + $0x108] sm:$0xff] %vm1026_vm2, %v3632_v31  ;;  %v7381_v0 = vpop.f32.mrf.mxu0  ;;  %v4100_v18 = vadd.f32 %v4058_v15, %v9633_v22 }
 0x43c   : > { %v3526_v52 = vpop.f32.mrf.mxu1  ;;  %7335 = vmatmul.mubr.msk.bf16.gmra.mxu1 %vm1026_vm2, %v4215_v47  ;;  %v3595_v0 = vld [vmem:[#allocation3 + $0x130] sm:$0xff] }
 0x43d   : > { %v3633_v35 = vadd.f32 %v3591_v37, %v3526_v52  ;;  %v9839_v7 = vpop.f32.mrf.mxu0  ;;  %7430 = vmatprep.mubr.msk.bf16.mxu1 %vm7592_vm0, %v7591_v1  ;;  %4142 = vst.msk [vmem:[#allocation3 + $0xf8] sm:$0xff] %vm1026_vm2, %v4100_v18 }
 0x43e   : > { %v7148_v33 = vpop.f32.mrf.mxu1  ;;  %v4059_v42 = vld [vmem:[#allocation3 + $0x100] sm:$0xff] }
 0x43f   : > { %3675 = vst.msk [vmem:[#allocation3 + $0x110] sm:$0xff] %vm1026_vm2, %v3633_v35  ;;  %v7384_v2 = vpop.f32.mrf.mxu0  ;;  %v4101_v34 = vadd.f32 %v4059_v42, %v9641_v51 }
 0x440   : > { %v3529_v22 = vpop.f32.mrf.mxu1  ;;  %v3596_v2 = vld [vmem:[#allocation3 + $0x138] sm:$0xff] }
 0x441   : > { %v3634_v60 = vadd.f32 %v3592_v19, %v3529_v22  ;;  %v9846_v20 = vpop.f32.mrf.mxu0  ;;  %4143 = vst.msk [vmem:[#allocation3 + $0x100] sm:$0xff] %vm1026_vm2, %v4101_v34 }
 0x442   : > { %v7149_v6 = vpop.f32.mrf.mxu1  ;;  %v4060_v11 = vld [vmem:[#allocation3 + $0x108] sm:$0xff] }
 0x443   : > { %3676 = vst.msk [vmem:[#allocation3 + $0x118] sm:$0xff] %vm1026_vm2, %v3634_v60  ;;  %v7385_v53 = vpop.f32.mrf.mxu0  ;;  %v4102_v29 = vadd.f32 %v4060_v11, %v9650_v25 }
 0x444   : > { %v3534_v50 = vpop.f32.mrf.mxu1  ;;  %v3597_v53 = vld [vmem:[#allocation3 + $0x140] sm:$0xff] }
 0x445   : > { %v3635_v49 = vadd.f32 %v3593_v26, %v3534_v50  ;;  %v9851_v24 = vpop.f32.mrf.mxu0  ;;  %4144 = vst.msk [vmem:[#allocation3 + $0x108] sm:$0xff] %vm1026_vm2, %v4102_v29 }
 0x446   : > { %v7152_v51 = vpop.f32.mrf.mxu1  ;;  %v4061_v27 = vld [vmem:[#allocation3 + $0x110] sm:$0xff] }
 0x447   : > { %3677 = vst.msk [vmem:[#allocation3 + $0x120] sm:$0xff] %vm1026_vm2, %v3635_v49  ;;  %v7388_v48 = vpop.f32.mrf.mxu0  ;;  %v4103_v17 = vadd.f32 %v4061_v27, %v9657_v43 }
 0x448   : > { %v3537_v57 = vpop.f32.mrf.mxu1  ;;  %v3598_v48 = vld [vmem:[#allocation3 + $0x148] sm:$0xff] }
 0x449   : > { %v3636_v36 = vadd.f32 %v3594_v56, %v3537_v57  ;;  %v9856_v62 = vpop.f32.mrf.mxu0  ;;  %4145 = vst.msk [vmem:[#allocation3 + $0x110] sm:$0xff] %vm1026_vm2, %v4103_v17 }
 0x44a   : > { %v7153_v25 = vpop.f32.mrf.mxu1  ;;  %v4062_v31 = vld [vmem:[#allocation3 + $0x118] sm:$0xff] }
 0x44b   : > { %3678 = vst.msk [vmem:[#allocation3 + $0x128] sm:$0xff] %vm1026_vm2, %v3636_v36  ;;  %v7389_v8 = vpop.f32.mrf.mxu0  ;;  %v4104_v47 = vadd.f32 %v4062_v31, %v9664_v28 }
 0x44c   : > { %v3542_v15 = vpop.f32.mrf.mxu1  ;;  %v4497_v8 = vld [vmem:[#allocation3] sm:$0xff] }
 0x44d   : > { %v3637_v18 = vadd.f32 %v3595_v0, %v3542_v15  ;;  %v9861_v52 = vpop.f32.mrf.mxu0  ;;  %4146 = vst.msk [vmem:[#allocation3 + $0x118] sm:$0xff] %vm1026_vm2, %v4104_v47 }
 0x44e   : > { %v7156_v43 = vpop.f32.mrf.mxu1  ;;  %v4063_v37 = vld [vmem:[#allocation3 + $0x120] sm:$0xff] }
 0x44f   : > { %3679 = vst.msk [vmem:[#allocation3 + $0x130] sm:$0xff] %vm1026_vm2, %v3637_v18  ;;  %v7392_v35 = vpop.f32.mrf.mxu0  ;;  %v4105_v33 = vadd.f32 %v4063_v37, %v9670_v21 }
 0x450   : > { %v3545_v42 = vpop.f32.mrf.mxu1  ;;  %v4498_v35 = vld [vmem:[#allocation3 + $0x8] sm:$0xff] }
 0x451   : > { %v3638_v34 = vadd.f32 %v3596_v2, %v3545_v42  ;;  %v9866_v22 = vpop.f32.mrf.mxu0  ;;  %4147 = vst.msk [vmem:[#allocation3 + $0x120] sm:$0xff] %vm1026_vm2, %v4105_v33 }
 0x452   : > { %v7157_v28 = vpop.f32.mrf.mxu1  ;;  %v4064_v19 = vld [vmem:[#allocation3 + $0x128] sm:$0xff] }
 0x453   : > { %3680 = vst.msk [vmem:[#allocation3 + $0x138] sm:$0xff] %vm1026_vm2, %v3638_v34  ;;  %v7393_v60 = vpop.f32.mrf.mxu0  ;;  %v4106_v6 = vadd.f32 %v4064_v19, %v9677_v40 }
 0x454   : > { %v3550_v11 = vpop.f32.mrf.mxu1  ;;  %v4499_v60 = vld [vmem:[#allocation3 + $0x10] sm:$0xff] }
 0x455   : > { %v3639_v29 = vadd.f32 %v3597_v53, %v3550_v11  ;;  %v9871_v50 = vpop.f32.mrf.mxu0  ;;  %4148 = vst.msk [vmem:[#allocation3 + $0x128] sm:$0xff] %vm1026_vm2, %v4106_v6 }
 0x456   : > { %v7160_v21 = vpop.f32.mrf.mxu1  ;;  %v4065_v26 = vld [vmem:[#allocation3 + $0x130] sm:$0xff] }
 0x457   : > { %3681 = vst.msk [vmem:[#allocation3 + $0x140] sm:$0xff] %vm1026_vm2, %v3639_v29  ;;  %v7396_v49 = vpop.f32.mrf.mxu0  ;;  %v4107_v51 = vadd.f32 %v4065_v26, %v9683_v46 }
 0x458   : > { %v3553_v27 = vpop.f32.mrf.mxu1  ;;  %v4500_v49 = vld [vmem:[#allocation3 + $0x18] sm:$0xff] }
 0x459   : > { %v3640_v17 = vadd.f32 %v3598_v48, %v3553_v27  ;;  %v9876_v57 = vpop.f32.mrf.mxu0  ;;  %4149 = vst.msk [vmem:[#allocation3 + $0x130] sm:$0xff] %vm1026_vm2, %v4107_v51 }
 0x45a   : > { %v7161_v40 = vpop.f32.mrf.mxu1  ;;  %v4066_v56 = vld [vmem:[#allocation3 + $0x138] sm:$0xff] }
 0x45b   : > { %3682 = vst.msk [vmem:[#allocation3 + $0x148] sm:$0xff] %vm1026_vm2, %v3640_v17  ;;  %v7397_v36 = vpop.f32.mrf.mxu0  ;;  %v4108_v25 = vadd.f32 %v4066_v56, %v9690_v55 }
 0x45c   : > { %v4330_v31 = vpop.f32.mrf.mxu1  ;;  %v4501_v36 = vld [vmem:[#allocation3 + $0x20] sm:$0xff] }
 0x45d   : > { %v4539_v47 = vadd.f32 %v4497_v8, %v4330_v31  ;;  %v9881_v15 = vpop.f32.mrf.mxu0  ;;  %4150 = vst.msk [vmem:[#allocation3 + $0x138] sm:$0xff] %vm1026_vm2, %v4108_v25 }
 0x45e   : > { %v7256_v46 = vpop.f32.mrf.mxu1  ;;  %v4067_v0 = vld [vmem:[#allocation3 + $0x140] sm:$0xff] }
 0x45f   : > { %4581 = vst.msk [vmem:[#allocation3] sm:$0xff] %vm1026_vm2, %v4539_v47  ;;  %v7400_v18 = vpop.f32.mrf.mxu0  ;;  %v4109_v43 = vadd.f32 %v4067_v0, %v9696_v4 }
 0x460   : > { %v4333_v37 = vpop.f32.mrf.mxu1  ;;  %v4502_v18 = vld [vmem:[#allocation3 + $0x28] sm:$0xff] }
 0x461   : > { %v4540_v33 = vadd.f32 %v4498_v35, %v4333_v37  ;;  %v9886_v42 = vpop.f32.mrf.mxu0  ;;  %4151 = vst.msk [vmem:[#allocation3 + $0x140] sm:$0xff] %vm1026_vm2, %v4109_v43  ;;  %v9909_v43 = vld [vmem:[%s10244_s4] ss:$0 sm:$0xff] }
 0x462   : > { %v7257_v55 = vpop.f32.mrf.mxu1  ;;  %v4068_v2 = vld [vmem:[#allocation3 + $0x148] sm:$0xff] }
 0x463   : > { %4582 = vst.msk [vmem:[#allocation3 + $0x8] sm:$0xff] %vm1026_vm2, %v4540_v33  ;;  %v7401_v34 = vpop.f32.mrf.mxu0  ;;  %v4110_v28 = vadd.f32 %v4068_v2, %v9703_v30 }
 0x464   : > { %v4338_v19 = vpop.f32.mrf.mxu1 }
 0x465   : > { %v4541_v6 = vadd.f32 %v4499_v60, %v4338_v19  ;;  %v9891_v11 = vpop.f32.mrf.mxu0  ;;  %4152 = vst.msk [vmem:[#allocation3 + $0x148] sm:$0xff] %vm1026_vm2, %v4110_v28  ;;  %v4503_v19 = vld [vmem:[#allocation3 + $0x30] sm:$0xff] }
 0x466   : > { %v4967_v4 = vld [vmem:[#allocation3] sm:$0xff]  ;;  %v7260_v53 = vpop.f32.mrf.mxu1 }
 0x467   : > { %v5009_v29 = vadd.f32 %v4967_v4, %v9709_v41  ;;  %4583 = vst.msk [vmem:[#allocation3 + $0x10] sm:$0xff] %vm1026_vm2, %v4541_v6  ;;  %v7404_v21 = vpop.f32.mrf.mxu0 }
 0x468   : > { %v4341_v26 = vpop.f32.mrf.mxu1 }
 0x469   : > { %5051 = vst.msk [vmem:[#allocation3] sm:$0xff] %vm1026_vm2, %v5009_v29  ;;  %v4542_v51 = vadd.f32 %v4500_v49, %v4341_v26  ;;  %v9897_v30 = vpop.f32.mrf.mxu0 }
 0x46a   : > { %v4968_v27 = vld [vmem:[#allocation3 + $0x8] sm:$0xff]  ;;  %v7261_v48 = vpop.f32.mrf.mxu1 }
 0x46b   : > { %v5010_v17 = vadd.f32 %v4968_v27, %v9716_v63  ;;  %4584 = vst.msk [vmem:[#allocation3 + $0x18] sm:$0xff] %vm1026_vm2, %v4542_v51  ;;  %v7405_v40 = vpop.f32.mrf.mxu0  ;;  %v4504_v48 = vld [vmem:[#allocation3 + $0x38] sm:$0xff] }
 0x46c   : > { %v4346_v56 = vpop.f32.mrf.mxu1 }
 0x46d   : > { %5052 = vst.msk [vmem:[#allocation3 + $0x8] sm:$0xff] %vm1026_vm2, %v5010_v17  ;;  %v4543_v41 = vadd.f32 %v4501_v36, %v4346_v56  ;;  %v9902_v25 = vpop.f32.mrf.mxu0 }
 0x46e   : > { %v4969_v31 = vld [vmem:[#allocation3 + $0x10] sm:$0xff]  ;;  %v7264_v8 = vpop.f32.mrf.mxu1 }
 0x46f   : > { %v5011_v47 = vadd.f32 %v4969_v31, %v9722_v14  ;;  %4585 = vst.msk [vmem:[#allocation3 + $0x20] sm:$0xff] %vm1026_vm2, %v4543_v41  ;;  %v7408_v46 = vpop.f32.mrf.mxu0 }
 0x470   : > { %v4349_v0 = vpop.f32.mrf.mxu1  ;;  %v5093_v63 = vld [vmem:[#allocation3] sm:$0xff] }
 0x471   : > { %5053 = vst.msk [vmem:[#allocation3 + $0x10] sm:$0xff] %vm1026_vm2, %v5011_v47  ;;  %v4544_v37 = vadd.f32 %v4502_v18, %v4349_v0  ;;  %v9912_v35 = vpop.f32.mrf.mxu0  ;;  %v5142_v34 = vadd.f32 %v9909_v43, %v5093_v63  ;;  %v4505_v0 = vld [vmem:[#allocation3 + $0x40] sm:$0xff] }
 0x472   : > { %v4970_v33 = vld [vmem:[#allocation3 + $0x18] sm:$0xff]  ;;  %v7265_v55 = vpop.f32.mrf.mxu1 }
 0x473   : > { %v5012_v14 = vadd.f32 %v4970_v33, %v9729_v32  ;;  %4586 = vst.msk [vmem:[#allocation3 + $0x28] sm:$0xff] %vm1026_vm2, %v4544_v37  ;;  %v7409_v2 = vpop.f32.mrf.mxu0  ;;  %v5184_v49 = vmax.f32 %v5142_v34, 0.0 }
 0x474   : > { %v4354_v28 = vpop.f32.mrf.mxu1  ;;  %v5094_v60 = vld [vmem:[#allocation3 + $0x8] sm:$0xff] }
 0x475   : > { %5054 = vst.msk [vmem:[#allocation3 + $0x18] sm:$0xff] %vm1026_vm2, %v5012_v14  ;;  %v4545_v6 = vadd.f32 %v4503_v19, %v4354_v28  ;;  %v9918_v4 = vpop.f32.mrf.mxu0  ;;  %v5143_v53 = vadd.f32 %v9909_v43, %v5094_v60  ;;  %v4506_v60 = vld [vmem:[#allocation3 + $0x48] sm:$0xff] }
 0x476   : > { %v4971_v29 = vld [vmem:[#allocation3 + $0x20] sm:$0xff]  ;;  %v7268_v21 = vpop.f32.mrf.mxu1 }
 0x477   : > { %v5013_v26 = vadd.f32 %v4971_v29, %v9735_v23  ;;  %4587 = vst.msk [vmem:[#allocation3 + $0x30] sm:$0xff] %vm1026_vm2, %v4545_v6  ;;  %v7412_v32 = vpop.f32.mrf.mxu0  ;;  %v5185_v51 = vmax.f32 %v5143_v53, 0.0 }
 0x478   : > { %v4357_v27 = vpop.f32.mrf.mxu1  ;;  %v5095_v17 = vld [vmem:[#allocation3 + $0x10] sm:$0xff] }
 0x479   : > { %5055 = vst.msk [vmem:[#allocation3 + $0x20] sm:$0xff] %vm1026_vm2, %v5013_v26  ;;  %v4546_v40 = vadd.f32 %v4504_v48, %v4357_v27  ;;  %v9924_v56 = vpop.f32.mrf.mxu0  ;;  %v5226_v36 = vpack.c.bf16 %v5185_v51, %v5184_v49  ;;  %v5144_v47 = vadd.f32 %v9909_v43, %v5095_v17  ;;  %v4507_v48 = vld [vmem:[#allocation3 + $0x50] sm:$0xff] }
 0x47a   : > { %v4972_v41 = vld [vmem:[#allocation3 + $0x28] sm:$0xff]  ;;  %v7269_v31 = vpop.f32.mrf.mxu1 }
 0x47b   : > { %v5014_v8 = vadd.f32 %v4972_v41, %v9742_v3  ;;  %4588 = vst.msk [vmem:[#allocation3 + $0x38] sm:$0xff] %vm1026_vm2, %v4546_v40  ;;  %v7413_v23 = vpop.f32.mrf.mxu0  ;;  %7431 = vmatmul.mubr.msk.bf16.vlgmr.msra.gmra.mxu1 %vm1026_vm2, %v5226_v36  ;;  %v5186_v34 = vmax.f32 %v5144_v47, 0.0 }
 0x47c   : > { %v4362_v46 = vpop.f32.mrf.mxu1  ;;  %7434 = vmatprep.mubr.msk.bf16.mxu1 %vm7592_vm0, %v7591_v1  ;;  %v5096_v18 = vld [vmem:[#allocation3 + $0x18] sm:$0xff] }
 0x47d   : > { %5056 = vst.msk [vmem:[#allocation3 + $0x28] sm:$0xff] %vm1026_vm2, %v5014_v8  ;;  %v4547_v63 = vadd.f32 %v4505_v0, %v4362_v46  ;;  %v9933_v37 = vpop.f32.mrf.mxu0  ;;  %v5145_v3 = vadd.f32 %v9909_v43, %v5096_v18  ;;  %v4508_v18 = vld [vmem:[#allocation3 + $0x58] sm:$0xff] }
 0x47e   : > { %v4973_v33 = vld [vmem:[#allocation3 + $0x30] sm:$0xff]  ;;  %v7272_v55 = vpop.f32.mrf.mxu1 }
 0x47f   : > { %v5015_v14 = vadd.f32 %v4973_v33, %v9748_v16  ;;  %4589 = vst.msk [vmem:[#allocation3 + $0x40] sm:$0xff] %vm1026_vm2, %v4547_v63  ;;  %v7416_v2 = vpop.f32.mrf.mxu0  ;;  %v5187_v28 = vmax.f32 %v5145_v3, 0.0 }
 0x480   : > { %v4365_v19 = vpop.f32.mrf.mxu1  ;;  %v5097_v6 = vld [vmem:[#allocation3 + $0x20] sm:$0xff] }
 0x481   : > { %5057 = vst.msk [vmem:[#allocation3 + $0x30] sm:$0xff] %vm1026_vm2, %v5015_v14  ;;  %v4548_v53 = vadd.f32 %v4506_v60, %v4365_v19  ;;  %v9939_v29 = vpop.f32.mrf.mxu0  ;;  %v5227_v21 = vpack.c.bf16 %v5187_v28, %v5186_v34  ;;  %v5146_v51 = vadd.f32 %v9909_v43, %v5097_v6  ;;  %v4509_v60 = vld [vmem:[#allocation3 + $0x60] sm:$0xff] }
 0x482   : > { %v4974_v26 = vld [vmem:[#allocation3 + $0x38] sm:$0xff]  ;;  %v7273_v32 = vpop.f32.mrf.mxu1 }
 0x483   : > { %v5016_v49 = vadd.f32 %v4974_v26, %v9755_v44  ;;  %4590 = vst.msk [vmem:[#allocation3 + $0x48] sm:$0xff] %vm1026_vm2, %v4548_v53  ;;  %v7417_v16 = vpop.f32.mrf.mxu0  ;;  %7435 = vmatmul.mubr.msk.bf16.gmra.mxu1 %vm1026_vm2, %v5227_v21  ;;  %v5188_v47 = vmax.f32 %v5146_v51, 0.0 }
 0x484   : > { %v4370_v27 = vpop.f32.mrf.mxu1  ;;  %7438 = vmatprep.mubr.msk.bf16.mxu1 %vm7592_vm0, %v7591_v1  ;;  %v5098_v17 = vld [vmem:[#allocation3 + $0x28] sm:$0xff] }
 0x485   : > { %5058 = vst.msk [vmem:[#allocation3 + $0x38] sm:$0xff] %vm1026_vm2, %v5016_v49  ;;  %v4549_v40 = vadd.f32 %v4507_v48, %v4370_v27  ;;  %v9948_v36 = vpop.f32.mrf.mxu0  ;;  %v5147_v44 = vadd.f32 %v9909_v43, %v5098_v17  ;;  %v4510_v17 = vld [vmem:[#allocation3 + $0x68] sm:$0xff] }
 0x486   : > { %v4975_v41 = vld [vmem:[#allocation3 + $0x40] sm:$0xff]  ;;  %v7276_v31 = vpop.f32.mrf.mxu1 }
 0x487   : > { %v5017_v8 = vadd.f32 %v4975_v41, %v9761_v10  ;;  %4591 = vst.msk [vmem:[#allocation3 + $0x50] sm:$0xff] %vm1026_vm2, %v4549_v40  ;;  %v7420_v23 = vpop.f32.mrf.mxu0  ;;  %v5189_v46 = vmax.f32 %v5147_v44, 0.0 }
 0x488   : > { %v4373_v0 = vpop.f32.mrf.mxu1  ;;  %v5099_v63 = vld [vmem:[#allocation3 + $0x30] sm:$0xff] }
 0x489   : > { %5059 = vst.msk [vmem:[#allocation3 + $0x40] sm:$0xff] %vm1026_vm2, %v5017_v8  ;;  %v4550_v3 = vadd.f32 %v4508_v18, %v4373_v0  ;;  %v9954_v33 = vpop.f32.mrf.mxu0  ;;  %v5228_v55 = vpack.c.bf16 %v5189_v46, %v5188_v47  ;;  %v5148_v28 = vadd.f32 %v9909_v43, %v5099_v63  ;;  %v4511_v18 = vld [vmem:[#allocation3 + $0x70] sm:$0xff] }
 0x48a   : > { %v4976_v14 = vld [vmem:[#allocation3 + $0x48] sm:$0xff]  ;;  %v7277_v2 = vpop.f32.mrf.mxu1 }
 0x48b   : > { %v5018_v34 = vadd.f32 %v4976_v14, %v9768_v59  ;;  %4592 = vst.msk [vmem:[#allocation3 + $0x58] sm:$0xff] %vm1026_vm2, %v4550_v3  ;;  %v7421_v10 = vpop.f32.mrf.mxu0  ;;  %7439 = vmatmul.mubr.msk.bf16.gmra.mxu1 %vm1026_vm2, %v5228_v55  ;;  %v5190_v51 = vmax.f32 %v5148_v28, 0.0 }
 0x48c   : > { %v4378_v19 = vpop.f32.mrf.mxu1  ;;  %7442 = vmatprep.mubr.msk.bf16.mxu1 %vm7592_vm0, %v7591_v1  ;;  %v5100_v6 = vld [vmem:[#allocation3 + $0x38] sm:$0xff] }
 0x48d   : > { %5060 = vst.msk [vmem:[#allocation3 + $0x48] sm:$0xff] %vm1026_vm2, %v5018_v34  ;;  %v4551_v53 = vadd.f32 %v4509_v60, %v4378_v19  ;;  %v9963_v21 = vpop.f32.mrf.mxu0  ;;  %v5149_v59 = vadd.f32 %v9909_v43, %v5100_v6  ;;  %v4512_v19 = vld [vmem:[#allocation3 + $0x78] sm:$0xff] }
 0x48e   : > { %v4977_v26 = vld [vmem:[#allocation3 + $0x50] sm:$0xff]  ;;  %v7280_v32 = vpop.f32.mrf.mxu1 }
 0x48f   : > { %v5019_v49 = vadd.f32 %v4977_v26, %v9774_v45  ;;  %4593 = vst.msk [vmem:[#allocation3 + $0x60] sm:$0xff] %vm1026_vm2, %v4551_v53  ;;  %v7424_v16 = vpop.f32.mrf.mxu0  ;;  %v5191_v27 = vmax.f32 %v5149_v59, 0.0 }
 0x490   : > { %v4381_v48 = vpop.f32.mrf.mxu1  ;;  %v5101_v40 = vld [vmem:[#allocation3 + $0x40] sm:$0xff] }
 0x491   : > { %5061 = vst.msk [vmem:[#allocation3 + $0x50] sm:$0xff] %vm1026_vm2, %v5019_v49  ;;  %v4552_v44 = vadd.f32 %v4510_v17, %v4381_v48  ;;  %v9969_v41 = vpop.f32.mrf.mxu0  ;;  %v5229_v31 = vpack.c.bf16 %v5191_v27, %v5190_v51  ;;  %v5150_v46 = vadd.f32 %v9909_v43, %v5101_v40  ;;  %v4513_v16 = vld [vmem:[#allocation3 + $0x80] sm:$0xff] }
 0x492   : > { %v4978_v8 = vld [vmem:[#allocation3 + $0x58] sm:$0xff]  ;;  %v7281_v23 = vpop.f32.mrf.mxu1 }
 0x493   : > { %v5020_v47 = vadd.f32 %v4978_v8, %v9781_v39  ;;  %4594 = vst.msk [vmem:[#allocation3 + $0x68] sm:$0xff] %vm1026_vm2, %v4552_v44  ;;  %v7425_v45 = vpop.f32.mrf.mxu0  ;;  %7443 = vmatmul.mubr.msk.bf16.gmra.mxu1 %vm1026_vm2, %v5229_v31  ;;  %v5192_v34 = vmax.f32 %v5150_v46, 0.0  ;;  %v4514_v23 = vld [vmem:[#allocation3 + $0x88] sm:$0xff] }
 0x494   : > { %v4386_v0 = vpop.f32.mrf.mxu1  ;;  %7446 = vmatprep.mubr.msk.bf16.mxu1 %vm7592_vm0, %v7591_v1  ;;  %v5102_v63 = vld [vmem:[#allocation3 + $0x48] sm:$0xff] }
 0x495   : > { %5062 = vst.msk [vmem:[#allocation3 + $0x58] sm:$0xff] %vm1026_vm2, %v5020_v47  ;;  %v4553_v3 = vadd.f32 %v4511_v18, %v4386_v0  ;;  %v5151_v55 = vadd.f32 %v9909_v43, %v5102_v63 }
 0x496   : > { %v4979_v14 = vld [vmem:[#allocation3 + $0x60] sm:$0xff]  ;;  %v7284_v39 = vpop.f32.mrf.mxu1 }
 0x497   : > { %v5021_v2 = vadd.f32 %v4979_v14, %v9787_v13  ;;  %4595 = vst.msk [vmem:[#allocation3 + $0x70] sm:$0xff] %vm1026_vm2, %v4553_v3  ;;  %v5193_v10 = vmax.f32 %v5151_v55, 0.0  ;;  %v4515_v55 = vld [vmem:[#allocation3 + $0x90] sm:$0xff] }
 0x498   : > { %v4389_v28 = vpop.f32.mrf.mxu1  ;;  %v5103_v60 = vld [vmem:[#allocation3 + $0x50] sm:$0xff] }
 0x499   : > { %5063 = vst.msk [vmem:[#allocation3 + $0x60] sm:$0xff] %vm1026_vm2, %v5021_v2  ;;  %v4554_v6 = vadd.f32 %v4512_v19, %v4389_v28  ;;  %v5230_v53 = vpack.c.bf16 %v5193_v10, %v5192_v34  ;;  %v5152_v13 = vadd.f32 %v9909_v43, %v5103_v60 }
 0x49a   : > { %v4980_v59 = vld [vmem:[#allocation3 + $0x68] sm:$0xff]  ;;  %v7285_v26 = vpop.f32.mrf.mxu1 }
 0x49b   : > { %v5022_v32 = vadd.f32 %v4980_v59, %v9794_v58  ;;  %4596 = vst.msk [vmem:[#allocation3 + $0x78] sm:$0xff] %vm1026_vm2, %v4554_v6  ;;  %7447 = vmatmul.mubr.msk.bf16.gmra.mxu1 %vm1026_vm2, %v5230_v53  ;;  %v5194_v44 = vmax.f32 %v5152_v13, 0.0  ;;  %v4516_v6 = vld [vmem:[#allocation3 + $0x98] sm:$0xff] }
 0x49c   : > { %v4394_v49 = vpop.f32.mrf.mxu1  ;;  %7450 = vmatprep.mubr.msk.bf16.mxu1 %vm7592_vm0, %v7591_v1  ;;  %v5104_v51 = vld [vmem:[#allocation3 + $0x58] sm:$0xff] }
 0x49d   : > { %5064 = vst.msk [vmem:[#allocation3 + $0x68] sm:$0xff] %vm1026_vm2, %v5022_v32  ;;  %v4555_v27 = vadd.f32 %v4513_v16, %v4394_v49  ;;  %v5153_v48 = vadd.f32 %v9909_v43, %v5104_v51  ;;  %v4517_v51 = vld [vmem:[#allocation3 + $0xa0] sm:$0xff] }
 0x49e   : > { %v4981_v17 = vld [vmem:[#allocation3 + $0x70] sm:$0xff]  ;;  %v7288_v40 = vpop.f32.mrf.mxu1 }
 0x49f   : > { %v5023_v58 = vadd.f32 %v4981_v17, %v9800_v12  ;;  %4597 = vst.msk [vmem:[#allocation3 + $0x80] sm:$0xff] %vm1026_vm2, %v4555_v27  ;;  %v5195_v31 = vmax.f32 %v5153_v48, 0.0 }
 0x4a0   : > { %v4397_v8 = vpop.f32.mrf.mxu1  ;;  %v5105_v47 = vld [vmem:[#allocation3 + $0x60] sm:$0xff] }
 0x4a1   : > { %5065 = vst.msk [vmem:[#allocation3 + $0x70] sm:$0xff] %vm1026_vm2, %v5023_v58  ;;  %v4556_v45 = vadd.f32 %v4514_v23, %v4397_v8  ;;  %v5231_v46 = vpack.c.bf16 %v5195_v31, %v5194_v44  ;;  %v5154_v12 = vadd.f32 %v9909_v43, %v5105_v47  ;;  %v4518_v23 = vld [vmem:[#allocation3 + $0xa8] sm:$0xff] }
 0x4a2   : > { %v4982_v0 = vld [vmem:[#allocation3 + $0x78] sm:$0xff]  ;;  %v7289_v18 = vpop.f32.mrf.mxu1 }
 0x4a3   : > { %v5024_v63 = vadd.f32 %v4982_v0, %v9807_v9  ;;  %4598 = vst.msk [vmem:[#allocation3 + $0x88] sm:$0xff] %vm1026_vm2, %v4556_v45  ;;  %7451 = vmatmul.mubr.msk.bf16.gmra.mxu1 %vm1026_vm2, %v5231_v46  ;;  %v5196_v28 = vmax.f32 %v5154_v12, 0.0 }
 0x4a4   : > { %v4402_v3 = vpop.f32.mrf.mxu1  ;;  %7454 = vmatprep.mubr.msk.bf16.mxu1 %vm7592_vm0, %v7591_v1  ;;  %v5106_v14 = vld [vmem:[#allocation3 + $0x68] sm:$0xff] }
 0x4a5   : > { %5066 = vst.msk [vmem:[#allocation3 + $0x78] sm:$0xff] %vm1026_vm2, %v5024_v63  ;;  %v4557_v39 = vadd.f32 %v4515_v55, %v4402_v3  ;;  %v5155_v2 = vadd.f32 %v9909_v43, %v5106_v14  ;;  %v4519_v3 = vld [vmem:[#allocation3 + $0xb0] sm:$0xff] }
 0x4a6   : > { %v4983_v34 = vld [vmem:[#allocation3 + $0x80] sm:$0xff]  ;;  %v7292_v10 = vpop.f32.mrf.mxu1 }
 0x4a7   : > { %v5025_v9 = vadd.f32 %v4983_v34, %v9813_v38  ;;  %4599 = vst.msk [vmem:[#allocation3 + $0x90] sm:$0xff] %vm1026_vm2, %v4557_v39  ;;  %v5197_v19 = vmax.f32 %v5155_v2, 0.0 }
 0x4a8   : > { %v4405_v60 = vpop.f32.mrf.mxu1  ;;  %v5107_v53 = vld [vmem:[#allocation3 + $0x70] sm:$0xff] }
 0x4a9   : > { %5067 = vst.msk [vmem:[#allocation3 + $0x80] sm:$0xff] %vm1026_vm2, %v5025_v9  ;;  %v4558_v59 = vadd.f32 %v4516_v6, %v4405_v60  ;;  %v5232_v26 = vpack.c.bf16 %v5197_v19, %v5196_v28  ;;  %v5156_v38 = vadd.f32 %v9909_v43, %v5107_v53  ;;  %v4520_v19 = vld [vmem:[#allocation3 + $0xb8] sm:$0xff] }
 0x4aa   : > { %v4984_v32 = vld [vmem:[#allocation3 + $0x88] sm:$0xff]  ;;  %v7293_v13 = vpop.f32.mrf.mxu1 }
 0x4ab   : > { %v5026_v49 = vadd.f32 %v4984_v32, %v9820_v61  ;;  %4600 = vst.msk [vmem:[#allocation3 + $0x98] sm:$0xff] %vm1026_vm2, %v4558_v59  ;;  %7455 = vmatmul.mubr.msk.bf16.gmra.mxu1 %vm1026_vm2, %v5232_v26  ;;  %v5198_v44 = vmax.f32 %v5156_v38, 0.0 }
 0x4ac   : > { %v4410_v16 = vpop.f32.mrf.mxu1  ;;  %7458 = vmatprep.mubr.msk.bf16.mxu1 %vm7592_vm0, %v7591_v1  ;;  %v5108_v27 = vld [vmem:[#allocation3 + $0x78] sm:$0xff] }
 0x4ad   : > { %5068 = vst.msk [vmem:[#allocation3 + $0x88] sm:$0xff] %vm1026_vm2, %v5026_v49  ;;  %v4559_v48 = vadd.f32 %v4517_v51, %v4410_v16  ;;  %v5157_v17 = vadd.f32 %v9909_v43, %v5108_v27  ;;  %v4521_v49 = vld [vmem:[#allocation3 + $0xc0] sm:$0xff] }
 0x4ae   : > { %v4985_v40 = vld [vmem:[#allocation3 + $0x90] sm:$0xff]  ;;  %v7296_v58 = vpop.f32.mrf.mxu1 }
 0x4af   : > { %v5027_v61 = vadd.f32 %v4985_v40, %v9826_v5  ;;  %4601 = vst.msk [vmem:[#allocation3 + $0xa0] sm:$0xff] %vm1026_vm2, %v4559_v48  ;;  %v5199_v31 = vmax.f32 %v5157_v17, 0.0 }
 0x4b0   : > { %v4413_v8 = vpop.f32.mrf.mxu1  ;;  %v5109_v47 = vld [vmem:[#allocation3 + $0x80] sm:$0xff] }
 0x4b1   : > { %5069 = vst.msk [vmem:[#allocation3 + $0x90] sm:$0xff] %vm1026_vm2, %v5027_v61  ;;  %v4560_v45 = vadd.f32 %v4518_v23, %v4413_v8  ;;  %v5233_v46 = vpack.c.bf16 %v5199_v31, %v5198_v44  ;;  %v5158_v5 = vadd.f32 %v9909_v43, %v5109_v47  ;;  %v4522_v61 = vld [vmem:[#allocation3 + $0xc8] sm:$0xff] }
 0x4b2   : > { %v4986_v0 = vld [vmem:[#allocation3 + $0x98] sm:$0xff]  ;;  %v7297_v18 = vpop.f32.mrf.mxu1 }
 0x4b3   : > { %v5028_v63 = vadd.f32 %v4986_v0, %v9833_v54  ;;  %4602 = vst.msk [vmem:[#allocation3 + $0xa8] sm:$0xff] %vm1026_vm2, %v4560_v45  ;;  %7459 = vmatmul.mubr.msk.bf16.gmra.mxu1 %vm1026_vm2, %v5233_v46  ;;  %v5200_v10 = vmax.f32 %v5158_v5, 0.0  ;;  %v4523_v0 = vld [vmem:[#allocation3 + $0xd0] sm:$0xff] }
 0x4b4   : > { %v4418_v12 = vpop.f32.mrf.mxu1  ;;  %7462 = vmatprep.mubr.msk.bf16.mxu1 %vm7592_vm0, %v7591_v1  ;;  %v5110_v55 = vld [vmem:[#allocation3 + $0x88] sm:$0xff] }
 0x4b5   : > { %5070 = vst.msk [vmem:[#allocation3 + $0x98] sm:$0xff] %vm1026_vm2, %v5028_v63  ;;  %v4561_v14 = vadd.f32 %v4519_v3, %v4418_v12  ;;  %v5159_v39 = vadd.f32 %v9909_v43, %v5110_v55 }
 0x4b6   : > { %v4987_v2 = vld [vmem:[#allocation3 + $0xa0] sm:$0xff]  ;;  %v7300_v34 = vpop.f32.mrf.mxu1 }
 0x4b7   : > { %v5029_v54 = vadd.f32 %v4987_v2, %v9839_v7  ;;  %4603 = vst.msk [vmem:[#allocation3 + $0xb0] sm:$0xff] %vm1026_vm2, %v4561_v14  ;;  %v5201_v9 = vmax.f32 %v5159_v39, 0.0  ;;  %v4524_v2 = vld [vmem:[#allocation3 + $0xd8] sm:$0xff] }
 0x4b8   : > { %v4421_v28 = vpop.f32.mrf.mxu1  ;;  %v5111_v60 = vld [vmem:[#allocation3 + $0x90] sm:$0xff] }
 0x4b9   : > { %5071 = vst.msk [vmem:[#allocation3 + $0xa0] sm:$0xff] %vm1026_vm2, %v5029_v54  ;;  %v4562_v6 = vadd.f32 %v4520_v19, %v4421_v28  ;;  %v5234_v53 = vpack.c.bf16 %v5201_v9, %v5200_v10  ;;  %v5160_v7 = vadd.f32 %v9909_v43, %v5111_v60 }
 0x4ba   : > { %v4988_v59 = vld [vmem:[#allocation3 + $0xa8] sm:$0xff]  ;;  %v7301_v26 = vpop.f32.mrf.mxu1 }
 0x4bb   : > { %v5030_v32 = vadd.f32 %v4988_v59, %v9846_v20  ;;  %4604 = vst.msk [vmem:[#allocation3 + $0xb8] sm:$0xff] %vm1026_vm2, %v4562_v6  ;;  %7463 = vmatmul.mubr.msk.bf16.gmra.mxu1 %vm1026_vm2, %v5234_v53  ;;  %v5202_v17 = vmax.f32 %v5160_v7, 0.0  ;;  %v4525_v6 = vld [vmem:[#allocation3 + $0xe0] sm:$0xff] }
 0x4bc   : > { %v4426_v13 = vpop.f32.mrf.mxu1  ;;  %7466 = vmatprep.mubr.msk.bf16.mxu1 %vm7592_vm0, %v7591_v1  ;;  %v5112_v38 = vld [vmem:[#allocation3 + $0x98] sm:$0xff] }
 0x4bd   : > { %5072 = vst.msk [vmem:[#allocation3 + $0xa8] sm:$0xff] %vm1026_vm2, %v5030_v32  ;;  %v4563_v16 = vadd.f32 %v4521_v49, %v4426_v13  ;;  %v5161_v51 = vadd.f32 %v9909_v43, %v5112_v38 }
 0x4be   : > { %v4989_v27 = vld [vmem:[#allocation3 + $0xb0] sm:$0xff]  ;;  %v7304_v48 = vpop.f32.mrf.mxu1 }
 0x4bf   : > { %v5031_v20 = vadd.f32 %v4989_v27, %v9851_v24  ;;  %4605 = vst.msk [vmem:[#allocation3 + $0xc0] sm:$0xff] %vm1026_vm2, %v4563_v16  ;;  %v5203_v40 = vmax.f32 %v5161_v51, 0.0  ;;  %v4526_v16 = vld [vmem:[#allocation3 + $0xe8] sm:$0xff] }
 0x4c0   : > { %v4429_v58 = vpop.f32.mrf.mxu1  ;;  %v5113_v44 = vld [vmem:[#allocation3 + $0xa0] sm:$0xff] }
 0x4c1   : > { %5073 = vst.msk [vmem:[#allocation3 + $0xb0] sm:$0xff] %vm1026_vm2, %v5031_v20  ;;  %v4564_v31 = vadd.f32 %v4522_v61, %v4429_v58  ;;  %v5235_v8 = vpack.c.bf16 %v5203_v40, %v5202_v17  ;;  %v5162_v24 = vadd.f32 %v9909_v43, %v5113_v44  ;;  %v4527_v61 = vld [vmem:[#allocation3 + $0xf0] sm:$0xff] }
 0x4c2   : > { %v4990_v23 = vld [vmem:[#allocation3 + $0xb8] sm:$0xff]  ;;  %v7305_v47 = vpop.f32.mrf.mxu1 }
 0x4c3   : > { %v5032_v45 = vadd.f32 %v4990_v23, %v9856_v62  ;;  %4606 = vst.msk [vmem:[#allocation3 + $0xc8] sm:$0xff] %vm1026_vm2, %v4564_v31  ;;  %7467 = vmatmul.mubr.msk.bf16.gmra.mxu1 %vm1026_vm2, %v5235_v8  ;;  %v5204_v55 = vmax.f32 %v5162_v24, 0.0 }
 0x4c4   : > { %v4434_v46 = vpop.f32.mrf.mxu1  ;;  %7470 = vmatprep.mubr.msk.bf16.mxu1 %vm7592_vm0, %v7591_v1  ;;  %v5114_v18 = vld [vmem:[#allocation3 + $0xa8] sm:$0xff] }
 0x4c5   : > { %5074 = vst.msk [vmem:[#allocation3 + $0xb8] sm:$0xff] %vm1026_vm2, %v5032_v45  ;;  %v4565_v63 = vadd.f32 %v4523_v0, %v4434_v46  ;;  %v5163_v5 = vadd.f32 %v9909_v43, %v5114_v18  ;;  %v4528_v0 = vld [vmem:[#allocation3 + $0xf8] sm:$0xff] }
 0x4c6   : > { %v4991_v12 = vld [vmem:[#allocation3 + $0xc0] sm:$0xff]  ;;  %v7308_v3 = vpop.f32.mrf.mxu1 }
 0x4c7   : > { %v5033_v62 = vadd.f32 %v4991_v12, %v9861_v52  ;;  %4607 = vst.msk [vmem:[#allocation3 + $0xd0] sm:$0xff] %vm1026_vm2, %v4565_v63  ;;  %v5205_v14 = vmax.f32 %v5163_v5, 0.0 }
 0x4c8   : > { %v4437_v39 = vpop.f32.mrf.mxu1  ;;  %v5115_v34 = vld [vmem:[#allocation3 + $0xb0] sm:$0xff] }
 0x4c9   : > { %5075 = vst.msk [vmem:[#allocation3 + $0xc0] sm:$0xff] %vm1026_vm2, %v5033_v62  ;;  %v4566_v54 = vadd.f32 %v4524_v2, %v4437_v39  ;;  %v5236_v10 = vpack.c.bf16 %v5205_v14, %v5204_v55  ;;  %v5164_v52 = vadd.f32 %v9909_v43, %v5115_v34  ;;  %v4529_v14 = vld [vmem:[#allocation3 + $0x100] sm:$0xff] }
 0x4ca   : > { %v4992_v9 = vld [vmem:[#allocation3 + $0xc8] sm:$0xff]  ;;  %v7309_v28 = vpop.f32.mrf.mxu1 }
 0x4cb   : > { %v5034_v19 = vadd.f32 %v4992_v9, %v9866_v22  ;;  %4608 = vst.msk [vmem:[#allocation3 + $0xd8] sm:$0xff] %vm1026_vm2, %v4566_v54  ;;  %7471 = vmatmul.mubr.msk.bf16.gmra.mxu1 %vm1026_vm2, %v5236_v10  ;;  %v5206_v13 = vmax.f32 %v5164_v52, 0.0  ;;  %v4530_v52 = vld [vmem:[#allocation3 + $0x108] sm:$0xff] }
 0x4cc   : > { %v4442_v60 = vpop.f32.mrf.mxu1  ;;  %7474 = vmatprep.mubr.msk.bf16.mxu1 %vm7592_vm0, %v7591_v1  ;;  %v5116_v53 = vld [vmem:[#allocation3 + $0xb8] sm:$0xff] }
 0x4cd   : > { %5076 = vst.msk [vmem:[#allocation3 + $0xc8] sm:$0xff] %vm1026_vm2, %v5034_v19  ;;  %v4567_v59 = vadd.f32 %v4525_v6, %v4442_v60  ;;  %v5165_v26 = vadd.f32 %v9909_v43, %v5116_v53 }
 0x4ce   : > { %v4993_v32 = vld [vmem:[#allocation3 + $0xd0] sm:$0xff]  ;;  %v7312_v7 = vpop.f32.mrf.mxu1 }
 0x4cf   : > { %v5035_v22 = vadd.f32 %v4993_v32, %v9871_v50  ;;  %4609 = vst.msk [vmem:[#allocation3 + $0xe0] sm:$0xff] %vm1026_vm2, %v4567_v59  ;;  %v5207_v49 = vmax.f32 %v5165_v26, 0.0 }
 0x4d0   : > { %v4445_v38 = vpop.f32.mrf.mxu1  ;;  %v5117_v51 = vld [vmem:[#allocation3 + $0xc0] sm:$0xff] }
 0x4d1   : > { %5077 = vst.msk [vmem:[#allocation3 + $0xd0] sm:$0xff] %vm1026_vm2, %v5035_v22  ;;  %v4568_v27 = vadd.f32 %v4526_v16, %v4445_v38  ;;  %v5237_v48 = vpack.c.bf16 %v5207_v49, %v5206_v13  ;;  %v5166_v50 = vadd.f32 %v9909_v43, %v5117_v51  ;;  %v4531_v22 = vld [vmem:[#allocation3 + $0x110] sm:$0xff] }
 0x4d2   : > { %v4994_v20 = vld [vmem:[#allocation3 + $0xd8] sm:$0xff]  ;;  %v7313_v17 = vpop.f32.mrf.mxu1 }
 0x4d3   : > { %v5036_v40 = vadd.f32 %v4994_v20, %v9876_v57  ;;  %4610 = vst.msk [vmem:[#allocation3 + $0xe8] sm:$0xff] %vm1026_vm2, %v4568_v27  ;;  %7475 = vmatmul.mubr.msk.bf16.gmra.mxu1 %vm1026_vm2, %v5237_v48  ;;  %v5208_v45 = vmax.f32 %v5166_v50, 0.0  ;;  %v4532_v17 = vld [vmem:[#allocation3 + $0x118] sm:$0xff] }
 0x4d4   : > { %v4450_v58 = vpop.f32.mrf.mxu1  ;;  %7478 = vmatprep.mubr.msk.bf16.mxu1 %vm7592_vm0, %v7591_v1  ;;  %v5118_v44 = vld [vmem:[#allocation3 + $0xc8] sm:$0xff] }
 0x4d5   : > { %5078 = vst.msk [vmem:[#allocation3 + $0xd8] sm:$0xff] %vm1026_vm2, %v5036_v40  ;;  %v4569_v31 = vadd.f32 %v4527_v61, %v4450_v58  ;;  %v5167_v8 = vadd.f32 %v9909_v43, %v5118_v44 }
 0x4d6   : > { %v4995_v23 = vld [vmem:[#allocation3 + $0xe0] sm:$0xff]  ;;  %v7316_v47 = vpop.f32.mrf.mxu1 }
 0x4d7   : > { %v5037_v57 = vadd.f32 %v4995_v23, %v9881_v15  ;;  %4611 = vst.msk [vmem:[#allocation3 + $0xf0] sm:$0xff] %vm1026_vm2, %v4569_v31  ;;  %v5209_v24 = vmax.f32 %v5167_v8, 0.0  ;;  %v4533_v23 = vld [vmem:[#allocation3 + $0x120] sm:$0xff] }
 0x4d8   : > { %v4453_v46 = vpop.f32.mrf.mxu1  ;;  %v5119_v18 = vld [vmem:[#allocation3 + $0xd0] sm:$0xff] }
 0x4d9   : > { %5079 = vst.msk [vmem:[#allocation3 + $0xe0] sm:$0xff] %vm1026_vm2, %v5037_v57  ;;  %v4570_v63 = vadd.f32 %v4528_v0, %v4453_v46  ;;  %v5238_v5 = vpack.c.bf16 %v5209_v24, %v5208_v45  ;;  %v5168_v15 = vadd.f32 %v9909_v43, %v5119_v18 }
 0x4da   : > { %v4996_v12 = vld [vmem:[#allocation3 + $0xe8] sm:$0xff]  ;;  %v7317_v3 = vpop.f32.mrf.mxu1 }
 0x4db   : > { %v5038_v62 = vadd.f32 %v4996_v12, %v9886_v42  ;;  %4612 = vst.msk [vmem:[#allocation3 + $0xf8] sm:$0xff] %vm1026_vm2, %v4570_v63  ;;  %7479 = vmatmul.mubr.msk.bf16.gmra.mxu1 %vm1026_vm2, %v5238_v5  ;;  %v5210_v9 = vmax.f32 %v5168_v15, 0.0  ;;  %v4534_v5 = vld [vmem:[#allocation3 + $0x128] sm:$0xff] }
 0x4dc   : > { %v4458_v55 = vpop.f32.mrf.mxu1  ;;  %7482 = vmatprep.mubr.msk.bf16.mxu1 %vm7592_vm0, %v7591_v1  ;;  %v5120_v39 = vld [vmem:[#allocation3 + $0xd8] sm:$0xff] }
 0x4dd   : > { %5080 = vst.msk [vmem:[#allocation3 + $0xe8] sm:$0xff] %vm1026_vm2, %v5038_v62  ;;  %v4571_v2 = vadd.f32 %v4529_v14, %v4458_v55  ;;  %v5169_v34 = vadd.f32 %v9909_v43, %v5120_v39 }
 0x4de   : > { %v4997_v54 = vld [vmem:[#allocation3 + $0xf0] sm:$0xff]  ;;  %v7320_v10 = vpop.f32.mrf.mxu1 }
 0x4df   : > { %v5039_v42 = vadd.f32 %v4997_v54, %v9891_v11  ;;  %4613 = vst.msk [vmem:[#allocation3 + $0x100] sm:$0xff] %vm1026_vm2, %v4571_v2  ;;  %v5211_v28 = vmax.f32 %v5169_v34, 0.0  ;;  %v4535_v2 = vld [vmem:[#allocation3 + $0x130] sm:$0xff] }
 0x4e0   : > { %v4461_v19 = vpop.f32.mrf.mxu1  ;;  %v5121_v60 = vld [vmem:[#allocation3 + $0xe0] sm:$0xff] }
 0x4e1   : > { %5081 = vst.msk [vmem:[#allocation3 + $0xf0] sm:$0xff] %vm1026_vm2, %v5039_v42  ;;  %v4572_v6 = vadd.f32 %v4530_v52, %v4461_v19  ;;  %v5239_v53 = vpack.c.bf16 %v5211_v28, %v5210_v9  ;;  %v5170_v11 = vadd.f32 %v9909_v43, %v5121_v60  ;;  %v4536_v60 = vld [vmem:[#allocation3 + $0x138] sm:$0xff] }
 0x4e2   : > { %v4998_v59 = vld [vmem:[#allocation3 + $0xf8] sm:$0xff]  ;;  %v7321_v26 = vpop.f32.mrf.mxu1 }
 0x4e3   : > { %v5040_v32 = vadd.f32 %v4998_v59, %v9897_v30  ;;  %4614 = vst.msk [vmem:[#allocation3 + $0x108] sm:$0xff] %vm1026_vm2, %v4572_v6  ;;  %7483 = vmatmul.mubr.msk.bf16.gmra.mxu1 %vm1026_vm2, %v5239_v53  ;;  %v5212_v27 = vmax.f32 %v5170_v11, 0.0 }
 0x4e4   : > { %v4466_v7 = vpop.f32.mrf.mxu1  ;;  %7486 = vmatprep.mubr.msk.bf16.mxu1 %vm7592_vm0, %v7591_v1  ;;  %v5122_v13 = vld [vmem:[#allocation3 + $0xe8] sm:$0xff] }
 0x4e5   : > { %5082 = vst.msk [vmem:[#allocation3 + $0xf8] sm:$0xff] %vm1026_vm2, %v5040_v32  ;;  %v4573_v49 = vadd.f32 %v4531_v22, %v4466_v7  ;;  %v5171_v38 = vadd.f32 %v9909_v43, %v5122_v13  ;;  %v4537_v22 = vld [vmem:[#allocation3 + $0x140] sm:$0xff] }
 0x4e6   : > { %v4999_v16 = vld [vmem:[#allocation3 + $0x100] sm:$0xff]  ;;  %v7324_v51 = vpop.f32.mrf.mxu1 }
 0x4e7   : > { %v5041_v30 = vadd.f32 %v4999_v16, %v9902_v25  ;;  %4615 = vst.msk [vmem:[#allocation3 + $0x110] sm:$0xff] %vm1026_vm2, %v4573_v49  ;;  %v5213_v48 = vmax.f32 %v5171_v38, 0.0 }
 0x4e8   : > { %v4469_v20 = vpop.f32.mrf.mxu1  ;;  %v5123_v40 = vld [vmem:[#allocation3 + $0xf0] sm:$0xff] }
 0x4e9   : > { %5083 = vst.msk [vmem:[#allocation3 + $0x100] sm:$0xff] %vm1026_vm2, %v5041_v30  ;;  %v4574_v50 = vadd.f32 %v4532_v17, %v4469_v20  ;;  %v5240_v58 = vpack.c.bf16 %v5213_v48, %v5212_v27  ;;  %v5172_v25 = vadd.f32 %v9909_v43, %v5123_v40  ;;  %v4538_v20 = vld [vmem:[#allocation3 + $0x148] sm:$0xff] }
 0x4ea   : > { %v5000_v61 = vld [vmem:[#allocation3 + $0x108] sm:$0xff]  ;;  %v7325_v44 = vpop.f32.mrf.mxu1 }
 0x4eb   : > { %v5042_v31 = vadd.f32 %v5000_v61, %v9912_v35  ;;  %4616 = vst.msk [vmem:[#allocation3 + $0x118] sm:$0xff] %vm1026_vm2, %v4574_v50  ;;  %7487 = vmatmul.mubr.msk.bf16.gmra.mxu1 %vm1026_vm2, %v5240_v58  ;;  %v5214_v0 = vmax.f32 %v5172_v25, 0.0 }
 0x4ec   : > { %v4474_v8 = vpop.f32.mrf.mxu1  ;;  %7490 = vmatprep.mubr.msk.bf16.mxu1 %vm7592_vm0, %v7591_v1  ;;  %v5124_v47 = vld [vmem:[#allocation3 + $0xf8] sm:$0xff] }
 0x4ed   : > { %5084 = vst.msk [vmem:[#allocation3 + $0x108] sm:$0xff] %vm1026_vm2, %v5042_v31  ;;  %v4575_v57 = vadd.f32 %v4533_v23, %v4474_v8  ;;  %v5173_v45 = vadd.f32 %v9909_v43, %v5124_v47 }
 0x4ee   : > { %v5001_v24 = vld [vmem:[#allocation3 + $0x110] sm:$0xff]  ;;  %v7328_v46 = vpop.f32.mrf.mxu1 }
 0x4ef   : > { %v5043_v35 = vadd.f32 %v5001_v24, %v9918_v4  ;;  %4617 = vst.msk [vmem:[#allocation3 + $0x120] sm:$0xff] %vm1026_vm2, %v4575_v57  ;;  %v5215_v18 = vmax.f32 %v5173_v45, 0.0 }
 0x4f0   : > { %v4477_v63 = vpop.f32.mrf.mxu1  ;;  %v5125_v12 = vld [vmem:[#allocation3 + $0x100] sm:$0xff] }
 0x4f1   : > { %5085 = vst.msk [vmem:[#allocation3 + $0x110] sm:$0xff] %vm1026_vm2, %v5043_v35  ;;  %v4576_v3 = vadd.f32 %v4534_v5, %v4477_v63  ;;  %v5241_v62 = vpack.c.bf16 %v5215_v18, %v5214_v0  ;;  %v5174_v4 = vadd.f32 %v9909_v43, %v5125_v12 }
 0x4f2   : > { %v5002_v15 = vld [vmem:[#allocation3 + $0x118] sm:$0xff]  ;;  %v7329_v55 = vpop.f32.mrf.mxu1 }
 0x4f3   : > { %v5044_v14 = vadd.f32 %v5002_v15, %v9924_v56  ;;  %4618 = vst.msk [vmem:[#allocation3 + $0x128] sm:$0xff] %vm1026_vm2, %v4576_v3  ;;  %7491 = vmatmul.mubr.msk.bf16.gmra.mxu1 %vm1026_vm2, %v5241_v62  ;;  %v5216_v28 = vmax.f32 %v5174_v4, 0.0  ;;  %v10151_v4 = vld [vmem:[%s10246_s6] ss:$0 sm:$0xff] }
 0x4f4   : > { %v4482_v39 = vpop.f32.mrf.mxu1  ;;  %7494 = vmatprep.mubr.msk.bf16.mxu1 %vm7592_vm0, %v7591_v1  ;;  %v5126_v34 = vld [vmem:[#allocation3 + $0x108] sm:$0xff] }
 0x4f5   : > { %5086 = vst.msk [vmem:[#allocation3 + $0x118] sm:$0xff] %vm1026_vm2, %v5044_v14  ;;  %v4577_v54 = vadd.f32 %v4535_v2, %v4482_v39  ;;  %v5175_v10 = vadd.f32 %v9909_v43, %v5126_v34 }
 0x4f6   : > { %v5003_v42 = vld [vmem:[#allocation3 + $0x120] sm:$0xff]  ;;  %v7332_v9 = vpop.f32.mrf.mxu1 }
 0x4f7   : > { %v5045_v56 = vadd.f32 %v5003_v42, %v9933_v37  ;;  %4619 = vst.msk [vmem:[#allocation3 + $0x130] sm:$0xff] %vm1026_vm2, %v4577_v54  ;;  %v5217_v19 = vmax.f32 %v5175_v10, 0.0 }
 0x4f8   : > { %v4485_v52 = vpop.f32.mrf.mxu1  ;;  %v5127_v6 = vld [vmem:[#allocation3 + $0x110] sm:$0xff] }
 0x4f9   : > { %5087 = vst.msk [vmem:[#allocation3 + $0x120] sm:$0xff] %vm1026_vm2, %v5045_v56  ;;  %v4578_v53 = vadd.f32 %v4536_v60, %v4485_v52  ;;  %v5242_v59 = vpack.c.bf16 %v5217_v19, %v5216_v28  ;;  %v5176_v37 = vadd.f32 %v9909_v43, %v5127_v6 }
 0x4fa   : > { %v5004_v26 = vld [vmem:[#allocation3 + $0x128] sm:$0xff]  ;;  %v7333_v32 = vpop.f32.mrf.mxu1 }
 0x4fb   : > { %v5046_v11 = vadd.f32 %v5004_v26, %v9939_v29  ;;  %4620 = vst.msk [vmem:[#allocation3 + $0x138] sm:$0xff] %vm1026_vm2, %v4578_v53  ;;  %7495 = vmatmul.mubr.msk.bf16.gmra.mxu1 %vm1026_vm2, %v5242_v59  ;;  %v5218_v30 = vmax.f32 %v5176_v37, 0.0 }
 0x4fc   : > { %v4490_v7 = vpop.f32.mrf.mxu1  ;;  %7498 = vmatprep.mubr.msk.bf16.mxu1 %vm7592_vm0, %v7591_v1  ;;  %v5128_v13 = vld [vmem:[#allocation3 + $0x118] sm:$0xff] }
 0x4fd   : > { %5088 = vst.msk [vmem:[#allocation3 + $0x128] sm:$0xff] %vm1026_vm2, %v5046_v11  ;;  %v4579_v49 = vadd.f32 %v4537_v22, %v4490_v7  ;;  %v5177_v38 = vadd.f32 %v9909_v43, %v5128_v13 }
 0x4fe   : > { %v5005_v16 = vld [vmem:[#allocation3 + $0x130] sm:$0xff]  ;;  %v7336_v51 = vpop.f32.mrf.mxu1 }
 0x4ff   : > { %v5047_v29 = vadd.f32 %v5005_v16, %v9948_v36  ;;  %4621 = vst.msk [vmem:[#allocation3 + $0x140] sm:$0xff] %vm1026_vm2, %v4579_v49  ;;  %v5219_v27 = vmax.f32 %v5177_v38, 0.0 }
 0x500   : > { %v4493_v48 = vpop.f32.mrf.mxu1  ;;  %v5129_v17 = vld [vmem:[#allocation3 + $0x120] sm:$0xff] }
 0x501   : > { %5089 = vst.msk [vmem:[#allocation3 + $0x130] sm:$0xff] %vm1026_vm2, %v5047_v29  ;;  %v4580_v40 = vadd.f32 %v4538_v20, %v4493_v48  ;;  %v5243_v50 = vpack.c.bf16 %v5219_v27, %v5218_v30  ;;  %v5178_v36 = vadd.f32 %v9909_v43, %v5129_v17 }
 0x502   : > { %v5006_v58 = vld [vmem:[#allocation3 + $0x138] sm:$0xff]  ;;  %v7337_v61 = vpop.f32.mrf.mxu1 }
 0x503   : > { %v5048_v44 = vadd.f32 %v5006_v58, %v9954_v33  ;;  %4622 = vst.msk [vmem:[#allocation3 + $0x148] sm:$0xff] %vm1026_vm2, %v4580_v40  ;;  %7499 = vmatmul.mubr.msk.bf16.gmra.mxu1 %vm1026_vm2, %v5243_v50  ;;  %v5220_v47 = vmax.f32 %v5178_v36, 0.0 }
 0x504   : > { %7502 = vmatprep.mubr.msk.bf16.mxu1 %vm7592_vm0, %v7591_v1  ;;  %v5130_v31 = vld [vmem:[#allocation3 + $0x128] sm:$0xff] }
 0x505   : > { %5090 = vst.msk [vmem:[#allocation3 + $0x138] sm:$0xff] %vm1026_vm2, %v5048_v44  ;;  %v5179_v25 = vadd.f32 %v9909_v43, %v5130_v31 }
 0x506   : > { %v5007_v8 = vld [vmem:[#allocation3 + $0x140] sm:$0xff] }
 0x507   : > { %v5049_v23 = vadd.f32 %v5007_v8, %v9963_v21  ;;  %v5221_v57 = vmax.f32 %v5179_v25, 0.0 }
 0x508   : > { %v5131_v33 = vld [vmem:[#allocation3 + $0x130] sm:$0xff] }
 0x509   : > { %5091 = vst.msk [vmem:[#allocation3 + $0x140] sm:$0xff] %vm1026_vm2, %v5049_v23  ;;  %v5244_v45 = vpack.c.bf16 %v5221_v57, %v5220_v47  ;;  %v5180_v35 = vadd.f32 %v9909_v43, %v5131_v33 }
 0x50a   : > { %v5008_v24 = vld [vmem:[#allocation3 + $0x148] sm:$0xff] }
 0x50b   : > { %v5050_v46 = vadd.f32 %v5008_v24, %v9969_v41  ;;  %7503 = vmatmul.mubr.msk.bf16.gmra.mxu1 %vm1026_vm2, %v5244_v45  ;;  %v5222_v18 = vmax.f32 %v5180_v35, 0.0 }
 0x50c   : > { %7506 = vmatprep.mubr.msk.bf16.mxu1 %vm7592_vm0, %v7591_v1  ;;  %v5132_v0 = vld [vmem:[#allocation3 + $0x138] sm:$0xff] }
 0x50d   : > { %5092 = vst.msk [vmem:[#allocation3 + $0x148] sm:$0xff] %vm1026_vm2, %v5050_v46  ;;  %v5181_v21 = vadd.f32 %v9909_v43, %v5132_v0 }
 0x50f   : > { %v5223_v63 = vmax.f32 %v5181_v21, 0.0 }
 0x510   : > { %v5133_v5 = vld [vmem:[#allocation3 + $0x140] sm:$0xff] }
 0x511   : > { %v5245_v12 = vpack.c.bf16 %v5223_v63, %v5222_v18  ;;  %v5182_v41 = vadd.f32 %v9909_v43, %v5133_v5 }
 0x513   : > { %7507 = vmatmul.mubr.msk.bf16.gmra.mxu1 %vm1026_vm2, %v5245_v12  ;;  %v5224_v15 = vmax.f32 %v5182_v41, 0.0 }
 0x514   : > { %7510 = vmatprep.mubr.msk.bf16.mxu1 %vm7592_vm0, %v7591_v1  ;;  %v5134_v3 = vld [vmem:[#allocation3 + $0x148] sm:$0xff] }
 0x515   : > { %v5183_v62 = vadd.f32 %v9909_v43, %v5134_v3 }
 0x517   : > { %v5225_v55 = vmax.f32 %v5183_v62, 0.0 }
 0x519   : > { %v5246_v14 = vpack.c.bf16 %v5225_v55, %v5224_v15 }
 0x51b   : > { %7511 = vmatmul.mubr.msk.bf16.gmra.mxu1 %vm1026_vm2, %v5246_v14 }
 0x53b   : > { %v5367_v39 = vpop.f32.mrf.mxu1 }
 0x53c   : > { %v5368_v2 = vadd.f32 %v10151_v4, %v5367_v39 }
 0x53d   : > { %v7432_v34 = vpop.f32.mrf.mxu1 }
 0x53e   : > { %v5534_v1 = vmax.f32 %v5368_v2, 0.0 }
 0x53f   : > { %v5370_v54 = vpop.f32.mrf.mxu1 }
 0x540   : > { %5618 = vst [vmem:[%s7992_s16] sm:$0xff] %v5534_v1  ;;  %v5371_v43 = vadd.f32 %v10151_v4, %v5370_v54 }
 0x541   : > { %v7433_v10 = vpop.f32.mrf.mxu1 }
 0x542   : > { %v5535_v42 = vmax.f32 %v5371_v43, 0.0 }
 0x543   : > { %v5375_v9 = vpop.f32.mrf.mxu1 }
 0x544   : > { %5619 = vst [vmem:[%s7992_s16 + $0x10] sm:$0xff] %v5535_v42  ;;  %v5376_v56 = vadd.f32 %v10151_v4, %v5375_v9 }
 0x545   : > { %v7436_v28 = vpop.f32.mrf.mxu1 }
 0x546   : > { %v5536_v19 = vmax.f32 %v5376_v56, 0.0 }
 0x547   : > { %v5378_v52 = vpop.f32.mrf.mxu1 }
 0x548   : > { %5620 = vst [vmem:[%s7992_s16 + $0x20] sm:$0xff] %v5536_v19  ;;  %v5379_v60 = vadd.f32 %v10151_v4, %v5378_v52 }
 0x549   : > { %v7437_v6 = vpop.f32.mrf.mxu1 }
 0x54a   : > { %v5537_v53 = vmax.f32 %v5379_v60, 0.0 }
 0x54b   : > { %v5383_v59 = vpop.f32.mrf.mxu1 }
 0x54c   : > { %5621 = vst [vmem:[%s7992_s16 + $0x30] sm:$0xff] %v5537_v53  ;;  %v5384_v26 = vadd.f32 %v10151_v4, %v5383_v59 }
 0x54d   : > { %v7440_v32 = vpop.f32.mrf.mxu1 }
 0x54e   : > { %v5538_v11 = vmax.f32 %v5384_v26, 0.0 }
 0x54f   : > { %v5386_v37 = vpop.f32.mrf.mxu1 }
 0x550   : > { %5622 = vst [vmem:[%s7992_s16 + $0x40] sm:$0xff] %v5538_v11  ;;  %v5387_v7 = vadd.f32 %v10151_v4, %v5386_v37 }
 0x551   : > { %v7441_v22 = vpop.f32.mrf.mxu1 }
 0x552   : > { %v5539_v13 = vmax.f32 %v5387_v7, 0.0 }
 0x553   : > { %v5391_v49 = vpop.f32.mrf.mxu1 }
 0x554   : > { %5623 = vst [vmem:[%s7992_s16 + $0x50] sm:$0xff] %v5539_v13  ;;  %v5392_v38 = vadd.f32 %v10151_v4, %v5391_v49 }
 0x555   : > { %v7444_v16 = vpop.f32.mrf.mxu1 }
 0x556   : > { %v5540_v51 = vmax.f32 %v5392_v38, 0.0 }
 0x557   : > { %v5394_v29 = vpop.f32.mrf.mxu1 }
 0x558   : > { %5624 = vst [vmem:[%s7992_s16 + $0x60] sm:$0xff] %v5540_v51  ;;  %v5395_v30 = vadd.f32 %v10151_v4, %v5394_v29 }
 0x559   : > { %v7445_v27 = vpop.f32.mrf.mxu1 }
 0x55a   : > { %v5541_v48 = vmax.f32 %v5395_v30, 0.0 }
 0x55b   : > { %v5399_v20 = vpop.f32.mrf.mxu1 }
 0x55c   : > { %5625 = vst [vmem:[%s7992_s16 + $0x70] sm:$0xff] %v5541_v48  ;;  %v5400_v17 = vadd.f32 %v10151_v4, %v5399_v20 }
 0x55d   : > { %v7448_v40 = vpop.f32.mrf.mxu1 }
 0x55e   : > { %v5542_v50 = vmax.f32 %v5400_v17, 0.0 }
 0x55f   : > { %v5402_v58 = vpop.f32.mrf.mxu1 }
 0x560   : > { %5626 = vst [vmem:[%s7992_s16 + $0x80] sm:$0xff] %v5542_v50  ;;  %v5403_v61 = vadd.f32 %v10151_v4, %v5402_v58 }
 0x561   : > { %v7449_v44 = vpop.f32.mrf.mxu1 }
 0x562   : > { %v5543_v36 = vmax.f32 %v5403_v61, 0.0 }
 0x563   : > { %v5407_v31 = vpop.f32.mrf.mxu1 }
 0x564   : > { %5627 = vst [vmem:[%s7992_s16 + $0x90] sm:$0xff] %v5543_v36  ;;  %v5408_v25 = vadd.f32 %v10151_v4, %v5407_v31 }
 0x565   : > { %v7452_v8 = vpop.f32.mrf.mxu1 }
 0x566   : > { %v5544_v23 = vmax.f32 %v5408_v25, 0.0 }
 0x567   : > { %v5410_v47 = vpop.f32.mrf.mxu1 }
 0x568   : > { %5628 = vst [vmem:[%s7992_s16 + $0xa0] sm:$0xff] %v5544_v23  ;;  %v5411_v57 = vadd.f32 %v10151_v4, %v5410_v47 }
 0x569   : > { %v7453_v33 = vpop.f32.mrf.mxu1 }
 0x56a   : > { %v5545_v45 = vmax.f32 %v5411_v57, 0.0 }
 0x56b   : > { %v5415_v24 = vpop.f32.mrf.mxu1 }
 0x56c   : > { %5629 = vst [vmem:[%s7992_s16 + $0xb0] sm:$0xff] %v5545_v45  ;;  %v5416_v46 = vadd.f32 %v10151_v4, %v5415_v24 }
 0x56d   : > { %v7456_v35 = vpop.f32.mrf.mxu1 }
 0x56e   : > { %v5546_v0 = vmax.f32 %v5416_v46, 0.0 }
 0x56f   : > { %v5418_v21 = vpop.f32.mrf.mxu1 }
 0x570   : > { %5630 = vst [vmem:[%s7992_s16 + $0xc0] sm:$0xff] %v5546_v0  ;;  %v5419_v18 = vadd.f32 %v10151_v4, %v5418_v21 }
 0x571   : > { %v7457_v63 = vpop.f32.mrf.mxu1 }
 0x572   : > { %v5547_v5 = vmax.f32 %v5419_v18, 0.0 }
 0x573   : > { %v5423_v12 = vpop.f32.mrf.mxu1 }
 0x574   : > { %5631 = vst [vmem:[%s7992_s16 + $0xd0] sm:$0xff] %v5547_v5  ;;  %v5424_v41 = vadd.f32 %v10151_v4, %v5423_v12 }
 0x575   : > { %v7460_v3 = vpop.f32.mrf.mxu1 }
 0x576   : > { %v5548_v62 = vmax.f32 %v5424_v41, 0.0 }
 0x577   : > { %v5426_v15 = vpop.f32.mrf.mxu1 }
 0x578   : > { %5632 = vst [vmem:[%s7992_s16 + $0xe0] sm:$0xff] %v5548_v62  ;;  %v5427_v55 = vadd.f32 %v10151_v4, %v5426_v15 }
 0x579   : > { %v7461_v14 = vpop.f32.mrf.mxu1 }
 0x57a   : > { %v5549_v39 = vmax.f32 %v5427_v55, 0.0 }
 0x57b   : > { %v5431_v2 = vpop.f32.mrf.mxu1 }
 0x57c   : > { %5633 = vst [vmem:[%s7992_s16 + $0xf0] sm:$0xff] %v5549_v39  ;;  %v5432_v34 = vadd.f32 %v10151_v4, %v5431_v2 }
 0x57d   : > { %v7464_v1 = vpop.f32.mrf.mxu1 }
 0x57e   : > { %v5550_v54 = vmax.f32 %v5432_v34, 0.0 }
 0x57f   : > { %v5434_v43 = vpop.f32.mrf.mxu1 }
 0x580   : > { %5634 = vst [vmem:[%s7992_s16 + $0x100] sm:$0xff] %v5550_v54  ;;  %v5435_v10 = vadd.f32 %v10151_v4, %v5434_v43 }
 0x581   : > { %v7465_v42 = vpop.f32.mrf.mxu1 }
 0x582   : > { %v5551_v9 = vmax.f32 %v5435_v10, 0.0 }
 0x583   : > { %v5439_v56 = vpop.f32.mrf.mxu1 }
 0x584   : > { %5635 = vst [vmem:[%s7992_s16 + $0x110] sm:$0xff] %v5551_v9  ;;  %v5440_v28 = vadd.f32 %v10151_v4, %v5439_v56 }
 0x585   : > { %v7468_v19 = vpop.f32.mrf.mxu1 }
 0x586   : > { %v5552_v52 = vmax.f32 %v5440_v28, 0.0 }
 0x587   : > { %v5442_v60 = vpop.f32.mrf.mxu1 }
 0x588   : > { %5636 = vst [vmem:[%s7992_s16 + $0x120] sm:$0xff] %v5552_v52  ;;  %v5443_v6 = vadd.f32 %v10151_v4, %v5442_v60 }
 0x589   : > { %v7469_v53 = vpop.f32.mrf.mxu1 }
 0x58a   : > { %v5553_v59 = vmax.f32 %v5443_v6, 0.0 }
 0x58b   : > { %v5447_v26 = vpop.f32.mrf.mxu1 }
 0x58c   : > { %5637 = vst [vmem:[%s7992_s16 + $0x130] sm:$0xff] %v5553_v59  ;;  %v5448_v32 = vadd.f32 %v10151_v4, %v5447_v26 }
 0x58d   : > { %v7472_v11 = vpop.f32.mrf.mxu1 }
 0x58e   : > { %v5554_v37 = vmax.f32 %v5448_v32, 0.0 }
 0x58f   : > { %v5450_v7 = vpop.f32.mrf.mxu1 }
 0x590   : > { %5638 = vst [vmem:[%s7992_s16 + $0x140] sm:$0xff] %v5554_v37  ;;  %v5451_v22 = vadd.f32 %v10151_v4, %v5450_v7 }
 0x591   : > { %v7473_v13 = vpop.f32.mrf.mxu1 }
 0x592   : > { %v5555_v49 = vmax.f32 %v5451_v22, 0.0 }
 0x593   : > { %v5455_v38 = vpop.f32.mrf.mxu1 }
 0x594   : > { %5639 = vst [vmem:[%s7992_s16 + $0x150] sm:$0xff] %v5555_v49  ;;  %v5456_v16 = vadd.f32 %v10151_v4, %v5455_v38 }
 0x595   : > { %v7476_v51 = vpop.f32.mrf.mxu1 }
 0x596   : > { %v5556_v29 = vmax.f32 %v5456_v16, 0.0 }
 0x597   : > { %v5458_v30 = vpop.f32.mrf.mxu1 }
 0x598   : > { %5640 = vst [vmem:[%s7992_s16 + $0x160] sm:$0xff] %v5556_v29  ;;  %v5459_v27 = vadd.f32 %v10151_v4, %v5458_v30 }
 0x599   : > { %v7477_v48 = vpop.f32.mrf.mxu1 }
 0x59a   : > { %v5557_v20 = vmax.f32 %v5459_v27, 0.0 }
 0x59b   : > { %v5463_v17 = vpop.f32.mrf.mxu1 }
 0x59c   : > { %5641 = vst [vmem:[%s7992_s16 + $0x170] sm:$0xff] %v5557_v20  ;;  %v5464_v40 = vadd.f32 %v10151_v4, %v5463_v17 }
 0x59d   : > { %v7480_v50 = vpop.f32.mrf.mxu1 }
 0x59e   : > { %v5558_v58 = vmax.f32 %v5464_v40, 0.0 }
 0x59f   : > { %v5466_v61 = vpop.f32.mrf.mxu1 }
 0x5a0   : > { %5642 = vst [vmem:[%s7992_s16 + $0x180] sm:$0xff] %v5558_v58  ;;  %v5467_v44 = vadd.f32 %v10151_v4, %v5466_v61 }
 0x5a1   : > { %v7481_v36 = vpop.f32.mrf.mxu1 }
 0x5a2   : > { %v5559_v31 = vmax.f32 %v5467_v44, 0.0 }
 0x5a3   : > { %v5471_v25 = vpop.f32.mrf.mxu1 }
 0x5a4   : > { %5643 = vst [vmem:[%s7992_s16 + $0x190] sm:$0xff] %v5559_v31  ;;  %v5472_v8 = vadd.f32 %v10151_v4, %v5471_v25 }
 0x5a5   : > { %v7484_v23 = vpop.f32.mrf.mxu1 }
 0x5a6   : > { %v5560_v47 = vmax.f32 %v5472_v8, 0.0 }
 0x5a7   : > { %v5474_v57 = vpop.f32.mrf.mxu1 }
 0x5a8   : > { %5644 = vst [vmem:[%s7992_s16 + $0x1a0] sm:$0xff] %v5560_v47  ;;  %v5475_v33 = vadd.f32 %v10151_v4, %v5474_v57 }
 0x5a9   : > { %v7485_v45 = vpop.f32.mrf.mxu1 }
 0x5aa   : > { %v5561_v24 = vmax.f32 %v5475_v33, 0.0 }
 0x5ab   : > { %v5479_v46 = vpop.f32.mrf.mxu1 }
 0x5ac   : > { %5645 = vst [vmem:[%s7992_s16 + $0x1b0] sm:$0xff] %v5561_v24  ;;  %v5480_v35 = vadd.f32 %v10151_v4, %v5479_v46 }
 0x5ad   : > { %v7488_v0 = vpop.f32.mrf.mxu1 }
 0x5ae   : > { %v5562_v21 = vmax.f32 %v5480_v35, 0.0 }
 0x5af   : > { %v5482_v18 = vpop.f32.mrf.mxu1 }
 0x5b0   : > { %5646 = vst [vmem:[%s7992_s16 + $0x1c0] sm:$0xff] %v5562_v21  ;;  %v5483_v63 = vadd.f32 %v10151_v4, %v5482_v18 }
 0x5b1   : > { %v7489_v5 = vpop.f32.mrf.mxu1 }
 0x5b2   : > { %v5563_v12 = vmax.f32 %v5483_v63, 0.0 }
 0x5b3   : > { %v5487_v41 = vpop.f32.mrf.mxu1 }
 0x5b4   : > { %5647 = vst [vmem:[%s7992_s16 + $0x1d0] sm:$0xff] %v5563_v12  ;;  %v5488_v3 = vadd.f32 %v10151_v4, %v5487_v41 }
 0x5b5   : > { %v7492_v62 = vpop.f32.mrf.mxu1 }
 0x5b6   : > { %v5564_v15 = vmax.f32 %v5488_v3, 0.0 }
 0x5b7   : > { %v5490_v55 = vpop.f32.mrf.mxu1 }
 0x5b8   : > { %5648 = vst [vmem:[%s7992_s16 + $0x1e0] sm:$0xff] %v5564_v15  ;;  %v5491_v14 = vadd.f32 %v10151_v4, %v5490_v55 }
 0x5b9   : > { %v7493_v39 = vpop.f32.mrf.mxu1 }
 0x5ba   : > { %v5565_v2 = vmax.f32 %v5491_v14, 0.0 }
 0x5bb   : > { %v5495_v34 = vpop.f32.mrf.mxu1 }
 0x5bc   : > { %5649 = vst [vmem:[%s7992_s16 + $0x1f0] sm:$0xff] %v5565_v2  ;;  %v5496_v1 = vadd.f32 %v10151_v4, %v5495_v34 }
 0x5bd   : > { %v7496_v54 = vpop.f32.mrf.mxu1 }
 0x5be   : > { %v5566_v43 = vmax.f32 %v5496_v1, 0.0 }
 0x5bf   : > { %v5498_v10 = vpop.f32.mrf.mxu1 }
 0x5c0   : > { %5650 = vst [vmem:[%s7992_s16 + $0x200] sm:$0xff] %v5566_v43  ;;  %v5499_v42 = vadd.f32 %v10151_v4, %v5498_v10 }
 0x5c1   : > { %v7497_v9 = vpop.f32.mrf.mxu1 }
 0x5c2   : > { %v5567_v56 = vmax.f32 %v5499_v42, 0.0 }
 0x5c3   : > { %v5503_v28 = vpop.f32.mrf.mxu1 }
 0x5c4   : > { %5651 = vst [vmem:[%s7992_s16 + $0x210] sm:$0xff] %v5567_v56  ;;  %v5504_v19 = vadd.f32 %v10151_v4, %v5503_v28 }
 0x5c5   : > { %v7500_v52 = vpop.f32.mrf.mxu1 }
 0x5c6   : > { %v5568_v60 = vmax.f32 %v5504_v19, 0.0 }
 0x5c7   : > { %v5506_v6 = vpop.f32.mrf.mxu1 }
 0x5c8   : > { %5652 = vst [vmem:[%s7992_s16 + $0x220] sm:$0xff] %v5568_v60  ;;  %v5507_v53 = vadd.f32 %v10151_v4, %v5506_v6 }
 0x5c9   : > { %v7501_v59 = vpop.f32.mrf.mxu1 }
 0x5ca   : > { %v5569_v26 = vmax.f32 %v5507_v53, 0.0 }
 0x5cb   : > { %v5511_v32 = vpop.f32.mrf.mxu1 }
 0x5cc   : > { %5653 = vst [vmem:[%s7992_s16 + $0x230] sm:$0xff] %v5569_v26  ;;  %v5512_v11 = vadd.f32 %v10151_v4, %v5511_v32 }
 0x5cd   : > { %v7504_v37 = vpop.f32.mrf.mxu1 }
 0x5ce   : > { %v5570_v7 = vmax.f32 %v5512_v11, 0.0 }
 0x5cf   : > { %v5514_v22 = vpop.f32.mrf.mxu1 }
 0x5d0   : > { %5654 = vst [vmem:[%s7992_s16 + $0x240] sm:$0xff] %v5570_v7  ;;  %v5515_v13 = vadd.f32 %v10151_v4, %v5514_v22 }
 0x5d1   : > { %v7505_v49 = vpop.f32.mrf.mxu1 }
 0x5d2   : > { %v5571_v38 = vmax.f32 %v5515_v13, 0.0 }
 0x5d3   : > { %v5519_v16 = vpop.f32.mrf.mxu1 }
 0x5d4   : > { %5655 = vst [vmem:[%s7992_s16 + $0x250] sm:$0xff] %v5571_v38  ;;  %v5520_v51 = vadd.f32 %v10151_v4, %v5519_v16 }
 0x5d5   : > { %v7508_v29 = vpop.f32.mrf.mxu1 }
 0x5d6   : > { %v5572_v30 = vmax.f32 %v5520_v51, 0.0 }
 0x5d7   : > { %v5522_v27 = vpop.f32.mrf.mxu1 }
 0x5d8   : > { %5656 = vst [vmem:[%s7992_s16 + $0x260] sm:$0xff] %v5572_v30  ;;  %v5523_v48 = vadd.f32 %v10151_v4, %v5522_v27 }
 0x5d9   : > { %v7509_v20 = vpop.f32.mrf.mxu1 }
 0x5da   : > { %v5573_v17 = vmax.f32 %v5523_v48, 0.0 }
 0x5db   : > { %v5527_v40 = vpop.f32.mrf.mxu1 }
 0x5dc   : > { %5657 = vst [vmem:[%s7992_s16 + $0x270] sm:$0xff] %v5573_v17  ;;  %v5528_v50 = vadd.f32 %v10151_v4, %v5527_v40 }
 0x5dd   : > { %v7512_v58 = vpop.f32.mrf.mxu1 }
 0x5de   : > { %v5574_v61 = vmax.f32 %v5528_v50, 0.0 }
 0x5df   : > { %v5530_v44 = vpop.f32.mrf.mxu1 }
 0x5e0   : > { %5658 = vst [vmem:[%s7992_s16 + $0x280] sm:$0xff] %v5574_v61  ;;  %v5531_v36 = vadd.f32 %v10151_v4, %v5530_v44 }
 0x5e1   : > { %v7513_v31 = vpop.f32.mrf.mxu1 }
 0x5e2   : > { %v5575_v25 = vmax.f32 %v5531_v36, 0.0 }
 0x5e4   : > { %5659 = vst [vmem:[%s7992_s16 + $0x290] sm:$0xff] %v5575_v25 }
 0x5e5 PF: > { %s17_s24 = sadd.s32 1, %s7589_s24  }
 0x5e6   : > { %p14_p4 = scmp.ge.s32.totalorder %s17_s24, 4  }
 0x5e8   :  { %16 = sbr.rel (!%p14_p4) target bundleno = 1 (0x1), region = 86 }

</bundles_post_ra>
